<compile_context>
chip_gen: v7x
topology: tpu7x:2x2x1
jax: 0.10.0
libtpu: 0.0.40
codegen_flags: <defaults>
</compile_context>

<pallas_src>
import functools

import numpy as np
import jax
import jax.numpy as jnp
from jax import lax
from jax.experimental import pallas as pl
from jax.experimental.pallas import tpu as pltpu

_LANE = 128


def _round_up(x, m):
    return (x + m - 1) // m * m


def _embedding_kernel(ids_ref, fmt_ref, rhs_ref, gamma_ref, beta_ref, out_ref,
                      *, h_real, eps):
    """One row tile: fused (one-hot | format) @ fused-table matmul + LayerNorm."""
    tm = ids_ref.shape[0]
    f_pad = fmt_ref.shape[1]
    k_id_pad = rhs_ref.shape[0] - f_pad           # width of the one-hot section

    # --- build the fused LHS [tm, k_id_pad + f_pad] in bf16 ------------------
    ids = ids_ref[...]                            # [tm, 8] int32 (cols 0..5 used)
    col = lax.broadcasted_iota(jnp.int32, (tm, k_id_pad), 1)
    hot = col == ids[:, 0:1]
    for c in range(1, 6):
        hot = jnp.logical_or(hot, col == ids[:, c:c + 1])
    onehot = jnp.where(hot, jnp.float32(1), jnp.float32(0)).astype(jnp.bfloat16)
    fmt = fmt_ref[...].astype(jnp.bfloat16)       # [tm, f_pad]
    lhs = jnp.concatenate([onehot, fmt], axis=1)  # [tm, K]

    # --- single MXU matmul: all lookups + format projection + the adds -------
    x = jnp.dot(lhs, rhs_ref[...], preferred_element_type=jnp.float32)  # [tm, Hp]

    # --- LayerNorm over the (real) hidden axis, biased variance (torch) ------
    h_pad = x.shape[-1]
    inv_h = jnp.float32(1.0 / h_real)
    mean = jnp.sum(x, axis=-1, keepdims=True) * inv_h
    diff = x - mean
    if h_pad != h_real:                           # padded lanes must not bias var
        lane = lax.broadcasted_iota(jnp.int32, (tm, h_pad), 1)
        diff = jnp.where(lane < h_real, diff, jnp.float32(0))
    var = jnp.sum(diff * diff, axis=-1, keepdims=True) * inv_h
    y = diff * lax.rsqrt(var + eps) * gamma_ref[...] + beta_ref[...]

    # TODO(synk): training-mode dropout would need pltpu.prng_seed /
    # pltpu.prng_random_bits with a per-call seed; eval mode => identity.
    out_ref[...] = y.astype(out_ref.dtype)


def fuse_embedding_params(params):
    """One-time prep: stack every table + format_w.T into one bf16 RHS [K, Hp]."""
    H = params["token"].shape[1]
    Hq = H // 4
    H_pad = _round_up(H, _LANE)
    F = params["format_w"].shape[1]
    F_pad = _round_up(F, _LANE)

    def pad_cols(t, width):
        t = jnp.asarray(t, jnp.float32)
        return jnp.pad(t, ((0, 0), (0, width - t.shape[1])))

    def place_quad(tab, slot):
        tab = jnp.asarray(tab, jnp.float32)
        out = jnp.zeros((tab.shape[0], H_pad), jnp.float32)
        return out.at[:, slot * Hq:(slot + 1) * Hq].set(tab)

    blocks = [
        pad_cols(params["token"], H_pad),        # token  -> full H
        place_quad(params["magnitude"], 0),      # quads  -> their H/4 slot
        place_quad(params["precision"], 1),      #   (== the torch concat(dim=2))
        place_quad(params["top_digit"], 2),
        place_quad(params["low_digit"], 3),
        pad_cols(params["order"], H_pad),        # order  -> full H
    ]
    sizes = [int(b.shape[0]) for b in blocks]
    offsets = np.cumsum([0] + sizes[:-1]).astype(np.int32)   # per-stream row offset
    k_id = int(sum(sizes))
    k_id_pad = _round_up(k_id, _LANE)

    fmt_wt = pad_cols(jnp.asarray(params["format_w"], jnp.float32).T, H_pad)  # [F, Hp]

    rhs = jnp.concatenate(
        [jnp.concatenate(blocks, axis=0),
         jnp.zeros((k_id_pad - k_id, H_pad), jnp.float32),
         fmt_wt,
         jnp.zeros((F_pad - F, H_pad), jnp.float32)],
        axis=0).astype(jnp.bfloat16)                          # [k_id_pad + F_pad, Hp]

    gamma = pad_cols(jnp.asarray(params["ln_gamma"], jnp.float32).reshape(1, H), H_pad)
    beta = pad_cols(jnp.asarray(params["ln_beta"], jnp.float32).reshape(1, H), H_pad)

    # TODO(synk): for a production-size token vocab (tens of thousands of rows,
    # too big for v7x's 64 MiB VMEM) the token table should stay HBM-resident
    # and be row-gathered via scalar-prefetched DMA instead of this one-hot path.
    return dict(rhs=rhs, gamma=gamma, beta=beta,
                offsets=jnp.asarray(offsets),
                f=F, f_pad=F_pad, h=H, h_pad=H_pad)


def embedding_for_base(token_id, num_mag, num_pre, num_top, num_low, order,
                       format_vec, fused, *, tm=256, eps=1e-12):
    """All id inputs: [B, S] int; format_vec: [B, S, F] f32. Returns [B, S, H] f32."""
    B, S = token_id.shape
    N = B * S
    F, F_pad = fused["f"], fused["f_pad"]
    H, H_pad = fused["h"], fused["h_pad"]
    rhs = fused["rhs"]
    K = rhs.shape[0]

    # Pack the six id streams into one [N, 8] int32 array with their table-row
    # offsets pre-added (columns 6..7 are unused padding, never compared).
    ids = jnp.stack([token_id, num_mag, num_pre, num_top, num_low, order],
                    axis=-1).reshape(N, 6).astype(jnp.int32)
    ids = ids + fused["offsets"][None, :]
    ids = jnp.pad(ids, ((0, 0), (0, 2)))

    fmt = jnp.pad(format_vec.reshape(N, F).astype(jnp.float32),
                  ((0, 0), (0, F_pad - F)))

    # Big row tiles amortize the ~0.35 us/step pipeline overhead.
    tm = min(tm, _round_up(N, 8))
    n_pad = _round_up(N, tm)
    if n_pad != N:
        # -1 ids never match the one-hot iota -> padded rows are all-zero.
        ids = jnp.pad(ids, ((0, n_pad - N), (0, 0)), constant_values=-1)
        fmt = jnp.pad(fmt, ((0, n_pad - N), (0, 0)))

    out = pl.pallas_call(
        functools.partial(_embedding_kernel, h_real=H, eps=eps),
        out_shape=jax.ShapeDtypeStruct((n_pad, H_pad), jnp.float32),
        grid_spec=pltpu.PrefetchScalarGridSpec(
            num_scalar_prefetch=0,
            grid=(n_pad // tm,),
            in_specs=[
                pl.BlockSpec((tm, 8), lambda i: (i, 0)),        # packed ids
                pl.BlockSpec((tm, F_pad), lambda i: (i, 0)),    # format features
                pl.BlockSpec((K, H_pad), lambda i: (0, 0)),     # fused table (resident)
                pl.BlockSpec((1, H_pad), lambda i: (0, 0)),     # LN gamma
                pl.BlockSpec((1, H_pad), lambda i: (0, 0)),     # LN beta
            ],
            out_specs=pl.BlockSpec((tm, H_pad), lambda i: (i, 0)),
        ),
        compiler_params=pltpu.CompilerParams(
            dimension_semantics=("parallel",),
            vmem_limit_bytes=64 * 1024 * 1024,
        ),
    )(ids, fmt, rhs, fused["gamma"], fused["beta"])

    return out[:N, :H].reshape(B, S, H)


def _reference(token_id, num_mag, num_pre, num_top, num_low, order, format_vec,
               params, eps=1e-12):
    tok = params["token"][token_id]
    numeric = jnp.concatenate(
        [params["magnitude"][num_mag], params["precision"][num_pre],
         params["top_digit"][num_top], params["low_digit"][num_low]], axis=2)
    x = tok + numeric + params["order"][order] + format_vec @ params["format_w"].T
    mean = jnp.mean(x, -1, keepdims=True)
    var = jnp.mean((x - mean) ** 2, -1, keepdims=True)
    return (x - mean) / jnp.sqrt(var + eps) * params["ln_gamma"] + params["ln_beta"]


if __name__ == "__main__":
    # Small synthetic config (H chosen lane-dense; kernel also supports padding).
    B, S, H = 4, 128, 128
    Hq = H // 4
    vocab_size = 512
    magnitude_size, precision_size = 10, 10
    top_digit_size, low_digit_size = 10, 10
    max_cell_length = 16
    num_format_feature = 11

    key = jax.random.PRNGKey(0)
    keys = jax.random.split(key, 16)

    params = {
        "token": jax.random.normal(keys[0], (vocab_size, H), jnp.float32) * 0.02,
        "magnitude": jax.random.normal(keys[1], (magnitude_size + 2, Hq), jnp.float32) * 0.02,
        "precision": jax.random.normal(keys[2], (precision_size + 2, Hq), jnp.float32) * 0.02,
        "top_digit": jax.random.normal(keys[3], (top_digit_size + 2, Hq), jnp.float32) * 0.02,
        "low_digit": jax.random.normal(keys[4], (low_digit_size + 2, Hq), jnp.float32) * 0.02,
        "order": jax.random.normal(keys[5], (max_cell_length, H), jnp.float32) * 0.02,
        "format_w": jax.random.normal(keys[6], (H, num_format_feature), jnp.float32) * 0.02,
        "ln_gamma": jnp.ones((H,), jnp.float32),
        "ln_beta": jnp.zeros((H,), jnp.float32),
    }

    token_id = jax.random.randint(keys[7], (B, S), 0, vocab_size, jnp.int32)
    num_mag = jax.random.randint(keys[8], (B, S), 0, magnitude_size + 2, jnp.int32)
    num_pre = jax.random.randint(keys[9], (B, S), 0, precision_size + 2, jnp.int32)
    num_top = jax.random.randint(keys[10], (B, S), 0, top_digit_size + 2, jnp.int32)
    num_low = jax.random.randint(keys[11], (B, S), 0, low_digit_size + 2, jnp.int32)
    order = jax.random.randint(keys[12], (B, S), 0, max_cell_length, jnp.int32)
    format_vec = jax.random.normal(keys[13], (B, S, num_format_feature), jnp.float32)

    # One-time parameter fusion (hoisted out of the per-call path), jitted call.
    fused = fuse_embedding_params(params)
    fwd = jax.jit(functools.partial(embedding_for_base, fused=fused))

    out = fwd(token_id, num_mag, num_pre, num_top, num_low, order, format_vec)
    out = jax.block_until_ready(out)

    ref = _reference(
        token_id, num_mag, num_pre, num_top, num_low, order, format_vec, params
    )
    assert out.shape == (B, S, H)
    # bf16 MXU operands (f32 accumulation) give ~1e-2-level agreement with the
    # pure-f32 reference after LayerNorm; real bugs would be O(1) off.
    max_err = float(jnp.abs(out - ref).max())
    assert jnp.allclose(out, ref, atol=5e-2, rtol=5e-2), max_err
    print("KERNEL_OK")
</pallas_src>

<mosaic_0001>
module attributes {stable_mosaic.version = 11 : i64} {
  func.func @_embedding_kernel(%arg0: i32, %arg1: memref<256x8xi32, #tpu.memory_space<vmem>>, %arg2: memref<256x128xf32, #tpu.memory_space<vmem>>, %arg3: memref<768x128xbf16, #tpu.memory_space<vmem>>, %arg4: memref<1x128xf32, #tpu.memory_space<vmem>>, %arg5: memref<1x128xf32, #tpu.memory_space<vmem>>, %arg6: memref<256x128xf32, #tpu.memory_space<vmem>>) attributes {dimension_semantics = [#tpu.dimension_semantics<parallel>], iteration_bounds = array<i64: 2>, scalar_prefetch = 0 : i64, scratch_operands = 0 : i64, tpu.core_type = #tpu.core_type<tc>, window_params = [{transform_indices = @transform_0, window_bounds = array<i64: 256, 8>}, {transform_indices = @transform_1, window_bounds = array<i64: 256, 128>}, {pipeline_mode = #tpu.pipeline_mode<synchronous>, transform_indices = @transform_2, window_bounds = array<i64: 768, 128>}, {pipeline_mode = #tpu.pipeline_mode<synchronous>, transform_indices = @transform_3, window_bounds = array<i64: 1, 128>}, {pipeline_mode = #tpu.pipeline_mode<synchronous>, transform_indices = @transform_4, window_bounds = array<i64: 1, 128>}, {transform_indices = @transform_5, window_bounds = array<i64: 256, 128>}]} {
    %c0 = arith.constant 0 : index
    %c0_0 = arith.constant 0 : index
    %0 = vector.load %arg1[%c0, %c0_0] : memref<256x8xi32, #tpu.memory_space<vmem>>, vector<256x8xi32>
    %1 = tpu.iota {dimensions = array<i32: 1>} : vector<256x640xi32>
    %2 = vector.extract_strided_slice %0 {offsets = [0, 0], sizes = [256, 1], strides = [1, 1]} : vector<256x8xi32> to vector<256x1xi32>
    %3 = vector.broadcast %2 : vector<256x1xi32> to vector<256x640xi32>
    %4 = arith.cmpi eq, %1, %3 : vector<256x640xi32>
    %5 = vector.extract_strided_slice %0 {offsets = [0, 1], sizes = [256, 1], strides = [1, 1]} : vector<256x8xi32> to vector<256x1xi32>
    %6 = vector.broadcast %5 : vector<256x1xi32> to vector<256x640xi32>
    %7 = arith.cmpi eq, %1, %6 : vector<256x640xi32>
    %8 = arith.ori %4, %7 : vector<256x640xi1>
    %9 = vector.extract_strided_slice %0 {offsets = [0, 2], sizes = [256, 1], strides = [1, 1]} : vector<256x8xi32> to vector<256x1xi32>
    %10 = vector.broadcast %9 : vector<256x1xi32> to vector<256x640xi32>
    %11 = arith.cmpi eq, %1, %10 : vector<256x640xi32>
    %12 = arith.ori %8, %11 : vector<256x640xi1>
    %13 = vector.extract_strided_slice %0 {offsets = [0, 3], sizes = [256, 1], strides = [1, 1]} : vector<256x8xi32> to vector<256x1xi32>
    %14 = vector.broadcast %13 : vector<256x1xi32> to vector<256x640xi32>
    %15 = arith.cmpi eq, %1, %14 : vector<256x640xi32>
    %16 = arith.ori %12, %15 : vector<256x640xi1>
    %17 = vector.extract_strided_slice %0 {offsets = [0, 4], sizes = [256, 1], strides = [1, 1]} : vector<256x8xi32> to vector<256x1xi32>
    %18 = vector.broadcast %17 : vector<256x1xi32> to vector<256x640xi32>
    %19 = arith.cmpi eq, %1, %18 : vector<256x640xi32>
    %20 = arith.ori %16, %19 : vector<256x640xi1>
    %21 = vector.extract_strided_slice %0 {offsets = [0, 5], sizes = [256, 1], strides = [1, 1]} : vector<256x8xi32> to vector<256x1xi32>
    %22 = vector.broadcast %21 : vector<256x1xi32> to vector<256x640xi32>
    %23 = arith.cmpi eq, %1, %22 : vector<256x640xi32>
    %24 = arith.ori %20, %23 : vector<256x640xi1>
    %cst = arith.constant 1.000000e+00 : f32
    %cst_1 = arith.constant 0.000000e+00 : f32
    %25 = vector.broadcast %cst : f32 to vector<256x640xf32>
    %26 = vector.broadcast %cst_1 : f32 to vector<256x640xf32>
    %27 = arith.select %24, %25, %26 : vector<256x640xi1>, vector<256x640xf32>
    %28 = arith.truncf %27 : vector<256x640xf32> to vector<256x640xbf16>
    %c0_2 = arith.constant 0 : index
    %c0_3 = arith.constant 0 : index
    %29 = vector.load %arg2[%c0_2, %c0_3] : memref<256x128xf32, #tpu.memory_space<vmem>>, vector<256x128xf32>
    %30 = arith.truncf %29 : vector<256x128xf32> to vector<256x128xbf16>
    %31 = tpu.concatenate %28, %30 in 1 : vector<256x640xbf16>, vector<256x128xbf16> -> vector<256x768xbf16>
    %c0_4 = arith.constant 0 : index
    %c0_5 = arith.constant 0 : index
    %32 = vector.load %arg3[%c0_4, %c0_5] : memref<768x128xbf16, #tpu.memory_space<vmem>>, vector<768x128xbf16>
    %cst_6 = arith.constant dense<0.000000e+00> : vector<256x128xf32>
    %33 = tpu.matmul %31, %32, %cst_6 {dimension_numbers = #tpu.dot_dimension_numbers<[1], [0], [0], [1], [0, 0, 1, 1], [], []>} : vector<256x768xbf16>, vector<768x128xbf16>, vector<256x128xf32> -> vector<256x128xf32>
    %cst_7 = arith.constant dense<0.000000e+00> : vector<256xf32>
    %34 = vector.multi_reduction <add>, %33, %cst_7 [1] : vector<256x128xf32> to vector<256xf32>
    %35 = vector.shape_cast %34 : vector<256xf32> to vector<256x1xf32>
    %cst_8 = arith.constant 7.812500e-03 : f32
    %36 = vector.broadcast %cst_8 : f32 to vector<256x1xf32>
    %37 = arith.mulf %35, %36 : vector<256x1xf32>
    %38 = vector.broadcast %37 : vector<256x1xf32> to vector<256x128xf32>
    %39 = arith.subf %33, %38 : vector<256x128xf32>
    %40 = arith.mulf %39, %39 : vector<256x128xf32>
    %cst_9 = arith.constant dense<0.000000e+00> : vector<256xf32>
    %41 = vector.multi_reduction <add>, %40, %cst_9 [1] : vector<256x128xf32> to vector<256xf32>
    %42 = vector.shape_cast %41 : vector<256xf32> to vector<256x1xf32>
    %cst_10 = arith.constant 7.812500e-03 : f32
    %43 = vector.broadcast %cst_10 : f32 to vector<256x1xf32>
    %44 = arith.mulf %42, %43 : vector<256x1xf32>
    %cst_11 = arith.constant 9.99999996E-13 : f32
    %45 = vector.broadcast %cst_11 : f32 to vector<256x1xf32>
    %46 = arith.addf %44, %45 : vector<256x1xf32>
    %47 = math.rsqrt %46 : vector<256x1xf32>
    %48 = vector.broadcast %47 : vector<256x1xf32> to vector<256x128xf32>
    %49 = arith.mulf %39, %48 : vector<256x128xf32>
    %c0_12 = arith.constant 0 : index
    %c0_13 = arith.constant 0 : index
    %50 = vector.load %arg4[%c0_12, %c0_13] : memref<1x128xf32, #tpu.memory_space<vmem>>, vector<1x128xf32>
    %51 = vector.broadcast %50 : vector<1x128xf32> to vector<256x128xf32>
    %52 = arith.mulf %49, %51 : vector<256x128xf32>
    %c0_14 = arith.constant 0 : index
    %c0_15 = arith.constant 0 : index
    %53 = vector.load %arg5[%c0_14, %c0_15] : memref<1x128xf32, #tpu.memory_space<vmem>>, vector<1x128xf32>
    %54 = vector.broadcast %53 : vector<1x128xf32> to vector<256x128xf32>
    %55 = arith.addf %52, %54 : vector<256x128xf32>
    %c0_16 = arith.constant 0 : index
    %c0_17 = arith.constant 0 : index
    %56 = vector.load %arg6[%c0_16, %c0_17] : memref<256x128xf32, #tpu.memory_space<vmem>>, vector<256x128xf32>
    tpu.vector_store %arg6[%c0_16, %c0_17], %55 {strides = array<i32>} : memref<256x128xf32, #tpu.memory_space<vmem>>, vector<256x128xf32>,
    return
  }
  func.func @transform_0(%arg0: i32) -> (i32, i32) {
    %c0_i32 = arith.constant 0 : i32
    %c0_i32_0 = arith.constant 0 : i32
    return %arg0, %c0_i32 : i32, i32
  }
  func.func @transform_1(%arg0: i32) -> (i32, i32) {
    %c0_i32 = arith.constant 0 : i32
    %c0_i32_0 = arith.constant 0 : i32
    return %arg0, %c0_i32 : i32, i32
  }
  func.func @transform_2(%arg0: i32) -> (i32, i32) {
    %c0_i32 = arith.constant 0 : i32
    %c0_i32_0 = arith.constant 0 : i32
    %c0_i32_1 = arith.constant 0 : i32
    return %c0_i32, %c0_i32_0 : i32, i32
  }
  func.func @transform_3(%arg0: i32) -> (i32, i32) {
    %c0_i32 = arith.constant 0 : i32
    %c0_i32_0 = arith.constant 0 : i32
    %c0_i32_1 = arith.constant 0 : i32
    return %c0_i32, %c0_i32_0 : i32, i32
  }
  func.func @transform_4(%arg0: i32) -> (i32, i32) {
    %c0_i32 = arith.constant 0 : i32
    %c0_i32_0 = arith.constant 0 : i32
    %c0_i32_1 = arith.constant 0 : i32
    return %c0_i32, %c0_i32_0 : i32, i32
  }
  func.func @transform_5(%arg0: i32) -> (i32, i32) {
    %c0_i32 = arith.constant 0 : i32
    %c0_i32_0 = arith.constant 0 : i32
    return %arg0, %c0_i32 : i32, i32
  }
}

</mosaic_0001>

<bundles_post_ra>
// kernel: embedding_for_base.1
= control target key start
LH: loop header
LB: loop body
LE: loop exit
PB: predicated region body
PF: predicated region fallthrough
CT: control target
= control target key end

     0   :  { %s12237_s0 = inlined_call_operand.hbm [shape: s32[512,8], index: 0, kind: input, shape index: {}]   ;;  %s12238_s1 = inlined_call_operand.hbm [shape: f32[512,128], index: 1, kind: input, shape index: {}]   ;;  %s12239_s2 = inlined_call_operand.hbm [shape: bf16[768,128], index: 2, kind: input, shape index: {}]   ;;  %s12240_s3 = inlined_call_operand.hbm [shape: f32[1,128], index: 3, kind: input, shape index: {}]   ;;  %s12241_s4 = inlined_call_operand.hbm [shape: f32[1,128], index: 4, kind: input, shape index: {}]   ;;  %s12242_s5 = inlined_call_operand.hbm [shape: f32[512,128], index: 5, kind: output, shape index: {}]  }
   0x1   :  { %12635 = sst [smem:[#allocation195_spill]] %s12237_s0 }
   0x2   :  { %12636 = sst [smem:[#allocation196_spill]] %s12239_s2 }
   0x3   :  { %10 = vsyncpa [#allocation3], 0 }
   0x4   :  { %12 = vsyncpa [#allocation3 + $0x1], 0 }
   0x5   :  { %13 = vsyncpa [#allocation6], 0 }
   0x6   :  { %15 = vsyncpa [#allocation6 + $0x1], 0 }
   0x7   :  { %16 = vsyncpa [#allocation9], 0 }
   0x8   :  { %17 = vsyncpa [#allocation4], 0 }
   0x9   :  { %19 = vsyncpa [#allocation4 + $0x1], 0  ;;  %s5452_s18 = smov 0   ;;  %s5454_s19 = smov 0  }
   0xa   :  { %s5456_s20 = smov 0   ;;  %s5458_s21 = smov 0  }
   0xb LB: > { %s5473_s22 = sadd.s32 4294967295, %s5401_s21   ;;  %s4455_s23 = sadd.s32 4294967294, %s5401_s21   ;;  %s5401_s21 = sphi %s5458_s21, %s14178_s21   ;;  %s5397_s20 = sphi %s5456_s20, %s14177_s20   ;;  %s5393_s19 = sphi %s5454_s19, %s14176_s19   ;;  %s5389_s18 = sphi %s5452_s18, %s14175_s18  }
   0xc   : > { %p45_p0 = scmp.ne.s32.totalorder %s5393_s19, %s5389_s18  ;;  %p12243_p1 = scmp.eq.s32.totalorder %s5473_s22, 0 }
   0xd   : > { %p164_p3 = scmp.eq.s32.totalorder %s4455_s23, 1  ;;  %p4456_p5 = scmp.ge.s32.totalorder %s5401_s21, 1 }
   0xe   : > { %p5482_p4 = por %p12243_p1, %p45_p0  ;;  %p171_p7 = scmp.lt.s32.totalorder %s5401_s21, 3 }
   0xf   : > { %p5487_p6 = por %p164_p3, %p45_p0  ;;  %s5403_s27 = smov [#allocation7]  }
  0x10   : > { %s12637_s24 = scalar_select %p5482_p4, 1, 0 }
  0x11   : > { %s12638_s25 = scalar_select %p5487_p6, 1, 0 }
  0x12   : > { %p5492_p8 = pnand %p4456_p5, %p171_p7  ;;  %s183_s28 = sshll.u32 %s5403_s27, 4  ;;  %s5496_s28 = int_to_ptr.vmem [resolvable:$true] %s183_s28 }
  0x13   : > { %s5404_s30 = smov [#allocation8]   ;;  %s5405_s7 = smov [#allocation10]  }
  0x14   : > { %s12639_s26 = scalar_select %p5492_p8, 1, 0 }
  0x15   : > { %p4902_p9 = pneg %p5492_p8  ;;  %s197_s6 = sshll.u32 %s5404_s30, 4  ;;  %s5507_s6 = int_to_ptr.vmem [resolvable:$true] %s197_s6 }
  0x16   : > { %s5509_s8 = sshll.u32 %s5405_s7, 4  ;;  %s12641_s2 = sld [smem:[#allocation196_spill]]  ;;  %s209_s8 = int_to_ptr.vmem [resolvable:$true] %s5509_s8 }
  0x17   : > { %p5503_p11 = pnand %p4902_p9, %p12243_p1 }
  0x19   : > { %p5519_p13 = pneg %p5503_p11 }
  0x1c   : > { %s5179_s11 = scalar_lea.hbm %s12641_s2, 6144 }
  0x1d   : > { %p5180_p12 = scmp.ne.s32.totalorder %s12641_s2, %s5179_s11  ;;  %p5186_p5 = scmp.lt.u32.totalorder %s5179_s11, %s12641_s2 }
  0x1f   : > { %p5182_p0 = pnand %p5519_p13, %p5180_p12 }
  0x21   : > { %p5183_p3 = pneg %p5182_p0 }
  0x23   : > { %p5188_p7 = pnand %p5186_p5, %p5183_p3 }
  0x25   : > { %5191 = shalt.err (!%p5188_p7)
}
  0x26   : > { %s5192_s17 = scalar_lea.vmem %s5496_s28, 6144  ;;  %p5200_p2 = scmp.lt.s32.totalorder %s5496_s28, %s5496_s28 }
  0x27   : > { %p5193_p9 = scmp.ne.s32.totalorder %s5496_s28, %s5192_s17  ;;  %p5201_p6 = scmp.lt.s32.totalorder %s5192_s17, %s5192_s17 }
  0x29   : > { %p5195_p10 = pnand %p5193_p9, %p5519_p13  ;;  %p5202_p12 = por %p5201_p6, %p5200_p2 }
  0x2b   : > { %p5196_p1 = pneg %p5195_p10 }
  0x2d   : > { %p5203_p0 = pnand %p5202_p12, %p5196_p1 }
  0x2f   : > { %5206 = shalt.err (!%p5203_p0)
}
  0x30   : > { %s5406_s23 = smov 64   ;;  %s5407_s27 = smov 4  }
  0x31   : > { %4905 = dma.hbm_to_vmem [thread:$0]  (!%p5503_p11), %s12641_s2, 6144, %s5496_s28, [#allocation6], %s5406_s23, %s5406_s23, %s5407_s27  }
  0x32   : > { %s5207_s11 = scalar_lea.hbm %s12240_s3, 16 }
  0x33   : > { %p5208_p2 = scmp.ne.s32.totalorder %s12240_s3, %s5207_s11  ;;  %p5214_p10 = scmp.lt.u32.totalorder %s5207_s11, %s12240_s3 }
  0x35   : > { %p5210_p1 = pnand %p5208_p2, %p5519_p13 }
  0x37   : > { %p5211_p6 = pneg %p5210_p1 }
  0x39   : > { %p5216_p3 = pnand %p5214_p10, %p5211_p6 }
  0x3b   : > { %5219 = shalt.err (!%p5216_p3)
}
  0x3c   : > { %s5220_s28 = scalar_lea.vmem %s5507_s6, 16  ;;  %s5227_s17 = scalar_lea.vmem %s5507_s6, 32 }
  0x3d   : > { %p5221_p5 = scmp.ne.s32.totalorder %s5507_s6, %s5220_s28  ;;  %p5228_p12 = scmp.lt.s32.totalorder %s5507_s6, %s5507_s6 }
  0x3e   : > { %p5229_p0 = scmp.lt.s32.totalorder %s5227_s17, %s5220_s28 }
  0x3f   : > { %p5223_p7 = pnand %p5221_p5, %p5519_p13 }
  0x40   : > { %p5230_p2 = por %p5229_p0, %p5228_p12 }
  0x41   : > { %p5224_p9 = pneg %p5223_p7 }
  0x43   : > { %p5231_p1 = pnand %p5230_p2, %p5224_p9 }
  0x45   : > { %5234 = shalt.err (!%p5231_p1)
}
  0x46   : > { %4908 = dma.hbm_to_vmem [thread:$0]  (!%p5503_p11), %s12240_s3, 16, %s5507_s6, [#allocation9]  }
  0x47   : > { %s5235_s9 = scalar_lea.hbm %s12241_s4, 16 }
  0x48   : > { %p5236_p6 = scmp.ne.s32.totalorder %s12241_s4, %s5235_s9  ;;  %p5242_p5 = scmp.lt.u32.totalorder %s5235_s9, %s12241_s4 }
  0x4a   : > { %p5238_p10 = pnand %p5236_p6, %p5519_p13 }
  0x4c   : > { %p5239_p3 = pneg %p5238_p10 }
  0x4e   : > { %p5244_p7 = pnand %p5242_p5, %p5239_p3 }
  0x50   : > { %5247 = shalt.err (!%p5244_p7)
}
  0x51   : > { %s5248_s15 = scalar_lea.vmem %s209_s8, 16  ;;  %s5255_s6 = scalar_lea.vmem %s209_s8, 32 }
  0x52   : > { %p5249_p9 = scmp.ne.s32.totalorder %s209_s8, %s5248_s15  ;;  %p5256_p2 = scmp.lt.s32.totalorder %s209_s8, %s209_s8 }
  0x53   : > { %p5257_p1 = scmp.lt.s32.totalorder %s5255_s6, %s5248_s15 }
  0x54   : > { %p5251_p12 = pnand %p5249_p9, %p5519_p13 }
  0x55   : > { %p5258_p4 = por %p5257_p1, %p5256_p2 }
  0x56   : > { %p5252_p0 = pneg %p5251_p12 }
  0x58   : > { %p5259_p8 = pnand %p5258_p4, %p5252_p0 }
  0x5a   : > { %5262 = shalt.err (!%p5259_p8)
}
  0x5b   : > { %4911 = dma.hbm_to_vmem [thread:$0]  (!%p5503_p11), %s12241_s4, 16, %s209_s8, [#allocation9]  }
  0x5c   : > { %s5584_s14 = sadd.s32 1, %s5401_s21   ;;  %s32_s17 = sadd.s32 1, %s5397_s20 }
  0x5d   : > { %s29_s29 = ssub.s32 %s5401_s21, %s5584_s14  ;;  %p39_p8 = scmp.ne.s32.totalorder %s5397_s20, %s5393_s19 }
  0x5e   : > { %p30_p4 = scmp.eq.s32.totalorder %s29_s29, 0  ;;  %p40_p13 = scmp.eq.s32.totalorder %s5401_s21, 0 }
  0x5f   : > { %p4926_p6 = scmp.lt.s32.totalorder %s5401_s21, 2  ;;  %p12643_p3 = scmp.eq.s32.totalorder %s5473_s22, 1 }
  0x60   : > { %s5594_s23 = scalar_select %p30_p4, %s5397_s20, %s32_s17  }
  0x61   : > { %p41_p10 = por %p40_p13, %p39_p8  ;;  %p5598_p5 = por %p12643_p3, %p39_p8 }
  0x62   : > { %s219_s30 = sand.u32 1, %s5397_s20   ;;  %s4529_s7 = sshll.u32 %s5401_s21, 12 }
  0x63   : > { %s5604_s8 = sshll.u32 %s219_s30, 8  ;;  %s12645_s0 = sld [smem:[#allocation195_spill]] }
  0x64   : > { %s223_s12 = scalar_lea.vmem [#allocation2], %s5604_s8  ;;  %p5614_p11 = pnand %p4926_p6, %p41_p10 }
  0x65   : > { %s230_s13 = sshll.u32 %s223_s12, 4  ;;  %s5620_s6 = scalar_lea.sflag [#allocation3], %s219_s30  ;;  %s5618_s13 = int_to_ptr.vmem [resolvable:$true] %s230_s13 }
  0x66   : > { %p5265_p9 = pneg %p5614_p11 }
  0x69   : > { %s5611_s11 = scalar_lea.hbm %s12645_s0, %s4529_s7  ;;  %s5268_s17 = scalar_lea.hbm %s12645_s0, 8192 }
  0x6a   : > { %s5263_s16 = scalar_lea.hbm %s5611_s11, 4096  ;;  %p5269_p2 = scmp.lt.u32.totalorder %s5611_s11, %s12645_s0 }
  0x6b   : > { %p5264_p7 = scmp.ne.s32.totalorder %s5611_s11, %s5263_s16  ;;  %p5270_p1 = scmp.lt.u32.totalorder %s5268_s17, %s5263_s16 }
  0x6c   : > { %p5272_p8 = scmp.lt.u32.totalorder %s5263_s16, %s5611_s11 }
  0x6d   : > { %p5266_p12 = pnand %p5265_p9, %p5264_p7  ;;  %p5271_p4 = por %p5270_p1, %p5269_p2 }
  0x6f   : > { %p5267_p0 = pneg %p5266_p12  ;;  %p5273_p13 = por %p5272_p8, %p5271_p4 }
  0x71   : > { %p5274_p6 = pnand %p5273_p13, %p5267_p0 }
  0x73   : > { %5277 = shalt.err (!%p5274_p6)
}
  0x74   : > { %s5278_s30 = scalar_lea.vmem %s5618_s13, 4096  ;;  %s5408_s12 = smov [#allocation2]  }
  0x75   : > { %p5279_p10 = scmp.ne.s32.totalorder %s5618_s13, %s5278_s30  ;;  %s5283_s28 = sshll.u32 %s5408_s12, 4  ;;  %s5284_s28 = int_to_ptr.vmem [resolvable:$false] %s5283_s28 }
  0x76   : > { %s5285_s29 = scalar_lea.vmem %s5284_s28, 8192  ;;  %p5286_p12 = scmp.lt.s32.totalorder %s5618_s13, %s5284_s28 }
  0x77   : > { %p5281_p3 = pnand %p5279_p10, %p5265_p9  ;;  %p5287_p2 = scmp.lt.s32.totalorder %s5285_s29, %s5278_s30 }
  0x79   : > { %p5282_p7 = pneg %p5281_p3  ;;  %p5288_p1 = por %p5287_p2, %p5286_p12 }
  0x7b   : > { %p5289_p4 = pnand %p5288_p1, %p5282_p7 }
  0x7d   : > { %5292 = shalt.err (!%p5289_p4)
}
  0x7e   : > { %s5409_s16 = smov 128   ;;  %s5410_s17 = smov 8  }
  0x7f   : > { %4915 = dma.hbm_to_vmem [thread:$0]  (!%p5614_p11), %s5611_s11, 4096, %s5618_s13, %s5620_s6, %s5409_s16, %s5409_s16, %s5410_s17  }
  0x80   : > { %s5656_s30 = scalar_lea.hbm %s12238_s1, %s4529_s7  ;;  %s244_s12 = scalar_lea.vmem [#allocation5], %s5604_s8 }
  0x81   : > { %s251_s28 = sshll.u32 %s244_s12, 4  ;;  %s240_s29 = sand.u32 1, %s5401_s21   ;;  %s5660_s28 = int_to_ptr.vmem [resolvable:$true] %s251_s28 }
  0x82   : > { %s5662_s0 = scalar_lea.sflag [#allocation6], %s240_s29  ;;  %s5293_s2 = scalar_lea.hbm %s5656_s30, 4096 }
  0x83   : > { %p5294_p0 = scmp.ne.s32.totalorder %s5656_s30, %s5293_s2  ;;  %s5298_s13 = scalar_lea.hbm %s12238_s1, 8192 }
  0x84   : > { %p5299_p6 = scmp.lt.u32.totalorder %s5656_s30, %s12238_s1  ;;  %p5300_p10 = scmp.lt.u32.totalorder %s5298_s13, %s5293_s2 }
  0x85   : > { %p5296_p8 = pnand %p5294_p0, %p5265_p9  ;;  %p5302_p7 = scmp.lt.u32.totalorder %s5293_s2, %s5656_s30 }
  0x86   : > { %p5301_p3 = por %p5300_p10, %p5299_p6 }
  0x87   : > { %p5297_p13 = pneg %p5296_p8 }
  0x88   : > { %p5303_p12 = por %p5302_p7, %p5301_p3 }
  0x8a   : > { %p5304_p2 = pnand %p5303_p12, %p5297_p13 }
  0x8c   : > { %5307 = shalt.err (!%p5304_p2)
}
  0x8d   : > { %s5308_s8 = scalar_lea.vmem %s5660_s28, 4096  ;;  %s5411_s10 = smov [#allocation5]  }
  0x8e   : > { %p5309_p1 = scmp.ne.s32.totalorder %s5660_s28, %s5308_s8  ;;  %s5313_s12 = sshll.u32 %s5411_s10, 4  ;;  %s5314_s12 = int_to_ptr.vmem [resolvable:$false] %s5313_s12 }
  0x8f   : > { %s5315_s29 = scalar_lea.vmem %s5314_s12, 8192  ;;  %p5316_p8 = scmp.lt.s32.totalorder %s5660_s28, %s5314_s12 }
  0x90   : > { %p5311_p4 = pnand %p5309_p1, %p5265_p9  ;;  %p5317_p6 = scmp.lt.s32.totalorder %s5315_s29, %s5308_s8 }
  0x92   : > { %p5312_p0 = pneg %p5311_p4  ;;  %p5318_p10 = por %p5317_p6, %p5316_p8 }
  0x94   : > { %p5319_p3 = pnand %p5318_p10, %p5312_p0 }
  0x96   : > { %5322 = shalt.err (!%p5319_p3)
}
  0x97   : > { %4918 = dma.hbm_to_vmem [thread:$0]  (!%p5614_p11), %s5656_s30, 4096, %s5660_s28, %s5662_s0, %s5409_s16, %s5409_s16, %s5410_s17  }
  0x98   : > { %p12647_p9 = scmp.ne.s32.totalorder %s12639_s26, 0 }
  0x9a   : > { %263 = sbr.rel (%p12647_p9) target bundleno = 1866 (0x74a), region = 40 }
  0xa1   : > { %s5694_s2 = sand.u32 1, %s5393_s19   ;;  %p12648_p13 = scmp.ne.s32.totalorder %s12637_s24, 0 }
  0xa2   : > { %s5697_s11 = sshll.u32 %s5694_s2, 8  ;;  %s266_s15 = scalar_lea.sflag [#allocation3], %s5694_s2 }
  0xa3   : > { %s5701_s7 = scalar_lea.vmem [#allocation2], %s5697_s11 }
  0xa4   : > { %5368 = dma.done.wait (%p12648_p13), %s266_s15, 4096  }
  0xa5   : > { %5370 = vsyncadd (%p12648_p13), %s266_s15, 4294963200  ;;  %s274_s0 = sand.u32 1, %s5473_s22   ;;  %s5709_s16 = scalar_lea.vmem [#allocation5], %s5697_s11 }
  0xa6   : > { %s275_s26 = scalar_lea.sflag [#allocation6], %s274_s0 }
  0xa7   : > { %5372 = dma.done.wait (%p12648_p13), %s275_s26, 4096  }
  0xa8   : > { %5374 = vsyncadd (%p12648_p13), %s275_s26, 4294963200  ;;  %p12649_p11 = scmp.eq.s32.totalorder %s5473_s22, 0 }
  0xaa   : > { %5376 = dma.done.wait (%p12649_p11), [#allocation6], 6144   ;;  %p12650_p7 = pmov %p12649_p11 }
  0xac   : > { %5378 = vsyncadd (%p12650_p7), [#allocation6], 4294961152  ;;  %p12651_p12 = pmov %p12650_p7 }
  0xad   : > { %p12652_p2 = pmov %p12650_p7 }
  0xae   : > { %5380 = dma.done.wait (%p12651_p12), [#allocation9], 32  }
  0xaf   : > { %5382 = vsyncadd (%p12652_p2), [#allocation9], 4294967264  ;;  %v5412_v0 = vmov 0   ;;  %v5724_v1 = vld [vmem:[%s5701_s7 + $0x10] sm:$0xff]  ;;  %v5727_v2 = vld [vmem:[%s5701_s7] sm:$0xff]  ;;  %v5413_v33 = vmov 1  }
  0xb0   : > { %4980 = vset.pattern.permute.xlu1 %v5412_v0  ;;  %4979 = vset.pattern.permute.xlu0 %v5412_v0  ;;  %v5732_v3 = vld [vmem:[%s5701_s7 + $0x18] sm:$0xff]  ;;  %v5735_v4 = vld [vmem:[%s5701_s7 + $0x8] sm:$0xff]  ;;  %v5743_v6 = vld [vmem:[%s5701_s7 + $0x20] sm:$0xff]  ;;  %v12256_v36 = vmov 2   ;;  %v12246_v37 = vmov 4   ;;  %v12250_v42 = vmov 3  }
  0xb1   : > { %371 = vperm.xlu1 %4980, %v5724_v1   ;;  %365 = vperm.xlu0 %4979, %v5727_v2   ;;  %v5740_v5 = vld [vmem:[%s5701_s7 + $0x28] sm:$0xff]  ;;  %v5748_v7 = vld [vmem:[%s5701_s7 + $0x38] sm:$0xff]  ;;  %v5751_v8 = vld [vmem:[%s5701_s7 + $0x30] sm:$0xff]  ;;  %v12248_v61 = vmov 5   ;;  %s12062_s24 = scalar_lea.vmem [#allocation11], %s5697_s11  ;;  %s4531_s17 = sshll.u32 %s5473_s22, 12 }
  0xb2   : > { %v5754_v9 = vld [vmem:[%s5701_s7 + $0x48] sm:$0xff]  ;;  %v5757_v10 = vld [vmem:[%s5701_s7 + $0x40] sm:$0xff]  ;;  %v5762_v11 = vld [vmem:[%s5701_s7 + $0x58] sm:$0xff]  ;;  %s4331_s30 = sshll.u32 %s12062_s24, 4  ;;  %s12188_s6 = scalar_lea.hbm %s12242_s5, %s4531_s17  ;;  %s12190_s30 = int_to_ptr.vmem [resolvable:$true] %s4331_s30 }
  0xb3   : > { %v5765_v12 = vld [vmem:[%s5701_s7 + $0x50] sm:$0xff]  ;;  %v5770_v13 = vld [vmem:[%s5701_s7 + $0x68] sm:$0xff]  ;;  %v5773_v14 = vld [vmem:[%s5701_s7 + $0x60] sm:$0xff]  ;;  %s4318_s22 = scalar_lea.sflag [#allocation4], %s5694_s2  ;;  %s5323_s9 = scalar_lea.vmem %s12190_s30, 4096 }
  0xb4   : > { %v5778_v15 = vld [vmem:[%s5701_s7 + $0x78] sm:$0xff]  ;;  %v5781_v16 = vld [vmem:[%s5701_s7 + $0x70] sm:$0xff]  ;;  %v5786_v17 = vld [vmem:[%s5701_s7 + $0x88] sm:$0xff]  ;;  %p5324_p1 = scmp.ne.s32.totalorder %s12190_s30, %s5323_s9  ;;  %s5419_s8 = smov [#allocation11]  }
  0xb5   : > { %374 = vperm.xlu1 %4980, %v5732_v3   ;;  %368 = vperm.xlu0 %4979, %v5735_v4   ;;  %v5789_v18 = vld [vmem:[%s5701_s7 + $0x80] sm:$0xff]  ;;  %v5794_v19 = vld [vmem:[%s5701_s7 + $0x98] sm:$0xff]  ;;  %v5797_v20 = vld [vmem:[%s5701_s7 + $0x90] sm:$0xff]  ;;  %s5327_s10 = sshll.u32 %s5419_s8, 4  ;;  %s5328_s10 = int_to_ptr.vmem [resolvable:$false] %s5327_s10 }
  0xb6   : > { %v5802_v21 = vld [vmem:[%s5701_s7 + $0xa8] sm:$0xff]  ;;  %v5805_v22 = vld [vmem:[%s5701_s7 + $0xa0] sm:$0xff]  ;;  %v5810_v23 = vld [vmem:[%s5701_s7 + $0xb8] sm:$0xff]  ;;  %p5325_p4 = pnand %p5324_p1, %p5598_p5  ;;  %s5329_s12 = scalar_lea.vmem %s5328_s10, 8192 }
  0xb7   : > { %v5813_v24 = vld [vmem:[%s5701_s7 + $0xb0] sm:$0xff]  ;;  %v5820_v25 = vld [vmem:[%s5701_s7 + $0xc8] sm:$0xff]  ;;  %v5823_v26 = vld [vmem:[%s5701_s7 + $0xc0] sm:$0xff]  ;;  %p5330_p8 = scmp.lt.s32.totalorder %s12190_s30, %s5328_s10  ;;  %p5331_p6 = scmp.lt.s32.totalorder %s5329_s12, %s5323_s9 }
  0xb8   : > { %v5828_v27 = vld [vmem:[%s5701_s7 + $0xd8] sm:$0xff]  ;;  %v5831_v28 = vld [vmem:[%s5701_s7 + $0xd0] sm:$0xff]  ;;  %v5836_v29 = vld [vmem:[%s5701_s7 + $0xe8] sm:$0xff]  ;;  %p5326_p0 = pneg %p5325_p4 }
  0xb9   : > { %380 = vperm.xlu1 %4980, %v5740_v5   ;;  %377 = vperm.xlu0 %4979, %v5743_v6   ;;  %v5839_v30 = vld [vmem:[%s5701_s7 + $0xe0] sm:$0xff]  ;;  %v5844_v31 = vld [vmem:[%s5701_s7 + $0xf8] sm:$0xff]  ;;  %v5847_v32 = vld [vmem:[%s5701_s7 + $0xf0] sm:$0xff]  ;;  %p5332_p10 = por %p5331_p6, %p5330_p8 }
  0xba   : > { %v5053_v49 = vld [vmem:[#allocation7 + $0x40] sm:$0xff]   ;;  %v5055_v53 = vld [vmem:[#allocation7 + $0x48] sm:$0xff]   ;;  %v5057_v57 = vld [vmem:[#allocation7 + $0x50] sm:$0xff]  }
  0xbb   : > { %v5054_v50 = vld [vmem:[#allocation7] sm:$0xff]   ;;  %4532 = vmatprep.subr.bf16.mxu0 %v5053_v49  ;;  %4868 = vmatprep.subr.bf16.mxu1 %v5053_v49  ;;  %v5056_v56 = vld [vmem:[#allocation7 + $0x8] sm:$0xff]   ;;  %v5058_v60 = vld [vmem:[#allocation7 + $0x10] sm:$0xff]   ;;  %p5333_p3 = pnand %p5332_p10, %p5326_p0 }
  0xbc   : > { %4533 = vmatpush3.bf16.msra.mxu0 %v5054_v50  ;;  %4876 = vmatpush3.bf16.msra.mxu1 %v5054_v50  ;;  %v5059_v62 = vld [vmem:[#allocation7 + $0x58] sm:$0xff]  }
  0xbd   : > { %386 = vperm.xlu1 %4980, %v5748_v7   ;;  %383 = vperm.xlu0 %4979, %v5751_v8  }
  0xbe   : > { %4534 = vmatprep.subr.bf16.mxu0 %v5055_v53  ;;  %4869 = vmatprep.subr.bf16.mxu1 %v5055_v53  ;;  %v5062_v53 = vld [vmem:[#allocation7 + $0x20] sm:$0xff]  }
  0xc0   : > { %4535 = vmatpush3.bf16.msra.mxu0 %v5056_v56  ;;  %4877 = vmatpush3.bf16.msra.mxu1 %v5056_v56  ;;  %v5063_v56 = vld [vmem:[#allocation7 + $0x68] sm:$0xff]  }
  0xc1   : > { %392 = vperm.xlu1 %4980, %v5754_v9   ;;  %389 = vperm.xlu0 %4979, %v5757_v10  }
  0xc2   : > { %4536 = vmatprep.subr.bf16.mxu0 %v5057_v57  ;;  %4870 = vmatprep.subr.bf16.mxu1 %v5057_v57  ;;  %v5064_v57 = vld [vmem:[#allocation7 + $0x28] sm:$0xff]  }
  0xc4   : > { %4537 = vmatpush3.bf16.msra.mxu0 %v5058_v60  ;;  %4878 = vmatpush3.bf16.msra.mxu1 %v5058_v60 }
  0xc5   : > { %398 = vperm.xlu1 %4980, %v5762_v11   ;;  %395 = vperm.xlu0 %4979, %v5765_v12  }
  0xc6   : > { %4538 = vmatprep.subr.bf16.mxu0 %v5059_v62  ;;  %4871 = vmatprep.subr.bf16.mxu1 %v5059_v62 }
  0xc9   : > { %404 = vperm.xlu1 %4980, %v5770_v13   ;;  %401 = vperm.xlu0 %4979, %v5773_v14  }
  0xcd   : > { %410 = vperm.xlu1 %4980, %v5778_v15   ;;  %407 = vperm.xlu0 %4979, %v5781_v16  }
  0xd1   : > { %416 = vperm.xlu1 %4980, %v5786_v17   ;;  %413 = vperm.xlu0 %4979, %v5789_v18  }
  0xd5   : > { %422 = vperm.xlu1 %4980, %v5794_v19   ;;  %419 = vperm.xlu0 %4979, %v5797_v20  }
  0xd9   : > { %428 = vperm.xlu1 %4980, %v5802_v21   ;;  %425 = vperm.xlu0 %4979, %v5805_v22  }
  0xdd   : > { %434 = vperm.xlu1 %4980, %v5810_v23   ;;  %431 = vperm.xlu0 %4979, %v5813_v24  }
  0xe1   : > { %440 = vperm.xlu1 %4980, %v5820_v25   ;;  %437 = vperm.xlu0 %4979, %v5823_v26  }
  0xe5   : > { %446 = vperm.xlu1 %4980, %v5828_v27   ;;  %443 = vperm.xlu0 %4979, %v5831_v28  }
  0xe9   : > { %452 = vperm.xlu1 %4980, %v5836_v29   ;;  %449 = vperm.xlu0 %4979, %v5839_v30  }
  0xed   : > { %458 = vperm.xlu1 %4980, %v5844_v31   ;;  %455 = vperm.xlu0 %4979, %v5847_v32  }
  0xf1   : > { %4982 = vset.pattern.permute.xlu1 %v5413_v33  ;;  %4981 = vset.pattern.permute.xlu0 %v5413_v33  ;;  %v5061_v33 = vld [vmem:[#allocation7 + $0x60] sm:$0xff]  }
  0xf2   : > { %624 = vperm.xlu1 %4982, %v5735_v4   ;;  %621 = vperm.xlu0 %4981, %v5727_v2  }
  0xf6   : > { %627 = vperm.xlu1 %4982, %v5724_v1   ;;  %630 = vperm.xlu0 %4981, %v5732_v3  }
  0xfa   : > { %633 = vperm.xlu1 %4982, %v5743_v6   ;;  %636 = vperm.xlu0 %4981, %v5740_v5  }
  0xfe   : > { %639 = vperm.xlu1 %4982, %v5751_v8   ;;  %642 = vperm.xlu0 %4981, %v5748_v7  }
 0x102   : > { %645 = vperm.xlu1 %4982, %v5757_v10   ;;  %648 = vperm.xlu0 %4981, %v5754_v9  }
 0x106   : > { %651 = vperm.xlu1 %4982, %v5765_v12   ;;  %654 = vperm.xlu0 %4981, %v5762_v11  }
 0x10a   : > { %657 = vperm.xlu1 %4982, %v5773_v14   ;;  %660 = vperm.xlu0 %4981, %v5770_v13  }
 0x10e   : > { %663 = vperm.xlu1 %4982, %v5781_v16   ;;  %666 = vperm.xlu0 %4981, %v5778_v15  }
 0x112   : > { %669 = vperm.xlu1 %4982, %v5789_v18   ;;  %672 = vperm.xlu0 %4981, %v5786_v17  }
 0x116   : > { %675 = vperm.xlu1 %4982, %v5797_v20   ;;  %678 = vperm.xlu0 %4981, %v5794_v19  }
 0x11a   : > { %681 = vperm.xlu1 %4982, %v5805_v22   ;;  %684 = vperm.xlu0 %4981, %v5802_v21  }
 0x11e   : > { %687 = vperm.xlu1 %4982, %v5813_v24   ;;  %690 = vperm.xlu0 %4981, %v5810_v23  }
 0x122   : > { %693 = vperm.xlu1 %4982, %v5823_v26   ;;  %696 = vperm.xlu0 %4981, %v5820_v25  }
 0x126   : > { %699 = vperm.xlu1 %4982, %v5831_v28   ;;  %702 = vperm.xlu0 %4981, %v5828_v27  }
 0x12a   : > { %705 = vperm.xlu1 %4982, %v5839_v30   ;;  %708 = vperm.xlu0 %4981, %v5836_v29  }
 0x12e   : > { %711 = vperm.xlu1 %4982, %v5847_v32   ;;  %714 = vperm.xlu0 %4981, %v5844_v31  }
 0x130   : > { %v5883_v34 = vpop.permute.xlu1 %371  ;;  %v5885_v35 = vpop.permute.xlu0 %365 }
 0x131   : > { %12653 = vst [vmem:[#allocation17_spill] sm:$0xff] %v5883_v34  ;;  %12654 = vst [vmem:[#allocation18_spill] sm:$0xff] %v5885_v35 }
 0x132   : > { %4983 = vset.pattern.permute.xlu1 %v12256_v36  ;;  %4987 = vset.pattern.permute.xlu0 %v12246_v37 }
 0x133   : > { %1037 = vperm.xlu1 %4983, %v5727_v2   ;;  %1920 = vperm.xlu0 %4987, %v5786_v17  }
 0x134   : > { %v5891_v38 = vpop.permute.xlu1 %374  ;;  %v5893_v39 = vpop.permute.xlu0 %368 }
 0x135   : > { %12655 = vst [vmem:[#allocation19_spill] sm:$0xff] %v5893_v39 }
 0x137   : > { %1088 = vperm.xlu1 %4983, %v5786_v17   ;;  %1872 = vperm.xlu0 %4987, %v5735_v4  }
 0x138   : > { %v5897_v40 = vpop.permute.xlu1 %380  ;;  %v5899_v41 = vpop.permute.xlu0 %377 }
 0x139   : > { %12656 = vst [vmem:[#allocation20_spill] sm:$0xff] %v5899_v41 }
 0x13b   : > { %4984 = vset.pattern.permute.xlu1 %v12250_v42  ;;  %1923 = vperm.xlu0 %4987, %v5797_v20  }
 0x13c   : > { %v5903_v43 = vpop.permute.xlu1 %386  ;;  %1501 = vperm.xlu1 %4984, %v5789_v18   ;;  %v5906_v44 = vpop.permute.xlu0 %383 }
 0x13d   : > { %12657 = vst [vmem:[#allocation21_spill] sm:$0xff] %v5903_v43  ;;  %12658 = vst [vmem:[#allocation22_spill] sm:$0xff] %v5906_v44 }
 0x13f   : > { %1875 = vperm.xlu0 %4987, %v5724_v1  }
 0x140   : > { %v5909_v45 = vpop.permute.xlu1 %392  ;;  %4985 = vset.pattern.permute.xlu1 %v12256_v36  ;;  %v5912_v46 = vpop.permute.xlu0 %389 }
 0x141   : > { %12659 = vst [vmem:[#allocation23_spill] sm:$0xff] %v5909_v45  ;;  %12660 = vst [vmem:[#allocation24_spill] sm:$0xff] %v5912_v46  ;;  %1040 = vperm.xlu1 %4985, %v5735_v4  }
 0x143   : > { %1935 = vperm.xlu0 %4987, %v5813_v24  }
 0x144   : > { %v5916_v47 = vpop.permute.xlu1 %398  ;;  %v5918_v48 = vpop.permute.xlu0 %395 }
 0x145   : > { %12661 = vst [vmem:[#allocation25_spill] sm:$0xff] %v5916_v47  ;;  %12662 = vst [vmem:[#allocation26_spill] sm:$0xff] %v5918_v48  ;;  %4986 = vset.pattern.permute.xlu1 %v12246_v37  ;;  %v12696_v48 = vmov 5  }
 0x146   : > { %1917 = vperm.xlu1 %4986, %v5789_v18  }
 0x147   : > { %1887 = vperm.xlu0 %4987, %v5751_v8  }
 0x148   : > { %v5923_v51 = vpop.permute.xlu1 %404  ;;  %v5925_v52 = vpop.permute.xlu0 %401 }
 0x149   : > { %12663 = vst [vmem:[#allocation27_spill] sm:$0xff] %v5923_v51  ;;  %12664 = vst [vmem:[#allocation28_spill] sm:$0xff] %v5925_v52  ;;  %v12691_v52 = vmov 2  }
 0x14a   : > { %4988 = vset.pattern.permute.xlu1 %v12250_v42  ;;  %v5068_v42 = vld [vmem:[#allocation7 + $0x38] sm:$0xff]  }
 0x14b   : > { %1453 = vperm.xlu1 %4988, %v5727_v2   ;;  %1947 = vperm.xlu0 %4987, %v5831_v28  }
 0x14c   : > { %v5930_v54 = vpop.permute.xlu1 %410  ;;  %v5932_v55 = vpop.permute.xlu0 %407 }
 0x14d   : > { %12665 = vst [vmem:[#allocation29_spill] sm:$0xff] %v5930_v54  ;;  %12666 = vst [vmem:[#allocation30_spill] sm:$0xff] %v5932_v55 }
 0x14f   : > { %1456 = vperm.xlu1 %4988, %v5735_v4   ;;  %1899 = vperm.xlu0 %4987, %v5765_v12   ;;  %v5060_v12 = vld [vmem:[#allocation7 + $0x18] sm:$0xff]  }
 0x150   : > { %v5936_v58 = vpop.permute.xlu1 %416  ;;  %v5938_v59 = vpop.permute.xlu0 %413  ;;  %4539 = vmatpush3.bf16.msra.mxu0 %v5060_v12  ;;  %4879 = vmatpush3.bf16.msra.mxu1 %v5060_v12  ;;  %v5065_v12 = vld [vmem:[#allocation7 + $0x70] sm:$0xff]  }
 0x151   : > { %12667 = vst [vmem:[#allocation31_spill] sm:$0xff] %v5936_v58  ;;  %12668 = vst [vmem:[#allocation32_spill] sm:$0xff] %v5938_v59  ;;  %4540 = vmatprep.subr.bf16.mxu0 %v5061_v33  ;;  %4872 = vmatprep.subr.bf16.mxu1 %v5061_v33 }
 0x153   : > { %4989 = vset.pattern.permute.xlu1 %v12248_v61  ;;  %5030 = vset.pattern.permute.xlu0 %v12248_v61 }
 0x154   : > { %v5942_v63 = vpop.permute.xlu1 %422  ;;  %2336 = vperm.xlu1 %4989, %v5786_v17   ;;  %2333 = vperm.xlu0 %5030, %v5789_v18   ;;  %v5946_v0 = vpop.permute.xlu0 %419 }
 0x155   : > { %12669 = vst [vmem:[#allocation33_spill] sm:$0xff] %v5942_v63  ;;  %12670 = vst [vmem:[#allocation34_spill] sm:$0xff] %v5946_v0  ;;  %4541 = vmatpush3.bf16.msra.mxu0 %v5062_v53  ;;  %4880 = vmatpush3.bf16.msra.mxu1 %v5062_v53 }
 0x156   : > { %4542 = vmatprep.subr.bf16.mxu0 %v5063_v56  ;;  %4873 = vmatprep.subr.bf16.mxu1 %v5063_v56  ;;  %v5067_v56 = vld [vmem:[#allocation7 + $0x78] sm:$0xff]  }
 0x158   : > { %v5948_v49 = vpop.permute.xlu1 %428  ;;  %4990 = vset.pattern.permute.xlu1 %v12246_v37  ;;  %2294 = vperm.xlu0 %5030, %v5732_v3   ;;  %v5952_v50 = vpop.permute.xlu0 %425  ;;  %v5066_v37 = vld [vmem:[#allocation7 + $0x30] sm:$0xff]  }
 0x159   : > { %12671 = vst [vmem:[#allocation35_spill] sm:$0xff] %v5948_v49  ;;  %12672 = vst [vmem:[#allocation36_spill] sm:$0xff] %v5952_v50  ;;  %1869 = vperm.xlu1 %4990, %v5727_v2   ;;  %4543 = vmatpush3.bf16.msra.mxu0 %v5064_v57 }
 0x15a   : > { %4881 = vmatpush3.bf16.msra.mxu1 %v5064_v57  ;;  %4544 = vmatprep.subr.bf16.mxu0 %v5065_v12 }
 0x15b   : > { %4874 = vmatprep.subr.bf16.mxu1 %v5065_v12  ;;  %v12681_v12 = vmov 3  }
 0x15c   : > { %v5955_v60 = vpop.permute.xlu1 %434  ;;  %2348 = vperm.xlu0 %5030, %v5802_v21   ;;  %v5958_v62 = vpop.permute.xlu0 %431 }
 0x15d   : > { %12673 = vst [vmem:[#allocation37_spill] sm:$0xff] %v5955_v60  ;;  %12674 = vst [vmem:[#allocation38_spill] sm:$0xff] %v5958_v62  ;;  %4991 = vset.pattern.permute.xlu1 %v12248_v61  ;;  %4545 = vmatpush3.bf16.msra.mxu0 %v5066_v37 }
 0x15e   : > { %2285 = vperm.xlu1 %4991, %v5727_v2   ;;  %4882 = vmatpush3.bf16.msra.mxu1 %v5066_v37 }
 0x15f   : > { %4546 = vmatprep.subr.bf16.mxu0 %v5067_v56  ;;  %4875 = vmatprep.subr.bf16.mxu1 %v5067_v56 }
 0x160   : > { %v5962_v33 = vpop.permute.xlu1 %440  ;;  %2297 = vperm.xlu0 %5030, %v5743_v6   ;;  %v5965_v53 = vpop.permute.xlu0 %437 }
 0x161   : > { %12675 = vst [vmem:[#allocation39_spill] sm:$0xff] %v5962_v33  ;;  %12676 = vst [vmem:[#allocation40_spill] sm:$0xff] %v5965_v53  ;;  %4547 = vmatpush3.bf16.msra.mxu0 %v5068_v42  ;;  %v358_v53 = vlaneseq }
 0x162   : > { %2288 = vperm.xlu1 %4991, %v5735_v4   ;;  %4883 = vmatpush3.bf16.msra.mxu1 %v5068_v42 }
 0x164   : > { %v5968_v61 = vpop.permute.xlu1 %446  ;;  %2306 = vperm.xlu0 %5030, %v5748_v7   ;;  %v5971_v2 = vpop.permute.xlu0 %443 }
 0x165   : > { %12677 = vst [vmem:[#allocation41_spill] sm:$0xff] %v5968_v61  ;;  %12678 = vst [vmem:[#allocation42_spill] sm:$0xff] %v5971_v2 }
 0x166   : > { %4992 = vset.pattern.permute.xlu1 %v12256_v36 }
 0x167   : > { %1094 = vperm.xlu1 %4992, %v5794_v19  }
 0x168   : > { %v5975_v57 = vpop.permute.xlu1 %452  ;;  %2360 = vperm.xlu0 %5030, %v5820_v25   ;;  %v5978_v4 = vpop.permute.xlu0 %449 }
 0x169   : > { %12679 = vst [vmem:[#allocation43_spill] sm:$0xff] %v5975_v57  ;;  %12680 = vst [vmem:[#allocation44_spill] sm:$0xff] %v5978_v4 }
 0x16b   : > { %4993 = vset.pattern.permute.xlu1 %v12681_v12 }
 0x16c   : > { %v5981_v54 = vpop.permute.xlu1 %458  ;;  %1507 = vperm.xlu1 %4993, %v5797_v20   ;;  %2309 = vperm.xlu0 %5030, %v5757_v10   ;;  %v5985_v37 = vpop.permute.xlu0 %455 }
 0x16d   : > { %12682 = vst [vmem:[#allocation45_spill] sm:$0xff] %v5981_v54  ;;  %12683 = vst [vmem:[#allocation46_spill] sm:$0xff] %v5985_v37 }
 0x170   : > { %4994 = vset.pattern.permute.xlu1 %v12256_v36  ;;  %2318 = vperm.xlu0 %5030, %v5762_v11   ;;  %v12689_v36 = vmov 4  }
 0x171   : > { %v5989_v55 = vpop.permute.xlu1 %624  ;;  %1043 = vperm.xlu1 %4994, %v5724_v1   ;;  %v5992_v56 = vpop.permute.xlu0 %621 }
 0x172   : > { %12684 = vst [vmem:[#allocation47_spill] sm:$0xff] %v5989_v55  ;;  %12685 = vst [vmem:[#allocation48_spill] sm:$0xff] %v5992_v56 }
 0x174   : > { %2372 = vperm.xlu0 %5030, %v5836_v29  }
 0x175   : > { %v5995_v42 = vpop.permute.xlu1 %627  ;;  %1046 = vperm.xlu1 %4994, %v5732_v3   ;;  %v5998_v54 = vpop.permute.xlu0 %630 }
 0x176   : > { %12686 = vst [vmem:[#allocation49_spill] sm:$0xff] %v5995_v42  ;;  %12687 = vst [vmem:[#allocation50_spill] sm:$0xff] %v5998_v54 }
 0x178   : > { %2321 = vperm.xlu0 %5030, %v5773_v14  }
 0x179   : > { %v6001_v37 = vpop.permute.xlu1 %633  ;;  %4995 = vset.pattern.permute.xlu1 %v12689_v36  ;;  %v6004_v51 = vpop.permute.xlu0 %636 }
 0x17a   : > { %12688 = vst [vmem:[#allocation51_spill] sm:$0xff] %v6001_v37  ;;  %12690 = vst [vmem:[#allocation52_spill] sm:$0xff] %v6004_v51  ;;  %1926 = vperm.xlu1 %4995, %v5794_v19  }
 0x17c   : > { %5040 = vset.pattern.permute.xlu0 %v12691_v52 }
 0x17d   : > { %v6008_v57 = vpop.permute.xlu1 %639  ;;  %1085 = vperm.xlu0 %5040, %v5789_v18   ;;  %v6011_v29 = vpop.permute.xlu0 %642 }
 0x17e   : > { %12692 = vst [vmem:[#allocation53_spill] sm:$0xff] %v6008_v57  ;;  %12693 = vst [vmem:[#allocation54_spill] sm:$0xff] %v6011_v29  ;;  %4996 = vset.pattern.permute.xlu1 %v12681_v12 }
 0x17f   : > { %1459 = vperm.xlu1 %4996, %v5724_v1  }
 0x181   : > { %v6015_v4 = vpop.permute.xlu1 %645  ;;  %1091 = vperm.xlu0 %5040, %v5797_v20   ;;  %v6018_v47 = vpop.permute.xlu0 %648 }
 0x182   : > { %12694 = vst [vmem:[#allocation55_spill] sm:$0xff] %v6015_v4  ;;  %12695 = vst [vmem:[#allocation56_spill] sm:$0xff] %v6018_v47 }
 0x183   : > { %4997 = vset.pattern.permute.xlu1 %v12696_v48 }
 0x184   : > { %2339 = vperm.xlu1 %4997, %v5797_v20  }
 0x185   : > { %v6022_v61 = vpop.permute.xlu1 %651  ;;  %1052 = vperm.xlu0 %5040, %v5740_v5   ;;  %v6025_v18 = vpop.permute.xlu0 %654 }
 0x186   : > { %12697 = vst [vmem:[#allocation57_spill] sm:$0xff] %v6022_v61  ;;  %12698 = vst [vmem:[#allocation58_spill] sm:$0xff] %v6025_v18 }
 0x188   : > { %2342 = vperm.xlu1 %4997, %v5794_v19  }
 0x189   : > { %v6028_v2 = vpop.permute.xlu1 %657  ;;  %1103 = vperm.xlu0 %5040, %v5813_v24   ;;  %v6031_v45 = vpop.permute.xlu0 %660 }
 0x18a   : > { %12699 = vst [vmem:[#allocation59_spill] sm:$0xff] %v6028_v2  ;;  %12700 = vst [vmem:[#allocation60_spill] sm:$0xff] %v6031_v45 }
 0x18c   : > { %4998 = vset.pattern.permute.xlu1 %v12689_v36 }
 0x18d   : > { %v6034_v47 = vpop.permute.xlu1 %663  ;;  %1878 = vperm.xlu1 %4998, %v5732_v3   ;;  %1064 = vperm.xlu0 %5040, %v5754_v9   ;;  %v6038_v20 = vpop.permute.xlu0 %666 }
 0x18e   : > { %12701 = vst [vmem:[#allocation61_spill] sm:$0xff] %v6034_v47  ;;  %12702 = vst [vmem:[#allocation62_spill] sm:$0xff] %v6038_v20 }
 0x191   : > { %v6040_v61 = vpop.permute.xlu1 %669  ;;  %4999 = vset.pattern.permute.xlu1 %v12696_v48  ;;  %1115 = vperm.xlu0 %5040, %v5831_v28   ;;  %v6044_v2 = vpop.permute.xlu0 %672 }
 0x192   : > { %12703 = vst [vmem:[#allocation63_spill] sm:$0xff] %v6040_v61  ;;  %12704 = vst [vmem:[#allocation64_spill] sm:$0xff] %v6044_v2  ;;  %2291 = vperm.xlu1 %4999, %v5724_v1  }
 0x195   : > { %v6047_v45 = vpop.permute.xlu1 %675  ;;  %1076 = vperm.xlu0 %5040, %v5770_v13   ;;  %v6050_v47 = vpop.permute.xlu0 %678 }
 0x196   : > { %12705 = vst [vmem:[#allocation65_spill] sm:$0xff] %v6047_v45  ;;  %12706 = vst [vmem:[#allocation66_spill] sm:$0xff] %v6050_v47  ;;  %5000 = vset.pattern.permute.xlu1 %v12691_v52 }
 0x197   : > { %1097 = vperm.xlu1 %5000, %v5805_v22  }
 0x199   : > { %v6054_v9 = vpop.permute.xlu1 %681  ;;  %1127 = vperm.xlu0 %5040, %v5847_v32   ;;  %v6057_v20 = vpop.permute.xlu0 %684 }
 0x19a   : > { %12707 = vst [vmem:[#allocation67_spill] sm:$0xff] %v6054_v9  ;;  %12708 = vst [vmem:[#allocation68_spill] sm:$0xff] %v6057_v20 }
 0x19b   : > { %1100 = vperm.xlu1 %5000, %v5802_v21  }
 0x19d   : > { %v6060_v28 = vpop.permute.xlu1 %687  ;;  %5042 = vset.pattern.permute.xlu0 %v12681_v12  ;;  %v6063_v1 = vpop.permute.xlu0 %690 }
 0x19e   : > { %12709 = vst [vmem:[#allocation69_spill] sm:$0xff] %v6060_v28  ;;  %12710 = vst [vmem:[#allocation70_spill] sm:$0xff] %v6063_v1  ;;  %1504 = vperm.xlu0 %5042, %v5786_v17  }
 0x19f   : > { %5001 = vset.pattern.permute.xlu1 %v12681_v12 }
 0x1a0   : > { %1516 = vperm.xlu1 %5001, %v5802_v21  }
 0x1a1   : > { %v6068_v13 = vpop.permute.xlu1 %693  ;;  %v6070_v18 = vpop.permute.xlu0 %696 }
 0x1a2   : > { %12711 = vst [vmem:[#allocation71_spill] sm:$0xff] %v6068_v13  ;;  %12712 = vst [vmem:[#allocation72_spill] sm:$0xff] %v6070_v18  ;;  %1510 = vperm.xlu0 %5042, %v5794_v19  }
 0x1a4   : > { %5002 = vset.pattern.permute.xlu1 %v12691_v52 }
 0x1a5   : > { %v6074_v4 = vpop.permute.xlu1 %699  ;;  %1049 = vperm.xlu1 %5002, %v5743_v6   ;;  %v6077_v46 = vpop.permute.xlu0 %702 }
 0x1a6   : > { %12713 = vst [vmem:[#allocation73_spill] sm:$0xff] %v6074_v4  ;;  %12714 = vst [vmem:[#allocation74_spill] sm:$0xff] %v6077_v46  ;;  %1462 = vperm.xlu0 %5042, %v5732_v3  }
 0x1a9   : > { %v6080_v17 = vpop.permute.xlu1 %705  ;;  %5003 = vset.pattern.permute.xlu1 %v12689_v36  ;;  %v6083_v33 = vpop.permute.xlu0 %708 }
 0x1aa   : > { %12715 = vst [vmem:[#allocation75_spill] sm:$0xff] %v6080_v17  ;;  %12716 = vst [vmem:[#allocation76_spill] sm:$0xff] %v6083_v33  ;;  %1929 = vperm.xlu1 %5003, %v5805_v22   ;;  %1513 = vperm.xlu0 %5042, %v5805_v22  }
 0x1ad   : > { %v6087_v19 = vpop.permute.xlu1 %711  ;;  %v6089_v18 = vpop.permute.xlu0 %714 }
 0x1ae   : > { %12717 = vst [vmem:[#allocation77_spill] sm:$0xff] %v6087_v19  ;;  %12718 = vst [vmem:[#allocation78_spill] sm:$0xff] %v6089_v18  ;;  %1932 = vperm.xlu1 %5003, %v5802_v21   ;;  %1465 = vperm.xlu0 %5042, %v5743_v6  }
 0x1b2   : > { %5004 = vset.pattern.permute.xlu1 %v12681_v12  ;;  %v6094_v3 = vpop.permute.xlu1 %1037  ;;  %v6096_v17 = vpop.permute.xlu0 %1920  ;;  %1522 = vperm.xlu0 %5042, %v5810_v23  }
 0x1b3   : > { %12719 = vst [vmem:[#allocation79_spill] sm:$0xff] %v6094_v3  ;;  %12720 = vst [vmem:[#allocation80_spill] sm:$0xff] %v6096_v17  ;;  %1468 = vperm.xlu1 %5004, %v5740_v5  }
 0x1b6   : > { %v6100_v33 = vpop.permute.xlu1 %1088  ;;  %v6102_v46 = vpop.permute.xlu0 %1872  ;;  %1474 = vperm.xlu0 %5042, %v5748_v7  }
 0x1b7   : > { %12721 = vst [vmem:[#allocation81_spill] sm:$0xff] %v6100_v33  ;;  %12722 = vst [vmem:[#allocation82_spill] sm:$0xff] %v6102_v46  ;;  %5005 = vset.pattern.permute.xlu1 %v12696_v48 }
 0x1b8   : > { %2345 = vperm.xlu1 %5005, %v5805_v22  }
 0x1ba   : > { %v6107_v21 = vpop.permute.xlu0 %1923  ;;  %1525 = vperm.xlu0 %5042, %v5823_v26  }
 0x1bb   : > { %12723 = vst [vmem:[#allocation83_spill] sm:$0xff] %v6107_v21  ;;  %v6110_v18 = vpop.permute.xlu1 %1501 }
 0x1bc   : > { %12724 = vst [vmem:[#allocation84_spill] sm:$0xff] %v6110_v18  ;;  %5006 = vset.pattern.permute.xlu1 %v12689_v36 }
 0x1bd   : > { %1881 = vperm.xlu1 %5006, %v5743_v6  }
 0x1be   : > { %v6114_v19 = vpop.permute.xlu0 %1875  ;;  %1477 = vperm.xlu0 %5042, %v5757_v10   ;;  %v6130_v10 = vand.u32 127, %v358_v53 }
 0x1bf   : > { %12725 = vst [vmem:[#allocation85_spill] sm:$0xff] %v6114_v19 }
 0x1c0   : > { %v6117_v4 = vpop.permute.xlu1 %1040  ;;  %vm460_vm4 = vcmp.eq.s32.totalorder %v6130_v10, %v5885_v35  ;;  %vm716_vm5 = vcmp.eq.s32.totalorder %v6130_v10, %v5992_v56  ;;  %vm465_vm7 = vcmp.eq.s32.totalorder %v6130_v10, %v5893_v39  ;;  %vm721_vm8 = vcmp.eq.s32.totalorder %v6130_v10, %v5989_v55 }
 0x1c1   : > { %12726 = vst [vmem:[#allocation86_spill] sm:$0xff] %v6117_v4  ;;  %1884 = vperm.xlu1 %5006, %v5740_v5   ;;  %vm876_vm11 = vmor %vm460_vm4, %vm716_vm5  ;;  %vm1132_vm12 = vcmp.eq.s32.totalorder %v6130_v10, %v6094_v3 }
 0x1c2   : > { %v6120_v13 = vpop.permute.xlu0 %1935  ;;  %1534 = vperm.xlu0 %5042, %v5828_v27   ;;  %vm881_vm14 = vmor %vm465_vm7, %vm721_vm8 }
 0x1c3   : > { %12727 = vst [vmem:[#allocation87_spill] sm:$0xff] %v6120_v13 }
 0x1c5   : > { %5007 = vset.pattern.permute.xlu1 %v12696_v48  ;;  %v6124_v22 = vpop.permute.xlu1 %1917 }
 0x1c6   : > { %12728 = vst [vmem:[#allocation88_spill] sm:$0xff] %v6124_v22  ;;  %2300 = vperm.xlu1 %5007, %v5740_v5   ;;  %v6127_v6 = vpop.permute.xlu0 %1887  ;;  %1486 = vperm.xlu0 %5042, %v5762_v11   ;;  %v6144_v5 = vadd.s32 128, %v6130_v10 }
 0x1c7   : > { %12729 = vst [vmem:[#allocation89_spill] sm:$0xff] %v6127_v6 }
 0x1c8   : > { %vm461_vm0 = vcmp.eq.s32.totalorder %v6144_v5, %v5885_v35  ;;  %vm717_vm1 = vcmp.eq.s32.totalorder %v6144_v5, %v5992_v56  ;;  %vm466_vm2 = vcmp.eq.s32.totalorder %v6144_v5, %v5893_v39  ;;  %vm722_vm3 = vcmp.eq.s32.totalorder %v6144_v5, %v5989_v55 }
 0x1c9   : > { %vm877_vm6 = vmor %vm461_vm0, %vm717_vm1  ;;  %vm1133_vm10 = vcmp.eq.s32.totalorder %v6144_v5, %v6094_v3  ;;  %vm1138_vm13 = vcmp.eq.s32.totalorder %v6144_v5, %v6117_v4  ;;  %vm1137_vm0 = vcmp.eq.s32.totalorder %v6130_v10, %v6117_v4 }
 0x1ca   : > { %5008 = vset.pattern.permute.xlu1 %v12691_v52  ;;  %v6133_v43 = vpop.permute.xlu1 %1453  ;;  %v6135_v13 = vpop.permute.xlu0 %1947  ;;  %1537 = vperm.xlu0 %5042, %v5839_v30   ;;  %vm6171_vm9 = vmor %vm466_vm2, %vm722_vm3 }
 0x1cb   : > { %12730 = vst [vmem:[#allocation90_spill] sm:$0xff] %v6133_v43  ;;  %12731 = vst [vmem:[#allocation91_spill] sm:$0xff] %v6135_v13  ;;  %1106 = vperm.xlu1 %5008, %v5810_v23   ;;  %vm1549_vm1 = vcmp.eq.s32.totalorder %v6144_v5, %v6133_v43  ;;  %vm1548_vm8 = vcmp.eq.s32.totalorder %v6130_v10, %v6133_v43 }
 0x1cc   : > { %vm1293_vm15 = vmor %vm877_vm6, %vm1133_vm10  ;;  %vm1970_vm10 = vcmp.eq.s32.totalorder %v6144_v5, %v6102_v46 }
 0x1cd   : > { %vm6191_vm2 = vmor %vm876_vm11, %vm1132_vm12  ;;  %vm1969_vm12 = vcmp.eq.s32.totalorder %v6130_v10, %v6102_v46 }
 0x1ce   : > { %v6139_v27 = vpop.permute.xlu1 %1456  ;;  %v6141_v29 = vpop.permute.xlu0 %1899  ;;  %1489 = vperm.xlu0 %5042, %v5773_v14   ;;  %vm1298_vm3 = vmor %vm6171_vm9, %vm1138_vm13 }
 0x1cf   : > { %12732 = vst [vmem:[#allocation92_spill] sm:$0xff] %v6139_v27  ;;  %12733 = vst [vmem:[#allocation93_spill] sm:$0xff] %v6141_v29  ;;  %5009 = vset.pattern.permute.xlu1 %v12681_v12  ;;  %vm1554_vm4 = vcmp.eq.s32.totalorder %v6144_v5, %v6139_v27  ;;  %vm1553_vm6 = vcmp.eq.s32.totalorder %v6130_v10, %v6139_v27 }
 0x1d0   : > { %1519 = vperm.xlu1 %5009, %v5813_v24   ;;  %vm1297_vm5 = vmor %vm881_vm14, %vm1137_vm0 }
 0x1d1   : > { %vm6205_vm7 = vmor %vm1293_vm15, %vm1549_vm1 }
 0x1d2   : > { %1546 = vperm.xlu0 %5042, %v5844_v31   ;;  %vm1714_vm9 = vmor %vm1298_vm3, %vm1554_vm4 }
 0x1d3   : > { %v6162_v11 = vpop.permute.xlu1 %2336  ;;  %v6164_v14 = vpop.permute.xlu0 %2333  ;;  %vm1713_vm11 = vmor %vm1297_vm5, %vm1553_vm6 }
 0x1d4   : > { %12734 = vst [vmem:[#allocation94_spill] sm:$0xff] %v6162_v11  ;;  %12735 = vst [vmem:[#allocation95_spill] sm:$0xff] %v6164_v14  ;;  %5010 = vset.pattern.permute.xlu1 %v12691_v52 }
 0x1d5   : > { %1055 = vperm.xlu1 %5010, %v5751_v8   ;;  %vm1708_vm14 = vmor %vm6191_vm2, %vm1548_vm8 }
 0x1d6   : > { %1498 = vperm.xlu0 %5042, %v5778_v15   ;;  %vm6226_vm15 = vmor %vm1714_vm9, %vm1970_vm10 }
 0x1d7   : > { %v6183_v31 = vpop.permute.xlu0 %2294  ;;  %vm6235_vm3 = vmor %vm1713_vm11, %vm1969_vm12  ;;  %vm727_vm12 = vcmp.eq.s32.totalorder %v6144_v5, %v5995_v42 }
 0x1d8   : > { %12738 = vst [vmem:[#allocation96_spill] sm:$0xff] %v6183_v31  ;;  %v6187_v53 = vpop.permute.xlu1 %1869 }
 0x1d9   : > { %12739 = vst [vmem:[#allocation97_spill] sm:$0xff] %v6187_v53  ;;  %1058 = vperm.xlu1 %5010, %v5748_v7   ;;  %vm1965_vm13 = vcmp.eq.s32.totalorder %v6144_v5, %v6187_v53  ;;  %vm1964_vm0 = vcmp.eq.s32.totalorder %v6130_v10, %v6187_v53 }
 0x1da   : > { %5048 = vset.pattern.permute.xlu0 %v12689_v36  ;;  %vm2125_vm2 = vmor %vm6205_vm7, %vm1965_vm13  ;;  %vm726_vm13 = vcmp.eq.s32.totalorder %v6130_v10, %v5995_v42  ;;  %v12768_v42 = vmov 0 }
 0x1db   : > { %v6203_v4 = vpop.permute.xlu0 %2348  ;;  %1959 = vperm.xlu0 %5048, %v5847_v32   ;;  %vm2124_vm6 = vmor %vm1708_vm14, %vm1964_vm0  ;;  %vm541_vm14 = vcmp.eq.s32.totalorder %v6144_v5, %v5938_v59  ;;  %vm471_vm0 = vcmp.eq.s32.totalorder %v6144_v5, %v5883_v34 }
 0x1dc   : > { %12742 = vst [vmem:[#allocation98_spill] sm:$0xff] %v6203_v4 }
 0x1dd   : > { %5011 = vset.pattern.permute.xlu1 %v12689_v36  ;;  %v6215_v30 = vpop.permute.xlu1 %2285 }
 0x1de   : > { %12745 = vst [vmem:[#allocation99_spill] sm:$0xff] %v6215_v30  ;;  %1938 = vperm.xlu1 %5011, %v5810_v23   ;;  %vm2381_vm1 = vcmp.eq.s32.totalorder %v6144_v5, %v6215_v30  ;;  %vm2380_vm4 = vcmp.eq.s32.totalorder %v6130_v10, %v6215_v30  ;;  %v12314_v30 = vmov 0.0  }
 0x1df   : > { %v6224_v32 = vpop.permute.xlu0 %2297  ;;  %1911 = vperm.xlu0 %5048, %v5781_v16   ;;  %vm2541_vm8 = vmor %vm2125_vm2, %vm2381_vm1  ;;  %vm802_vm1 = vcmp.eq.s32.totalorder %v6144_v5, %v6044_v2  ;;  %vm796_vm2 = vcmp.eq.s32.totalorder %v6130_v10, %v6040_v61 }
 0x1e0   : > { %12746 = vst [vmem:[#allocation100_spill] sm:$0xff] %v6224_v32  ;;  %vm2540_vm7 = vmor %vm2124_vm6, %vm2380_vm4  ;;  %v2701_v53 = vsel %vm2541_vm8, 1.0, %v12314_v30  ;;  %vm807_vm8 = vcmp.eq.s32.totalorder %v6144_v5, %v6047_v45 }
 0x1e1   : > { %v6239_v55 = vpop.permute.xlu1 %2288  ;;  %v2700_v39 = vsel %vm2540_vm7, 1.0, %v12314_v30  ;;  %vm6330_vm4 = vmor %vm471_vm0, %vm727_vm12  ;;  %vm546_vm7 = vcmp.eq.s32.totalorder %v6144_v5, %v5936_v58  ;;  %vm550_vm12 = vcmp.eq.s32.totalorder %v6130_v10, %v5946_v0 }
 0x1e2   : > { %12751 = vst [vmem:[#allocation101_spill] sm:$0xff] %v6239_v55  ;;  %5012 = vset.pattern.permute.xlu1 %v12681_v12  ;;  %vm2386_vm5 = vcmp.eq.s32.totalorder %v6144_v5, %v6239_v55  ;;  %vm2385_vm9 = vcmp.eq.s32.totalorder %v6130_v10, %v6239_v55  ;;  %v12769_v42 = vsel %vm6330_vm4, 4294967295, %v12768_v42  ;;  %vm6360_vm0 = vmor %vm546_vm7, %vm802_vm1  ;;  %vm12775_vm1 = vcmp.eq.s32.totalorder %v6144_v5, %v5946_v0 }
 0x1e3   : > { %1471 = vperm.xlu1 %5012, %v5751_v8   ;;  %v6249_v16 = vpop.permute.xlu0 %2306  ;;  %5052 = vset.pattern.permute.xlu0 %v12696_v48  ;;  %vm2546_vm10 = vmor %vm6226_vm15, %vm2386_vm5  ;;  %vm797_vm15 = vcmp.eq.s32.totalorder %v6144_v5, %v6040_v61  ;;  %vm470_vm5 = vcmp.eq.s32.totalorder %v6130_v10, %v5883_v34  ;;  %v12773_v34 = vmov 0  ;;  %v12782_v0 = vmov 0 }
 0x1e4   : > { %12752 = vst [vmem:[#allocation102_spill] sm:$0xff] %v6249_v16  ;;  %2330 = vperm.xlu0 %5052, %v5778_v15   ;;  %v2706_v43 = vsel %vm2546_vm10, 1.0, %v12314_v30  ;;  %vm2545_vm11 = vmor %vm6235_vm3, %vm2385_vm9  ;;  %vm540_vm3 = vcmp.eq.s32.totalorder %v6130_v10, %v5938_v59  ;;  %v12774_v34 = vsel %vm6360_vm0, 4294967295, %v12773_v34 }
 0x1e5   : > { %v2861_v55 = vpack.c.bf16 %v2706_v43, %v2701_v53  ;;  %v2705_v15 = vsel %vm2545_vm11, 1.0, %v12314_v30  ;;  %vm6340_vm9 = vmor %vm470_vm5, %vm726_vm13  ;;  %vm806_vm13 = vcmp.eq.s32.totalorder %v6130_v10, %v6047_v45 }
 0x1e6   : > { %v6257_v3 = vpop.permute.xlu1 %1094  ;;  %v2860_v27 = vpack.c.bf16 %v2705_v15, %v2700_v39  ;;  %vm957_vm10 = vmor %vm541_vm14, %vm797_vm15  ;;  %vm801_vm14 = vcmp.eq.s32.totalorder %v6130_v10, %v6044_v2 }
 0x1e7   : > { %12753 = vst [vmem:[#allocation103_spill] sm:$0xff] %v6257_v3  ;;  %5013 = vset.pattern.permute.xlu1 %v12696_v48  ;;  %v6266_v56 = vpop.permute.xlu0 %2360  ;;  %3404 = vmatprep.mubr.bf16.mxu0 %v2861_v55  ;;  %vm956_vm15 = vmor %vm540_vm3, %vm796_vm2 }
 0x1e8   : > { %12754 = vst [vmem:[#allocation104_spill] sm:$0xff] %v6266_v56  ;;  %2351 = vperm.xlu1 %5013, %v5813_v24   ;;  %3405 = vmatmul.mubr.bf16.vlgmr.msra.gmra.mrb[0].mxu0 %v2860_v27  ;;  %vm967_vm7 = vmor %vm12775_vm1, %vm807_vm8 }
 0x1e9   : > { %vm6389_vm4 = vmor %vm550_vm12, %vm806_vm13  ;;  %vm1629_vm13 = vcmp.eq.s32.totalorder %v6144_v5, %v6110_v18 }
 0x1eb   : > { %v6269_v35 = vpop.permute.xlu1 %1507  ;;  %v6271_v29 = vpop.permute.xlu0 %2309 }
 0x1ec   : > { %12755 = vst [vmem:[#allocation105_spill] sm:$0xff] %v6269_v35  ;;  %12756 = vst [vmem:[#allocation106_spill] sm:$0xff] %v6271_v29  ;;  %2354 = vperm.xlu1 %5013, %v5810_v23  }
 0x1ef   : > { %v6274_v46 = vpop.permute.xlu0 %2318 }
 0x1f0   : > { %12757 = vst [vmem:[#allocation107_spill] sm:$0xff] %v6274_v46  ;;  %5014 = vset.pattern.permute.xlu1 %v12689_v36  ;;  %v6277_v43 = vpop.permute.xlu1 %1043  ;;  %v12770_v46 = vmov 0 }
 0x1f1   : > { %12758 = vst [vmem:[#allocation108_spill] sm:$0xff] %v6277_v43  ;;  %1890 = vperm.xlu1 %5014, %v5748_v7   ;;  %v12771_v46 = vsel %vm6340_vm9, 4294967295, %v12770_v46  ;;  %vm1143_vm6 = vcmp.eq.s32.totalorder %v6144_v5, %v6277_v43  ;;  %vm1142_vm3 = vcmp.eq.s32.totalorder %v6130_v10, %v6277_v43  ;;  %vm545_vm9 = vcmp.eq.s32.totalorder %v6130_v10, %v5936_v58 }
 0x1f2   : > { %vm6395_vm1 = vmor %vm545_vm9, %vm801_vm14  ;;  %vm12785_vm9 = vnez %v12771_v46 }
 0x1f3   : > { %v6280_v53 = vpop.permute.xlu0 %2372  ;;  %vm6413_vm14 = vmor %vm12785_vm9, %vm1142_vm3  ;;  %vm732_vm3 = vcmp.eq.s32.totalorder %v6144_v5, %v5998_v54 }
 0x1f4   : > { %12759 = vst [vmem:[#allocation109_spill] sm:$0xff] %v6280_v53  ;;  %v6282_v24 = vpop.permute.xlu1 %1046  ;;  %v6315_v53 = vld [vmem:[%s5701_s7 + $0x40] sm:$0xff] }
 0x1f5   : > { %5015 = vset.pattern.permute.xlu1 %v12696_v48 }
 0x1f6   : > { %2303 = vperm.xlu1 %5015, %v5751_v8  }
 0x1f7   : > { %v6286_v39 = vpop.permute.xlu0 %2321 }
 0x1f8   : > { %12760 = vst [vmem:[#allocation110_spill] sm:$0xff] %v6286_v39 }
 0x1f9   : > { %v6288_v55 = vpop.permute.xlu1 %1926 }
 0x1fa   : > { %12761 = vst [vmem:[#allocation111_spill] sm:$0xff] %v6288_v55  ;;  %5016 = vset.pattern.permute.xlu1 %v12691_v52 }
 0x1fb   : > { %1109 = vperm.xlu1 %5016, %v5823_v26  }
 0x1fc   : > { %v6292_v23 = vpop.permute.xlu0 %1085 }
 0x1fd   : > { %12762 = vst [vmem:[#allocation112_spill] sm:$0xff] %v6292_v23  ;;  %vm1213_vm11 = vcmp.eq.s32.totalorder %v6144_v5, %v6292_v23  ;;  %vm1212_vm5 = vcmp.eq.s32.totalorder %v6130_v10, %v6292_v23  ;;  %v12776_v23 = vmov 0 }
 0x1fe   : > { %v6294_v7 = vpop.permute.xlu1 %1459  ;;  %vm1373_vm2 = vmor %vm957_vm10, %vm1213_vm11  ;;  %v12777_v23 = vsel %vm6389_vm4, 4294967295, %v12776_v23  ;;  %vm812_vm10 = vcmp.eq.s32.totalorder %v6144_v5, %v6050_v47  ;;  %vm12781_vm11 = vnez %v12769_v42  ;;  %v12805_v42 = vmov 0 }
 0x1ff   : > { %12763 = vst [vmem:[#allocation113_spill] sm:$0xff] %v6294_v7  ;;  %1112 = vperm.xlu1 %5016, %v5820_v25   ;;  %vm1372_vm8 = vmor %vm956_vm15, %vm1212_vm5  ;;  %vm556_vm5 = vcmp.eq.s32.totalorder %v6144_v5, %v5942_v63 }
 0x200   : > { %v6297_v15 = vpop.permute.xlu0 %1091  ;;  %vm6403_vm12 = vmor %vm12781_vm11, %vm1143_vm6  ;;  %vm1628_vm6 = vcmp.eq.s32.totalorder %v6130_v10, %v6110_v18  ;;  %vm1218_vm11 = vcmp.eq.s32.totalorder %v6144_v5, %v6100_v33  ;;  %v12868_v18 = vmov 0.0  }
 0x201   : > { %12764 = vst [vmem:[#allocation114_spill] sm:$0xff] %v6297_v15  ;;  %vm1223_vm0 = vcmp.eq.s32.totalorder %v6144_v5, %v6297_v15  ;;  %v12783_v0 = vsel %vm6403_vm12, 4294967295, %v12782_v0  ;;  %vm1789_vm15 = vmor %vm1373_vm2, %vm1629_vm13  ;;  %vm2045_vm2 = vcmp.eq.s32.totalorder %v6144_v5, %v6124_v22 }
 0x202   : > { %vm1383_vm4 = vmor %vm967_vm7, %vm1223_vm0  ;;  %vm1639_vm7 = vcmp.eq.s32.totalorder %v6144_v5, %v6269_v35 }
 0x203   : > { %5017 = vset.pattern.permute.xlu1 %v12681_v12  ;;  %v6300_v8 = vpop.permute.xlu1 %2339  ;;  %vm6424_vm12 = vmor %vm1372_vm8, %vm1628_vm6  ;;  %vm2044_vm6 = vcmp.eq.s32.totalorder %v6130_v10, %v6124_v22  ;;  %v12881_v22 = vmov 0 }
 0x204   : > { %12765 = vst [vmem:[#allocation115_spill] sm:$0xff] %v6300_v8  ;;  %1528 = vperm.xlu1 %5017, %v5820_v25   ;;  %v6303_v27 = vpop.permute.xlu0 %1052  ;;  %vm6428_vm0 = vmor %vm556_vm5, %vm812_vm10  ;;  %vm2055_vm10 = vcmp.eq.s32.totalorder %v6144_v5, %v6107_v21  ;;  %vm476_vm5 = vcmp.eq.s32.totalorder %v6144_v5, %v5891_v38 }
 0x205   : > { %vm6440_vm8 = vmor %vm1383_vm4, %vm1639_vm7 }
 0x206   : > { %vm6446_vm13 = vmor %vm1789_vm15, %vm2045_vm2  ;;  %vm12798_vm15 = vnez %v12774_v34  ;;  %vm1217_vm2 = vcmp.eq.s32.totalorder %v6130_v10, %v6100_v33  ;;  %v6490_v34 = vld [vmem:[%s5701_s7 + $0x48] sm:$0xff] }
 0x207   : > { %v6305_v30 = vpop.permute.xlu1 %2342  ;;  %vm6466_vm7 = vmor %vm12798_vm15, %vm1218_vm11  ;;  %vm1559_vm11 = vcmp.eq.s32.totalorder %v6144_v5, %v6294_v7  ;;  %vm731_vm15 = vcmp.eq.s32.totalorder %v6130_v10, %v5998_v54  ;;  %v12809_v54 = vmov 0 }
 0x208   : > { %12766 = vst [vmem:[#allocation116_spill] sm:$0xff] %v6305_v30  ;;  %5018 = vset.pattern.permute.xlu1 %v12691_v52  ;;  %v6310_v39 = vpop.permute.xlu0 %1103  ;;  %vm6474_vm9 = vmor %vm6424_vm12, %vm2044_vm6  ;;  %vm12808_vm6 = vcmp.eq.s32.totalorder %v6144_v5, %v6164_v14 }
 0x209   : > { %12767 = vst [vmem:[#allocation117_spill] sm:$0xff] %v6310_v39  ;;  %1061 = vperm.xlu1 %5018, %v6315_v53   ;;  %vm6481_vm4 = vmor %vm476_vm5, %vm732_vm3  ;;  %vm1558_vm3 = vcmp.eq.s32.totalorder %v6130_v10, %v6294_v7  ;;  %v12839_v7 = vmov 0 }
 0x20a   : > { %vm6498_vm12 = vmor %vm6440_vm8, %vm2055_vm10  ;;  %vm475_vm10 = vcmp.eq.s32.totalorder %v6130_v10, %v5891_v38  ;;  %vm12817_vm8 = vnez %v12783_v0 }
 0x20b   : > { %v12806_v42 = vsel %vm6498_vm12, 4294967295, %v12805_v42  ;;  %vm6511_vm5 = vmor %vm6446_vm13, %vm12808_vm6  ;;  %vm1228_vm6 = vcmp.eq.s32.totalorder %v6144_v5, %v6257_v3 }
 0x20c   : > { %v6344_v13 = vpop.permute.xlu1 %1878  ;;  %v6346_v29 = vpop.permute.xlu0 %1064  ;;  %v12810_v54 = vsel %vm6511_vm5, 4294967295, %v12809_v54  ;;  %vm6530_vm13 = vmor %vm6395_vm1, %vm1217_vm2  ;;  %vm811_vm1 = vcmp.eq.s32.totalorder %v6130_v10, %v6050_v47 }
 0x20d   : > { %12772 = vst [vmem:[#allocation118_spill] sm:$0xff] %v6346_v29  ;;  %5019 = vset.pattern.permute.xlu1 %v12689_v36  ;;  %vm6538_vm5 = vmor %vm12817_vm8, %vm1559_vm11  ;;  %vm1638_vm8 = vcmp.eq.s32.totalorder %v6130_v10, %v6269_v35 }
 0x20e   : > { %1941 = vperm.xlu1 %5019, %v5823_v26   ;;  %vm6556_vm11 = vmor %vm6413_vm14, %vm1558_vm3  ;;  %vm555_vm14 = vcmp.eq.s32.totalorder %v6130_v10, %v5942_v63 }
 0x210   : > { %v6393_v2 = vpop.permute.xlu0 %1115 }
 0x211   : > { %12778 = vst [vmem:[#allocation119_spill] sm:$0xff] %v6393_v2  ;;  %v6407_v58 = vpop.permute.xlu1 %2291  ;;  %v12803_v2 = vmov 0 }
 0x212   : > { %12784 = vst [vmem:[#allocation120_spill] sm:$0xff] %v6407_v58  ;;  %1944 = vperm.xlu1 %5019, %v5820_v25   ;;  %v12804_v2 = vsel %vm6481_vm4, 4294967295, %v12803_v2  ;;  %vm12811_vm4 = vcmp.eq.s32.totalorder %v6130_v10, %v6297_v15  ;;  %v12826_v15 = vmov 0 }
 0x214   : > { %v6436_v25 = vpop.permute.xlu0 %1076 }
 0x215   : > { %12792 = vst [vmem:[#allocation121_spill] sm:$0xff] %v6436_v25  ;;  %v12799_v25 = vmov 0 }
 0x216   : > { %5020 = vset.pattern.permute.xlu1 %v12681_v12  ;;  %v6459_v43 = vpop.permute.xlu1 %1097  ;;  %v12800_v25 = vsel %vm6466_vm7, 4294967295, %v12799_v25  ;;  %vm12812_vm7 = vnez %v12777_v23 }
 0x217   : > { %12797 = vst [vmem:[#allocation122_spill] sm:$0xff] %v6459_v43  ;;  %1480 = vperm.xlu1 %5020, %v6490_v34   ;;  %vm6524_vm12 = vmor %vm12812_vm7, %vm12811_vm4  ;;  %vm1975_vm4 = vcmp.eq.s32.totalorder %v6144_v5, %v6114_v19 }
 0x218   : > { %v6504_v33 = vpop.permute.xlu0 %1127  ;;  %vm6544_vm7 = vmor %vm475_vm10, %vm731_vm15  ;;  %vm12825_vm10 = vcmp.eq.s32.totalorder %v6130_v10, %v6164_v14  ;;  %vm2054_vm15 = vcmp.eq.s32.totalorder %v6130_v10, %v6107_v21  ;;  %v12850_v21 = vmov 0 }
 0x219   : > { %12807 = vst [vmem:[#allocation123_spill] sm:$0xff] %v6504_v33  ;;  %vm6570_vm2 = vmor %vm6474_vm9, %vm12825_vm10 }
 0x21a   : > { %v6550_v45 = vpop.permute.xlu1 %1100  ;;  %v12827_v15 = vsel %vm6570_vm2, 4294967295, %v12826_v15  ;;  %vm6578_vm3 = vmor %vm6524_vm12, %vm1638_vm8  ;;  %vm12838_vm12 = vnez %v12806_v42  ;;  %v12844_v42 = vmov 0 }
 0x21b   : > { %12822 = vst [vmem:[#allocation124_spill] sm:$0xff] %v6550_v45  ;;  %5021 = vset.pattern.permute.xlu1 %v12696_v48  ;;  %vm6590_vm9 = vmor %vm6428_vm0, %vm1228_vm6  ;;  %vm12841_vm0 = vcmp.eq.s32.totalorder %v6130_v10, %v6114_v19 }
 0x21c   : > { %2357 = vperm.xlu1 %5021, %v5823_v26   ;;  %vm6601_vm8 = vmor %vm6538_vm5, %vm1975_vm4  ;;  %vm12837_vm4 = vcmp.eq.s32.totalorder %v6144_v5, %v6300_v8 }
 0x21d   : > { %vm6608_vm10 = vmor %vm555_vm14, %vm811_vm1  ;;  %v6616_v46 = vpop.permute.xlu0 %1504  ;;  %vm12848_vm14 = vcmp.eq.s32.totalorder %v6144_v5, %v6282_v24 }
 0x21e   : > { %12836 = vst [vmem:[#allocation125_spill] sm:$0xff] %v6616_v46  ;;  %vm6625_vm1 = vmor %vm12838_vm12, %vm12837_vm4  ;;  %vm1634_vm12 = vcmp.eq.s32.totalorder %v6144_v5, %v6616_v46 }
 0x21f   : > { %v12840_v7 = vsel %vm6625_vm1, 4294967295, %v12839_v7  ;;  %vm6636_vm6 = vmor %vm6556_vm11, %vm12841_vm0  ;;  %v6653_v0 = vpop.permute.xlu1 %1516  ;;  %vm12847_vm11 = vnez %v12800_v25  ;;  %vm12849_vm1 = vnez %v12804_v2  ;;  %v12854_v25 = vmov 0 }
 0x220   : > { %vm6649_vm4 = vmor %vm6578_vm3, %vm2054_vm15  ;;  %12846 = vst [vmem:[#allocation126_spill] sm:$0xff] %v6653_v0  ;;  %vm566_vm3 = vcmp.eq.s32.totalorder %v6144_v5, %v5948_v49  ;;  %5022 = vset.pattern.permute.xlu1 %v12689_v36  ;;  %vm2466_vm15 = vcmp.eq.s32.totalorder %v6144_v5, %v6162_v11 }
 0x221   : > { %v12845_v42 = vsel %vm6649_vm4, 4294967295, %v12844_v42  ;;  %vm1794_vm0 = vmor %vm12847_vm11, %vm1634_vm12  ;;  %vm12852_vm12 = vcmp.eq.s32.totalorder %v6144_v5, %v6054_v9  ;;  %vm12853_vm11 = vcmp.eq.s32.totalorder %v6144_v5, %v5952_v50  ;;  %vm12857_vm4 = vcmp.eq.s32.totalorder %v6144_v5, %v6407_v58  ;;  %1893 = vperm.xlu1 %5022, %v6315_v53   ;;  %v6707_v63 = vpop.permute.xlu0 %1510  ;;  %v5170_v53 = vld [vmem:[%s5701_s7 + $0x58] sm:$0xff] }
 0x222   : > { %vm6664_vm2 = vmor %vm12849_vm1, %vm12848_vm14  ;;  %vm12856_vm1 = vcmp.eq.s32.totalorder %v6144_v5, %v6096_v17  ;;  %12863 = vst [vmem:[#allocation127_spill] sm:$0xff] %v6707_v63 }
 0x223   : > { %v12851_v21 = vsel %vm6664_vm2, 4294967295, %v12850_v21  ;;  %vm6678_vm5 = vmor %vm12853_vm11, %vm12852_vm12  ;;  %vm12860_vm11 = vcmp.eq.s32.totalorder %v6144_v5, %v6057_v20 }
 0x224   : > { %v12855_v25 = vsel %vm6678_vm5, 4294967295, %v12854_v25  ;;  %vm2210_vm14 = vmor %vm1794_vm0, %vm12856_vm1  ;;  %vm2390_vm1 = vcmp.eq.s32.totalorder %v6130_v10, %v6407_v58  ;;  %v6746_v23 = vpop.permute.xlu1 %1049  ;;  %v13322_v58 = vmov 0 }
 0x225   : > { %vm6695_vm12 = vmor %vm6601_vm8, %vm12857_vm4  ;;  %vm1227_vm8 = vcmp.eq.s32.totalorder %v6130_v10, %v6257_v3  ;;  %vm12869_vm4 = vnez %v12810_v54  ;;  %v12871_v54 = vmov 0  ;;  %1896 = vperm.xlu1 %5022, %v6490_v34   ;;  %v6770_v35 = vpop.permute.xlu0 %1462  ;;  %v5076_v3 = vld [vmem:[#allocation7 + $0x108] sm:$0xff]  }
 0x226   : > { %vm6702_vm5 = vmor %vm566_vm3, %vm12860_vm11  ;;  %vm12864_vm11 = vcmp.eq.s32.totalorder %v6130_v10, %v6616_v46  ;;  %v2781_v59 = vsel %vm12869_vm4, 1.0, %v12868_v18  ;;  %vm12873_vm4 = vcmp.eq.s32.totalorder %v6130_v10, %v6054_v9  ;;  %v5071_v9 = vld [vmem:[#allocation7 + $0x140] sm:$0xff]  }
 0x227   : > { %vm2626_vm0 = vmor %vm2210_vm14, %vm2466_vm15  ;;  %vm12865_vm15 = vcmp.eq.s32.totalorder %v6130_v10, %v6282_v24  ;;  %4756 = vmatprep.subr.bf16.mxu0 %v5071_v9  ;;  %v7595_v9 = vld [vmem:[%s5701_s7 + $0xf0] sm:$0xff]  ;;  %v5088_v46 = vld [vmem:[#allocation7 + $0x120] sm:$0xff]  }
 0x228   : > { %vm1793_vm2 = vmor %vm6530_vm13, %vm12864_vm11  ;;  %v2786_v47 = vsel %vm2626_vm0, 1.0, %v12868_v18  ;;  %vm12870_vm13 = vcmp.eq.s32.totalorder %v6130_v10, %v6096_v17 }
 0x229   : > { %vm6727_vm14 = vmor %vm6544_vm7, %vm12865_vm15  ;;  %vm2465_vm7 = vcmp.eq.s32.totalorder %v6130_v10, %v6162_v11  ;;  %v2901_v14 = vpack.c.bf16 %v2786_v47, %v2781_v59  ;;  %5023 = vset.pattern.permute.xlu1 %v12696_v48  ;;  %v7026_v47 = vld [vmem:[%s5701_s7 + $0x50] sm:$0xff] }
 0x22a   : > { %vm2209_vm11 = vmor %vm1793_vm2, %vm12870_vm13  ;;  %vm565_vm2 = vcmp.eq.s32.totalorder %v6130_v10, %v5948_v49  ;;  %vm12874_vm13 = vcmp.eq.s32.totalorder %v6130_v10, %v5952_v50  ;;  %2312 = vperm.xlu1 %5023, %v6490_v34   ;;  %v2711_v34 = vsel %vm6695_vm12, 1.0, %v12868_v18  ;;  %v5072_v50 = vld [vmem:[#allocation7 + $0x100] sm:$0xff]   ;;  %v5079_v11 = vld [vmem:[#allocation7 + $0x150] sm:$0xff]  }
 0x22b   : > { %vm2625_vm3 = vmor %vm2209_vm11, %vm2465_vm7  ;;  %vm2060_vm11 = vcmp.eq.s32.totalorder %v6144_v5, %v6288_v55  ;;  %3468 = vmatprep.mubr.bf16.mxu1 %v2901_v14  ;;  %4757 = vmatpush3.bf16.msra.mxu0 %v5072_v50  ;;  %v5073_v50 = vld [vmem:[#allocation7 + $0xc8] sm:$0xff]  }
 0x22c   : > { %vm6753_vm0 = vmor %vm6636_vm6, %vm2390_vm1  ;;  %v2785_v59 = vsel %vm2625_vm3, 1.0, %v12868_v18  ;;  %vm12877_vm6 = vcmp.eq.s32.totalorder %v6144_v5, %v6707_v63  ;;  %vm12884_vm3 = vcmp.eq.s32.totalorder %v6130_v10, %v6300_v8  ;;  %v13019_v8 = vld [vmem:[#allocation56_spill] sm:$0xff] }
 0x22d   : > { %v12872_v54 = vsel %vm6753_vm0, 4294967295, %v12871_v54  ;;  %vm6765_vm15 = vmor %vm12874_vm13, %vm12873_vm4  ;;  %vm12880_vm4 = vcmp.eq.s32.totalorder %v6130_v10, %v6057_v20  ;;  %v12886_v20 = vmov 0  ;;  %vm1980_vm0 = vcmp.eq.s32.totalorder %v6144_v5, %v6344_v13 }
 0x22e   : > { %vm1804_vm1 = vmor %vm6590_vm9, %vm12877_vm6  ;;  %vm1564_vm9 = vcmp.eq.s32.totalorder %v6144_v5, %v6770_v35  ;;  %vm2476_vm6 = vcmp.eq.s32.totalorder %v6144_v5, %v6305_v30  ;;  %5024 = vset.pattern.permute.xlu1 %v12691_v52 }
 0x22f   : > { %vm6785_vm7 = vmor %vm6608_vm10, %vm1227_vm8  ;;  %vm12883_vm10 = vnez %v12827_v15 }
 0x230   : > { %vm6794_vm13 = vmor %vm565_vm2, %vm12880_vm4  ;;  %v2780_v26 = vsel %vm12883_vm10, 1.0, %v12868_v18  ;;  %vm12885_vm2 = vnez %v12845_v42  ;;  %vm12888_vm10 = vnez %v12840_v7  ;;  %v6838_v7 = vpop.permute.xlu1 %1929 }
 0x231   : > { %v12882_v22 = vsel %vm6794_vm13, 4294967295, %v12881_v22  ;;  %vm2220_vm8 = vmor %vm1804_vm1, %vm2060_vm11  ;;  %v2900_v14 = vpack.c.bf16 %v2785_v59, %v2780_v26  ;;  %vm2396_vm1 = vcmp.eq.s32.totalorder %v6144_v5, %v6183_v31  ;;  %vm1563_vm11 = vcmp.eq.s32.totalorder %v6130_v10, %v6770_v35  ;;  %12894 = vst [vmem:[#allocation128_spill] sm:$0xff] %v6838_v7 }
 0x232   : > { %vm6810_vm4 = vmor %vm12885_vm2, %vm12884_vm3  ;;  %v2791_v15 = vsel %vm12888_vm10, 1.0, %v12868_v18  ;;  %vm12889_vm3 = vnez %v12851_v21  ;;  %v12896_v21 = vmov 0 }
 0x233   : > { %v12887_v20 = vsel %vm6810_vm4, 4294967295, %v12886_v20  ;;  %vm2636_vm13 = vmor %vm2220_vm8, %vm2476_vm6  ;;  %vm12890_vm8 = vcmp.eq.s32.totalorder %v6144_v5, %v6459_v43  ;;  %vm12891_vm6 = vnez %v12855_v25  ;;  %3469 = vmatmul.mubr.bf16.vlgmr.msra.gmra.mrb[0].mxu1 %v2900_v14  ;;  %v6860_v25 = vpop.permute.xlu0 %1513 }
 0x234   : > { %v2796_v42 = vsel %vm2636_vm13, 1.0, %v12868_v18  ;;  %vm1724_vm2 = vmor %vm12889_vm3, %vm1564_vm9  ;;  %vm12895_vm9 = vcmp.eq.s32.totalorder %v6144_v5, %v6550_v45  ;;  %12898 = vst [vmem:[#allocation129_spill] sm:$0xff] %v6860_v25 }
 0x235   : > { %vm6833_vm4 = vmor %vm12891_vm6, %vm12890_vm8  ;;  %v2906_v26 = vpack.c.bf16 %v2796_v42, %v2791_v15  ;;  %vm1979_vm8 = vcmp.eq.s32.totalorder %v6130_v10, %v6344_v13  ;;  %vm2395_vm6 = vcmp.eq.s32.totalorder %v6130_v10, %v6183_v31  ;;  %v6875_v15 = vpop.permute.xlu1 %1932 }
 0x236   : > { %vm2140_vm13 = vmor %vm1724_vm2, %vm1980_vm0  ;;  %vm1232_vm0 = vcmp.eq.s32.totalorder %v6130_v10, %v6459_v43  ;;  %vm742_vm2 = vcmp.eq.s32.totalorder %v6144_v5, %v6004_v51  ;;  %12899 = vst [vmem:[#allocation130_spill] sm:$0xff] %v6875_v15 }
 0x237   : > { %vm6845_vm10 = vmor %vm6702_vm5, %vm12895_vm9  ;;  %3476 = vmatprep.mubr.bf16.mxu1 %v2906_v26  ;;  %vm486_vm5 = vcmp.eq.s32.totalorder %v6144_v5, %v5897_v40  ;;  %v7008_v2 = vpop.permute.xlu0 %1465 }
 0x238   : > { %v12897_v21 = vsel %vm6845_vm10, 4294967295, %v12896_v21  ;;  %vm2556_vm3 = vmor %vm2140_vm13, %vm2396_vm1  ;;  %vm1237_vm13 = vcmp.eq.s32.totalorder %v6130_v10, %v6550_v45  ;;  %v13006_v45 = vld [vmem:[#allocation40_spill] sm:$0xff] }
 0x239   : > { %v2716_v61 = vsel %vm2556_vm3, 1.0, %v12868_v18  ;;  %vm1723_vm1 = vmor %vm6727_vm14, %vm1563_vm11  ;;  %vm1649_vm14 = vcmp.eq.s32.totalorder %v6144_v5, %v6860_v25  ;;  %vm12904_vm11 = vcmp.eq.s32.totalorder %v6130_v10, %v6707_v63 }
 0x23a   : > { %v2866_v14 = vpack.c.bf16 %v2716_v61, %v2711_v34  ;;  %vm2139_vm9 = vmor %vm1723_vm1, %vm1979_vm8  ;;  %vm1654_vm1 = vcmp.eq.s32.totalorder %v6144_v5, %v6653_v0 }
 0x23b   : > { %vm2555_vm10 = vmor %vm2139_vm9, %vm2395_vm6  ;;  %vm12905_vm6 = vnez %v12882_v22  ;;  %v6912_v22 = vld [vmem:[%s5701_s7 + $0xd8] sm:$0xff]  ;;  %vm2065_vm9 = vcmp.eq.s32.totalorder %v6144_v5, %v6838_v7 }
 0x23c   : > { %vm6879_vm12 = vmor %vm6765_vm15, %vm1232_vm0  ;;  %3412 = vmatprep.mubr.bf16.mxu0 %v2866_v14  ;;  %vm2059_vm15 = vcmp.eq.s32.totalorder %v6130_v10, %v6288_v55  ;;  %v2715_v26 = vsel %vm2555_vm10, 1.0, %v12868_v18  ;;  %1118 = vperm.xlu1 %5024, %v6912_v22   ;;  %vm741_vm10 = vcmp.eq.s32.totalorder %v6130_v10, %v6004_v51  ;;  %v6934_v14 = vpop.permute.xlu1 %1468  ;;  %v13017_v55 = vmov 0 }
 0x23d   : > { %vm6883_vm3 = vmor %vm486_vm5, %vm742_vm2  ;;  %vm12908_vm2 = vnez %v12872_v54 }
 0x23e   : > { %vm1803_vm8 = vmor %vm6785_vm7, %vm12904_vm11  ;;  %v2710_v42 = vsel %vm12908_vm2, 1.0, %v12868_v18  ;;  %vm2475_vm7 = vcmp.eq.s32.totalorder %v6130_v10, %v6305_v30  ;;  %vm737_vm2 = vcmp.eq.s32.totalorder %v6144_v5, %v6001_v37  ;;  %vm1158_vm11 = vcmp.eq.s32.totalorder %v6144_v5, %v6303_v27 }
 0x23f   : > { %vm6898_vm0 = vmor %vm12905_vm6, %vm1237_vm13  ;;  %v2865_v49 = vpack.c.bf16 %v2715_v26, %v2710_v42  ;;  %vm2070_vm6 = vcmp.eq.s32.totalorder %v6144_v5, %v6875_v15  ;;  %v6977_v42 = vld [vmem:[%s5701_s7 + $0xd0] sm:$0xff] }
 0x240   : > { %vm2219_vm5 = vmor %vm1803_vm8, %vm2059_vm15  ;;  %vm12909_vm8 = vnez %v12887_v20  ;;  %v12911_v20 = vmov 0  ;;  %5025 = vset.pattern.permute.xlu1 %v12681_v12 }
 0x241   : > { %vm2635_vm13 = vmor %vm2219_vm5, %vm2475_vm7  ;;  %v2790_v54 = vsel %vm12909_vm8, 1.0, %v12868_v18  ;;  %3413 = vmatmul.mubr.bf16.gmra.mrb[4].mxu0 %v2865_v49  ;;  %vm12910_vm5 = vnez %v12897_v21  ;;  %1531 = vperm.xlu1 %5025, %v6977_v42  }
 0x242   : > { %v2795_v34 = vsel %vm2635_vm13, 1.0, %v12868_v18  ;;  %vm1809_vm15 = vmor %vm6833_vm4, %vm1649_vm14  ;;  %vm2486_vm4 = vcmp.eq.s32.totalorder %v6144_v5, %v6203_v4  ;;  %vm485_vm14 = vcmp.eq.s32.totalorder %v6130_v10, %v5897_v40  ;;  %vm1648_vm13 = vcmp.eq.s32.totalorder %v6130_v10, %v6860_v25 }
 0x243   : > { %v2905_v61 = vpack.c.bf16 %v2795_v34, %v2790_v54  ;;  %vm1814_vm7 = vmor %vm12910_vm5, %vm1654_vm1  ;;  %v6994_v54 = vpop.permute.xlu1 %2345 }
 0x244   : > { %vm6950_vm8 = vmor %vm1809_vm15, %vm2065_vm9  ;;  %vm1653_vm9 = vcmp.eq.s32.totalorder %v6130_v10, %v6653_v0  ;;  %vm12915_vm15 = vcmp.eq.s32.totalorder %v6144_v5, %v5899_v41  ;;  %12922 = vst [vmem:[#allocation131_spill] sm:$0xff] %v6994_v54  ;;  %v5173_v0 = vld [vmem:[%s5701_s7 + $0x60] sm:$0xff] }
 0x245   : > { %v12912_v20 = vsel %vm6950_vm8, 4294967295, %v12911_v20  ;;  %vm6959_vm1 = vmor %vm485_vm14, %vm741_vm10  ;;  %3477 = vmatmul.mubr.bf16.gmra.mrb[4].mxu1 %v2905_v61  ;;  %vm2069_vm14 = vcmp.eq.s32.totalorder %v6130_v10, %v6875_v15  ;;  %5026 = vset.pattern.permute.xlu1 %v12691_v52 }
 0x246   : > { %vm2230_vm5 = vmor %vm1814_vm7, %vm2070_vm6  ;;  %vm2064_vm6 = vcmp.eq.s32.totalorder %v6130_v10, %v6838_v7  ;;  %1067 = vperm.xlu1 %5026, %v7026_v47  }
 0x247   : > { %vm6972_vm8 = vmor %vm12915_vm15, %vm737_vm2  ;;  %vm2485_vm15 = vcmp.eq.s32.totalorder %v6130_v10, %v6203_v4  ;;  %v7054_v34 = vpop.permute.xlu1 %1881 }
 0x248   : > { %vm6980_vm10 = vmor %vm2230_vm5, %vm2486_vm4  ;;  %vm12927_vm5 = vnez %v12912_v20  ;;  %12931 = vst [vmem:[#allocation132_spill] sm:$0xff] %v7054_v34 }
 0x249   : > { %vm1808_vm7 = vmor %vm6879_vm12, %vm1648_vm13  ;;  %vm1157_vm12 = vcmp.eq.s32.totalorder %v6130_v10, %v6303_v27 }
 0x24a   : > { %vm6990_vm2 = vmor %vm6883_vm3, %vm1158_vm11  ;;  %vm736_vm3 = vcmp.eq.s32.totalorder %v6130_v10, %v6001_v37  ;;  %vm2481_vm11 = vcmp.eq.s32.totalorder %v6144_v5, %v6994_v54  ;;  %1070 = vperm.xlu1 %5026, %v5170_v53  }
 0x24b   : > { %vm6998_vm4 = vmor %vm6898_vm0, %vm1653_vm9  ;;  %vm2480_vm0 = vcmp.eq.s32.totalorder %v6130_v10, %v6994_v54  ;;  %v2806_v54 = vsel %vm6980_vm10, 1.0, %v12868_v18  ;;  %vm1569_vm10 = vcmp.eq.s32.totalorder %v6144_v5, %v7008_v2  ;;  %v7081_v59 = vpop.permute.xlu1 %1884 }
 0x24c   : > { %vm7012_vm13 = vmor %vm1808_vm7, %vm2064_vm6  ;;  %vm1153_vm7 = vcmp.eq.s32.totalorder %v6144_v5, %v6746_v23  ;;  %12934 = vst [vmem:[#allocation133_spill] sm:$0xff] %v7081_v59 }
 0x24d   : > { %vm2641_vm9 = vmor %vm12927_vm5, %vm2481_vm11  ;;  %vm12928_vm11 = vcmp.eq.s32.totalorder %v6130_v10, %v5899_v41 }
 0x24e   : > { %v2801_v61 = vsel %vm2641_vm9, 1.0, %v12868_v18  ;;  %vm2229_vm6 = vmor %vm6998_vm4, %vm2069_vm14  ;;  %vm1574_vm9 = vcmp.eq.s32.totalorder %v6144_v5, %v6934_v14  ;;  %5027 = vset.pattern.permute.xlu1 %v12689_v36 }
 0x24f   : > { %vm7046_vm5 = vmor %vm12928_vm11, %vm736_vm3  ;;  %v2911_v26 = vpack.c.bf16 %v2806_v54, %v2801_v61  ;;  %vm1990_vm11 = vcmp.eq.s32.totalorder %v6144_v5, %v7081_v59  ;;  %1950 = vperm.xlu1 %5027, %v6912_v22   ;;  %v7101_v21 = vpop.permute.xlu1 %2300 }
 0x250   : > { %vm2640_vm4 = vmor %vm7012_vm13, %vm2480_vm0  ;;  %vm1985_vm0 = vcmp.eq.s32.totalorder %v6144_v5, %v7054_v34  ;;  %12937 = vst [vmem:[#allocation134_spill] sm:$0xff] %v7101_v21 }
 0x251   : > { %vm2645_vm14 = vmor %vm2229_vm6, %vm2485_vm15  ;;  %v2800_v4 = vsel %vm2640_vm4, 1.0, %v12868_v18  ;;  %3484 = vmatprep.mubr.bf16.mxu1 %v2911_v26  ;;  %vm1152_vm6 = vcmp.eq.s32.totalorder %v6130_v10, %v6746_v23  ;;  %vm1573_vm4 = vcmp.eq.s32.totalorder %v6130_v10, %v6934_v14 }
 0x252   : > { %vm7064_vm3 = vmor %vm6959_vm1, %vm1157_vm12  ;;  %v2805_v54 = vsel %vm2645_vm14, 1.0, %v12868_v18  ;;  %vm2401_vm1 = vcmp.eq.s32.totalorder %v6144_v5, %v6224_v32 }
 0x253   : > { %vm1313_vm13 = vmor %vm6972_vm8, %vm1153_vm7  ;;  %v2910_v61 = vpack.c.bf16 %v2805_v54, %v2800_v4  ;;  %vm1568_vm7 = vcmp.eq.s32.totalorder %v6130_v10, %v7008_v2  ;;  %5028 = vset.pattern.permute.xlu1 %v12681_v12  ;;  %v7119_v26 = vpop.permute.xlu1 %1106 }
 0x254   : > { %vm1729_vm15 = vmor %vm1313_vm13, %vm1569_vm10  ;;  %1483 = vperm.xlu1 %5028, %v7026_v47   ;;  %12938 = vst [vmem:[#allocation135_spill] sm:$0xff] %v7119_v26 }
 0x255   : > { %vm1734_vm12 = vmor %vm6990_vm2, %vm1574_vm9  ;;  %3485 = vmatmul.mubr.bf16.gmra.mrb[8].mxu1 %v2910_v61  ;;  %vm1984_vm9 = vcmp.eq.s32.totalorder %v6130_v10, %v7054_v34  ;;  %v13291_v34 = vmov 0 }
 0x256   : > { %vm2145_vm8 = vmor %vm1729_vm15, %vm1985_vm0  ;;  %vm1989_vm15 = vcmp.eq.s32.totalorder %v6130_v10, %v7081_v59  ;;  %v13381_v59 = vmov 0 }
 0x257   : > { %vm7089_vm10 = vmor %vm2145_vm8, %vm2401_vm1  ;;  %vm2406_vm1 = vcmp.eq.s32.totalorder %v6144_v5, %v7101_v21  ;;  %vm2400_vm8 = vcmp.eq.s32.totalorder %v6130_v10, %v6224_v32  ;;  %v7125_v4 = vpop.permute.xlu1 %1519  ;;  %v13268_v32 = vld [vmem:[#allocation97_spill] sm:$0xff] }
 0x258   : > { %vm2150_vm2 = vmor %vm1734_vm12, %vm1990_vm11  ;;  %v2721_v15 = vsel %vm7089_vm10, 1.0, %v12868_v18  ;;  %5029 = vset.pattern.permute.xlu1 %v12696_v48  ;;  %12939 = vst [vmem:[#allocation136_spill] sm:$0xff] %v7125_v4  ;;  %vm571_vm10 = vcmp.eq.s32.totalorder %v6144_v5, %v5958_v62 }
 0x259   : > { %vm1312_vm14 = vmor %vm7046_vm5, %vm1152_vm6  ;;  %vm2405_vm6 = vcmp.eq.s32.totalorder %v6130_v10, %v7101_v21  ;;  %2363 = vperm.xlu1 %5029, %v6977_v42   ;;  %v7151_v42 = vpop.permute.xlu0 %1522 }
 0x25a   : > { %vm1728_vm13 = vmor %vm1312_vm14, %vm1568_vm7  ;;  %vm570_vm14 = vcmp.eq.s32.totalorder %v6130_v10, %v5958_v62  ;;  %12944 = vst [vmem:[#allocation139_spill] sm:$0xff] %v7151_v42  ;;  %v5172_v62 = vld [vmem:[%s5701_s7 + $0xe8] sm:$0xff] }
 0x25b   : > { %vm1733_vm0 = vmor %vm7064_vm3, %vm1573_vm4  ;;  %vm832_vm4 = vcmp.eq.s32.totalorder %v6144_v5, %v6063_v1 }
 0x25c   : > { %vm2144_vm12 = vmor %vm1728_vm13, %vm1984_vm9  ;;  %vm826_vm9 = vcmp.eq.s32.totalorder %v6130_v10, %v6060_v28  ;;  %vm576_vm13 = vcmp.eq.s32.totalorder %v6144_v5, %v5955_v60 }
 0x25d   : > { %vm2566_vm5 = vmor %vm2150_vm2, %vm2406_vm1  ;;  %2366 = vperm.xlu1 %5029, %v6912_v22   ;;  %vm827_vm2 = vcmp.eq.s32.totalorder %v6144_v5, %v6060_v28  ;;  %v12969_v28 = vld [vmem:[#allocation87_spill] sm:$0xff] }
 0x25e   : > { %v2726_v49 = vsel %vm2566_vm5, 1.0, %v12868_v18  ;;  %vm2149_vm3 = vmor %vm1733_vm0, %vm1989_vm15  ;;  %vm831_vm15 = vcmp.eq.s32.totalorder %v6130_v10, %v6063_v1  ;;  %vm747_vm5 = vcmp.eq.s32.totalorder %v6144_v5, %v6008_v57 }
 0x25f   : > { %v2871_v20 = vpack.c.bf16 %v2726_v49, %v2721_v15  ;;  %vm2560_vm7 = vmor %vm2144_vm12, %vm2400_vm8  ;;  %v7128_v15 = vpop.permute.xlu1 %1055  ;;  %vm1248_vm12 = vcmp.eq.s32.totalorder %v6144_v5, %v7119_v26  ;;  %vm491_vm8 = vcmp.eq.s32.totalorder %v6144_v5, %v5906_v44 }
 0x260   : > { %vm2565_vm11 = vmor %vm2149_vm3, %vm2405_vm6  ;;  %v2720_v54 = vsel %vm2560_vm7, 1.0, %v12868_v18  ;;  %12940 = vst [vmem:[#allocation137_spill] sm:$0xff] %v7128_v15  ;;  %vm1243_vm6 = vcmp.eq.s32.totalorder %v6144_v5, %v6310_v39  ;;  %vm575_vm3 = vcmp.eq.s32.totalorder %v6130_v10, %v5955_v60  ;;  %v12955_v60 = vmov 0 }
 0x261   : > { %3420 = vmatprep.mubr.bf16.mxu0 %v2871_v20  ;;  %v2725_v61 = vsel %vm2565_vm11, 1.0, %v12868_v18  ;;  %5031 = vset.pattern.permute.xlu1 %v12689_v36  ;;  %vm7145_vm0 = vmor %vm571_vm10, %vm827_vm2  ;;  %v12949_v20 = vld [vmem:[#allocation54_spill] sm:$0xff]  ;;  %vm1242_vm2 = vcmp.eq.s32.totalorder %v6130_v10, %v6310_v39  ;;  %v12963_v39 = vmov 0 }
 0x262   : > { %v2870_v7 = vpack.c.bf16 %v2725_v61, %v2720_v54  ;;  %1902 = vperm.xlu1 %5031, %v5170_v53   ;;  %vm7153_vm1 = vmor %vm576_vm13, %vm832_vm4  ;;  %vm752_vm11 = vcmp.eq.s32.totalorder %v6144_v5, %v12949_v20  ;;  %v12954_v61 = vld [vmem:[#allocation21_spill] sm:$0xff]  ;;  %v7278_v54 = vpop.permute.xlu0 %1474 }
 0x263   : > { %vm7168_vm7 = vmor %vm570_vm14, %vm826_vm9  ;;  %vm746_vm14 = vcmp.eq.s32.totalorder %v6130_v10, %v6008_v57  ;;  %vm751_vm9 = vcmp.eq.s32.totalorder %v6130_v10, %v12949_v20  ;;  %vm496_vm4 = vcmp.eq.s32.totalorder %v6144_v5, %v12954_v61  ;;  %12973 = vst [vmem:[#allocation142_spill] sm:$0xff] %v7278_v54 }
 0x264   : > { %3421 = vmatmul.mubr.bf16.gmra.mrb[8].mxu0 %v2870_v7  ;;  %v7141_v7 = vpop.permute.xlu1 %1058  ;;  %vm7175_vm10 = vmor %vm575_vm3, %vm831_vm15 }
 0x265   : > { %12941 = vst [vmem:[#allocation138_spill] sm:$0xff] %v7141_v7  ;;  %vm7194_vm15 = vmor %vm7153_vm1, %vm1248_vm12  ;;  %vm1659_vm12 = vcmp.eq.s32.totalorder %v6144_v5, %v7125_v4 }
 0x266   : > { %5032 = vset.pattern.permute.xlu1 %v12696_v48  ;;  %vm7208_vm13 = vmor %vm491_vm8, %vm747_vm5  ;;  %vm495_vm8 = vcmp.eq.s32.totalorder %v6130_v10, %v12954_v61 }
 0x267   : > { %2315 = vperm.xlu1 %5032, %v7026_v47   ;;  %v12956_v60 = vsel %vm7208_vm13, 4294967295, %v12955_v60  ;;  %vm1403_vm1 = vmor %vm7145_vm0, %vm1243_vm6  ;;  %vm1658_vm13 = vcmp.eq.s32.totalorder %v6130_v10, %v7125_v4  ;;  %vm12960_vm0 = vcmp.eq.s32.totalorder %v6130_v10, %v5906_v44  ;;  %v7263_v4 = vld [vmem:[%s5701_s7 + $0xe0] sm:$0xff] }
 0x268   : > { %v7212_v53 = vpop.permute.xlu1 %1938  ;;  %vm7224_vm3 = vmor %vm496_vm4, %vm752_vm11  ;;  %vm1663_vm4 = vcmp.eq.s32.totalorder %v6130_v10, %v7151_v42 }
 0x269   : > { %12957 = vst [vmem:[#allocation140_spill] sm:$0xff] %v7212_v53  ;;  %vm1402_vm5 = vmor %vm7168_vm7, %vm1242_vm2  ;;  %vm12965_vm7 = vcmp.eq.s32.totalorder %v6144_v5, %v7151_v42 }
 0x26a   : > { %vm7237_vm6 = vmor %vm12960_vm0, %vm746_vm14  ;;  %vm12968_vm14 = vcmp.eq.s32.totalorder %v6130_v10, %v7119_v26  ;;  %vm2075_vm0 = vcmp.eq.s32.totalorder %v6144_v5, %v12969_v28  ;;  %v12974_v26 = vmov 0 }
 0x26b   : > { %vm7241_vm11 = vmor %vm495_vm8, %vm751_vm9  ;;  %5033 = vset.pattern.permute.xlu1 %v12691_v52 }
 0x26c   : > { %v12964_v39 = vsel %vm7241_vm11, 4294967295, %v12963_v39  ;;  %vm7253_vm2 = vmor %vm7194_vm15, %vm12965_vm7  ;;  %1121 = vperm.xlu1 %5033, %v7263_v4   ;;  %vm2074_vm15 = vcmp.eq.s32.totalorder %v6130_v10, %v12969_v28  ;;  %v7270_v47 = vpop.permute.xlu1 %1471  ;;  %v12976_v28 = vmov 0 }
 0x26d   : > { %vm1407_vm9 = vmor %vm7175_vm10, %vm12968_vm14  ;;  %12970 = vst [vmem:[#allocation141_spill] sm:$0xff] %v7270_v47  ;;  %vm1163_vm10 = vcmp.eq.s32.totalorder %v6144_v5, %v7128_v15 }
 0x26e   : > { %vm1819_vm8 = vmor %vm1403_vm1, %vm1659_vm12  ;;  %vm1162_vm12 = vcmp.eq.s32.totalorder %v6130_v10, %v7128_v15 }
 0x26f   : > { %vm1818_vm11 = vmor %vm1402_vm5, %vm1658_vm13  ;;  %vm1168_vm13 = vcmp.eq.s32.totalorder %v6144_v5, %v7141_v7  ;;  %vm1167_vm5 = vcmp.eq.s32.totalorder %v6130_v10, %v7141_v7 }
 0x270   : > { %vm7272_vm7 = vmor %vm1407_vm9, %vm1663_vm4  ;;  %1124 = vperm.xlu1 %5033, %v5172_v62   ;;  %vm2080_vm4 = vcmp.eq.s32.totalorder %v6144_v5, %v7212_v53  ;;  %vm12978_vm9 = vnez %v12956_v60  ;;  %v7309_v25 = vpop.permute.xlu1 %2351 }
 0x271   : > { %vm7280_vm14 = vmor %vm1819_vm8, %vm2075_vm0  ;;  %vm2079_vm0 = vcmp.eq.s32.totalorder %v6130_v10, %v7212_v53  ;;  %12981 = vst [vmem:[#allocation143_spill] sm:$0xff] %v7309_v25 }
 0x272   : > { %v12975_v26 = vsel %vm7280_vm14, 4294967295, %v12974_v26  ;;  %vm7287_vm1 = vmor %vm1818_vm11, %vm2074_vm15  ;;  %vm1584_vm11 = vcmp.eq.s32.totalorder %v6144_v5, %v7278_v54 }
 0x273   : > { %v12977_v28 = vsel %vm7287_vm1, 4294967295, %v12976_v28  ;;  %vm7299_vm8 = vmor %vm12978_vm9, %vm1163_vm10  ;;  %vm1579_vm1 = vcmp.eq.s32.totalorder %v6144_v5, %v7270_v47  ;;  %vm12984_vm9 = vnez %v12964_v39  ;;  %v12989_v39 = vmov 0 }
 0x274   : > { %vm1328_vm15 = vmor %vm7224_vm3, %vm1168_vm13  ;;  %5034 = vset.pattern.permute.xlu1 %v12681_v12  ;;  %vm2491_vm13 = vcmp.eq.s32.totalorder %v6144_v5, %v7309_v25  ;;  %v7348_v49 = vpop.permute.xlu1 %2354 }
 0x275   : > { %vm7315_vm10 = vmor %vm7237_vm6, %vm1162_vm12  ;;  %1540 = vperm.xlu1 %5034, %v5172_v62   ;;  %vm2490_vm12 = vcmp.eq.s32.totalorder %v6130_v10, %v7309_v25  ;;  %12993 = vst [vmem:[#allocation144_spill] sm:$0xff] %v7348_v49 }
 0x276   : > { %vm7321_vm14 = vmor %vm12984_vm9, %vm1167_vm5  ;;  %vm12995_vm9 = vnez %v12977_v28 }
 0x277   : > { %vm2240_vm3 = vmor %vm7253_vm2, %vm2080_vm4 }
 0x278   : > { %vm7332_vm6 = vmor %vm7272_vm7, %vm2079_vm0  ;;  %vm12994_vm7 = vnez %v12975_v26  ;;  %vm1583_vm0 = vcmp.eq.s32.totalorder %v6130_v10, %v7278_v54  ;;  %v7381_v43 = vpop.permute.xlu1 %1890  ;;  %v13304_v54 = vmov 0 }
 0x279   : > { %vm7338_vm5 = vmor %vm1328_vm15, %vm1584_vm11  ;;  %vm2496_vm11 = vcmp.eq.s32.totalorder %v6144_v5, %v7348_v49  ;;  %vm2495_vm15 = vcmp.eq.s32.totalorder %v6130_v10, %v7348_v49  ;;  %5035 = vset.pattern.permute.xlu1 %v12691_v52  ;;  %12998 = vst [vmem:[#allocation145_spill] sm:$0xff] %v7381_v43 }
 0x27a   : > { %v12990_v39 = vsel %vm7338_vm5, 4294967295, %v12989_v39  ;;  %vm7344_vm2 = vmor %vm7299_vm8, %vm1579_vm1  ;;  %vm1578_vm5 = vcmp.eq.s32.totalorder %v6130_v10, %v7270_v47  ;;  %1073 = vperm.xlu1 %5035, %v5173_v0   ;;  %v13310_v47 = vmov 0 }
 0x27b   : > { %vm2651_vm4 = vmor %vm12994_vm7, %vm2491_vm13  ;;  %vm1995_vm7 = vcmp.eq.s32.totalorder %v6144_v5, %v6127_v6 }
 0x27c   : > { %vm2650_vm1 = vmor %vm12995_vm9, %vm2490_vm12  ;;  %v2811_v26 = vsel %vm2651_vm4, 1.0, %v12868_v18  ;;  %vm1994_vm12 = vcmp.eq.s32.totalorder %v6130_v10, %v6127_v6  ;;  %vm2000_vm4 = vcmp.eq.s32.totalorder %v6144_v5, %v7381_v43  ;;  %v13294_v6 = vld [vmem:[#allocation30_spill] sm:$0xff] }
 0x27d   : > { %vm2656_vm8 = vmor %vm2240_vm3, %vm2496_vm11  ;;  %v2810_v49 = vsel %vm2650_vm1, 1.0, %v12868_v18 }
 0x27e   : > { %v2816_v42 = vsel %vm2656_vm8, 1.0, %v12868_v18  ;;  %vm2655_vm13 = vmor %vm7332_vm6, %vm2495_vm15  ;;  %5036 = vset.pattern.permute.xlu1 %v12689_v36 }
 0x27f   : > { %v2916_v28 = vpack.c.bf16 %v2816_v42, %v2811_v26  ;;  %v2815_v25 = vsel %vm2655_vm13, 1.0, %v12868_v18  ;;  %vm7377_vm3 = vmor %vm7321_vm14, %vm1583_vm0  ;;  %vm1999_vm14 = vcmp.eq.s32.totalorder %v6130_v10, %v7381_v43  ;;  %vm2416_vm0 = vcmp.eq.s32.totalorder %v6144_v5, %v6249_v16  ;;  %1953 = vperm.xlu1 %5036, %v7263_v4   ;;  %v13249_v43 = vld [vmem:[#allocation77_spill] sm:$0xff] }
 0x280   : > { %v2915_v1 = vpack.c.bf16 %v2815_v25, %v2810_v49  ;;  %vm1738_vm6 = vmor %vm7315_vm10, %vm1578_vm5  ;;  %vm13001_vm10 = vnez %v12990_v39  ;;  %v7407_v25 = vpop.permute.xlu1 %2303 }
 0x281   : > { %3492 = vmatprep.mubr.bf16.mxu1 %v2916_v28  ;;  %vm7391_vm11 = vmor %vm7344_vm2, %vm1995_vm7  ;;  %vm2415_vm2 = vcmp.eq.s32.totalorder %v6130_v10, %v6249_v16  ;;  %13002 = vst [vmem:[#allocation146_spill] sm:$0xff] %v7407_v25  ;;  %vm2411_vm8 = vcmp.eq.s32.totalorder %v6144_v5, %v7407_v25  ;;  %vm2410_vm13 = vcmp.eq.s32.totalorder %v6130_v10, %v7407_v25  ;;  %v13077_v25 = vld [vmem:[#allocation119_spill] sm:$0xff] }
 0x282   : > { %3493 = vmatmul.mubr.bf16.gmra.mrb[12].mxu1 %v2915_v1  ;;  %vm2160_vm5 = vmor %vm13001_vm10, %vm2000_vm4 }
 0x283   : > { %vm2154_vm15 = vmor %vm1738_vm6, %vm1994_vm12  ;;  %1956 = vperm.xlu1 %5036, %v5172_v62   ;;  %v5174_v62 = vld [vmem:[%s5701_s7 + $0x68] sm:$0xff]  ;;  %vm581_vm12 = vcmp.eq.s32.totalorder %v6144_v5, %v13006_v45 }
 0x284   : > { %vm2159_vm9 = vmor %vm7377_vm3, %vm1999_vm14  ;;  %v7419_v26 = vpop.permute.xlu1 %1109  ;;  %vm580_vm14 = vcmp.eq.s32.totalorder %v6130_v10, %v13006_v45  ;;  %v5070_v45 = vld [vmem:[#allocation7 + $0x80] sm:$0xff]  }
 0x285   : > { %vm2576_vm1 = vmor %vm2160_vm5, %vm2416_vm0  ;;  %13003 = vst [vmem:[#allocation147_spill] sm:$0xff] %v7419_v26 }
 0x286   : > { %vm2575_vm7 = vmor %vm2159_vm9, %vm2415_vm2  ;;  %v2736_v53 = vsel %vm2576_vm1, 1.0, %v12868_v18 }
 0x287   : > { %vm2571_vm6 = vmor %vm7391_vm11, %vm2411_vm8  ;;  %v2735_v49 = vsel %vm2575_vm7, 1.0, %v12868_v18  ;;  %5037 = vset.pattern.permute.xlu1 %v12681_v12  ;;  %vm1252_vm8 = vcmp.eq.s32.totalorder %v6130_v10, %v7419_v26 }
 0x288   : > { %v2731_v60 = vsel %vm2571_vm6, 1.0, %v12868_v18  ;;  %vm2570_vm3 = vmor %vm2154_vm15, %vm2410_vm13  ;;  %1492 = vperm.xlu1 %5037, %v5174_v62   ;;  %v7423_v28 = vpop.permute.xlu1 %1112  ;;  %vm1253_vm15 = vcmp.eq.s32.totalorder %v6144_v5, %v7419_v26  ;;  %v5075_v26 = vld [vmem:[#allocation7 + $0x148] sm:$0xff]  }
 0x289   : > { %v2876_v39 = vpack.c.bf16 %v2736_v53, %v2731_v60  ;;  %v2730_v22 = vsel %vm2570_vm3, 1.0, %v12868_v18  ;;  %13004 = vst [vmem:[#allocation148_spill] sm:$0xff] %v7423_v28  ;;  %v13007_v60 = vld [vmem:[#allocation71_spill] sm:$0xff]  ;;  %4758 = vmatprep.subr.bf16.mxu0 %v5075_v26 }
 0x28a   : > { %v2875_v42 = vpack.c.bf16 %v2735_v49, %v2730_v22  ;;  %vm837_vm4 = vcmp.eq.s32.totalorder %v6144_v5, %v13007_v60  ;;  %vm836_vm10 = vcmp.eq.s32.totalorder %v6130_v10, %v13007_v60  ;;  %v13012_v22 = vld [vmem:[#allocation24_spill] sm:$0xff]  ;;  %v13013_v49 = vld [vmem:[#allocation55_spill] sm:$0xff]  ;;  %4759 = vmatpush3.bf16.msra.mxu0 %v5076_v3 }
 0x28b   : > { %3428 = vmatprep.mubr.bf16.mxu0 %v2876_v39  ;;  %v13009_v39 = vld [vmem:[#allocation72_spill] sm:$0xff]  ;;  %vm997_vm0 = vmor %vm581_vm12, %vm837_vm4  ;;  %vm501_vm2 = vcmp.eq.s32.totalorder %v6144_v5, %v13012_v22  ;;  %vm757_vm9 = vcmp.eq.s32.totalorder %v6144_v5, %v13013_v49  ;;  %4760 = vmatprep.subr.bf16.mxu0 %v5079_v11 }
 0x28c   : > { %3429 = vmatmul.mubr.bf16.gmra.mrb[12].mxu0 %v2875_v42  ;;  %5038 = vset.pattern.permute.xlu1 %v12696_v48  ;;  %v7427_v1 = vpop.permute.xlu1 %1528  ;;  %vm842_vm11 = vcmp.eq.s32.totalorder %v6144_v5, %v13009_v39  ;;  %v5069_v60 = vld [vmem:[#allocation7 + $0xc0] sm:$0xff]   ;;  %vm841_vm13 = vcmp.eq.s32.totalorder %v6130_v10, %v13009_v39  ;;  %vm996_vm7 = vmor %vm580_vm14, %vm836_vm10  ;;  %vm762_vm10 = vcmp.eq.s32.totalorder %v6144_v5, %v13019_v8  ;;  %v7523_v42 = vld [vmem:[%s5701_s7 + $0xf8] sm:$0xff] }
 0x28d   : > { %2369 = vperm.xlu1 %5038, %v7263_v4   ;;  %13005 = vst [vmem:[#allocation149_spill] sm:$0xff] %v7427_v1  ;;  %v7442_v4 = vpop.permute.xlu0 %1525  ;;  %vm1413_vm3 = vmor %vm997_vm0, %vm1253_vm15  ;;  %4644 = vmatprep.subr.bf16.mxu1 %v5069_v60  ;;  %v7672_v60 = vld [vmem:[%s5701_s7 + $0x78] sm:$0xff] }
 0x28e   : > { %13010 = vst [vmem:[#allocation151_spill] sm:$0xff] %v7442_v4  ;;  %vm1669_vm6 = vcmp.eq.s32.totalorder %v6144_v5, %v7442_v4  ;;  %vm7464_vm12 = vmor %vm501_vm2, %vm757_vm9  ;;  %vm1668_vm4 = vcmp.eq.s32.totalorder %v6130_v10, %v7442_v4  ;;  %4645 = vmatpush3.bf16.msra.mxu1 %v5070_v45  ;;  %vm1257_vm2 = vcmp.eq.s32.totalorder %v6130_v10, %v7423_v28  ;;  %v13022_v45 = vld [vmem:[#allocation23_spill] sm:$0xff] }
 0x28f   : > { %v13018_v55 = vsel %vm7464_vm12, 4294967295, %v13017_v55  ;;  %vm1412_vm14 = vmor %vm996_vm7, %vm1252_vm8  ;;  %vm506_vm9 = vcmp.eq.s32.totalorder %v6144_v5, %v13022_v45  ;;  %vm1674_vm8 = vcmp.eq.s32.totalorder %v6144_v5, %v7427_v1  ;;  %4646 = vmatprep.subr.bf16.mxu1 %v5073_v50  ;;  %v7633_v4 = vld [vmem:[%s5701_s7 + $0x70] sm:$0xff]  ;;  %v5081_v50 = vld [vmem:[#allocation7 + $0xd8] sm:$0xff]  }
 0x290   : > { %v7434_v53 = vpop.permute.xlu1 %1061  ;;  %vm7486_vm15 = vmor %vm1413_vm3, %vm1669_vm6  ;;  %vm1673_vm3 = vcmp.eq.s32.totalorder %v6130_v10, %v7427_v1  ;;  %v5078_v1 = vld [vmem:[#allocation7 + $0x90] sm:$0xff]   ;;  %v5082_v26 = vld [vmem:[#allocation7 + $0x98] sm:$0xff]  }
 0x291   : > { %5039 = vset.pattern.permute.xlu1 %v12689_v36  ;;  %13008 = vst [vmem:[#allocation150_spill] sm:$0xff] %v7434_v53  ;;  %vm7505_vm7 = vmor %vm506_vm9, %vm762_vm10  ;;  %vm756_vm10 = vcmp.eq.s32.totalorder %v6130_v10, %v13013_v49  ;;  %v7611_v17 = vpop.permute.xlu0 %1477 }
 0x292   : > { %1905 = vperm.xlu1 %5039, %v5173_v0   ;;  %v13011_v0 = vld [vmem:[#allocation39_spill] sm:$0xff]  ;;  %13047 = vst [vmem:[#allocation155_spill] sm:$0xff] %v7611_v17 }
 0x293   : > { %vm586_vm5 = vcmp.eq.s32.totalorder %v6144_v5, %v13011_v0 }
 0x294   : > { %vm7452_vm1 = vmor %vm586_vm5, %vm842_vm11  ;;  %v7462_v30 = vpop.permute.xlu1 %1941  ;;  %vm585_vm11 = vcmp.eq.s32.totalorder %v6130_v10, %v13011_v0  ;;  %vm1258_vm5 = vcmp.eq.s32.totalorder %v6144_v5, %v7423_v28  ;;  %v5074_v28 = vld [vmem:[#allocation7 + $0x88] sm:$0xff]  }
 0x295   : > { %13016 = vst [vmem:[#allocation152_spill] sm:$0xff] %v7462_v30  ;;  %vm1001_vm0 = vmor %vm585_vm11, %vm841_vm13  ;;  %vm2085_vm11 = vcmp.eq.s32.totalorder %v6144_v5, %v7462_v30  ;;  %4647 = vmatpush3.bf16.msra.mxu1 %v5074_v28  ;;  %v5077_v28 = vld [vmem:[#allocation7 + $0xd0] sm:$0xff]  }
 0x296   : > { %1908 = vperm.xlu1 %5039, %v5174_v62   ;;  %vm7501_vm13 = vmor %vm1412_vm14, %vm1668_vm4  ;;  %vm1173_vm4 = vcmp.eq.s32.totalorder %v6144_v5, %v7434_v53  ;;  %vm500_vm14 = vcmp.eq.s32.totalorder %v6130_v10, %v13012_v22  ;;  %4648 = vmatprep.subr.bf16.mxu1 %v5077_v28 }
 0x297   : > { %vm1418_vm6 = vmor %vm7452_vm1, %vm1258_vm5  ;;  %vm2084_vm5 = vcmp.eq.s32.totalorder %v6130_v10, %v7462_v30 }
 0x298   : > { %vm1417_vm12 = vmor %vm1001_vm0, %vm1257_vm2  ;;  %vm761_vm0 = vcmp.eq.s32.totalorder %v6130_v10, %v13019_v8  ;;  %vm505_vm2 = vcmp.eq.s32.totalorder %v6130_v10, %v13022_v45 }
 0x299   : > { %vm7526_vm1 = vmor %vm1418_vm6, %vm1674_vm8  ;;  %vm13035_vm6 = vnez %v13018_v55  ;;  %4649 = vmatpush3.bf16.msra.mxu1 %v5078_v1  ;;  %v5080_v1 = vld [vmem:[#allocation7 + $0x110] sm:$0xff]  }
 0x29a   : > { %5041 = vset.pattern.permute.xlu1 %v12696_v48  ;;  %vm7536_vm9 = vmor %vm1417_vm12, %vm1673_vm3  ;;  %4761 = vmatpush3.bf16.msra.mxu0 %v5080_v1 }
 0x29b   : > { %2324 = vperm.xlu1 %5041, %v5174_v62   ;;  %v7494_v62 = vpop.permute.xlu1 %1944  ;;  %vm7547_vm8 = vmor %vm7486_vm15, %vm2085_vm11  ;;  %4650 = vmatprep.subr.bf16.mxu1 %v5081_v50 }
 0x29c   : > { %13023 = vst [vmem:[#allocation153_spill] sm:$0xff] %v7494_v62  ;;  %vm2089_vm12 = vcmp.eq.s32.totalorder %v6130_v10, %v7494_v62  ;;  %vm7558_vm3 = vmor %vm13035_vm6, %vm1173_vm4  ;;  %vm1178_vm4 = vcmp.eq.s32.totalorder %v6144_v5, %v6346_v29 }
 0x29d   : > { %vm7570_vm15 = vmor %vm500_vm14, %vm756_vm10  ;;  %vm13044_vm14 = vcmp.eq.s32.totalorder %v6144_v5, %v7494_v62  ;;  %vm2506_vm10 = vcmp.eq.s32.totalorder %v6144_v5, %v6266_v56  ;;  %4651 = vmatpush3.bf16.msra.mxu1 %v5082_v26 }
 0x29e   : > { %vm7576_vm11 = vmor %vm7501_vm13, %vm2084_vm5 }
 0x29f   : > { %5043 = vset.pattern.permute.xlu1 %v12691_v52  ;;  %v7540_v39 = vpop.permute.xlu1 %1480  ;;  %vm7582_vm6 = vmor %vm505_vm2, %vm761_vm0  ;;  %vm2505_vm0 = vcmp.eq.s32.totalorder %v6130_v10, %v6266_v56 }
 0x2a0   : > { %1130 = vperm.xlu1 %5043, %v7523_v42   ;;  %13032 = vst [vmem:[#allocation154_spill] sm:$0xff] %v7540_v39  ;;  %vm2250_vm13 = vmor %vm7526_vm1, %vm13044_vm14 }
 0x2a1   : > { %vm2249_vm5 = vmor %vm7536_vm9, %vm2089_vm12 }
 0x2a2   : > { %vm7607_vm1 = vmor %vm7505_vm7, %vm1178_vm4  ;;  %vm1172_vm7 = vcmp.eq.s32.totalorder %v6130_v10, %v7434_v53 }
 0x2a3   : > { %v7613_v62 = vpop.permute.xlu1 %2357  ;;  %vm2666_vm2 = vmor %vm2250_vm13, %vm2506_vm10  ;;  %vm1177_vm13 = vcmp.eq.s32.totalorder %v6130_v10, %v6346_v29  ;;  %vm1589_vm10 = vcmp.eq.s32.totalorder %v6144_v5, %v7611_v17  ;;  %v13272_v29 = vmov 0 }
 0x2a4   : > { %5044 = vset.pattern.permute.xlu1 %v12681_v12  ;;  %13048 = vst [vmem:[#allocation156_spill] sm:$0xff] %v7613_v62  ;;  %vm2501_vm9 = vcmp.eq.s32.totalorder %v6144_v5, %v7613_v62  ;;  %vm2500_vm12 = vcmp.eq.s32.totalorder %v6130_v10, %v7613_v62  ;;  %vm7619_vm14 = vmor %vm2249_vm5, %vm2505_vm0  ;;  %v2826_v11 = vsel %vm2666_vm2, 1.0, %v12868_v18 }
 0x2a5   : > { %1543 = vperm.xlu1 %5044, %v7595_v9   ;;  %vm2661_vm4 = vmor %vm7547_vm8, %vm2501_vm9  ;;  %vm1588_vm8 = vcmp.eq.s32.totalorder %v6130_v10, %v7611_v17  ;;  %v2825_v28 = vsel %vm7619_vm14, 1.0, %v12868_v18 }
 0x2a6   : > { %v2821_v0 = vsel %vm2661_vm4, 1.0, %v12868_v18  ;;  %vm2660_vm5 = vmor %vm7576_vm11, %vm2500_vm12  ;;  %vm1594_vm11 = vcmp.eq.s32.totalorder %v6144_v5, %v7540_v39 }
 0x2a7   : > { %v2820_v63 = vsel %vm2660_vm5, 1.0, %v12868_v18  ;;  %vm1332_vm0 = vmor %vm7570_vm15, %vm1172_vm7  ;;  %v7651_v55 = vpop.permute.xlu1 %1893 }
 0x2a8   : > { %13051 = vst [vmem:[#allocation157_spill] sm:$0xff] %v7651_v55  ;;  %v2920_v56 = vpack.c.bf16 %v2825_v28, %v2820_v63  ;;  %vm7660_vm2 = vmor %vm7582_vm6, %vm1177_vm13  ;;  %vm2005_vm9 = vcmp.eq.s32.totalorder %v6144_v5, %v7651_v55  ;;  %vm2004_vm12 = vcmp.eq.s32.totalorder %v6130_v10, %v7651_v55  ;;  %v5085_v63 = vld [vmem:[#allocation7 + $0xe0] sm:$0xff]   ;;  %v5098_v55 = vld [vmem:[#allocation7 + $0xb8] sm:$0xff]  }
 0x2a9   : > { %5045 = vset.pattern.permute.xlu1 %v12691_v52  ;;  %v2921_v52 = vpack.c.bf16 %v2826_v11, %v2821_v0  ;;  %vm1749_vm15 = vmor %vm7558_vm3, %vm1589_vm10  ;;  %vm1593_vm3 = vcmp.eq.s32.totalorder %v6130_v10, %v7540_v39  ;;  %v5083_v11 = vld [vmem:[#allocation7 + $0x158] sm:$0xff]   ;;  %4652 = vmatprep.subr.bf16.mxu1 %v5085_v63  ;;  %v5087_v63 = vld [vmem:[#allocation7 + $0x160] sm:$0xff]  }
 0x2aa   : > { %1079 = vperm.xlu1 %5045, %v7633_v4   ;;  %vm1748_vm6 = vmor %vm1332_vm0, %vm1588_vm8  ;;  %4762 = vmatprep.subr.bf16.mxu0 %v5083_v11  ;;  %v13175_v39 = vld [vmem:[#allocation109_spill] sm:$0xff] }
 0x2ab   : > { %3500 = vmatprep.mubr.bf16.mxu1 %v2921_v52  ;;  %vm7682_vm14 = vmor %vm7607_vm1, %vm1594_vm11  ;;  %v7688_v0 = vpop.permute.xlu1 %1896  ;;  %v5084_v52 = vld [vmem:[#allocation7 + $0x118] sm:$0xff]  }
 0x2ac   : > { %3501 = vmatmul.mubr.bf16.gmra.mrb[16].mxu1 %v2920_v56  ;;  %13056 = vst [vmem:[#allocation158_spill] sm:$0xff] %v7688_v0  ;;  %vm2165_vm7 = vmor %vm1749_vm15, %vm2005_vm9  ;;  %v13057_v56 = vld [vmem:[#allocation106_spill] sm:$0xff]  ;;  %vm2010_vm1 = vcmp.eq.s32.totalorder %v6144_v5, %v7688_v0  ;;  %vm2009_vm0 = vcmp.eq.s32.totalorder %v6130_v10, %v7688_v0  ;;  %4763 = vmatpush3.bf16.msra.mxu0 %v5084_v52  ;;  %v5086_v52 = vld [vmem:[#allocation7 + $0xa0] sm:$0xff]  }
 0x2ad   : > { %vm2421_vm4 = vcmp.eq.s32.totalorder %v6144_v5, %v13057_v56  ;;  %vm2164_vm13 = vmor %vm1748_vm6, %vm2004_vm12  ;;  %vm2420_vm10 = vcmp.eq.s32.totalorder %v6130_v10, %v13057_v56  ;;  %4653 = vmatpush3.bf16.msra.mxu1 %v5086_v52  ;;  %v5089_v56 = vld [vmem:[#allocation7 + $0xe8] sm:$0xff]   ;;  %4764 = vmatprep.subr.bf16.mxu0 %v5087_v63  ;;  %v13095_v52 = vmov 0 }
 0x2ae   : > { %1082 = vperm.xlu1 %5045, %v7672_v60   ;;  %vm1753_vm5 = vmor %vm7660_vm2, %vm1593_vm3  ;;  %4654 = vmatprep.subr.bf16.mxu1 %v5089_v56  ;;  %v13066_v56 = vld [vmem:[#allocation74_spill] sm:$0xff]  ;;  %v13075_v0 = vld [vmem:[#allocation57_spill] sm:$0xff] }
 0x2af   : > { %vm2581_vm8 = vmor %vm2165_vm7, %vm2421_vm4  ;;  %v7706_v1 = vpop.permute.xlu1 %2312  ;;  %vm852_vm4 = vcmp.eq.s32.totalorder %v6144_v5, %v13066_v56  ;;  %v13071_v63 = vld [vmem:[#allocation26_spill] sm:$0xff] }
 0x2b0   : > { %vm7702_vm11 = vmor %vm2164_vm13, %vm2420_vm10  ;;  %13060 = vst [vmem:[#allocation159_spill] sm:$0xff] %v7706_v1  ;;  %vm2426_vm15 = vcmp.eq.s32.totalorder %v6144_v5, %v7706_v1  ;;  %vm2425_vm6 = vcmp.eq.s32.totalorder %v6130_v10, %v7706_v1  ;;  %v2741_v3 = vsel %vm2581_vm8, 1.0, %v12868_v18  ;;  %v5090_v1 = vld [vmem:[#allocation7 + $0xa8] sm:$0xff]   ;;  %4765 = vmatpush3.bf16.msra.mxu0 %v5088_v46  ;;  %vm851_vm8 = vcmp.eq.s32.totalorder %v6130_v10, %v13066_v56 }
 0x2b1   : > { %vm2170_vm2 = vmor %vm7682_vm14, %vm2010_vm1  ;;  %v2740_v26 = vsel %vm7702_vm11, 1.0, %v12868_v18  ;;  %4655 = vmatpush3.bf16.msra.mxu1 %v5090_v1  ;;  %v13065_v46 = vld [vmem:[#allocation73_spill] sm:$0xff]  ;;  %v5094_v1 = vld [vmem:[#allocation7 + $0xb0] sm:$0xff]  }
 0x2b2   : > { %5046 = vset.pattern.permute.xlu1 %v12689_v36  ;;  %vm2169_vm9 = vmor %vm1753_vm5, %vm2009_vm0  ;;  %vm847_vm7 = vcmp.eq.s32.totalorder %v6144_v5, %v13065_v46  ;;  %vm846_vm10 = vcmp.eq.s32.totalorder %v6130_v10, %v13065_v46  ;;  %vm511_vm0 = vcmp.eq.s32.totalorder %v6144_v5, %v13071_v63  ;;  %v13086_v56 = vld [vmem:[#allocation25_spill] sm:$0xff]  ;;  %v13132_v46 = vld [vmem:[#allocation44_spill] sm:$0xff] }
 0x2b3   : > { %1962 = vperm.xlu1 %5046, %v7523_v42   ;;  %vm2586_vm12 = vmor %vm2170_vm2, %vm2426_vm15 }
 0x2b4   : > { %v2746_v50 = vsel %vm2586_vm12, 1.0, %v12868_v18  ;;  %vm2585_vm3 = vmor %vm2169_vm9, %vm2425_vm6  ;;  %vm767_vm9 = vcmp.eq.s32.totalorder %v6144_v5, %v13075_v0  ;;  %vm1263_vm6 = vcmp.eq.s32.totalorder %v6144_v5, %v13077_v25 }
 0x2b5   : > { %v2881_v30 = vpack.c.bf16 %v2746_v50, %v2741_v3  ;;  %v2745_v11 = vsel %vm2585_vm3, 1.0, %v12868_v18  ;;  %v5091_v3 = vld [vmem:[#allocation7 + $0x168] sm:$0xff]  }
 0x2b6   : > { %v2880_v62 = vpack.c.bf16 %v2745_v11, %v2740_v26  ;;  %v5092_v50 = vld [vmem:[#allocation7 + $0x128] sm:$0xff]   ;;  %4766 = vmatprep.subr.bf16.mxu0 %v5091_v3  ;;  %v7755_v3 = vpop.permute.xlu0 %1534 }
 0x2b7   : > { %5047 = vset.pattern.permute.xlu1 %v12681_v12  ;;  %3436 = vmatprep.mubr.bf16.mxu0 %v2881_v30  ;;  %v13068_v11 = vld [vmem:[#allocation41_spill] sm:$0xff]  ;;  %13072 = vst [vmem:[#allocation164_spill] sm:$0xff] %v7755_v3 }
 0x2b8   : > { %1495 = vperm.xlu1 %5047, %v7633_v4   ;;  %3437 = vmatmul.mubr.bf16.gmra.mrb[16].mxu0 %v2880_v62  ;;  %v13064_v62 = vld [vmem:[#allocation42_spill] sm:$0xff]  ;;  %vm596_vm1 = vcmp.eq.s32.totalorder %v6144_v5, %v13068_v11  ;;  %vm595_vm15 = vcmp.eq.s32.totalorder %v6130_v10, %v13068_v11 }
 0x2b9   : > { %4767 = vmatpush3.bf16.msra.mxu0 %v5092_v50  ;;  %vm591_vm14 = vcmp.eq.s32.totalorder %v6144_v5, %v13064_v62  ;;  %vm590_vm13 = vcmp.eq.s32.totalorder %v6130_v10, %v13064_v62  ;;  %vm7761_vm11 = vmor %vm596_vm1, %vm852_vm4  ;;  %vm510_vm4 = vcmp.eq.s32.totalorder %v6130_v10, %v13071_v63  ;;  %v13133_v62 = vld [vmem:[#allocation75_spill] sm:$0xff]  ;;  %v13248_v63 = vld [vmem:[#allocation45_spill] sm:$0xff] }
 0x2ba   : > { %vm7747_vm5 = vmor %vm591_vm14, %vm847_vm7  ;;  %vm1262_vm7 = vcmp.eq.s32.totalorder %v6130_v10, %v13077_v25  ;;  %v13125_v25 = vld [vmem:[#allocation93_spill] sm:$0xff] }
 0x2bb   : > { %v7722_v12 = vpop.permute.xlu1 %1118  ;;  %vm7782_vm12 = vmor %vm590_vm13, %vm846_vm10  ;;  %vm766_vm13 = vcmp.eq.s32.totalorder %v6130_v10, %v13075_v0  ;;  %vm516_vm10 = vcmp.eq.s32.totalorder %v6144_v5, %v13086_v56 }
 0x2bc   : > { %13061 = vst [vmem:[#allocation160_spill] sm:$0xff] %v7722_v12  ;;  %5049 = vset.pattern.permute.xlu1 %v12696_v48  ;;  %vm1268_vm2 = vcmp.eq.s32.totalorder %v6144_v5, %v7722_v12  ;;  %vm7791_vm14 = vmor %vm595_vm15, %vm851_vm8 }
 0x2bd   : > { %2375 = vperm.xlu1 %5049, %v7595_v9   ;;  %v5093_v9 = vld [vmem:[#allocation7 + $0xf0] sm:$0xff]   ;;  %vm7812_vm8 = vmor %vm7761_vm11, %vm1268_vm2 }
 0x2be   : > { %4656 = vmatprep.subr.bf16.mxu1 %v5093_v9  ;;  %vm7826_vm1 = vmor %vm511_vm0, %vm767_vm9  ;;  %vm515_vm0 = vcmp.eq.s32.totalorder %v6130_v10, %v13086_v56 }
 0x2bf   : > { %4657 = vmatpush3.bf16.msra.mxu1 %v5094_v1  ;;  %v5097_v1 = vld [vmem:[#allocation7 + $0xf8] sm:$0xff]   ;;  %vm1423_vm11 = vmor %vm7747_vm5, %vm1263_vm6 }
 0x2c0   : > { %v7726_v28 = vpop.permute.xlu1 %1531  ;;  %4658 = vmatprep.subr.bf16.mxu1 %v5097_v1  ;;  %v13090_v1 = vmov 0  ;;  %vm1422_vm9 = vmor %vm7782_vm12, %vm1262_vm7  ;;  %vm1683_vm12 = vcmp.eq.s32.totalorder %v6130_v10, %v7755_v3  ;;  %vm13097_vm7 = vcmp.eq.s32.totalorder %v6144_v5, %v7755_v3  ;;  %v13102_v3 = vld [vmem:[#allocation91_spill] sm:$0xff] }
 0x2c1   : > { %13062 = vst [vmem:[#allocation161_spill] sm:$0xff] %v7726_v28  ;;  %2378 = vperm.xlu1 %5049, %v7523_v42   ;;  %v5096_v42 = vld [vmem:[#allocation7 + $0x130] sm:$0xff]   ;;  %vm1679_vm2 = vcmp.eq.s32.totalorder %v6144_v5, %v7726_v28  ;;  %vm1678_vm5 = vcmp.eq.s32.totalorder %v6130_v10, %v7726_v28  ;;  %vm7861_vm6 = vmor %vm510_vm4, %vm766_vm13  ;;  %vm13100_vm4 = vcmp.eq.s32.totalorder %v6130_v10, %v7722_v12  ;;  %v5100_v28 = vld [vmem:[#allocation7 + $0x138] sm:$0xff]   ;;  %v13106_v12 = vmov 0 }
 0x2c2   : > { %vm1427_vm13 = vmor %vm7791_vm14, %vm13100_vm4 }
 0x2c3   : > { %4659 = vmatpush3.bf16.msra.mxu1 %v5098_v55 }
 0x2c5   : > { %5050 = vset.pattern.permute.xlu1 %v12689_v36  ;;  %v7730_v30 = vpop.permute.xlu1 %1067  ;;  %v5095_v36 = vld [vmem:[#allocation7 + $0x170] sm:$0xff]  }
 0x2c6   : > { %13063 = vst [vmem:[#allocation162_spill] sm:$0xff] %v7730_v30  ;;  %1914 = vperm.xlu1 %5050, %v7672_v60   ;;  %v4548_v60 = vpop.f32.mrb[0].mxu0  ;;  %4768 = vmatprep.subr.bf16.mxu0 %v5095_v36  ;;  %v13080_v36 = vld [vmem:[#allocation58_spill] sm:$0xff] }
 0x2c7   : > { %v4549_v50 = vpop.f32.mrb[1].mxu0  ;;  %vm772_vm3 = vcmp.eq.s32.totalorder %v6144_v5, %v13080_v36  ;;  %4769 = vmatpush3.bf16.msra.mxu0 %v5096_v42 }
 0x2c8   : > { %v4551_v16 = vpop.f32.mrb[2].mxu0  ;;  %vm7842_vm15 = vmor %vm516_vm10, %vm772_vm3  ;;  %vm13094_vm3 = vcmp.eq.s32.totalorder %v6130_v10, %v13080_v36 }
 0x2c9   : > { %v7743_v26 = vpop.permute.xlu1 %1070  ;;  %v13091_v1 = vsel %vm7842_vm15, 4294967295, %v13090_v1  ;;  %vm7868_vm10 = vmor %vm515_vm0, %vm13094_vm3 }
 0x2ca   : > { %13067 = vst [vmem:[#allocation163_spill] sm:$0xff] %v7743_v26  ;;  %5051 = vset.pattern.permute.xlu1 %v12696_v48  ;;  %v7771_v48 = vadd.f32 %v4549_v50, %v4548_v60  ;;  %v4552_v60 = vpop.f32.mrb[3].mxu0  ;;  %v13096_v52 = vsel %vm7868_vm10, 4294967295, %v13095_v52  ;;  %vm7879_vm15 = vmor %vm7812_vm8, %vm13097_vm7  ;;  %vm2095_vm10 = vcmp.eq.s32.totalorder %v6144_v5, %v13102_v3  ;;  %vm1183_vm7 = vcmp.eq.s32.totalorder %v6144_v5, %v7730_v30 }
 0x2cb   : > { %2327 = vperm.xlu1 %5051, %v7633_v4   ;;  %v7805_v42 = vadd.f32 %v4552_v60, %v4551_v16  ;;  %v5099_v60 = vld [vmem:[#allocation7 + $0x178] sm:$0xff]   ;;  %vm1839_vm0 = vmor %vm1423_vm11, %vm1679_vm2  ;;  %v7898_v4 = vpop.permute.xlu0 %1486  ;;  %vm2094_vm11 = vcmp.eq.s32.totalorder %v6130_v10, %v13102_v3  ;;  %vm1188_vm2 = vcmp.eq.s32.totalorder %v6144_v5, %v7743_v26  ;;  %v13112_v3 = vmov 0 }
 0x2cc   : > { %13076 = vst [vmem:[#allocation165_spill] sm:$0xff] %v7771_v48  ;;  %vm1838_vm3 = vmor %vm1422_vm9, %vm1678_vm5  ;;  %4770 = vmatprep.subr.bf16.mxu0 %v5099_v60  ;;  %v13108_v60 = vmov 0  ;;  %vm1182_vm5 = vcmp.eq.s32.totalorder %v6130_v10, %v7730_v30  ;;  %v13174_v30 = vld [vmem:[#allocation48_spill] sm:$0xff] }
 0x2cd   : > { %13083 = vst [vmem:[#allocation166_spill] sm:$0xff] %v7805_v42  ;;  %vm7892_vm8 = vmor %vm1427_vm13, %vm1683_vm12  ;;  %4771 = vmatpush3.bf16.msra.mxu0 %v5100_v28  ;;  %vm1187_vm12 = vcmp.eq.s32.totalorder %v6130_v10, %v7743_v26  ;;  %vm1604_vm13 = vcmp.eq.s32.totalorder %v6144_v5, %v7898_v4  ;;  %v13173_v26 = vld [vmem:[#allocation18_spill] sm:$0xff] }
 0x2ce   : > { %v7830_v9 = vpop.permute.xlu1 %1950  ;;  %13105 = vst [vmem:[#allocation169_spill] sm:$0xff] %v7898_v4  ;;  %vm7900_vm14 = vmor %vm1839_vm0, %vm2095_vm10 }
 0x2cf   : > { %13089 = vst [vmem:[#allocation167_spill] sm:$0xff] %v7830_v9  ;;  %v13107_v12 = vsel %vm7900_vm14, 4294967295, %v13106_v12  ;;  %vm7908_vm9 = vmor %vm1838_vm3, %vm2094_vm11  ;;  %vm2100_vm10 = vcmp.eq.s32.totalorder %v6144_v5, %v7830_v9  ;;  %vm2099_vm0 = vcmp.eq.s32.totalorder %v6130_v10, %v7830_v9  ;;  %vm13110_vm3 = vnez %v13091_v1 }
 0x2d0   : > { %v13109_v60 = vsel %vm7908_vm9, 4294967295, %v13108_v60  ;;  %vm1343_vm4 = vmor %vm7826_vm1, %vm1183_vm7  ;;  %vm13114_vm1 = vnez %v13096_v52 }
 0x2d1   : > { %vm1348_vm11 = vmor %vm13110_vm3, %vm1188_vm2 }
 0x2d2   : > { %vm7932_vm14 = vmor %vm7861_vm6, %vm1182_vm5 }
 0x2d3   : > { %v7888_v42 = vpop.permute.xlu1 %1483  ;;  %v13113_v3 = vsel %vm7932_vm14, 4294967295, %v13112_v3  ;;  %vm7938_vm7 = vmor %vm13114_vm1, %vm1187_vm12  ;;  %vm1603_vm1 = vcmp.eq.s32.totalorder %v6130_v10, %v7898_v4 }
 0x2d4   : > { %13101 = vst [vmem:[#allocation168_spill] sm:$0xff] %v7888_v42  ;;  %vm1599_vm9 = vcmp.eq.s32.totalorder %v6144_v5, %v7888_v42  ;;  %vm2260_vm2 = vmor %vm7879_vm15, %vm2100_vm10  ;;  %vm13122_vm15 = vnez %v13107_v12 }
 0x2d5   : > { %vm2259_vm5 = vmor %vm7892_vm8, %vm2099_vm0  ;;  %vm13123_vm0 = vnez %v13109_v60 }
 0x2d6   : > { %vm7950_vm14 = vmor %vm1348_vm11, %vm1604_vm13  ;;  %vm1598_vm11 = vcmp.eq.s32.totalorder %v6130_v10, %v7888_v42 }
 0x2d7   : > { %vm7954_vm12 = vmor %vm1343_vm4, %vm1599_vm9 }
 0x2d8   : > { %v7926_v28 = vpop.permute.xlu1 %2363 }
 0x2d9   : > { %13111 = vst [vmem:[#allocation170_spill] sm:$0xff] %v7926_v28  ;;  %vm2511_vm3 = vcmp.eq.s32.totalorder %v6144_v5, %v7926_v28  ;;  %vm2510_vm6 = vcmp.eq.s32.totalorder %v6130_v10, %v7926_v28 }
 0x2da   : > { %vm2671_vm10 = vmor %vm13122_vm15, %vm2511_vm3 }
 0x2db   : > { %vm2670_vm9 = vmor %vm13123_vm0, %vm2510_vm6  ;;  %v2831_v11 = vsel %vm2671_vm10, 1.0, %v12868_v18  ;;  %vm13126_vm6 = vnez %v13113_v3  ;;  %v13127_v3 = vld [vmem:[#allocation107_spill] sm:$0xff] }
 0x2dc   : > { %v7958_v52 = vpop.permute.xlu1 %2366  ;;  %v2830_v28 = vsel %vm2670_vm9, 1.0, %v12868_v18  ;;  %vm1763_vm15 = vmor %vm7938_vm7, %vm1603_vm1  ;;  %vm2014_vm1 = vcmp.eq.s32.totalorder %v6130_v10, %v13125_v25  ;;  %vm2436_vm9 = vcmp.eq.s32.totalorder %v6144_v5, %v13127_v3 }
 0x2dd   : > { %13121 = vst [vmem:[#allocation171_spill] sm:$0xff] %v7958_v52  ;;  %vm2516_vm8 = vcmp.eq.s32.totalorder %v6144_v5, %v7958_v52  ;;  %vm2515_vm13 = vcmp.eq.s32.totalorder %v6130_v10, %v7958_v52  ;;  %vm1758_vm10 = vmor %vm13126_vm6, %vm1598_vm11 }
 0x2de   : > { %vm2676_vm4 = vmor %vm2260_vm2, %vm2516_vm8  ;;  %vm2015_vm2 = vcmp.eq.s32.totalorder %v6144_v5, %v13125_v25  ;;  %v13152_v25 = vmov 0 }
 0x2df   : > { %v2836_v12 = vsel %vm2676_vm4, 1.0, %v12868_v18  ;;  %vm2675_vm3 = vmor %vm2259_vm5, %vm2515_vm13 }
 0x2e0   : > { %v2926_v50 = vpack.c.bf16 %v2836_v12, %v2831_v11  ;;  %v2835_v9 = vsel %vm2675_vm3, 1.0, %v12868_v18  ;;  %vm2175_vm8 = vmor %vm7954_vm12, %vm2015_vm2  ;;  %vm2435_vm12 = vcmp.eq.s32.totalorder %v6130_v10, %v13127_v3  ;;  %v13167_v3 = vld [vmem:[#allocation121_spill] sm:$0xff] }
 0x2e1   : > { %v7978_v52 = vpop.permute.xlu1 %1902  ;;  %v2925_v60 = vpack.c.bf16 %v2835_v9, %v2830_v28  ;;  %vm2174_vm0 = vmor %vm1758_vm10, %vm2014_vm1 }
 0x2e2   : > { %13124 = vst [vmem:[#allocation172_spill] sm:$0xff] %v7978_v52  ;;  %3508 = vmatprep.mubr.bf16.mxu1 %v2926_v50  ;;  %vm2020_vm5 = vcmp.eq.s32.totalorder %v6144_v5, %v7978_v52  ;;  %vm2019_vm13 = vcmp.eq.s32.totalorder %v6130_v10, %v7978_v52 }
 0x2e3   : > { %3509 = vmatmul.mubr.bf16.gmra.mrb[20].mxu1 %v2925_v60  ;;  %vm2180_vm7 = vmor %vm7950_vm14, %vm2020_vm5  ;;  %vm857_vm5 = vcmp.eq.s32.totalorder %v6144_v5, %v13133_v62 }
 0x2e4   : > { %vm2179_vm4 = vmor %vm1763_vm15, %vm2019_vm13  ;;  %vm601_vm15 = vcmp.eq.s32.totalorder %v6144_v5, %v13132_v46  ;;  %vm600_vm13 = vcmp.eq.s32.totalorder %v6130_v10, %v13132_v46  ;;  %v13140_v46 = vmov 0 }
 0x2e5   : > { %vm2596_vm11 = vmor %vm2180_vm7, %vm2436_vm9  ;;  %vm856_vm7 = vcmp.eq.s32.totalorder %v6130_v10, %v13133_v62 }
 0x2e6   : > { %v7996_v9 = vpop.permute.xlu1 %2315  ;;  %vm2595_vm2 = vmor %vm2179_vm4, %vm2435_vm12  ;;  %v2756_v16 = vsel %vm2596_vm11, 1.0, %v12868_v18 }
 0x2e7   : > { %13128 = vst [vmem:[#allocation173_spill] sm:$0xff] %v7996_v9  ;;  %vm2431_vm3 = vcmp.eq.s32.totalorder %v6144_v5, %v7996_v9  ;;  %vm2430_vm14 = vcmp.eq.s32.totalorder %v6130_v10, %v7996_v9  ;;  %v2755_v11 = vsel %vm2595_vm2, 1.0, %v12868_v18  ;;  %vm1016_vm2 = vmor %vm600_vm13, %vm856_vm7  ;;  %v13148_v9 = vld [vmem:[#allocation27_spill] sm:$0xff] }
 0x2e8   : > { %vm2591_vm6 = vmor %vm2175_vm8, %vm2431_vm3 }
 0x2e9   : > { %v2751_v28 = vsel %vm2591_vm6, 1.0, %v12868_v18  ;;  %vm2590_vm10 = vmor %vm2174_vm0, %vm2430_vm14 }
 0x2ea   : > { %v2886_v1 = vpack.c.bf16 %v2756_v16, %v2751_v28  ;;  %v2750_v55 = vsel %vm2590_vm10, 1.0, %v12868_v18  ;;  %v13135_v16 = vld [vmem:[#allocation76_spill] sm:$0xff]  ;;  %vm1017_vm0 = vmor %vm601_vm15, %vm857_vm5 }
 0x2eb   : > { %v8008_v12 = vpop.permute.xlu1 %1121  ;;  %v2885_v50 = vpack.c.bf16 %v2755_v11, %v2750_v55  ;;  %vm862_vm8 = vcmp.eq.s32.totalorder %v6144_v5, %v13135_v16  ;;  %v13137_v55 = vld [vmem:[#allocation43_spill] sm:$0xff]  ;;  %v13138_v11 = vld [vmem:[#allocation28_spill] sm:$0xff]  ;;  %vm861_vm14 = vcmp.eq.s32.totalorder %v6130_v10, %v13135_v16  ;;  %v13146_v16 = vmov 0 }
 0x2ec   : > { %13129 = vst [vmem:[#allocation174_spill] sm:$0xff] %v8008_v12  ;;  %3444 = vmatprep.mubr.bf16.mxu0 %v2886_v1  ;;  %v8026_v1 = vpop.permute.xlu0 %1537  ;;  %vm606_vm1 = vcmp.eq.s32.totalorder %v6144_v5, %v13137_v55  ;;  %vm1273_vm9 = vcmp.eq.s32.totalorder %v6144_v5, %v8008_v12  ;;  %vm521_vm4 = vcmp.eq.s32.totalorder %v6144_v5, %v13138_v11 }
 0x2ed   : > { %3445 = vmatmul.mubr.bf16.gmra.mrb[20].mxu0 %v2885_v50  ;;  %13136 = vst [vmem:[#allocation178_spill] sm:$0xff] %v8026_v1  ;;  %v13139_v50 = vld [vmem:[#allocation59_spill] sm:$0xff]  ;;  %vm8036_vm12 = vmor %vm606_vm1, %vm862_vm8  ;;  %vm1272_vm3 = vcmp.eq.s32.totalorder %v6130_v10, %v8008_v12  ;;  %vm1689_vm6 = vcmp.eq.s32.totalorder %v6144_v5, %v8026_v1  ;;  %vm1688_vm5 = vcmp.eq.s32.totalorder %v6130_v10, %v8026_v1  ;;  %v13145_v12 = vld [vmem:[#allocation60_spill] sm:$0xff] }
 0x2ee   : > { %vm777_vm11 = vcmp.eq.s32.totalorder %v6144_v5, %v13139_v50  ;;  %v13141_v46 = vsel %vm8036_vm12, 4294967295, %v13140_v46  ;;  %vm1433_vm10 = vmor %vm1017_vm0, %vm1273_vm9  ;;  %vm605_vm8 = vcmp.eq.s32.totalorder %v6130_v10, %v13137_v55  ;;  %vm782_vm13 = vcmp.eq.s32.totalorder %v6144_v5, %v13145_v12 }
 0x2ef   : > { %v8010_v60 = vpop.permute.xlu1 %1124  ;;  %vm8048_vm15 = vmor %vm521_vm4, %vm777_vm11  ;;  %vm526_vm4 = vcmp.eq.s32.totalorder %v6144_v5, %v13148_v9 }
 0x2f0   : > { %13130 = vst [vmem:[#allocation175_spill] sm:$0xff] %v8010_v60  ;;  %vm1432_vm1 = vmor %vm1016_vm2, %vm1272_vm3  ;;  %vm1278_vm7 = vcmp.eq.s32.totalorder %v6144_v5, %v8010_v60  ;;  %vm1277_vm9 = vcmp.eq.s32.totalorder %v6130_v10, %v8010_v60  ;;  %vm13154_vm2 = vnez %v13141_v46  ;;  %v13179_v60 = vmov 0  ;;  %v8168_v46 = vpop.permute.xlu0 %1489 }
 0x2f1   : > { %vm1021_vm12 = vmor %vm605_vm8, %vm861_vm14  ;;  %13181 = vst [vmem:[#allocation18_spill] sm:$0xff] %v8168_v46 }
 0x2f2   : > { %vm8060_vm0 = vmor %vm1433_vm10, %vm1689_vm6 }
 0x2f3   : > { %v13147_v16 = vsel %vm8060_vm0, 4294967295, %v13146_v16  ;;  %vm8072_vm3 = vmor %vm1432_vm1, %vm1688_vm5  ;;  %vm520_vm5 = vcmp.eq.s32.totalorder %v6130_v10, %v13138_v11  ;;  %vm776_vm1 = vcmp.eq.s32.totalorder %v6130_v10, %v13139_v50  ;;  %v13160_v50 = vmov 0 }
 0x2f4   : > { %v8012_v48 = vpop.permute.xlu1 %1540  ;;  %vm8076_vm14 = vmor %vm526_vm4, %vm782_vm13  ;;  %vm781_vm4 = vcmp.eq.s32.totalorder %v6130_v10, %v13145_v12  ;;  %v8693_v31 = vpop.permute.xlu0 %1546 }
 0x2f5   : > { %13131 = vst [vmem:[#allocation176_spill] sm:$0xff] %v8012_v48  ;;  %vm1694_vm11 = vcmp.eq.s32.totalorder %v6144_v5, %v8012_v48  ;;  %v13153_v25 = vsel %vm8076_vm14, 4294967295, %v13152_v25  ;;  %vm1438_vm6 = vmor %vm13154_vm2, %vm1278_vm7  ;;  %vm1693_vm10 = vcmp.eq.s32.totalorder %v6130_v10, %v8012_v48 }
 0x2f6   : > { %vm1437_vm8 = vmor %vm1021_vm12, %vm1277_vm9 }
 0x2f7   : > { %vm8090_vm13 = vmor %vm1438_vm6, %vm1694_vm11  ;;  %vm525_vm6 = vcmp.eq.s32.totalorder %v6130_v10, %v13148_v9  ;;  %v8135_v9 = vadd.s32 256, %v6130_v10 }
 0x2f8   : > { %vm8100_vm9 = vmor %vm1437_vm8, %vm1693_vm10  ;;  %vm13164_vm10 = vnez %v13147_v16 }
 0x2f9   : > { %v8018_v28 = vpop.permute.xlu1 %1073  ;;  %vm8116_vm14 = vmor %vm520_vm5, %vm776_vm1 }
 0x2fa   : > { %13134 = vst [vmem:[#allocation177_spill] sm:$0xff] %v8018_v28  ;;  %vm1193_vm0 = vcmp.eq.s32.totalorder %v6144_v5, %v8018_v28 }
 0x2fb   : > { %vm8110_vm2 = vmor %vm8048_vm15, %vm1193_vm0  ;;  %vm1198_vm0 = vcmp.eq.s32.totalorder %v6144_v5, %v13167_v3 }
 0x2fc   : > { %v13161_v50 = vsel %vm8110_vm2, 4294967295, %v13160_v50  ;;  %vm8130_vm2 = vmor %vm525_vm6, %vm781_vm4  ;;  %vm718_vm4 = vcmp.eq.s32.totalorder %v8135_v9, %v13174_v30  ;;  %vm2526_vm6 = vcmp.eq.s32.totalorder %v6144_v5, %v13175_v39 }
 0x2fe   : > { %v8046_v62 = vpop.permute.xlu1 %1953 }
 0x2ff   : > { %13142 = vst [vmem:[#allocation179_spill] sm:$0xff] %v8046_v62  ;;  %vm2105_vm7 = vcmp.eq.s32.totalorder %v6144_v5, %v8046_v62  ;;  %vm2104_vm15 = vcmp.eq.s32.totalorder %v6130_v10, %v8046_v62 }
 0x300   : > { %vm8122_vm8 = vmor %vm13164_vm10, %vm2105_vm7  ;;  %vm462_vm7 = vcmp.eq.s32.totalorder %v8135_v9, %v13173_v26 }
 0x302   : > { %v8068_v1 = vpop.permute.xlu1 %1956 }
 0x303   : > { %13149 = vst [vmem:[#allocation180_spill] sm:$0xff] %v8068_v1  ;;  %vm2110_vm12 = vcmp.eq.s32.totalorder %v6144_v5, %v8068_v1  ;;  %vm2109_vm11 = vcmp.eq.s32.totalorder %v6130_v10, %v8068_v1  ;;  %v13195_v1 = vld [vmem:[#allocation47_spill] sm:$0xff] }
 0x304   : > { %vm2270_vm5 = vmor %vm8090_vm13, %vm2110_vm12  ;;  %vm13178_vm12 = vnez %v13153_v25  ;;  %v13224_v25 = vld [vmem:[#allocation86_spill] sm:$0xff] }
 0x305   : > { %vm8143_vm1 = vmor %vm8100_vm9, %vm2109_vm11 }
 0x306   : > { %v4596_v11 = vpop.f32.mrb[0].mxu1  ;;  %vm8155_vm13 = vmor %vm8072_vm3, %vm2104_vm15  ;;  %vm2525_vm3 = vcmp.eq.s32.totalorder %v6130_v10, %v13175_v39 }
 0x307   : > { %v8104_v48 = vpop.permute.xlu1 %1492  ;;  %v4597_v4 = vpop.f32.mrb[1].mxu1  ;;  %vm8161_vm9 = vmor %vm13178_vm12, %vm1198_vm0  ;;  %vm1192_vm12 = vcmp.eq.s32.totalorder %v6130_v10, %v8018_v28 }
 0x308   : > { %13159 = vst [vmem:[#allocation181_spill] sm:$0xff] %v8104_v48  ;;  %v8139_v16 = vadd.f32 %v4597_v4, %v4596_v11  ;;  %v4599_v42 = vpop.f32.mrb[2].mxu1  ;;  %v13180_v60 = vsel %vm8161_vm9, 4294967295, %v13179_v60  ;;  %v8166_v11 = vadd.s32 384, %v6130_v10  ;;  %vm2686_vm11 = vmor %vm2270_vm5, %vm2526_vm6  ;;  %vm1197_vm9 = vcmp.eq.s32.totalorder %v6130_v10, %v13167_v3 }
 0x309   : > { %v4600_v56 = vpop.f32.mrb[3].mxu1  ;;  %vm2685_vm0 = vmor %vm8143_vm1, %vm2525_vm3  ;;  %vm1609_vm3 = vcmp.eq.s32.totalorder %v6144_v5, %v8168_v46 }
 0x30a   : > { %13170 = vst [vmem:[#allocation182_spill] sm:$0xff] %v8139_v16  ;;  %v8170_v16 = vadd.f32 %v4600_v56, %v4599_v42  ;;  %vm8190_vm5 = vmor %vm462_vm7, %vm718_vm4  ;;  %vm463_vm1 = vcmp.eq.s32.totalorder %v8166_v11, %v13173_v26  ;;  %v2846_v56 = vsel %vm2686_vm11, 1.0, %v12868_v18  ;;  %vm719_vm4 = vcmp.eq.s32.totalorder %v8166_v11, %v13174_v30 }
 0x30b   : > { %v2845_v55 = vsel %vm2685_vm0, 1.0, %v12868_v18  ;;  %vm8227_vm11 = vmor %vm8130_vm2, %vm1197_vm9  ;;  %vm723_vm9 = vcmp.eq.s32.totalorder %v8135_v9, %v13195_v1 }
 0x30c   : > { %13182 = vst [vmem:[#allocation48_spill] sm:$0xff] %v8170_v16  ;;  %v8172_v36 = vpop.permute.xlu1 %2369 }
 0x30d   : > { %13183 = vst [vmem:[#allocation183_spill] sm:$0xff] %v8172_v36  ;;  %vm2521_vm10 = vcmp.eq.s32.totalorder %v6144_v5, %v8172_v36  ;;  %vm2520_vm15 = vcmp.eq.s32.totalorder %v6130_v10, %v8172_v36 }
 0x30e   : > { %vm2681_vm6 = vmor %vm8122_vm8, %vm2521_vm10  ;;  %vm1608_vm8 = vcmp.eq.s32.totalorder %v6130_v10, %v8168_v46 }
 0x30f   : > { %v2841_v62 = vsel %vm2681_vm6, 1.0, %v12868_v18  ;;  %vm2680_vm7 = vmor %vm8155_vm13, %vm2520_vm15  ;;  %vm1614_vm13 = vcmp.eq.s32.totalorder %v6144_v5, %v8104_v48 }
 0x310   : > { %v2931_v42 = vpack.c.bf16 %v2846_v56, %v2841_v62  ;;  %v2840_v52 = vsel %vm2680_vm7, 1.0, %v12868_v18  ;;  %vm8214_vm10 = vmor %vm8116_vm14, %vm1192_vm12  ;;  %vm13191_vm14 = vnez %v13161_v50  ;;  %vm1613_vm7 = vcmp.eq.s32.totalorder %v6130_v10, %v8104_v48 }
 0x311   : > { %v8220_v39 = vpop.permute.xlu1 %1905  ;;  %v2930_v36 = vpack.c.bf16 %v2845_v55, %v2840_v52  ;;  %vm8236_vm15 = vmor %vm13191_vm14, %vm1609_vm3  ;;  %v13194_v52 = vld [vmem:[#allocation19_spill] sm:$0xff]  ;;  %v8313_v56 = vadd.s32 512, %v6130_v10  ;;  %v13422_v62 = vmov 0 }
 0x312   : > { %13188 = vst [vmem:[#allocation184_spill] sm:$0xff] %v8220_v39  ;;  %3516 = vmatprep.mubr.bf16.mxu1 %v2931_v42  ;;  %vm2025_vm0 = vcmp.eq.s32.totalorder %v6144_v5, %v8220_v39  ;;  %vm467_vm2 = vcmp.eq.s32.totalorder %v8135_v9, %v13194_v52  ;;  %vm8253_vm12 = vmor %vm8214_vm10, %vm1608_vm8  ;;  %vm2024_vm6 = vcmp.eq.s32.totalorder %v6130_v10, %v8220_v39 }
 0x313   : > { %3517 = vmatmul.mubr.bf16.gmra.mrb[24].mxu1 %v2930_v36  ;;  %vm8265_vm3 = vmor %vm463_vm1, %vm719_vm4  ;;  %v13199_v36 = vmov 0  ;;  %vm13201_vm8 = vnez %v13180_v60  ;;  %vm468_vm1 = vcmp.eq.s32.totalorder %v8166_v11, %v13194_v52  ;;  %vm724_vm4 = vcmp.eq.s32.totalorder %v8166_v11, %v13195_v1 }
 0x314   : > { %v4554_v4 = vpop.f32.mrb[4].mxu0  ;;  %v13200_v36 = vsel %vm8265_vm3, 4294967295, %v13199_v36  ;;  %vm8276_vm10 = vmor %vm13201_vm8, %vm1614_vm13  ;;  %v13207_v60 = vmov 0 }
 0x315   : > { %v4555_v12 = vpop.f32.mrb[5].mxu0  ;;  %v8288_v0 = vpop.permute.xlu1 %1908  ;;  %vm2185_vm13 = vmor %vm8236_vm15, %vm2025_vm0 }
 0x316   : > { %v8246_v42 = vadd.f32 %v4555_v12, %v4554_v4  ;;  %v4557_v3 = vpop.f32.mrb[6].mxu0  ;;  %13206 = vst [vmem:[#allocation186_spill] sm:$0xff] %v8288_v0  ;;  %vm8301_vm14 = vmor %vm467_vm2, %vm723_vm9  ;;  %vm2030_vm0 = vcmp.eq.s32.totalorder %v6144_v5, %v8288_v0 }
 0x317   : > { %v4558_v4 = vpop.f32.mrb[7].mxu0  ;;  %v13208_v60 = vsel %vm8301_vm14, 4294967295, %v13207_v60  ;;  %vm2184_vm15 = vmor %vm8253_vm12, %vm2024_vm6 }
 0x318   : > { %v4602_v55 = vpop.f32.mrb[4].mxu1  ;;  %13196 = vst [vmem:[#allocation19_spill] sm:$0xff] %v8246_v42  ;;  %v8286_v28 = vadd.f32 %v4558_v4, %v4557_v3  ;;  %v13209_v3 = vld [vmem:[#allocation79_spill] sm:$0xff]  ;;  %v13211_v4 = vld [vmem:[#allocation110_spill] sm:$0xff]  ;;  %vm8326_vm9 = vmor %vm8227_vm11, %vm1613_vm7  ;;  %vm2029_vm11 = vcmp.eq.s32.totalorder %v6130_v10, %v8288_v0 }
 0x319   : > { %v4603_v16 = vpop.f32.mrb[5].mxu1  ;;  %vm1134_vm8 = vcmp.eq.s32.totalorder %v8135_v9, %v13209_v3  ;;  %vm2441_vm2 = vcmp.eq.s32.totalorder %v6144_v5, %v13211_v4  ;;  %vm8336_vm12 = vmor %vm468_vm1, %vm724_vm4  ;;  %vm2440_vm7 = vcmp.eq.s32.totalorder %v6130_v10, %v13211_v4 }
 0x31a   : > { %v8284_v42 = vadd.f32 %v4603_v16, %v4602_v55  ;;  %v4605_v46 = vpop.f32.mrb[6].mxu1  ;;  %13205 = vst [vmem:[#allocation185_spill] sm:$0xff] %v8286_v28  ;;  %vm8340_vm6 = vmor %vm2185_vm13, %vm2441_vm2  ;;  %v13223_v28 = vld [vmem:[#allocation17_spill] sm:$0xff] }
 0x31b   : > { %v4606_v55 = vpop.f32.mrb[7].mxu1  ;;  %vm8352_vm3 = vmor %vm8190_vm5, %vm1134_vm8  ;;  %vm725_vm5 = vcmp.eq.s32.totalorder %v8313_v56, %v13195_v1  ;;  %v2761_v12 = vsel %vm8340_vm6, 1.0, %v12868_v18  ;;  %v13241_v1 = vld [vmem:[#allocation90_spill] sm:$0xff] }
 0x31c   : > { %13204 = vst [vmem:[#allocation47_spill] sm:$0xff] %v8284_v42  ;;  %v8315_v16 = vadd.f32 %v4606_v55, %v4605_v46  ;;  %vm8356_vm1 = vmor %vm2184_vm15, %vm2440_vm7  ;;  %v13225_v42 = vld [vmem:[#allocation49_spill] sm:$0xff]  ;;  %v13254_v46 = vmov 0 }
 0x31d   : > { %vm2190_vm13 = vmor %vm8276_vm10, %vm2030_vm0  ;;  %vm1135_vm10 = vcmp.eq.s32.totalorder %v8166_v11, %v13209_v3  ;;  %vm1140_vm0 = vcmp.eq.s32.totalorder %v8166_v11, %v13224_v25  ;;  %v2760_v39 = vsel %vm8356_vm1, 1.0, %v12868_v18  ;;  %vm13230_vm1 = vcmp.eq.s32.totalorder %v8313_v56, %v13194_v52  ;;  %v13274_v52 = vld [vmem:[#allocation82_spill] sm:$0xff] }
 0x31e   : > { %13210 = vst [vmem:[#allocation79_spill] sm:$0xff] %v8315_v16  ;;  %v8362_v16 = vpop.permute.xlu1 %2324  ;;  %vm2189_vm7 = vmor %vm8326_vm9, %vm2029_vm11  ;;  %vm729_vm9 = vcmp.eq.s32.totalorder %v8166_v11, %v13225_v42 }
 0x31f   : > { %13222 = vst [vmem:[#allocation187_spill] sm:$0xff] %v8362_v16  ;;  %vm2446_vm15 = vcmp.eq.s32.totalorder %v6144_v5, %v8362_v16  ;;  %vm2445_vm14 = vcmp.eq.s32.totalorder %v6130_v10, %v8362_v16  ;;  %v13226_v16 = vld [vmem:[#allocation50_spill] sm:$0xff] }
 0x320   : > { %vm2606_vm4 = vmor %vm2190_vm13, %vm2446_vm15  ;;  %vm734_vm8 = vcmp.eq.s32.totalorder %v8166_v11, %v13226_v16  ;;  %vm13233_vm15 = vcmp.eq.s32.totalorder %v8313_v56, %v13174_v30 }
 0x321   : > { %v2766_v4 = vsel %vm2606_vm4, 1.0, %v12868_v18  ;;  %vm2605_vm11 = vmor %vm2189_vm7, %vm2445_vm14  ;;  %vm13227_vm14 = vnez %v13200_v36  ;;  %vm728_vm4 = vcmp.eq.s32.totalorder %v8135_v9, %v13225_v42  ;;  %vm13234_vm7 = vcmp.eq.s32.totalorder %v8313_v56, %v13173_v26  ;;  %v13517_v36 = vld [vmem:[#allocation141_spill] sm:$0xff] }
 0x322   : > { %v2891_v0 = vpack.c.bf16 %v2766_v4, %v2761_v12  ;;  %v2765_v50 = vsel %vm2605_vm11, 1.0, %v12868_v18  ;;  %vm8409_vm6 = vmor %vm13227_vm14, %vm1135_vm10  ;;  %vm13237_vm11 = vcmp.eq.s32.totalorder %v8135_v9, %v13224_v25  ;;  %vm13238_vm14 = vnez %v13208_v60  ;;  %v8446_v55 = vpop.permute.xlu1 %1130  ;;  %v13246_v60 = vld [vmem:[#allocation92_spill] sm:$0xff]  ;;  %v13329_v18 = vld [vmem:[#allocation29_spill] sm:$0xff] }
 0x323   : > { %vm8421_vm13 = vmor %vm13230_vm1, %vm725_vm5  ;;  %13242 = vst [vmem:[#allocation17_spill] sm:$0xff] %v8446_v55  ;;  %v2890_v26 = vpack.c.bf16 %v2765_v50, %v2760_v39  ;;  %vm13243_vm1 = vcmp.eq.s32.totalorder %v8166_v11, %v13223_v28  ;;  %v13247_v50 = vld [vmem:[#allocation46_spill] sm:$0xff]  ;;  %v13319_v4 = vmov 0 }
 0x324   : > { %vm8431_vm10 = vmor %vm13234_vm7, %vm13233_vm15  ;;  %vm733_vm7 = vcmp.eq.s32.totalorder %v8135_v9, %v13226_v16  ;;  %3452 = vmatprep.mubr.bf16.mxu0 %v2891_v0  ;;  %13313 = vst [vmem:[#allocation92_spill] sm:$0xff] %v8693_v31  ;;  %v13330_v12 = vld [vmem:[#allocation62_spill] sm:$0xff]  ;;  %v13331_v31 = vld [vmem:[#allocation113_spill] sm:$0xff] }
 0x325   : > { %vm8440_vm2 = vmor %vm13238_vm14, %vm13237_vm11  ;;  %3453 = vmatmul.mubr.bf16.gmra.mrb[24].mxu0 %v2890_v26  ;;  %vm13256_vm14 = vcmp.eq.s32.totalorder %v8135_v9, %v13223_v28  ;;  %v13674_v26 = vld [vmem:[#allocation89_spill] sm:$0xff] }
 0x326   : > { %vm8454_vm15 = vmor %vm13243_vm1, %vm729_vm9  ;;  %vm13259_vm1 = vcmp.eq.s32.totalorder %v8135_v9, %v13241_v1 }
 0x327   : > { %vm8475_vm11 = vmor %vm8336_vm12, %vm1140_vm0  ;;  %vm13253_vm0 = vcmp.eq.s32.totalorder %v8166_v11, %v5891_v38 }
 0x328   : > { %v4608_v30 = vpop.f32.mrb[8].mxu1  ;;  %vm8497_vm5 = vmor %vm13253_vm0, %vm734_vm8  ;;  %vm13271_vm0 = vcmp.eq.s32.totalorder %v6144_v5, %v13247_v50 }
 0x329   : > { %v4609_v39 = vpop.f32.mrb[9].mxu1  ;;  %v13255_v46 = vsel %vm8497_vm5, 4294967295, %v13254_v46  ;;  %vm8507_vm9 = vmor %vm13256_vm14, %vm728_vm4  ;;  %vm13262_vm14 = vcmp.eq.s32.totalorder %v8135_v9, %v5891_v38  ;;  %vm13265_vm4 = vcmp.eq.s32.totalorder %v8135_v9, %v13246_v60 }
 0x32a   : > { %v8483_v0 = vadd.f32 %v4609_v39, %v4608_v30  ;;  %v4611_v21 = vpop.f32.mrb[10].mxu1  ;;  %vm8518_vm8 = vmor %vm8352_vm3, %vm13259_vm1  ;;  %vm13299_vm3 = vcmp.eq.s32.totalorder %v8135_v9, %v13274_v52  ;;  %v13341_v30 = vmov 0 }
 0x32b   : > { %v4612_v39 = vpop.f32.mrb[11].mxu1  ;;  %vm8532_vm12 = vmor %vm13262_vm14, %vm733_vm7  ;;  %vm13270_vm14 = vcmp.eq.s32.totalorder %v6144_v5, %v13249_v43 }
 0x32c   : > { %13252 = vst [vmem:[#allocation86_spill] sm:$0xff] %v8483_v0  ;;  %v13263_v0 = vmov 0  ;;  %vm8547_vm5 = vmor %vm8440_vm2, %vm13265_vm4  ;;  %v8553_v17 = vadd.f32 %v4612_v39, %v4611_v21  ;;  %v8571_v21 = vpop.permute.xlu1 %1543  ;;  %v13276_v39 = vld [vmem:[#allocation78_spill] sm:$0xff]  ;;  %vm13281_vm4 = vcmp.eq.s32.totalorder %v8166_v11, %v13241_v1 }
 0x32d   : > { %v13264_v0 = vsel %vm8532_vm12, 4294967295, %v13263_v0  ;;  %vm8561_vm1 = vmor %vm13271_vm0, %vm13270_vm14  ;;  %13275 = vst [vmem:[#allocation50_spill] sm:$0xff] %v8571_v21  ;;  %vm13277_vm0 = vcmp.eq.s32.totalorder %v6130_v10, %v13249_v43  ;;  %vm13278_vm14 = vcmp.eq.s32.totalorder %v6130_v10, %v13247_v50  ;;  %v13284_v43 = vld [vmem:[#allocation99_spill] sm:$0xff]  ;;  %v13288_v50 = vld [vmem:[#allocation108_spill] sm:$0xff]  ;;  %vm13295_vm12 = vcmp.eq.s32.totalorder %v8166_v11, %v6004_v51 }
 0x32e   : > { %13269 = vst [vmem:[#allocation49_spill] sm:$0xff] %v8553_v17  ;;  %v13273_v29 = vsel %vm8561_vm1, 4294967295, %v13272_v29  ;;  %vm8581_vm1 = vmor %vm13278_vm14, %vm13277_vm0  ;;  %v13279_v17 = vmov 0  ;;  %vm13289_vm0 = vcmp.eq.s32.totalorder %v8166_v11, %v6001_v37  ;;  %vm13290_vm14 = vcmp.eq.s32.totalorder %v8166_v11, %v5899_v41 }
 0x32f   : > { %v13280_v17 = vsel %vm8581_vm1, 4294967295, %v13279_v17  ;;  %vm8590_vm7 = vmor %vm8409_vm6, %vm13281_vm4  ;;  %vm13285_vm1 = vcmp.eq.s32.totalorder %v8166_v11, %v13246_v60  ;;  %vm13314_vm4 = vcmp.eq.s32.totalorder %v6144_v5, %v13276_v39 }
 0x330   : > { %vm8607_vm6 = vmor %vm8475_vm11, %vm13285_vm1  ;;  %vm13293_vm11 = vcmp.eq.s32.totalorder %v8135_v9, %v13268_v32  ;;  %v8742_v48 = vpop.permute.xlu1 %1079 }
 0x331   : > { %vm8621_vm2 = vmor %vm13290_vm14, %vm13289_vm0  ;;  %vm13296_vm0 = vcmp.eq.s32.totalorder %v8166_v11, %v5897_v40  ;;  %13328 = vst [vmem:[#allocation99_spill] sm:$0xff] %v8742_v48  ;;  %v13333_v48 = vmov 0 }
 0x332   : > { %v13292_v34 = vsel %vm8621_vm2, 4294967295, %v13291_v34  ;;  %vm2126_vm1 = vmor %vm8518_vm8, %vm13293_vm11  ;;  %vm13302_vm8 = vcmp.eq.s32.totalorder %v8166_v11, %v6008_v57  ;;  %vm13303_vm11 = vcmp.eq.s32.totalorder %v8166_v11, %v5906_v44 }
 0x333   : > { %vm8640_vm14 = vmor %vm13296_vm0, %vm13295_vm12 }
 0x334   : > { %vm8657_vm12 = vmor %vm8547_vm5, %vm13299_vm3  ;;  %vm13306_vm3 = vcmp.eq.s32.totalorder %v8313_v56, %v13224_v25  ;;  %vm13315_vm5 = vcmp.eq.s32.totalorder %v6144_v5, %v13248_v63  ;;  %v13564_v25 = vmov 0 }
 0x335   : > { %vm8669_vm2 = vmor %vm13303_vm11, %vm13302_vm8  ;;  %vm13309_vm8 = vcmp.eq.s32.totalorder %v8135_v9, %v13284_v43 }
 0x336   : > { %v13305_v54 = vsel %vm8669_vm2, 4294967295, %v13304_v54  ;;  %vm8682_vm0 = vmor %vm8421_vm13, %vm13306_vm3  ;;  %vm13325_vm13 = vcmp.eq.s32.totalorder %v8166_v11, %v13288_v50 }
 0x337   : > { %vm8689_vm11 = vmor %vm2126_vm1, %vm13309_vm8  ;;  %vm13318_vm1 = vcmp.eq.s32.totalorder %v8166_v11, %v13268_v32  ;;  %vm13321_vm8 = vcmp.eq.s32.totalorder %v8166_v11, %v13274_v52  ;;  %v13337_v32 = vmov 0 }
 0x338   : > { %v13311_v47 = vsel %vm8689_vm11, 4294967295, %v13310_v47  ;;  %vm8701_vm2 = vmor %vm13315_vm5, %vm13314_vm4 }
 0x339   : > { %13312 = vst [vmem:[#allocation90_spill] sm:$0xff] %v13311_v47  ;;  %vm8712_vm3 = vmor %vm8590_vm7, %vm13318_vm1  ;;  %v13324_v47 = vld [vmem:[#allocation61_spill] sm:$0xff]  ;;  %vm13340_vm1 = vcmp.eq.s32.totalorder %v8135_v9, %v5897_v40 }
 0x33a   : > { %v13320_v4 = vsel %vm8712_vm3, 4294967295, %v13319_v4  ;;  %vm8721_vm4 = vmor %vm8607_vm6, %vm13321_vm8  ;;  %vm13332_vm8 = vcmp.eq.s32.totalorder %v8135_v9, %v13288_v50  ;;  %vm13339_vm6 = vcmp.eq.s32.totalorder %v8135_v9, %v6004_v51  ;;  %v13348_v51 = vmov 0 }
 0x33b   : > { %v13323_v58 = vsel %vm8721_vm4, 4294967295, %v13322_v58  ;;  %vm8732_vm7 = vmor %vm8454_vm15, %vm13325_vm13  ;;  %vm13335_vm15 = vcmp.eq.s32.totalorder %v8135_v9, %v6001_v37  ;;  %vm13336_vm13 = vcmp.eq.s32.totalorder %v8135_v9, %v5899_v41  ;;  %v13345_v37 = vmov 0 }
 0x33c   : > { %vm8759_vm11 = vmor %vm8507_vm9, %vm13332_vm8  ;;  %vm13343_vm8 = vcmp.eq.s32.totalorder %v8166_v11, %v12949_v20  ;;  %vm13371_vm4 = vnez %v13273_v29  ;;  %v13377_v29 = vld [vmem:[#allocation101_spill] sm:$0xff]  ;;  %v13388_v41 = vmov 0 }
 0x33d   : > { %v13334_v48 = vsel %vm8759_vm11, 4294967295, %v13333_v48  ;;  %vm8769_vm5 = vmor %vm13336_vm13, %vm13335_vm15  ;;  %vm13344_vm11 = vcmp.eq.s32.totalorder %v8166_v11, %v12954_v61  ;;  %vm13347_vm13 = vcmp.eq.s32.totalorder %v8313_v56, %v13209_v3  ;;  %v13356_v3 = vmov 0 }
 0x33e   : > { %v13338_v32 = vsel %vm8769_vm5, 4294967295, %v13337_v32  ;;  %vm8779_vm9 = vmor %vm13340_vm1, %vm13339_vm6  ;;  %vm13354_vm1 = vcmp.eq.s32.totalorder %v8313_v56, %v13226_v16  ;;  %vm13355_vm6 = vcmp.eq.s32.totalorder %v8313_v56, %v5891_v38  ;;  %v13360_v16 = vmov 0 }
 0x33f   : > { %v13342_v30 = vsel %vm8779_vm9, 4294967295, %v13341_v30  ;;  %vm8789_vm15 = vmor %vm13344_vm11, %vm13343_vm8  ;;  %vm13350_vm11 = vcmp.eq.s32.totalorder %v8166_v11, %v6282_v24  ;;  %vm13351_vm8 = vnez %v13255_v46  ;;  %v8902_v46 = vpop.permute.xlu1 %1082  ;;  %v13401_v38 = vmov 0 }
 0x340   : > { %v13346_v37 = vsel %vm8789_vm15, 4294967295, %v13345_v37  ;;  %vm8798_vm5 = vmor %vm8431_vm10, %vm13347_vm13  ;;  %vm13358_vm10 = vcmp.eq.s32.totalorder %v6130_v10, %v13276_v39  ;;  %vm13359_vm13 = vcmp.eq.s32.totalorder %v6130_v10, %v13248_v63  ;;  %13378 = vst [vmem:[#allocation108_spill] sm:$0xff] %v8902_v46  ;;  %v13408_v63 = vmov 0 }
 0x341   : > { %v13349_v51 = vsel %vm8798_vm5, 4294967295, %v13348_v51  ;;  %vm8811_vm15 = vmor %vm13351_vm8, %vm13350_vm11  ;;  %vm13366_vm8 = vcmp.eq.s32.totalorder %v8313_v56, %v13225_v42  ;;  %vm13370_vm11 = vcmp.eq.s32.totalorder %v6144_v5, %v6504_v33  ;;  %v13511_v42 = vmov 0 }
 0x342   : > { %vm8825_vm5 = vmor %vm13355_vm6, %vm13354_vm1  ;;  %vm13362_vm1 = vcmp.eq.s32.totalorder %v8135_v9, %v6282_v24  ;;  %vm13363_vm6 = vnez %v13264_v0  ;;  %v4560_v0 = vpop.f32.mrb[8].mxu0 }
 0x343   : > { %v13357_v3 = vsel %vm8825_vm5, 4294967295, %v13356_v3  ;;  %vm8839_vm9 = vmor %vm13359_vm13, %vm13358_vm10  ;;  %vm13367_vm10 = vcmp.eq.s32.totalorder %v8313_v56, %v13223_v28  ;;  %v13372_v28 = vmov 0 }
 0x344   : > { %v13361_v16 = vsel %vm8839_vm9, 4294967295, %v13360_v16  ;;  %vm8848_vm5 = vmor %vm13363_vm6, %vm13362_vm1  ;;  %vm13379_vm1 = vcmp.eq.s32.totalorder %v6130_v10, %v6504_v33  ;;  %v4561_v33 = vpop.f32.mrb[9].mxu0 }
 0x345   : > { %vm8860_vm13 = vmor %vm13367_vm10, %vm13366_vm8  ;;  %vm13374_vm8 = vcmp.eq.s32.totalorder %v8166_v11, %v13331_v31  ;;  %v4563_v46 = vpop.f32.mrb[10].mxu0 }
 0x346   : > { %vm8875_vm3 = vmor %vm13371_vm4, %vm13370_vm11  ;;  %vm13380_vm4 = vnez %v13280_v17  ;;  %vm13383_vm11 = vcmp.eq.s32.totalorder %v8166_v11, %v6770_v35  ;;  %v8926_v17 = vpop.permute.xlu0 %1498  ;;  %v4564_v53 = vpop.f32.mrb[11].mxu0 }
 0x347   : > { %v13373_v28 = vsel %vm8875_vm3, 4294967295, %v13372_v28  ;;  %vm8884_vm10 = vmor %vm8732_vm7, %vm13374_vm8  ;;  %13386 = vst [vmem:[#allocation113_spill] sm:$0xff] %v8926_v17  ;;  %vm13390_vm8 = vcmp.eq.s32.totalorder %v8166_v11, %v6746_v23  ;;  %v8954_v17 = vadd.f32 %v4561_v33, %v4560_v0  ;;  %v13399_v33 = vmov 0  ;;  %v13505_v0 = vld [vmem:[#allocation96_spill] sm:$0xff] }
 0x348   : > { %vm8909_vm6 = vmor %vm13380_vm4, %vm13379_vm1  ;;  %vm13391_vm1 = vnez %v13292_v34  ;;  %v13537_v34 = vmov 0 }
 0x349   : > { %v13382_v59 = vsel %vm8909_vm6, 4294967295, %v13381_v59  ;;  %vm8920_vm7 = vmor %vm8811_vm15, %vm13383_vm11  ;;  %vm13387_vm15 = vcmp.eq.s32.totalorder %v8135_v9, %v6770_v35  ;;  %13394 = vst [vmem:[#allocation101_spill] sm:$0xff] %v8954_v17  ;;  %v13445_v17 = vmov 0 }
 0x34a   : > { %vm8939_vm11 = vmor %vm8848_vm5, %vm13387_vm15  ;;  %vm1982_vm5 = vcmp.eq.s32.totalorder %v8166_v11, %v6344_v13  ;;  %vm13395_vm15 = vcmp.eq.s32.totalorder %v8166_v11, %v6303_v27 }
 0x34b   : > { %v13389_v41 = vsel %vm8939_vm11, 4294967295, %v13388_v41  ;;  %vm8948_vm6 = vmor %vm13391_vm1, %vm13390_vm8  ;;  %vm13398_vm11 = vcmp.eq.s32.totalorder %v8135_v9, %v13377_v29  ;;  %vm13403_vm1 = vcmp.eq.s32.totalorder %v8166_v11, %v7128_v15  ;;  %vm13421_vm8 = vnez %v13323_v58 }
 0x34c   : > { %vm8963_vm4 = vmor %vm8640_vm14, %vm13395_vm15  ;;  %v13431_v58 = vmov 0 }
 0x34d   : > { %vm8978_vm3 = vmor %vm8657_vm12, %vm13398_vm11  ;;  %vm13404_vm12 = vnez %v13305_v54  ;;  %v9016_v54 = vadd.f32 %v4564_v53, %v4563_v46  ;;  %v9081_v46 = vpop.permute.xlu0 %1959  ;;  %v9083_v53 = vpop.permute.xlu1 %1962 }
 0x34e   : > { %v13400_v33 = vsel %vm8978_vm3, 4294967295, %v13399_v33  ;;  %vm8986_vm15 = vmor %vm8920_vm7, %vm1982_vm5  ;;  %vm13407_vm5 = vcmp.eq.s32.totalorder %v8313_v56, %v13246_v60  ;;  %v13417_v60 = vmov 0  ;;  %13437 = vst [vmem:[#allocation192_spill] sm:$0xff] %v9081_v46  ;;  %vm13448_vm3 = vcmp.eq.s32.totalorder %v8135_v9, %v6746_v23 }
 0x34f   : > { %v13402_v38 = vsel %vm8986_vm15, 4294967295, %v13401_v38  ;;  %vm8997_vm11 = vmor %vm13404_vm12, %vm13403_vm1  ;;  %13411 = vst [vmem:[#allocation189_spill] sm:$0xff] %v9016_v54  ;;  %vm13412_vm12 = vcmp.eq.s32.totalorder %v6144_v5, %v8446_v55  ;;  %vm13420_vm1 = vcmp.eq.s32.totalorder %v8166_v11, %v13377_v29  ;;  %v13441_v54 = vmov 0 }
 0x350   : > { %vm9010_vm9 = vmor %vm8682_vm0, %vm13407_vm5  ;;  %vm13415_vm0 = vcmp.eq.s32.totalorder %v8166_v11, %v13284_v43  ;;  %vm13416_vm5 = vnez %v13320_v4  ;;  %v13435_v4 = vmov 0  ;;  %13438 = vst [vmem:[#allocation193_spill] sm:$0xff] %v9083_v53 }
 0x351   : > { %v13409_v63 = vsel %vm9010_vm9, 4294967295, %v13408_v63  ;;  %vm9023_vm7 = vmor %vm8701_vm2, %vm13412_vm12  ;;  %vm13425_vm2 = vcmp.eq.s32.totalorder %v6144_v5, %v13324_v47  ;;  %vm13426_vm12 = vcmp.eq.s32.totalorder %v6144_v5, %v13294_v6 }
 0x352   : > { %13410 = vst [vmem:[#allocation188_spill] sm:$0xff] %v13409_v63  ;;  %vm9032_vm14 = vmor %vm13416_vm5, %vm13415_vm0  ;;  %v13474_v63 = vld [vmem:[#allocation90_spill] sm:$0xff] }
 0x353   : > { %v13418_v60 = vsel %vm9032_vm14, 4294967295, %v13417_v60  ;;  %vm9041_vm9 = vmor %vm13421_vm8, %vm13420_vm1  ;;  %vm13429_vm8 = vcmp.eq.s32.totalorder %v8135_v9, %v6008_v57  ;;  %vm13430_vm1 = vcmp.eq.s32.totalorder %v8135_v9, %v5906_v44  ;;  %v13465_v57 = vld [vmem:[#allocation51_spill] sm:$0xff]  ;;  %v13469_v44 = vmov 0 }
 0x354   : > { %13419 = vst [vmem:[#allocation190_spill] sm:$0xff] %v13418_v60  ;;  %v13423_v62 = vsel %vm9041_vm9, 4294967295, %v13422_v62  ;;  %vm9051_vm15 = vmor %vm13426_vm12, %vm13425_vm2  ;;  %vm13433_vm2 = vcmp.eq.s32.totalorder %v8135_v9, %v12949_v20  ;;  %vm13434_vm12 = vcmp.eq.s32.totalorder %v8135_v9, %v12954_v61  ;;  %v13450_v61 = vmov 0  ;;  %v13464_v20 = vld [vmem:[#allocation20_spill] sm:$0xff] }
 0x355   : > { %13424 = vst [vmem:[#allocation191_spill] sm:$0xff] %v13423_v62  ;;  %vm9065_vm9 = vmor %vm13430_vm1, %vm13429_vm8  ;;  %vm13439_vm8 = vcmp.eq.s32.totalorder %v6144_v5, %v13330_v12  ;;  %vm13440_vm1 = vcmp.eq.s32.totalorder %v6144_v5, %v13329_v18  ;;  %v13472_v62 = vld [vmem:[#allocation92_spill] sm:$0xff]  ;;  %v13473_v60 = vmov 0.0  }
 0x356   : > { %v13432_v58 = vsel %vm9065_vm9, 4294967295, %v13431_v58  ;;  %vm9075_vm0 = vmor %vm13434_vm12, %vm13433_vm2  ;;  %vm13443_vm2 = vcmp.eq.s32.totalorder %v8135_v9, %v13331_v31  ;;  %vm13444_vm12 = vnez %v13334_v48  ;;  %v13454_v48 = vmov 0 }
 0x357   : > { %v13436_v4 = vsel %vm9075_vm0, 4294967295, %v13435_v4  ;;  %vm9091_vm14 = vmor %vm13440_vm1, %vm13439_vm8  ;;  %vm13449_vm0 = vnez %v13338_v32  ;;  %vm13452_vm8 = vcmp.eq.s32.totalorder %v8135_v9, %v6303_v27  ;;  %vm13453_vm1 = vnez %v13342_v30 }
 0x358   : > { %v13442_v54 = vsel %vm9091_vm14, 4294967295, %v13441_v54  ;;  %vm9100_vm5 = vmor %vm13444_vm12, %vm13443_vm2  ;;  %vm13456_vm2 = vcmp.eq.s32.totalorder %v8166_v11, %v7141_v7  ;;  %vm13457_vm12 = vnez %v13346_v37  ;;  %v13458_v32 = vmov 0  ;;  %v13466_v37 = vld [vmem:[#allocation52_spill] sm:$0xff] }
 0x359   : > { %v13446_v17 = vsel %vm9100_vm5, 4294967295, %v13445_v17  ;;  %vm9109_vm9 = vmor %vm13449_vm0, %vm13448_vm3  ;;  %vm13460_vm3 = vcmp.eq.s32.totalorder %v8166_v11, %v13013_v49  ;;  %vm13461_vm0 = vcmp.eq.s32.totalorder %v8166_v11, %v13012_v22  ;;  %v13462_v30 = vmov 0  ;;  %v13604_v39 = vld [vmem:[#allocation188_spill] sm:$0xff] }
 0x35a   : > { %13447 = vst [vmem:[#allocation194_spill] sm:$0xff] %v13446_v17  ;;  %v13451_v61 = vsel %vm9109_vm9, 4294967295, %v13450_v61  ;;  %vm9118_vm14 = vmor %vm13453_vm1, %vm13452_vm8  ;;  %v13471_v17 = vld [vmem:[#allocation97_spill] sm:$0xff]  ;;  %vm13482_vm8 = vcmp.eq.s32.totalorder %v6130_v10, %v13329_v18  ;;  %v13489_v18 = vmov 0 }
 0x35b   : > { %v13455_v48 = vsel %vm9118_vm14, 4294967295, %v13454_v48  ;;  %vm9127_vm5 = vmor %vm13457_vm12, %vm13456_vm2  ;;  %vm13467_vm12 = vcmp.eq.s32.totalorder %v8313_v56, %v13241_v1  ;;  %vm13475_vm2 = vnez %v13474_v63  ;;  %v13483_v1 = vmov 0 }
 0x35c   : > { %v13459_v32 = vsel %vm9127_vm5, 4294967295, %v13458_v32  ;;  %vm9137_vm9 = vmor %vm13461_vm0, %vm13460_vm3  ;;  %vm13468_vm5 = vnez %v13349_v51  ;;  %vm1704_vm0 = vcmp.eq.s32.totalorder %v6144_v5, %v13472_v62  ;;  %v9165_v52 = vsel %vm13475_vm2, 1.0, %v13473_v60 }
 0x35d   : > { %v13463_v30 = vsel %vm9137_vm9, 4294967295, %v13462_v30  ;;  %vm9152_vm14 = vmor %vm13468_vm5, %vm13467_vm12  ;;  %13476 = vst [vmem:[#allocation20_spill] sm:$0xff] %v9165_v52  ;;  %vm13477_vm5 = vcmp.eq.s32.totalorder %v6130_v10, %v13324_v47  ;;  %vm13478_vm12 = vcmp.eq.s32.totalorder %v6130_v10, %v13294_v6  ;;  %vm13481_vm3 = vcmp.eq.s32.totalorder %v6130_v10, %v13330_v12  ;;  %v13546_v6 = vld [vmem:[#allocation132_spill] sm:$0xff]  ;;  %v13547_v52 = vld [vmem:[#allocation133_spill] sm:$0xff] }
 0x35e   : > { %v13470_v44 = vsel %vm9152_vm14, 4294967295, %v13469_v44  ;;  %vm9173_vm1 = vmor %vm13478_vm12, %vm13477_vm5  ;;  %vm13485_vm2 = vcmp.eq.s32.totalorder %v8166_v11, %v7008_v2  ;;  %vm13488_vm5 = vcmp.eq.s32.totalorder %v8166_v11, %v6934_v14  ;;  %v13495_v12 = vmov 0 }
 0x35f   : > { %vm9183_vm14 = vmor %vm13482_vm8, %vm13481_vm3  ;;  %vm13491_vm8 = vcmp.eq.s32.totalorder %v8313_v56, %v6282_v24  ;;  %vm13492_vm3 = vnez %v13357_v3  ;;  %v13502_v24 = vmov 0  ;;  %v13504_v3 = vld [vmem:[#allocation120_spill] sm:$0xff]  ;;  %v13544_v47 = vmov 0 }
 0x360   : > { %v13484_v1 = vsel %vm9183_vm14, 4294967295, %v13483_v1  ;;  %vm9192_vm9 = vmor %vm8948_vm6, %vm13485_vm2  ;;  %vm13498_vm2 = vnez %v13361_v16  ;;  %v13507_v16 = vmov 0  ;;  %v13625_v51 = vmov 0 }
 0x361   : > { %vm9201_vm12 = vmor %vm8963_vm4, %vm13488_vm5  ;;  %vm13497_vm4 = vcmp.eq.s32.totalorder %v6130_v10, %v8446_v55  ;;  %v13520_v55 = vmov 0 }
 0x362   : > { %v13490_v18 = vsel %vm9201_vm12, 4294967295, %v13489_v18  ;;  %vm9210_vm14 = vmor %vm13492_vm3, %vm13491_vm8  ;;  %vm13501_vm8 = vcmp.eq.s32.totalorder %v8166_v11, %v6114_v19  ;;  %vm13536_vm12 = vcmp.eq.s32.totalorder %v6144_v5, %v9081_v46 }
 0x363   : > { %vm9216_vm6 = vmor %vm9023_vm7, %vm1704_vm0  ;;  %vm13510_vm7 = vcmp.eq.s32.totalorder %v8166_v11, %v13022_v45 }
 0x364   : > { %v13496_v12 = vsel %vm9216_vm6, 4294967295, %v13495_v12  ;;  %vm9225_vm5 = vmor %vm13498_vm2, %vm13497_vm4  ;;  %vm13506_vm6 = vcmp.eq.s32.totalorder %v8313_v56, %v13288_v50  ;;  %vm13518_vm4 = vcmp.eq.s32.totalorder %v8313_v56, %v13465_v57  ;;  %vm13519_vm2 = vcmp.eq.s32.totalorder %v8313_v56, %v13464_v20  ;;  %v13531_v20 = vld [vmem:[#allocation99_spill] sm:$0xff] }
 0x365   : > { %vm9234_vm3 = vmor %vm8884_vm10, %vm13501_vm8  ;;  %vm13509_vm8 = vcmp.eq.s32.totalorder %v8166_v11, %v13019_v8  ;;  %v13540_v50 = vmov 0  ;;  %v13549_v57 = vmov 0 }
 0x366   : > { %v13503_v24 = vsel %vm9234_vm3, 4294967295, %v13502_v24  ;;  %vm9251_vm10 = vmor %vm8860_vm13, %vm13506_vm6  ;;  %vm13513_vm13 = vcmp.eq.s32.totalorder %v6144_v5, %v8571_v21  ;;  %vm13514_vm6 = vnez %v13373_v28  ;;  %v13524_v28 = vmov 0 }
 0x367   : > { %v13508_v16 = vsel %vm9251_vm10, 4294967295, %v13507_v16  ;;  %vm9261_vm0 = vmor %vm13510_vm7, %vm13509_vm8  ;;  %vm1703_vm8 = vcmp.eq.s32.totalorder %v6130_v10, %v13472_v62  ;;  %vm13526_vm3 = vcmp.eq.s32.totalorder %v6130_v10, %v8571_v21  ;;  %v13535_v62 = vld [vmem:[#allocation108_spill] sm:$0xff]  ;;  %v13539_v21 = vld [vmem:[#allocation150_spill] sm:$0xff] }
 0x368   : > { %v13512_v42 = vsel %vm9261_vm0, 4294967295, %v13511_v42  ;;  %vm9274_vm10 = vmor %vm13514_vm6, %vm13513_vm13  ;;  %vm13522_vm13 = vcmp.eq.s32.totalorder %v8313_v56, %v13466_v37  ;;  %vm13523_vm6 = vcmp.eq.s32.totalorder %v8313_v56, %v5897_v40  ;;  %v13530_v40 = vld [vmem:[#allocation142_spill] sm:$0xff]  ;;  %v13660_v37 = vmov 0 }
 0x369   : > { %vm9288_vm0 = vmor %vm13519_vm2, %vm13518_vm4  ;;  %vm13527_vm4 = vnez %v13382_v59  ;;  %v9323_v59 = vpop.permute.xlu1 %1495 }
 0x36a   : > { %v13521_v55 = vsel %vm9288_vm0, 4294967295, %v13520_v55  ;;  %vm9298_vm7 = vmor %vm13523_vm6, %vm13522_vm13  ;;  %vm2114_vm0 = vcmp.eq.s32.totalorder %v6130_v10, %v9081_v46  ;;  %13532 = vst [vmem:[#allocation51_spill] sm:$0xff] %v9323_v59  ;;  %vm13543_vm13 = vnez %v13389_v41  ;;  %v13553_v41 = vmov 0 }
 0x36b   : > { %v13525_v28 = vsel %vm9298_vm7, 4294967295, %v13524_v28  ;;  %vm9309_vm2 = vmor %vm13527_vm4, %vm13526_vm3  ;;  %vm13559_vm4 = vnez %v13432_v58  ;;  %v13560_v46 = vmov 0 }
 0x36c   : > { %vm9327_vm3 = vmor %vm9225_vm5, %vm1703_vm8 }
 0x36d   : > { %vm9342_vm6 = vmor %vm9274_vm10, %vm13536_vm12  ;;  %vm13542_vm10 = vcmp.eq.s32.totalorder %v8135_v9, %v6344_v13 }
 0x36e   : > { %v13538_v34 = vsel %vm9342_vm6, 4294967295, %v13537_v34  ;;  %vm9361_vm12 = vmor %vm9309_vm2, %vm2114_vm0  ;;  %vm13548_vm0 = vcmp.eq.s32.totalorder %v8166_v11, %v13517_v36 }
 0x36f   : > { %v13541_v50 = vsel %vm9361_vm12, 4294967295, %v13540_v50  ;;  %vm9370_vm8 = vmor %vm13543_vm13, %vm13542_vm10  ;;  %vm13551_vm13 = vcmp.eq.s32.totalorder %v8135_v9, %v13013_v49  ;;  %vm13552_vm10 = vcmp.eq.s32.totalorder %v8135_v9, %v13012_v22  ;;  %v13566_v49 = vld [vmem:[#allocation118_spill] sm:$0xff]  ;;  %v9537_v22 = vpop.permute.xlu1 %2375 }
 0x370   : > { %v13545_v47 = vsel %vm9370_vm8, 4294967295, %v13544_v47  ;;  %vm9383_vm2 = vmor %vm8997_vm11, %vm13548_vm0  ;;  %vm13555_vm0 = vcmp.eq.s32.totalorder %v6144_v5, %v13531_v20  ;;  %vm13562_vm11 = vcmp.eq.s32.totalorder %v8135_v9, %v7141_v7  ;;  %vm507_vm8 = vcmp.eq.s32.totalorder %v8135_v9, %v13022_v45  ;;  %13608 = vst [vmem:[#allocation52_spill] sm:$0xff] %v9537_v22  ;;  %v13611_v7 = vld [vmem:[#allocation191_spill] sm:$0xff] }
 0x371   : > { %v13550_v57 = vsel %vm9383_vm2, 4294967295, %v13549_v57  ;;  %vm9393_vm5 = vmor %vm13552_vm10, %vm13551_vm13  ;;  %vm13558_vm10 = vcmp.eq.s32.totalorder %v8135_v9, %v7128_v15  ;;  %vm13572_vm13 = vcmp.eq.s32.totalorder %v8166_v11, %v13505_v0  ;;  %v13574_v45 = vmov 0  ;;  %v13687_v15 = vld [vmem:[#allocation58_spill] sm:$0xff] }
 0x372   : > { %v13554_v41 = vsel %vm9393_vm5, 4294967295, %v13553_v41  ;;  %vm9408_vm2 = vmor %vm9051_vm15, %vm13555_vm0  ;;  %vm13563_vm15 = vnez %v13436_v4  ;;  %vm13577_vm5 = vnez %v13451_v61  ;;  %v13664_v4 = vmov 0 }
 0x373   : > { %vm9419_vm7 = vmor %vm13559_vm4, %vm13558_vm10  ;;  %vm13567_vm10 = vnez %v13400_v33  ;;  %v13721_v61 = vmov 0 }
 0x374   : > { %v13561_v46 = vsel %vm9419_vm7, 4294967295, %v13560_v46  ;;  %vm9428_vm0 = vmor %vm13563_vm15, %vm13562_vm11  ;;  %v9441_v58 = vsel %vm13567_vm10, 1.0, %v13473_v60  ;;  %vm13568_vm11 = vcmp.eq.s32.totalorder %v6144_v5, %v13535_v62  ;;  %vm13569_vm15 = vnez %v13442_v54 }
 0x375   : > { %v13565_v25 = vsel %vm9428_vm0, 4294967295, %v13564_v25  ;;  %vm9448_vm0 = vmor %vm13569_vm15, %vm13568_vm11  ;;  %vm13573_vm7 = vnez %v13402_v38  ;;  %vm13576_vm10 = vcmp.eq.s32.totalorder %v8135_v9, %v7008_v2  ;;  %vm13580_vm11 = vcmp.eq.s32.totalorder %v8135_v9, %v6934_v14 }
 0x376   : > { %vm9457_vm4 = vmor %vm13573_vm7, %vm13572_vm13  ;;  %vm13581_vm15 = vnez %v13455_v48  ;;  %v13582_v38 = vmov 0  ;;  %vm13584_vm7 = vcmp.eq.s32.totalorder %v8166_v11, %v13530_v40  ;;  %vm13585_vm13 = vnez %v13459_v32 }
 0x377   : > { %v13575_v45 = vsel %vm9457_vm4, 4294967295, %v13574_v45  ;;  %vm9466_vm12 = vmor %vm13577_vm5, %vm13576_vm10  ;;  %vm13588_vm5 = vcmp.eq.s32.totalorder %v8313_v56, %v6770_v35  ;;  %v13589_v54 = vmov 0  ;;  %v13593_v48 = vmov 0 }
 0x378   : > { %vm9475_vm6 = vmor %vm13581_vm15, %vm13580_vm11  ;;  %vm13591_vm11 = vcmp.eq.s32.totalorder %v8166_v11, %v13539_v21  ;;  %vm13592_vm15 = vnez %v13463_v30  ;;  %v13596_v35 = vmov 0  ;;  %v13600_v32 = vmov 0  ;;  %v13602_v30 = vld [vmem:[#allocation82_spill] sm:$0xff] }
 0x379   : > { %v13583_v38 = vsel %vm9475_vm6, 4294967295, %v13582_v38  ;;  %vm9484_vm4 = vmor %vm13585_vm13, %vm13584_vm7  ;;  %vm13603_vm7 = vcmp.eq.s32.totalorder %v8313_v56, %v13602_v30  ;;  %vm13605_vm13 = vnez %v13604_v39  ;;  %v13614_v39 = vmov 0 }
 0x37a   : > { %vm9493_vm10 = vmor %vm9210_vm14, %vm13588_vm5  ;;  %vm13595_vm14 = vcmp.eq.s32.totalorder %v8135_v9, %v13019_v8  ;;  %v13606_v8 = vmov 0 }
 0x37b   : > { %v13590_v54 = vsel %vm9493_vm10, 4294967295, %v13589_v54  ;;  %vm9502_vm6 = vmor %vm13592_vm15, %vm13591_vm11  ;;  %vm13598_vm10 = vcmp.eq.s32.totalorder %v8313_v56, %v13471_v17  ;;  %vm13599_vm11 = vnez %v13470_v44  ;;  %v13609_v44 = vld [vmem:[#allocation190_spill] sm:$0xff] }
 0x37c   : > { %v13594_v48 = vsel %vm9502_vm6, 4294967295, %v13593_v48  ;;  %vm9513_vm5 = vmor %vm507_vm8, %vm13595_vm14  ;;  %vm13612_vm14 = vnez %v13611_v7  ;;  %v13621_v7 = vmov 0 }
 0x37d   : > { %v13597_v35 = vsel %vm9513_vm5, 4294967295, %v13596_v35  ;;  %vm9522_vm15 = vmor %vm13599_vm11, %vm13598_vm10  ;;  %vm13610_vm10 = vnez %v13609_v44  ;;  %v9547_v30 = vsel %vm13612_vm14, 1.0, %v13473_v60  ;;  %vm13616_vm11 = vcmp.eq.s32.totalorder %v6130_v10, %v13535_v62 }
 0x37e   : > { %v13601_v32 = vsel %vm9522_vm15, 4294967295, %v13600_v32  ;;  %vm9531_vm6 = vmor %vm13605_vm13, %vm13603_vm7  ;;  %v9542_v17 = vsel %vm13610_vm10, 1.0, %v13473_v60  ;;  %vm13613_vm7 = vcmp.eq.s32.totalorder %v6130_v10, %v13531_v20  ;;  %vm13617_vm10 = vnez %v13484_v1  ;;  %v13627_v1 = vld [vmem:[#allocation113_spill] sm:$0xff]  ;;  %v13651_v20 = vld [vmem:[#allocation155_spill] sm:$0xff] }
 0x37f   : > { %v13607_v8 = vsel %vm9531_vm6, 4294967295, %v13606_v8  ;;  %vm9554_vm13 = vmor %vm9173_vm1, %vm13613_vm7  ;;  %vm13620_vm6 = vcmp.eq.s32.totalorder %v8166_v11, %v13546_v6  ;;  %vm13623_vm7 = vcmp.eq.s32.totalorder %v8166_v11, %v13547_v52  ;;  %vm13633_vm14 = vnez %v13503_v24 }
 0x380   : > { %v13615_v39 = vsel %vm9554_vm13, 4294967295, %v13614_v39  ;;  %vm9563_vm8 = vmor %vm13617_vm10, %vm13616_vm11  ;;  %vm13624_vm11 = vnez %v13490_v18  ;;  %vm1624_vm13 = vcmp.eq.s32.totalorder %v6144_v5, %v13627_v1  ;;  %v13634_v18 = vmov 0 }
 0x381   : > { %vm9574_vm1 = vmor %vm9192_vm9, %vm13620_vm6  ;;  %vm13628_vm9 = vcmp.eq.s32.totalorder %v6144_v5, %v9083_v53  ;;  %vm13629_vm6 = vnez %v13496_v12  ;;  %vm13637_vm15 = vcmp.eq.s32.totalorder %v8135_v9, %v6114_v19  ;;  %v13638_v12 = vld [vmem:[#allocation194_spill] sm:$0xff]  ;;  %v13640_v62 = vmov 0 }
 0x382   : > { %v13622_v7 = vsel %vm9574_vm1, 4294967295, %v13621_v7  ;;  %vm9583_vm10 = vmor %vm13624_vm11, %vm13623_vm7  ;;  %vm13632_vm11 = vcmp.eq.s32.totalorder %v8166_v11, %v13504_v3  ;;  %vm13642_vm5 = vcmp.eq.s32.totalorder %v8313_v56, %v13331_v31  ;;  %v13644_v24 = vmov 0 }
 0x383   : > { %v13626_v51 = vsel %vm9583_vm10, 4294967295, %v13625_v51  ;;  %vm9596_vm1 = vmor %vm13629_vm6, %vm13628_vm9  ;;  %vm13639_vm9 = vnez %v13638_v12  ;;  %v13649_v12 = vmov 0  ;;  %vm13658_vm7 = vcmp.eq.s32.totalorder %v8313_v56, %v6746_v23 }
 0x384   : > { %vm9607_vm10 = vmor %vm13633_vm14, %vm13632_vm11  ;;  %vm13643_vm14 = vnez %v13508_v16  ;;  %v13655_v16 = vmov 0  ;;  %v13667_v23 = vmov 0  ;;  %v13702_v44 = vmov 0 }
 0x385   : > { %v13635_v18 = vsel %vm9607_vm10, 4294967295, %v13634_v18  ;;  %vm9616_vm6 = vmor %vm13639_vm9, %vm13637_vm15  ;;  %vm13647_vm10 = vcmp.eq.s32.totalorder %v8166_v11, %v13566_v49  ;;  %vm13648_vm15 = vnez %v13512_v42  ;;  %v13657_v42 = vld [vmem:[#allocation100_spill] sm:$0xff] }
 0x386   : > { %13636 = vst [vmem:[#allocation97_spill] sm:$0xff] %v13635_v18  ;;  %v13641_v62 = vsel %vm9616_vm6, 4294967295, %v13640_v62  ;;  %vm9627_vm11 = vmor %vm13643_vm14, %vm13642_vm5  ;;  %vm13652_vm5 = vcmp.eq.s32.totalorder %v6130_v10, %v9083_v53  ;;  %vm13666_vm6 = vcmp.eq.s32.totalorder %v6144_v5, %v9323_v59  ;;  %v13679_v53 = vld [vmem:[#allocation145_spill] sm:$0xff] }
 0x387   : > { %v13645_v24 = vsel %vm9627_vm11, 4294967295, %v13644_v24  ;;  %vm9636_vm9 = vmor %vm13648_vm15, %vm13647_vm10  ;;  %vm13662_vm10 = vcmp.eq.s32.totalorder %v8313_v56, %v6303_v27  ;;  %v9700_v27 = vpop.permute.xlu0 %1911 }
 0x388   : > { %13646 = vst [vmem:[#allocation90_spill] sm:$0xff] %v13645_v24  ;;  %v13650_v12 = vsel %vm9636_vm9, 4294967295, %v13649_v12  ;;  %vm9649_vm14 = vmor %vm9327_vm3, %vm13652_vm5  ;;  %vm13659_vm3 = vnez %v13521_v55  ;;  %v13669_v55 = vld [vmem:[#allocation134_spill] sm:$0xff] }
 0x389   : > { %vm9657_vm15 = vmor %vm9448_vm0, %vm1624_vm13  ;;  %vm13663_vm0 = vnez %v13525_v28  ;;  %13670 = vst [vmem:[#allocation120_spill] sm:$0xff] %v9700_v27  ;;  %v9702_v28 = vpop.permute.xlu1 %2378 }
 0x38a   : > { %v13656_v16 = vsel %vm9657_vm15, 4294967295, %v13655_v16  ;;  %vm9668_vm5 = vmor %vm13659_vm3, %vm13658_vm7  ;;  %13671 = vst [vmem:[#allocation96_spill] sm:$0xff] %v9702_v28  ;;  %vm13675_vm15 = vcmp.eq.s32.totalorder %v6130_v10, %v9537_v22  ;;  %vm13724_vm3 = vnez %v13607_v8  ;;  %v13734_v8 = vmov 0 }
 0x38b   : > { %v13661_v37 = vsel %vm9668_vm5, 4294967295, %v13660_v37  ;;  %vm9677_vm13 = vmor %vm13663_vm0, %vm13662_vm10  ;;  %vm2535_vm5 = vcmp.eq.s32.totalorder %v6130_v10, %v9702_v28  ;;  %v9768_v19 = vpop.permute.xlu0 %2330 }
 0x38c   : > { %v13665_v4 = vsel %vm9677_vm13, 4294967295, %v13664_v4  ;;  %vm9686_vm11 = vmor %vm9408_vm2, %vm13666_vm6  ;;  %vm13672_vm2 = vcmp.eq.s32.totalorder %v6144_v5, %v9537_v22  ;;  %vm13673_vm6 = vnez %v13538_v34  ;;  %vm2536_vm13 = vcmp.eq.s32.totalorder %v6144_v5, %v9702_v28  ;;  %v13685_v28 = vld [vmem:[#allocation26_spill] sm:$0xff]  ;;  %v13686_v22 = vld [vmem:[#allocation57_spill] sm:$0xff]  ;;  %13693 = vst [vmem:[#allocation142_spill] sm:$0xff] %v9768_v19 }
 0x38d   : > { %v13668_v23 = vsel %vm9686_vm11, 4294967295, %v13667_v23  ;;  %vm2691_vm7 = vmor %vm13673_vm6, %vm13672_vm2  ;;  %vm13676_vm2 = vnez %v13541_v50  ;;  %vm13680_vm11 = vcmp.eq.s32.totalorder %v8135_v9, %v13539_v21  ;;  %v13682_v50 = vmov 0  ;;  %v13692_v21 = vld [vmem:[#allocation154_spill] sm:$0xff]  ;;  %v9857_v34 = vpop.permute.xlu1 %1914 }
 0x38e   : > { %vm9724_vm6 = vmor %vm13676_vm2, %vm13675_vm15  ;;  %vm13681_vm15 = vnez %v13554_v41  ;;  %v2851_v63 = vsel %vm2691_vm7, 1.0, %v13473_v60  ;;  %v13690_v41 = vmov 0  ;;  %13727 = vst [vmem:[#allocation132_spill] sm:$0xff] %v9857_v34 }
 0x38f   : > { %vm2696_vm9 = vmor %vm9596_vm1, %vm2536_vm13  ;;  %vm13688_vm13 = vcmp.eq.s32.totalorder %v8135_v9, %v13517_v36  ;;  %v2850_v31 = vsel %vm9724_vm6, 1.0, %v13473_v60  ;;  %vm13701_vm6 = vcmp.eq.s32.totalorder %v8135_v9, %v13546_v6 }
 0x390   : > { %vm9741_vm2 = vmor %vm13681_vm15, %vm13680_vm11  ;;  %v2856_v24 = vsel %vm2696_vm9, 1.0, %v13473_v60  ;;  %vm13689_vm15 = vnez %v13561_v46  ;;  %vm13694_vm9 = vcmp.eq.s32.totalorder %v6130_v10, %v13627_v1  ;;  %vm13719_vm11 = vcmp.eq.s32.totalorder %v8313_v56, %v13284_v43  ;;  %v13797_v43 = vld [vmem:[#allocation102_spill] sm:$0xff] }
 0x391   : > { %v13683_v50 = vsel %vm9741_vm2, 4294967295, %v13682_v50  ;;  %vm2695_vm1 = vmor %vm9649_vm14, %vm2535_vm5  ;;  %vm13697_vm5 = vcmp.eq.s32.totalorder %v8135_v9, %v13505_v0  ;;  %v13802_v46 = vld [vmem:[#allocation22_spill] sm:$0xff] }
 0x392   : > { %13684 = vst [vmem:[#allocation141_spill] sm:$0xff] %v13683_v50  ;;  %vm9762_vm10 = vmor %vm13689_vm15, %vm13688_vm13  ;;  %v2936_v50 = vpack.c.bf16 %v2856_v24, %v2851_v63  ;;  %v2855_v18 = vsel %vm2695_vm1, 1.0, %v13473_v60  ;;  %vm13698_vm13 = vnez %v13545_v47  ;;  %v13699_v24 = vmov 0 }
 0x393   : > { %v13691_v41 = vsel %vm9762_vm10, 4294967295, %v13690_v41  ;;  %vm9779_vm14 = vmor %vm9563_vm8, %vm13694_vm9  ;;  %vm13704_vm8 = vcmp.eq.s32.totalorder %v8135_v9, %v13547_v52  ;;  %vm13705_vm9 = vnez %v13583_v38  ;;  %v13713_v38 = vmov 0 }
 0x394   : > { %vm9788_vm15 = vmor %vm13698_vm13, %vm13697_vm5  ;;  %vm13708_vm5 = vcmp.eq.s32.totalorder %v8166_v11, %v13674_v26  ;;  %vm13709_vm13 = vnez %v13550_v57  ;;  %v13717_v57 = vmov 0  ;;  %v2935_v63 = vpack.c.bf16 %v2855_v18, %v2850_v31  ;;  %3524 = vmatprep.mubr.bf16.mxu1 %v2936_v50 }
 0x395   : > { %v13700_v24 = vsel %vm9788_vm15, 4294967295, %v13699_v24  ;;  %vm9797_vm1 = vmor %vm9466_vm12, %vm13701_vm6  ;;  %vm13712_vm12 = vcmp.eq.s32.totalorder %v8166_v11, %v13679_v53  ;;  %vm13746_vm15 = vnez %v13668_v23  ;;  %vm13751_vm10 = vnez %v13641_v62 }
 0x396   : > { %v13703_v44 = vsel %vm9797_vm1, 4294967295, %v13702_v44  ;;  %vm9806_vm0 = vmor %vm13705_vm9, %vm13704_vm8  ;;  %vm13715_vm9 = vcmp.eq.s32.totalorder %v8135_v9, %v13566_v49  ;;  %vm13723_vm8 = vcmp.eq.s32.totalorder %v8313_v56, %v13377_v29  ;;  %v13738_v29 = vmov 0  ;;  %3525 = vmatmul.mubr.bf16.gmra.mrb[28].mxu1 %v2935_v63  ;;  %v13796_v63 = vld [vmem:[#allocation146_spill] sm:$0xff] }
 0x397   : > { %vm9815_vm7 = vmor %vm13709_vm13, %vm13708_vm5  ;;  %vm13716_vm5 = vnez %v13597_v35  ;;  %v13725_v35 = vmov 0  ;;  %v13763_v62 = vmov 0  ;;  %v13774_v23 = vmov 0 }
 0x398   : > { %vm9824_vm6 = vmor %vm9484_vm4, %vm13712_vm12  ;;  %vm13720_vm4 = vnez %v13601_v32  ;;  %v13740_v32 = vld [vmem:[#allocation25_spill] sm:$0xff]  ;;  %v13793_v50 = vmov 0 }
 0x399   : > { %v13714_v38 = vsel %vm9824_vm6, 4294967295, %v13713_v38  ;;  %vm9835_vm13 = vmor %vm13716_vm5, %vm13715_vm9  ;;  %vm13728_vm9 = vcmp.eq.s32.totalorder %v6130_v10, %v9323_v59  ;;  %v13818_v47 = vld [vmem:[#allocation141_spill] sm:$0xff] }
 0x39a   : > { %v13718_v57 = vsel %vm9835_vm13, 4294967295, %v13717_v57  ;;  %vm9844_vm12 = vmor %vm13720_vm4, %vm13719_vm11  ;;  %vm13729_vm11 = vnez %v13615_v39  ;;  %vm518_vm4 = vcmp.eq.s32.totalorder %v8166_v11, %v13740_v32 }
 0x39b   : > { %v13722_v61 = vsel %vm9844_vm12, 4294967295, %v13721_v61  ;;  %vm9853_vm6 = vmor %vm13724_vm3, %vm13723_vm8  ;;  %vm13732_vm3 = vcmp.eq.s32.totalorder %v8166_v11, %v13669_v55  ;;  %vm13733_vm8 = vnez %v13626_v51  ;;  %vm1983_vm12 = vcmp.eq.s32.totalorder %v8313_v56, %v6344_v13 }
 0x39c   : > { %v13726_v35 = vsel %vm9853_vm6, 4294967295, %v13725_v35  ;;  %vm9864_vm5 = vmor %vm13729_vm11, %vm13728_vm9  ;;  %vm13736_vm9 = vcmp.eq.s32.totalorder %v8135_v9, %v13530_v40  ;;  %vm13737_vm11 = vnez %v13565_v25  ;;  %v13743_v13 = vmov 0 }
 0x39d   : > { %vm9875_vm6 = vmor %vm13733_vm8, %vm13732_vm3  ;;  %vm13741_vm3 = vcmp.eq.s32.totalorder %v8166_v11, %v13686_v22  ;;  %vm13742_vm8 = vcmp.eq.s32.totalorder %v8166_v11, %v13685_v28  ;;  %v2863_v25 = vpack.c.bf16 %v9547_v30, %v9542_v17  ;;  %v13752_v17 = vmov 0 }
 0x39e   : > { %v13735_v8 = vsel %vm9875_vm6, 4294967295, %v13734_v8  ;;  %vm9886_vm1 = vmor %vm13737_vm11, %vm13736_vm9  ;;  %vm2040_vm9 = vcmp.eq.s32.totalorder %v6144_v5, %v9857_v34  ;;  %vm13745_vm11 = vcmp.eq.s32.totalorder %v6144_v5, %v9700_v27  ;;  %v13755_v30 = vmov 0 }
 0x39f   : > { %v13739_v29 = vsel %vm9886_vm1, 4294967295, %v13738_v29  ;;  %vm9898_vm6 = vmor %vm13742_vm8, %vm13741_vm3  ;;  %vm13749_vm3 = vnez %v13575_v45  ;;  %vm13758_vm8 = vnez %v13594_v48  ;;  %v13768_v48 = vld [vmem:[#allocation20_spill] sm:$0xff]  ;;  %3565 = vmatprep.mubr.bf16.mxu1 %v2863_v25  ;;  %v10042_v25 = vpop.permute.xlu1 %2327 }
 0x3a0   : > { %v13744_v13 = vsel %vm9898_vm6, 4294967295, %v13743_v13  ;;  %vm9911_vm1 = vmor %vm13746_vm15, %vm13745_vm11  ;;  %v9918_v51 = vsel %vm13749_vm3, 1.0, %v13473_v60  ;;  %vm13750_vm6 = vcmp.eq.s32.totalorder %v8135_v9, %v13504_v3  ;;  %vm13754_vm15 = vnez %v13590_v54  ;;  %13798 = vst [vmem:[#allocation133_spill] sm:$0xff] %v10042_v25 }
 0x3a1   : > { %vm9927_vm13 = vmor %vm13751_vm10, %vm13750_vm6  ;;  %vm13757_vm3 = vcmp.eq.s32.totalorder %v8166_v11, %v13651_v20  ;;  %vm13761_vm10 = vcmp.eq.s32.totalorder %v8166_v11, %v13692_v21  ;;  %vm13762_vm6 = vnez %v13650_v12  ;;  %v13766_v54 = vmov 0 }
 0x3a2   : > { %v13753_v17 = vsel %vm9927_vm13, 4294967295, %v13752_v17  ;;  %vm9933_vm11 = vmor %vm13754_vm15, %vm1983_vm12  ;;  %vm13765_vm12 = vcmp.eq.s32.totalorder %v8166_v11, %v13687_v15  ;;  %v2862_v18 = vpack.c.bf16 %v9441_v58, %v13768_v48  ;;  %v13778_v58 = vmov 0  ;;  %v13803_v48 = vld [vmem:[#allocation53_spill] sm:$0xff] }
 0x3a3   : > { %v13756_v30 = vsel %vm9933_vm11, 4294967295, %v13755_v30  ;;  %vm9942_vm2 = vmor %vm13758_vm8, %vm13757_vm3  ;;  %vm13769_vm3 = vnez %v13656_v16  ;;  %v13784_v16 = vld [vmem:[#allocation97_spill] sm:$0xff] }
 0x3a4   : > { %vm9951_vm13 = vmor %vm13762_vm6, %vm13761_vm10  ;;  %vm13780_vm6 = vcmp.eq.s32.totalorder %v8313_v56, %v6934_v14  ;;  %vm13785_vm8 = vnez %v13784_v16  ;;  %v13789_v14 = vld [vmem:[#allocation85_spill] sm:$0xff]  ;;  %3566 = vmatmul.mubr.bf16.vlgmr.msra.gmra.mrb[32].mxu1 %v2862_v18  ;;  %v13875_v18 = vmov 0 }
 0x3a5   : > { %v13764_v62 = vsel %vm9951_vm13, 4294967295, %v13763_v62  ;;  %vm9958_vm15 = vmor %vm518_vm4, %vm13765_vm12  ;;  %vm13772_vm4 = vcmp.eq.s32.totalorder %v8166_v11, %v13657_v42  ;;  %vm13773_vm12 = vnez %v13622_v7  ;;  %v13782_v7 = vmov 0  ;;  %v2940_v16 = vld [vmem:[%s5709_s16] sm:$0xff] }
 0x3a6   : > { %v13767_v54 = vsel %vm9958_vm15, 4294967295, %v13766_v54  ;;  %vm9968_vm10 = vmor %vm13769_vm3, %vm2040_vm9  ;;  %vm13776_vm9 = vcmp.eq.s32.totalorder %v8313_v56, %v7008_v2  ;;  %vm13777_vm3 = vnez %v13661_v37  ;;  %v2713_v2 = vsel %vm13785_vm8, 1.0, %v13473_v60  ;;  %v13908_v37 = vld [vmem:[#allocation93_spill] sm:$0xff] }
 0x3a7   : > { %vm9979_vm11 = vmor %vm13773_vm12, %vm13772_vm4  ;;  %vm13781_vm4 = vnez %v13665_v4  ;;  %v13791_v4 = vld [vmem:[#allocation90_spill] sm:$0xff]  ;;  %v2868_v31 = vpack.c.bf16 %v9918_v51, %v2713_v2  ;;  %v13936_v51 = vmov 0 }
 0x3a8   : > { %v13775_v23 = vsel %vm9979_vm11, 4294967295, %v13774_v23  ;;  %vm9990_vm15 = vmor %vm13777_vm3, %vm13776_vm9  ;;  %vm13786_vm9 = vcmp.eq.s32.totalorder %v6130_v10, %v9700_v27  ;;  %vm13790_vm11 = vcmp.eq.s32.totalorder %v8313_v56, %v13789_v14  ;;  %vm13792_vm8 = vnez %v13791_v4  ;;  %v2941_v2 = vld [vmem:[%s5709_s16 + $0x8] sm:$0xff] }
 0x3a9   : > { %v13779_v58 = vsel %vm9990_vm15, 4294967295, %v13778_v58  ;;  %vm9999_vm12 = vmor %vm13781_vm4, %vm13780_vm6  ;;  %vm2451_vm6 = vcmp.eq.s32.totalorder %v6144_v5, %v10042_v25  ;;  %v13807_v14 = vld [vmem:[#allocation162_spill] sm:$0xff]  ;;  %v2972_v59 = vpack.c.bf16 %v2941_v2, %v2940_v16  ;;  %3573 = vmatprep.mubr.bf16.mxu1 %v2868_v31 }
 0x3aa   : > { %v13783_v7 = vsel %vm9999_vm12, 4294967295, %v13782_v7  ;;  %vm10011_vm3 = vmor %vm9864_vm5, %vm13786_vm9  ;;  %vm13795_vm9 = vcmp.eq.s32.totalorder %v6130_v10, %v9857_v34  ;;  %vm13799_vm5 = vcmp.eq.s32.totalorder %v6144_v5, %v9768_v19  ;;  %v13808_v5 = vld [vmem:[#allocation157_spill] sm:$0xff]  ;;  %v13809_v4 = vld [vmem:[#allocation158_spill] sm:$0xff] }
 0x3ab   : > { %vm10024_vm12 = vmor %vm13792_vm8, %vm13790_vm11  ;;  %vm2001_vm8 = vcmp.eq.s32.totalorder %v8135_v9, %v13679_v53  ;;  %vm1185_vm11 = vcmp.eq.s32.totalorder %v8166_v11, %v13807_v14  ;;  %v13826_v34 = vld [vmem:[#allocation168_spill] sm:$0xff]  ;;  %v2942_v2 = vld [vmem:[%s5709_s16 + $0x10] sm:$0xff] }
 0x3ac   : > { %v13794_v50 = vsel %vm10024_vm12, 4294967295, %v13793_v50  ;;  %vm2199_vm4 = vmor %vm9779_vm14, %vm13795_vm9  ;;  %vm2007_vm9 = vcmp.eq.s32.totalorder %v8166_v11, %v13808_v5 }
 0x3ad   : > { %vm10049_vm12 = vmor %vm9968_vm10, %vm13799_vm5  ;;  %vm2450_vm10 = vcmp.eq.s32.totalorder %v6130_v10, %v10042_v25  ;;  %vm13804_vm5 = vcmp.eq.s32.totalorder %v6130_v10, %v9768_v19  ;;  %v13810_v10 = vld [vmem:[#allocation163_spill] sm:$0xff] }
 0x3ae   : > { %vm10068_vm15 = vmor %vm2199_vm4, %vm13804_vm5  ;;  %v2776_v25 = vsel %vm10049_vm12, 1.0, %v13473_v60  ;;  %vm13814_vm5 = vcmp.eq.s32.totalorder %v8166_v11, %v13796_v63 }
 0x3af   : > { %vm2611_vm14 = vmor %vm9911_vm1, %vm2451_vm6  ;;  %vm13811_vm6 = vcmp.eq.s32.totalorder %v8135_v9, %v13669_v55 }
 0x3b0   : > { %v2771_v19 = vsel %vm2611_vm14, 1.0, %v13473_v60  ;;  %vm2610_vm1 = vmor %vm10011_vm3, %vm2450_vm10  ;;  %vm13817_vm3 = vcmp.eq.s32.totalorder %v8135_v9, %v13651_v20 }
 0x3b1   : > { %vm10099_vm4 = vmor %vm9806_vm0, %vm13811_vm6  ;;  %vm13819_vm0 = vnez %v13818_v47  ;;  %vm13822_vm6 = vcmp.eq.s32.totalorder %v8135_v9, %v13692_v21  ;;  %v2896_v1 = vpack.c.bf16 %v2776_v25, %v2771_v19  ;;  %v2770_v27 = vsel %vm2610_vm1, 1.0, %v13473_v60 }
 0x3b2   : > { %vm10108_vm14 = vmor %vm9815_vm7, %vm13814_vm5  ;;  %vm13823_vm7 = vnez %v13718_v57  ;;  %v2775_v47 = vsel %vm10068_vm15, 1.0, %v13473_v60  ;;  %v13832_v19 = vmov 0  ;;  %vm13834_vm15 = vnez %v13744_v13  ;;  %v13856_v13 = vld [vmem:[#allocation54_spill] sm:$0xff]  ;;  %v13971_v57 = vld [vmem:[#allocation60_spill] sm:$0xff] }
 0x3b3   : > { %vm10119_vm10 = vmor %vm13819_vm0, %vm13817_vm3  ;;  %vm13827_vm3 = vcmp.eq.s32.totalorder %v8135_v9, %v13674_v26  ;;  %vm13828_vm0 = vnez %v13691_v41  ;;  %v2895_v25 = vpack.c.bf16 %v2775_v47, %v2770_v27  ;;  %v13844_v27 = vmov 0  ;;  %3460 = vmatprep.mubr.bf16.mxu0 %v2896_v1  ;;  %v2943_v47 = vld [vmem:[%s5709_s16 + $0x18] sm:$0xff] }
 0x3b4   : > { %vm10128_vm5 = vmor %vm13823_vm7, %vm13822_vm6  ;;  %vm13831_vm7 = vnez %v13739_v29  ;;  %v13840_v29 = vmov 0  ;;  %v13862_v1 = vmov 0 }
 0x3b5   : > { %vm10143_vm6 = vmor %vm13828_vm0, %vm13827_vm3  ;;  %vm13837_vm3 = vnez %v13700_v24  ;;  %vm13839_vm0 = vnez %v13703_v44  ;;  %v13846_v24 = vmov 0  ;;  %v13850_v44 = vmov 0  ;;  %3461 = vmatmul.mubr.bf16.gmra.mrb[28].mxu0 %v2895_v25 }
 0x3b6   : > { %vm10152_vm1 = vmor %vm13831_vm7, %vm2001_vm8  ;;  %v2717_v12 = vsel %vm13837_vm3, 1.0, %v13473_v60  ;;  %vm13838_vm8 = vcmp.eq.s32.totalorder %v8135_v9, %v13657_v42  ;;  %3726 = vmatprep.mubr.bf16.mxu0 %v2972_v59 }
 0x3b7   : > { %v13833_v19 = vsel %vm10152_vm1, 4294967295, %v13832_v19  ;;  %vm10161_vm12 = vmor %vm13834_vm15, %vm1185_vm11  ;;  %vm13842_vm11 = vcmp.eq.s32.totalorder %v8166_v11, %v13797_v43  ;;  %vm13843_vm15 = vnez %v13714_v38  ;;  %v13912_v38 = vld [vmem:[#allocation106_spill] sm:$0xff] }
 0x3b8   : > { %vm10173_vm7 = vmor %vm13839_vm0, %vm13838_vm8  ;;  %vm13848_vm8 = vcmp.eq.s32.totalorder %v8166_v11, %v13809_v4  ;;  %vm13849_vm0 = vnez %v13764_v62 }
 0x3b9   : > { %v13841_v29 = vsel %vm10173_vm7, 4294967295, %v13840_v29  ;;  %vm10182_vm13 = vmor %vm13843_vm15, %vm13842_vm11  ;;  %vm13852_vm11 = vcmp.eq.s32.totalorder %v8166_v11, %v13810_v10  ;;  %vm13853_vm15 = vnez %v13767_v54 }
 0x3ba   : > { %v13845_v27 = vsel %vm10182_vm13, 4294967295, %v13844_v27  ;;  %vm10191_vm3 = vmor %vm9942_vm2, %vm2007_vm9  ;;  %vm13857_vm9 = vnez %v13735_v8 }
 0x3bb   : > { %v13847_v24 = vsel %vm10191_vm3, 4294967295, %v13846_v24  ;;  %vm10200_vm7 = vmor %vm13849_vm0, %vm13848_vm8  ;;  %v2728_v45 = vsel %vm13857_vm9, 1.0, %v13473_v60  ;;  %vm13858_vm8 = vnez %v13722_v61  ;;  %vm13859_vm0 = vnez %v13726_v35  ;;  %v13871_v35 = vld [vmem:[#allocation137_spill] sm:$0xff] }
 0x3bc   : > { %v13851_v44 = vsel %vm10200_vm7, 4294967295, %v13850_v44  ;;  %vm10209_vm13 = vmor %vm13853_vm15, %vm13852_vm11  ;;  %v10221_v62 = vsel %vm13858_vm8, 1.0, %v13473_v60  ;;  %v10226_v54 = vsel %vm13859_vm0, 1.0, %v13473_v60  ;;  %vm13860_vm11 = vcmp.eq.s32.totalorder %v8313_v56, %v13546_v6 }
 0x3bd   : > { %vm13861_vm15 = vnez %v13779_v58  ;;  %vm13864_vm9 = vcmp.eq.s32.totalorder %v8313_v56, %v13547_v52  ;;  %vm13865_vm8 = vnez %v13783_v7  ;;  %v13866_v61 = vmov 0  ;;  %v4614_v52 = vpop.f32.mrb[12].mxu1 }
 0x3be   : > { %vm10233_vm2 = vmor %vm13861_vm15, %vm13860_vm11  ;;  %vm13868_vm0 = vcmp.eq.s32.totalorder %v8166_v11, %v13826_v34  ;;  %vm13877_vm11 = vcmp.eq.s32.totalorder %v8313_v56, %v13505_v0  ;;  %vm13878_vm15 = vnez %v13756_v30  ;;  %v13879_v58 = vmov 0  ;;  %v13886_v0 = vld [vmem:[#allocation138_spill] sm:$0xff]  ;;  %v13887_v30 = vld [vmem:[#allocation169_spill] sm:$0xff]  ;;  %v4615_v7 = vpop.f32.mrb[13].mxu1 }
 0x3bf   : > { %v13863_v1 = vsel %vm10233_vm2, 4294967295, %v13862_v1  ;;  %vm10242_vm3 = vmor %vm13865_vm8, %vm13864_vm9  ;;  %vm13872_vm9 = vnez %v13753_v17  ;;  %vm13873_vm8 = vcmp.eq.s32.totalorder %v8313_v56, %v13504_v3  ;;  %v13881_v17 = vld [vmem:[#allocation21_spill] sm:$0xff]  ;;  %v2864_v33 = vpack.c.bf16 %v10226_v54, %v10221_v62 }
 0x3c0   : > { %v13867_v61 = vsel %vm10242_vm3, 4294967295, %v13866_v61  ;;  %vm10251_vm1 = vmor %vm10161_vm12, %vm13868_vm0  ;;  %v2712_v8 = vsel %vm13872_vm9, 1.0, %v13473_v60  ;;  %vm13874_vm12 = vnez %v13794_v50  ;;  %vm499_vm9 = vcmp.eq.s32.totalorder %v8313_v56, %v13881_v17  ;;  %v2944_v3 = vld [vmem:[%s5709_s16 + $0x20] sm:$0xff] }
 0x3c1   : > { %vm10267_vm0 = vmor %vm13874_vm12, %vm13873_vm8  ;;  %vm13882_vm3 = vcmp.eq.s32.totalorder %v8313_v56, %v13803_v48  ;;  %vm13883_vm8 = vcmp.eq.s32.totalorder %v8313_v56, %v13802_v46  ;;  %v2867_v50 = vpack.c.bf16 %v2717_v12, %v2712_v8  ;;  %v10304_v46 = vadd.f32 %v4615_v7, %v4614_v52  ;;  %v4617_v48 = vpop.f32.mrb[14].mxu1  ;;  %v13897_v12 = vld [vmem:[#allocation159_spill] sm:$0xff]  ;;  %3727 = vmatmul.mubr.bf16.vlgmr.msra.gmra.mrb[32].mxu0 %v2864_v33 }
 0x3c2   : > { %v13876_v18 = vsel %vm10267_vm0, 4294967295, %v13875_v18  ;;  %vm10276_vm2 = vmor %vm13878_vm15, %vm13877_vm11  ;;  %vm13888_vm15 = vnez %v13775_v23  ;;  %vm13891_vm0 = vcmp.eq.s32.totalorder %v8313_v56, %v13871_v35  ;;  %v4618_v59 = vpop.f32.mrb[15].mxu1  ;;  %v13892_v23 = vld [vmem:[#allocation172_spill] sm:$0xff]  ;;  %vm13893_vm11 = vcmp.eq.s32.totalorder %v8313_v56, %v13886_v0  ;;  %v2945_v0 = vld [vmem:[%s5709_s16 + $0x28] sm:$0xff] }
 0x3c3   : > { %v13880_v58 = vsel %vm10276_vm2, 4294967295, %v13879_v58  ;;  %vm10288_vm12 = vmor %vm13883_vm8, %vm13882_vm3  ;;  %v2723_v31 = vsel %vm13888_vm15, 1.0, %v13473_v60  ;;  %vm13889_vm2 = vcmp.eq.s32.totalorder %v8313_v56, %v13856_v13  ;;  %13890 = vst [vmem:[#allocation118_spill] sm:$0xff] %v10304_v46  ;;  %v10332_v25 = vadd.f32 %v4618_v59, %v4617_v48  ;;  %3574 = vmatmul.mubr.bf16.gmra.mrb[36].mxu1 %v2867_v50  ;;  %v13960_v48 = vld [vmem:[#allocation28_spill] sm:$0xff]  ;;  %v2946_v52 = vld [vmem:[%s5709_s16 + $0x30] sm:$0xff] }
 0x3c4   : > { %vm915_vm3 = vmor %vm499_vm9, %vm13889_vm2  ;;  %v2873_v16 = vpack.c.bf16 %v2728_v45, %v2723_v31  ;;  %vm13898_vm8 = vcmp.eq.s32.totalorder %v8313_v56, %v13517_v36  ;;  %v2973_v45 = vpack.c.bf16 %v2943_v47, %v2942_v2  ;;  %v13916_v62 = vmov 0  ;;  %v13961_v2 = vld [vmem:[#allocation173_spill] sm:$0xff]  ;;  %v13965_v47 = vld [vmem:[#allocation59_spill] sm:$0xff] }
 0x3c5   : > { %vm1326_vm2 = vmor %vm10288_vm12, %vm13891_vm0  ;;  %13896 = vst [vmem:[#allocation82_spill] sm:$0xff] %v10332_v25  ;;  %vm13901_vm12 = vcmp.eq.s32.totalorder %v8135_v9, %v13808_v5  ;;  %vm13907_vm0 = vcmp.eq.s32.totalorder %v8166_v11, %v13887_v30  ;;  %v2727_v54 = vsel %vm10099_vm4, 1.0, %v13473_v60  ;;  %v13923_v6 = vmov 0  ;;  %v13989_v36 = vld [vmem:[#allocation121_spill] sm:$0xff]  ;;  %v14125_v25 = vld [vmem:[#allocation171_spill] sm:$0xff] }
 0x3c6   : > { %vm10326_vm15 = vmor %vm915_vm3, %vm13893_vm11  ;;  %3581 = vmatprep.mubr.bf16.mxu1 %v2873_v16  ;;  %3734 = vmatprep.mubr.bf16.mxu0 %v2973_v45  ;;  %v2974_v41 = vpack.c.bf16 %v2945_v0, %v2944_v3  ;;  %v13973_v35 = vmov 0  ;;  %v13980_v8 = vmov 0  ;;  %v2947_v3 = vld [vmem:[%s5709_s16 + $0x38] sm:$0xff]  ;;  %v14026_v31 = vld [vmem:[#allocation61_spill] sm:$0xff] }
 0x3c7   : > { %vm10339_vm9 = vmor %vm1326_vm2, %vm13898_vm8  ;;  %vm13904_vm8 = vcmp.eq.s32.totalorder %v8135_v9, %v13809_v4  ;;  %v14126_v46 = vld [vmem:[#allocation189_spill] sm:$0xff] }
 0x3c8   : > { %vm10354_vm7 = vmor %vm10119_vm10, %vm13901_vm12  ;;  %vm2017_vm10 = vcmp.eq.s32.totalorder %v8166_v11, %v13908_v37  ;;  %vm13915_vm12 = vcmp.eq.s32.totalorder %v8166_v11, %v13892_v23 }
 0x3c9   : > { %vm10363_vm2 = vmor %vm10128_vm5, %vm13904_vm8  ;;  %vm13909_vm5 = vcmp.eq.s32.totalorder %v8135_v9, %v13796_v63 }
 0x3ca   : > { %vm1766_vm3 = vmor %vm10209_vm13, %vm13907_vm0  ;;  %vm13938_vm13 = vcmp.eq.s32.totalorder %v8135_v9, %v13687_v15 }
 0x3cb   : > { %vm10383_vm8 = vmor %vm10143_vm6, %vm13909_vm5  ;;  %vm13918_vm6 = vcmp.eq.s32.totalorder %v8313_v56, %v13530_v40  ;;  %v2733_v40 = vsel %vm10108_vm14, 1.0, %v13473_v60  ;;  %vm13928_vm14 = vcmp.eq.s32.totalorder %v8135_v9, %v13686_v22 }
 0x3cc   : > { %vm10391_vm0 = vmor %vm10251_vm1, %vm2017_vm10  ;;  %vm517_vm1 = vcmp.eq.s32.totalorder %v8135_v9, %v13740_v32  ;;  %vm13925_vm10 = vcmp.eq.s32.totalorder %v8313_v56, %v13674_v26  ;;  %v2732_v39 = vsel %vm10383_vm8, 1.0, %v13473_v60  ;;  %vm13997_vm8 = vcmp.eq.s32.totalorder %v8313_v56, %v13797_v43 }
 0x3cd   : > { %vm10398_vm11 = vmor %vm1766_vm3, %vm13915_vm12  ;;  %vm13922_vm3 = vnez %v13851_v44  ;;  %v13982_v44 = vld [vmem:[#allocation107_spill] sm:$0xff] }
 0x3ce   : > { %v13917_v62 = vsel %vm10398_vm11, 4294967295, %v13916_v62  ;;  %vm10407_vm5 = vmor %vm10326_vm15, %vm13918_vm6  ;;  %vm13921_vm15 = vcmp.eq.s32.totalorder %v8166_v11, %v13897_v12  ;;  %vm13930_vm6 = vcmp.eq.s32.totalorder %v8135_v9, %v13797_v43  ;;  %v14003_v43 = vld [vmem:[#allocation184_spill] sm:$0xff] }
 0x3cf   : > { %vm10426_vm12 = vmor %vm13922_vm3, %vm13921_vm15  ;;  %vm13929_vm15 = vcmp.eq.s32.totalorder %v8135_v9, %v13685_v28 }
 0x3d0   : > { %v13924_v6 = vsel %vm10426_vm12, 4294967295, %v13923_v6  ;;  %vm10437_vm4 = vmor %vm10339_vm9, %vm13925_vm10  ;;  %vm13931_vm9 = vnez %v13833_v19  ;;  %vm13934_vm12 = vcmp.eq.s32.totalorder %v8313_v56, %v13669_v55 }
 0x3d1   : > { %vm928_vm3 = vmor %vm13929_vm15, %vm13928_vm14  ;;  %vm13935_vm14 = vnez %v13867_v61  ;;  %v13945_v61 = vmov 0 }
 0x3d2   : > { %vm10454_vm10 = vmor %vm13931_vm9, %vm13930_vm6  ;;  %vm13941_vm9 = vnez %v13841_v29  ;;  %v4566_v29 = vpop.f32.mrb[12].mxu0  ;;  %vm13957_vm6 = vcmp.eq.s32.totalorder %v8135_v9, %v13826_v34 }
 0x3d3   : > { %vm10463_vm15 = vmor %vm13935_vm14, %vm13934_vm12  ;;  %v2722_v55 = vsel %vm13941_vm9, 1.0, %v13473_v60  ;;  %vm13942_vm12 = vnez %v13845_v27  ;;  %vm13943_vm14 = vcmp.eq.s32.totalorder %v8166_v11, %v13912_v38  ;;  %vm13947_vm9 = vcmp.eq.s32.totalorder %v8135_v9, %v13807_v14  ;;  %v4567_v50 = vpop.f32.mrb[13].mxu0 }
 0x3d4   : > { %v13937_v51 = vsel %vm10463_vm15, 4294967295, %v13936_v51  ;;  %vm10470_vm11 = vmor %vm517_vm1, %vm13938_vm13  ;;  %v2738_v19 = vsel %vm13942_vm12, 1.0, %v13473_v60  ;;  %vm13944_vm13 = vnez %v13847_v24  ;;  %v2872_v27 = vpack.c.bf16 %v2727_v54, %v2722_v55 }
 0x3d5   : > { %vm10487_vm1 = vmor %vm13944_vm13, %vm13943_vm14  ;;  %v2878_v17 = vpack.c.bf16 %v2738_v19, %v2733_v40  ;;  %vm13948_vm14 = vcmp.eq.s32.totalorder %v8313_v56, %v13657_v42  ;;  %vm13949_vm13 = vnez %v13863_v1  ;;  %v13950_v24 = vmov 0  ;;  %v13978_v40 = vld [vmem:[#allocation177_spill] sm:$0xff]  ;;  %v13986_v19 = vld [vmem:[#allocation27_spill] sm:$0xff] }
 0x3d6   : > { %v13946_v61 = vsel %vm10487_vm1, 4294967295, %v13945_v61  ;;  %vm1344_vm15 = vmor %vm928_vm3, %vm13947_vm9  ;;  %vm13952_vm3 = vcmp.eq.s32.totalorder %v8135_v9, %v13810_v10  ;;  %vm13955_vm12 = vnez %v13876_v18  ;;  %v10535_v16 = vadd.f32 %v4567_v50, %v4566_v29  ;;  %v4569_v18 = vpop.f32.mrb[14].mxu0  ;;  %3582 = vmatmul.mubr.bf16.gmra.mrb[40].mxu1 %v2872_v27  ;;  %v13995_v27 = vld [vmem:[#allocation181_spill] sm:$0xff] }
 0x3d7   : > { %vm10505_vm1 = vmor %vm13949_vm13, %vm13948_vm14  ;;  %v2714_v42 = vsel %vm13955_vm12, 1.0, %v13473_v60  ;;  %vm13956_vm14 = vnez %v13880_v58  ;;  %vm2427_vm13 = vcmp.eq.s32.totalorder %v8135_v9, %v13897_v12  ;;  %v4570_v59 = vpop.f32.mrb[15].mxu0  ;;  %3589 = vmatprep.mubr.bf16.mxu1 %v2878_v17  ;;  %v13992_v29 = vmov 0  ;;  %v14013_v58 = vld [vmem:[#allocation24_spill] sm:$0xff] }
 0x3d8   : > { %v13951_v24 = vsel %vm10505_vm1, 4294967295, %v13950_v24  ;;  %vm10514_vm9 = vmor %vm10470_vm11, %vm13952_vm3  ;;  %v2719_v1 = vsel %vm13956_vm14, 1.0, %v13473_v60  ;;  %vm13962_vm3 = vcmp.eq.s32.totalorder %v8313_v56, %v13679_v53  ;;  %v10563_v53 = vadd.f32 %v4570_v59, %v4569_v18  ;;  %v14011_v18 = vld [vmem:[#allocation187_spill] sm:$0xff] }
 0x3d9   : > { %vm10529_vm1 = vmor %vm1344_vm15, %vm13957_vm6  ;;  %vm2016_vm15 = vcmp.eq.s32.totalorder %v8135_v9, %v13908_v37  ;;  %v2869_v13 = vpack.c.bf16 %v2719_v1, %v2714_v42  ;;  %v2975_v1 = vpack.c.bf16 %v2947_v3, %v2946_v52  ;;  %v14014_v59 = vld [vmem:[#allocation55_spill] sm:$0xff] }
 0x3da   : > { %vm10544_vm14 = vmor %vm10407_vm5, %vm13962_vm3  ;;  %vm13966_vm5 = vcmp.eq.s32.totalorder %v8135_v9, %v13887_v30 }
 0x3db   : > { %vm1765_vm3 = vmor %vm10514_vm9, %vm13966_vm5  ;;  %vm13972_vm5 = vcmp.eq.s32.totalorder %v8166_v11, %v13961_v2  ;;  %3735 = vmatmul.mubr.bf16.gmra.mrb[36].mxu0 %v2869_v13  ;;  %v14017_v13 = vld [vmem:[#allocation56_spill] sm:$0xff] }
 0x3dc   : > { %vm10570_vm6 = vmor %vm10363_vm2, %vm2427_vm13  ;;  %vm528_vm2 = vcmp.eq.s32.totalorder %v8166_v11, %v13986_v19  ;;  %3742 = vmatprep.mubr.bf16.mxu0 %v2974_v41  ;;  %v14029_v41 = vld [vmem:[#allocation108_spill] sm:$0xff] }
 0x3dd   : > { %vm10576_vm12 = vmor %vm10529_vm1, %vm2016_vm15  ;;  %vm13975_vm1 = vcmp.eq.s32.totalorder %v8135_v9, %v13892_v23  ;;  %v2747_v33 = vsel %vm10570_vm6, 1.0, %v13473_v60  ;;  %vm14021_vm6 = vcmp.eq.s32.totalorder %v8313_v56, %v14013_v58  ;;  %v14027_v58 = vld [vmem:[#allocation62_spill] sm:$0xff] }
 0x3de   : > { %vm10587_vm11 = vmor %vm10391_vm0, %vm13972_vm5  ;;  %vm13979_vm0 = vcmp.eq.s32.totalorder %v8135_v9, %v13912_v38 }
 0x3df   : > { %v13974_v35 = vsel %vm10587_vm11, 4294967295, %v13973_v35  ;;  %vm10596_vm13 = vmor %vm1765_vm3, %vm13975_vm1  ;;  %vm2438_vm3 = vcmp.eq.s32.totalorder %v8166_v11, %v13982_v44  ;;  %vm13983_vm1 = vcmp.eq.s32.totalorder %v8313_v56, %v13796_v63  ;;  %v13990_v63 = vld [vmem:[#allocation18_spill] sm:$0xff]  ;;  %vm13996_vm11 = vnez %v13924_v6 }
 0x3e0   : > { %vm10607_vm5 = vmor %vm10354_vm7, %vm13979_vm0  ;;  %vm13987_vm7 = vcmp.eq.s32.totalorder %v8166_v11, %v13965_v47  ;;  %vm13988_vm0 = vcmp.eq.s32.totalorder %v8166_v11, %v13960_v48  ;;  %v2748_v17 = vsel %vm13996_vm11, 1.0, %v13473_v60  ;;  %v2737_v6 = vsel %vm10454_vm10, 1.0, %v13473_v60 }
 0x3e1   : > { %v13981_v8 = vsel %vm10607_vm5, 4294967295, %v13980_v8  ;;  %vm10618_vm15 = vmor %vm10437_vm4, %vm13983_vm1  ;;  %vm13991_vm4 = vnez %v13917_v62  ;;  %v13998_v62 = vmov 0  ;;  %vm14001_vm11 = vnez %v13937_v51  ;;  %v14006_v51 = vld [vmem:[#allocation186_spill] sm:$0xff] }
 0x3e2   : > { %vm939_vm9 = vmor %vm13988_vm0, %vm13987_vm7  ;;  %vm13994_vm7 = vcmp.eq.s32.totalorder %v8166_v11, %v13971_v57  ;;  %v2729_v0 = vsel %vm14001_vm11, 1.0, %v13473_v60  ;;  %vm2027_vm5 = vcmp.eq.s32.totalorder %v8166_v11, %v14003_v43  ;;  %v2877_v7 = vpack.c.bf16 %v2737_v6, %v2732_v39  ;;  %v14018_v39 = vld [vmem:[#allocation23_spill] sm:$0xff]  ;;  %v2948_v6 = vld [vmem:[%s5709_s16 + $0x40] sm:$0xff] }
 0x3e3   : > { %vm10639_vm1 = vmor %vm13991_vm4, %vm2438_vm3  ;;  %vm14005_vm10 = vcmp.eq.s32.totalorder %v8166_v11, %v13990_v63  ;;  %vm2032_vm11 = vcmp.eq.s32.totalorder %v8166_v11, %v14006_v51 }
 0x3e4   : > { %v13993_v29 = vsel %vm10639_vm1, 4294967295, %v13992_v29  ;;  %vm944_vm0 = vmor %vm528_vm2, %vm13994_vm7  ;;  %vm14000_vm2 = vcmp.eq.s32.totalorder %v8166_v11, %v13978_v40  ;;  %vm2432_vm7 = vcmp.eq.s32.totalorder %v8135_v9, %v13961_v2  ;;  %3590 = vmatmul.mubr.bf16.gmra.mrb[44].mxu1 %v2877_v7 }
 0x3e5   : > { %vm10658_vm3 = vmor %vm10544_vm14, %vm13997_vm8  ;;  %vm14002_vm14 = vcmp.eq.s32.totalorder %v8166_v11, %v13989_v36 }
 0x3e6   : > { %v13999_v62 = vsel %vm10658_vm3, 4294967295, %v13998_v62  ;;  %vm1355_vm4 = vmor %vm939_vm9, %vm14000_vm2  ;;  %vm14004_vm9 = vnez %v13946_v61  ;;  %vm14007_vm3 = vnez %v13951_v24  ;;  %v14012_v24 = vld [vmem:[#allocation110_spill] sm:$0xff] }
 0x3e7   : > { %vm1360_vm8 = vmor %vm944_vm0, %vm14002_vm14  ;;  %v2743_v26 = vsel %vm14004_vm9, 1.0, %v13473_v60  ;;  %v2724_v42 = vsel %vm14007_vm3, 1.0, %v13473_v60  ;;  %vm14008_vm0 = vcmp.eq.s32.totalorder %v8166_v11, %v13995_v27  ;;  %vm2437_vm3 = vcmp.eq.s32.totalorder %v8135_v9, %v13982_v44 }
 0x3e8   : > { %vm1771_vm2 = vmor %vm1355_vm4, %vm14005_vm10  ;;  %v2883_v50 = vpack.c.bf16 %v2748_v17, %v2743_v26  ;;  %v2874_v61 = vpack.c.bf16 %v2729_v0, %v2724_v42  ;;  %vm2448_vm10 = vcmp.eq.s32.totalorder %v8166_v11, %v14011_v18  ;;  %v14019_v17 = vld [vmem:[#allocation150_spill] sm:$0xff] }
 0x3e9   : > { %vm1776_vm14 = vmor %vm1360_vm8, %vm14008_vm0  ;;  %vm2443_vm8 = vcmp.eq.s32.totalorder %v8166_v11, %v14012_v24  ;;  %v2949_v0 = vld [vmem:[%s5709_s16 + $0x48] sm:$0xff] }
 0x3ea   : > { %vm10694_vm9 = vmor %vm10576_vm12, %vm2432_vm7  ;;  %3597 = vmatprep.mubr.bf16.mxu1 %v2883_v50  ;;  %vm760_vm7 = vcmp.eq.s32.totalorder %v8313_v56, %v14014_v59  ;;  %3743 = vmatmul.mubr.bf16.gmra.mrb[40].mxu0 %v2874_v61  ;;  %vm1176_vm12 = vcmp.eq.s32.totalorder %v8313_v56, %v14019_v17  ;;  %v2976_v50 = vpack.c.bf16 %v2949_v0, %v2948_v6  ;;  %v14025_v61 = vld [vmem:[#allocation30_spill] sm:$0xff]  ;;  %v14028_v59 = vld [vmem:[#allocation99_spill] sm:$0xff] }
 0x3eb   : > { %vm2187_vm4 = vmor %vm1771_vm2, %vm2027_vm5  ;;  %3750 = vmatprep.mubr.bf16.mxu0 %v2975_v1  ;;  %v14031_v17 = vld [vmem:[#allocation51_spill] sm:$0xff]  ;;  %v14033_v0 = vld [vmem:[#allocation113_spill] sm:$0xff] }
 0x3ec   : > { %vm2192_vm1 = vmor %vm1776_vm14, %vm2032_vm11  ;;  %vm765_vm11 = vcmp.eq.s32.totalorder %v8313_v56, %v14017_v13  ;;  %vm509_vm14 = vcmp.eq.s32.totalorder %v8313_v56, %v14018_v39  ;;  %v14030_v39 = vld [vmem:[#allocation29_spill] sm:$0xff] }
 0x3ed   : > { %vm10710_vm5 = vmor %vm10596_vm13, %vm2437_vm3  ;;  %vm14020_vm13 = vnez %v13974_v35  ;;  %vm14022_vm3 = vnez %v13981_v8  ;;  %v2734_v35 = vsel %vm10618_vm15, 1.0, %v13473_v60  ;;  %vm14024_vm15 = vnez %v13999_v62 }
 0x3ee   : > { %vm2603_vm2 = vmor %vm2187_vm4, %vm2443_vm8  ;;  %v2753_v54 = vsel %vm14020_vm13, 1.0, %v13473_v60  ;;  %vm1181_vm4 = vcmp.eq.s32.totalorder %v8313_v56, %v13566_v49  ;;  %v2742_v45 = vsel %vm14022_vm3, 1.0, %v13473_v60  ;;  %v2739_v55 = vsel %vm14024_vm15, 1.0, %v13473_v60 }
 0x3ef   : > { %vm2608_vm0 = vmor %vm2192_vm1, %vm2448_vm10  ;;  %v2763_v52 = vsel %vm2603_vm2, 1.0, %v13473_v60  ;;  %vm1592_vm10 = vcmp.eq.s32.totalorder %v8313_v56, %v13651_v20  ;;  %v2882_v26 = vpack.c.bf16 %v2747_v33, %v2742_v45  ;;  %vm2429_vm3 = vcmp.eq.s32.totalorder %v8313_v56, %v13897_v12  ;;  %v2950_v20 = vld [vmem:[%s5709_s16 + $0x50] sm:$0xff]  ;;  %v14034_v45 = vld [vmem:[#allocation132_spill] sm:$0xff] }
 0x3f0   : > { %v2768_v3 = vsel %vm2608_vm0, 1.0, %v13473_v60  ;;  %vm920_vm1 = vmor %vm14021_vm6, %vm760_vm7  ;;  %vm14023_vm7 = vnez %v13993_v29  ;;  %vm1597_vm0 = vcmp.eq.s32.totalorder %v8313_v56, %v13692_v21  ;;  %v2879_v29 = vpack.c.bf16 %v2739_v55, %v2734_v35 }
 0x3f1   : > { %v2893_v7 = vpack.c.bf16 %v2768_v3, %v2763_v52  ;;  %vm925_vm8 = vmor %vm509_vm14, %vm765_vm11  ;;  %v2758_v49 = vsel %vm14023_vm7, 1.0, %v13473_v60  ;;  %vm2008_vm11 = vcmp.eq.s32.totalorder %v8313_v56, %v13808_v5  ;;  %3598 = vmatmul.mubr.bf16.gmra.mrb[48].mxu1 %v2882_v26  ;;  %vm2013_vm14 = vcmp.eq.s32.totalorder %v8313_v56, %v13809_v4  ;;  %v2951_v5 = vld [vmem:[%s5709_s16 + $0x58] sm:$0xff]  ;;  %v4620_v52 = vpop.f32.mrb[16].mxu1  ;;  %v14036_v26 = vld [vmem:[#allocation133_spill] sm:$0xff] }
 0x3f2   : > { %vm1336_vm2 = vmor %vm920_vm1, %vm1176_vm12  ;;  %v2888_v8 = vpack.c.bf16 %v2758_v49, %v2753_v54  ;;  %vm2424_vm1 = vcmp.eq.s32.totalorder %v8313_v56, %v13912_v38  ;;  %3751 = vmatmul.mubr.bf16.gmra.mrb[44].mxu0 %v2879_v29  ;;  %v2752_v21 = vsel %vm10694_vm9, 1.0, %v13473_v60  ;;  %vm778_vm7 = vcmp.eq.s32.totalorder %v8135_v9, %v13965_v47  ;;  %v14032_v3 = vld [vmem:[#allocation120_spill] sm:$0xff]  ;;  %v4621_v6 = vpop.f32.mrb[17].mxu1 }
 0x3f3   : > { %vm1341_vm13 = vmor %vm925_vm8, %vm1181_vm4  ;;  %3758 = vmatprep.mubr.bf16.mxu0 %v2976_v50  ;;  %vm522_vm8 = vcmp.eq.s32.totalorder %v8135_v9, %v13960_v48  ;;  %v2757_v4 = vsel %vm10710_vm5, 1.0, %v13473_v60  ;;  %vm1194_vm9 = vcmp.eq.s32.totalorder %v8135_v9, %v13978_v40  ;;  %v2977_v42 = vpack.c.bf16 %v2951_v5, %v2950_v20  ;;  %v14039_v20 = vld [vmem:[#allocation32_spill] sm:$0xff]  ;;  %v14040_v5 = vld [vmem:[#allocation63_spill] sm:$0xff] }
 0x3f4   : > { %vm1752_vm12 = vmor %vm1336_vm2, %vm1592_vm10  ;;  %3605 = vmatprep.mubr.bf16.mxu1 %v2888_v8  ;;  %v2887_v12 = vpack.c.bf16 %v2757_v4, %v2752_v21  ;;  %v10827_v35 = vadd.f32 %v4621_v6, %v4620_v52  ;;  %v14037_v8 = vld [vmem:[#allocation142_spill] sm:$0xff]  ;;  %v14041_v4 = vld [vmem:[#allocation64_spill] sm:$0xff] }
 0x3f5   : > { %vm1757_vm6 = vmor %vm1341_vm13, %vm1597_vm0  ;;  %vm783_vm0 = vcmp.eq.s32.totalorder %v8135_v9, %v13971_v57  ;;  %vm527_vm13 = vcmp.eq.s32.totalorder %v8135_v9, %v13986_v19  ;;  %v14047_v52 = vld [vmem:[#allocation80_spill] sm:$0xff] }
 0x3f6   : > { %vm2168_vm4 = vmor %vm1752_vm12, %vm2008_vm11  ;;  %vm1199_vm12 = vcmp.eq.s32.totalorder %v8135_v9, %v13989_v36  ;;  %14035 = vst [vmem:[#allocation188_spill] sm:$0xff] %v10827_v35  ;;  %v14048_v6 = vld [vmem:[#allocation88_spill] sm:$0xff]  ;;  %v14123_v35 = vld [vmem:[#allocation170_spill] sm:$0xff] }
 0x3f7   : > { %vm2173_vm10 = vmor %vm1757_vm6, %vm2013_vm14  ;;  %vm1610_vm14 = vcmp.eq.s32.totalorder %v8135_v9, %v13990_v63  ;;  %vm1615_vm6 = vcmp.eq.s32.totalorder %v8135_v9, %v13995_v27 }
 0x3f8   : > { %vm2584_vm2 = vmor %vm2168_vm4, %vm2424_vm1 }
 0x3f9   : > { %vm2589_vm15 = vmor %vm2173_vm10, %vm2429_vm3  ;;  %v2744_v62 = vsel %vm2584_vm2, 1.0, %v13473_v60  ;;  %3606 = vmatmul.mubr.bf16.gmra.mrb[52].mxu1 %v2887_v12  ;;  %vm2026_vm3 = vcmp.eq.s32.totalorder %v8135_v9, %v14003_v43 }
 0x3fa   : > { %v2749_v38 = vsel %vm2589_vm15, 1.0, %v13473_v60  ;;  %vm938_vm11 = vmor %vm522_vm8, %vm778_vm7  ;;  %3613 = vmatprep.mubr.bf16.mxu1 %v2893_v7  ;;  %vm2031_vm8 = vcmp.eq.s32.totalorder %v8135_v9, %v14006_v51  ;;  %v4623_v7 = vpop.f32.mrb[18].mxu1 }
 0x3fb   : > { %vm943_vm5 = vmor %vm527_vm13, %vm783_vm0  ;;  %v2884_v1 = vpack.c.bf16 %v2749_v38, %v2744_v62  ;;  %vm2447_vm0 = vcmp.eq.s32.totalorder %v8135_v9, %v14011_v18  ;;  %vm533_vm13 = vcmp.eq.s32.totalorder %v8166_v11, %v14025_v61  ;;  %v4624_v49 = vpop.f32.mrb[19].mxu1  ;;  %v14042_v38 = vld [vmem:[#allocation112_spill] sm:$0xff] }
 0x3fc   : > { %vm1354_vm1 = vmor %vm938_vm11, %vm1194_vm9  ;;  %vm2442_vm9 = vcmp.eq.s32.totalorder %v8135_v9, %v14012_v24  ;;  %vm789_vm11 = vcmp.eq.s32.totalorder %v8166_v11, %v14026_v31  ;;  %v10833_v55 = vadd.f32 %v4624_v49, %v4623_v7  ;;  %v14049_v7 = vld [vmem:[#allocation95_spill] sm:$0xff]  ;;  %v14050_v49 = vld [vmem:[#allocation94_spill] sm:$0xff] }
 0x3fd   : > { %vm1359_vm4 = vmor %vm943_vm5, %vm1199_vm12  ;;  %3759 = vmatmul.mubr.bf16.gmra.mrb[48].mxu0 %v2884_v1  ;;  %vm1205_vm5 = vcmp.eq.s32.totalorder %v8166_v11, %v14028_v59  ;;  %v14044_v1 = vld [vmem:[#allocation81_spill] sm:$0xff] }
 0x3fe   : > { %vm1770_vm10 = vmor %vm1354_vm1, %vm1610_vm14  ;;  %3766 = vmatprep.mubr.bf16.mxu0 %v2977_v42  ;;  %vm794_vm14 = vcmp.eq.s32.totalorder %v8166_v11, %v14027_v58  ;;  %vm1210_vm1 = vcmp.eq.s32.totalorder %v8166_v11, %v14029_v41  ;;  %14038 = vst [vmem:[#allocation190_spill] sm:$0xff] %v10833_v55  ;;  %v14043_v42 = vld [vmem:[#allocation31_spill] sm:$0xff]  ;;  %v14119_v55 = vld [vmem:[#allocation164_spill] sm:$0xff] }
 0x3ff   : > { %vm1775_vm7 = vmor %vm1359_vm4, %vm1615_vm6  ;;  %vm538_vm4 = vcmp.eq.s32.totalorder %v8166_v11, %v14030_v39 }
 0x400   : > { %vm2186_vm2 = vmor %vm1770_vm10, %vm2026_vm3  ;;  %vm1621_vm10 = vcmp.eq.s32.totalorder %v8166_v11, %v14031_v17 }
 0x401   : > { %vm2191_vm15 = vmor %vm1775_vm7, %vm2031_vm8 }
 0x402   : > { %vm2602_vm12 = vmor %vm2186_vm2, %vm2442_vm9 }
 0x403   : > { %vm2607_vm6 = vmor %vm2191_vm15, %vm2447_vm0  ;;  %v2762_v13 = vsel %vm2602_vm12, 1.0, %v13473_v60  ;;  %vm2037_vm0 = vcmp.eq.s32.totalorder %v8166_v11, %v14032_v3  ;;  %vm1626_vm15 = vcmp.eq.s32.totalorder %v8166_v11, %v14033_v0  ;;  %vm2453_vm12 = vcmp.eq.s32.totalorder %v8166_v11, %v14036_v26 }
 0x404   : > { %v2767_v33 = vsel %vm2607_vm6, 1.0, %v13473_v60  ;;  %vm949_vm3 = vmor %vm533_vm13, %vm789_vm11  ;;  %vm2042_vm13 = vcmp.eq.s32.totalorder %v8166_v11, %v14034_v45 }
 0x405   : > { %v2892_v54 = vpack.c.bf16 %v2767_v33, %v2762_v13  ;;  %vm954_vm8 = vmor %vm538_vm4, %vm794_vm14  ;;  %vm770_vm4 = vcmp.eq.s32.totalorder %v8313_v56, %v13686_v22  ;;  %v14045_v33 = vld [vmem:[#allocation125_spill] sm:$0xff] }
 0x406   : > { %vm1365_vm7 = vmor %vm949_vm3, %vm1205_vm5  ;;  %vm2458_vm5 = vcmp.eq.s32.totalorder %v8166_v11, %v14037_v8 }
 0x407   : > { %3614 = vmatmul.mubr.bf16.gmra.mrb[56].mxu1 %v2892_v54  ;;  %vm1370_vm2 = vmor %vm954_vm8, %vm1210_vm1  ;;  %vm514_vm1 = vcmp.eq.s32.totalorder %v8313_v56, %v13685_v28  ;;  %v2952_v28 = vld [vmem:[%s5709_s16 + $0x60] sm:$0xff] }
 0x408   : > { %vm1781_vm9 = vmor %vm1365_vm7, %vm1621_vm10  ;;  %vm775_vm10 = vcmp.eq.s32.totalorder %v8313_v56, %v13687_v15  ;;  %vm1186_vm7 = vcmp.eq.s32.totalorder %v8313_v56, %v13807_v14  ;;  %v4572_v15 = vpop.f32.mrb[16].mxu0  ;;  %v14046_v54 = vld [vmem:[#allocation84_spill] sm:$0xff] }
 0x409   : > { %vm1786_vm11 = vmor %vm1370_vm2, %vm1626_vm15  ;;  %vm519_vm2 = vcmp.eq.s32.totalorder %v8313_v56, %v13740_v32  ;;  %vm1191_vm15 = vcmp.eq.s32.totalorder %v8313_v56, %v13810_v10  ;;  %v4573_v32 = vpop.f32.mrb[17].mxu0 }
 0x40a   : > { %vm2197_vm14 = vmor %vm1781_vm9, %vm2037_vm0  ;;  %v10869_v14 = vadd.f32 %v4573_v32, %v4572_v15  ;;  %v4575_v10 = vpop.f32.mrb[18].mxu0  ;;  %v14055_v15 = vld [vmem:[#allocation33_spill] sm:$0xff]  ;;  %v14057_v32 = vld [vmem:[#allocation127_spill] sm:$0xff] }
 0x40b   : > { %vm2202_vm6 = vmor %vm1786_vm11, %vm2042_vm13  ;;  %vm1602_vm13 = vcmp.eq.s32.totalorder %v8313_v56, %v13826_v34  ;;  %vm1607_vm11 = vcmp.eq.s32.totalorder %v8313_v56, %v13887_v30  ;;  %v2953_v34 = vld [vmem:[%s5709_s16 + $0x68] sm:$0xff] }
 0x40c   : > { %vm2613_vm3 = vmor %vm2197_vm14, %vm2453_vm12 }
 0x40d   : > { %vm2618_vm8 = vmor %vm2202_vm6, %vm2458_vm5  ;;  %v2773_v50 = vsel %vm2613_vm3, 1.0, %v13473_v60  ;;  %vm2023_vm6 = vcmp.eq.s32.totalorder %v8313_v56, %v13892_v23  ;;  %vm2434_vm3 = vcmp.eq.s32.totalorder %v8313_v56, %v13961_v2  ;;  %v4576_v23 = vpop.f32.mrb[19].mxu0  ;;  %v2978_v2 = vpack.c.bf16 %v2953_v34, %v2952_v28  ;;  %v14056_v28 = vld [vmem:[#allocation103_spill] sm:$0xff] }
 0x40e   : > { %v2778_v29 = vsel %vm2618_vm8, 1.0, %v13473_v60  ;;  %vm930_vm0 = vmor %vm514_vm1, %vm770_vm4  ;;  %vm2018_vm4 = vcmp.eq.s32.totalorder %v8313_v56, %v13908_v37 }
 0x40f   : > { %v2898_v22 = vpack.c.bf16 %v2778_v29, %v2773_v50  ;;  %vm935_vm9 = vmor %vm519_vm2, %vm775_vm10  ;;  %vm532_vm2 = vcmp.eq.s32.totalorder %v8135_v9, %v14025_v61 }
 0x410   : > { %vm1346_vm12 = vmor %vm930_vm0, %vm1186_vm7  ;;  %vm788_vm7 = vcmp.eq.s32.totalorder %v8135_v9, %v14026_v31  ;;  %vm2439_vm0 = vcmp.eq.s32.totalorder %v8313_v56, %v13982_v44  ;;  %v10885_v44 = vadd.f32 %v4576_v23, %v4575_v10  ;;  %v14058_v10 = vld [vmem:[#allocation105_spill] sm:$0xff]  ;;  %v14060_v23 = vld [vmem:[#allocation115_spill] sm:$0xff] }
 0x411   : > { %3621 = vmatprep.mubr.bf16.mxu1 %v2898_v22  ;;  %vm1351_vm14 = vmor %vm935_vm9, %vm1191_vm15  ;;  %vm793_vm9 = vcmp.eq.s32.totalorder %v8135_v9, %v14027_v58 }
 0x412   : > { %vm1762_vm5 = vmor %vm1346_vm12, %vm1602_vm13  ;;  %vm1204_vm13 = vcmp.eq.s32.totalorder %v8135_v9, %v14028_v59  ;;  %vm537_vm12 = vcmp.eq.s32.totalorder %v8135_v9, %v14030_v39 }
 0x413   : > { %vm1767_vm1 = vmor %vm1351_vm14, %vm1607_vm11  ;;  %vm1209_vm14 = vcmp.eq.s32.totalorder %v8135_v9, %v14029_v41 }
 0x414   : > { %vm2178_vm10 = vmor %vm1762_vm5, %vm2018_vm4 }
 0x415   : > { %vm2183_vm8 = vmor %vm1767_vm1, %vm2023_vm6  ;;  %vm1620_vm6 = vcmp.eq.s32.totalorder %v8135_v9, %v14031_v17 }
 0x416   : > { %vm2594_vm15 = vmor %vm2178_vm10, %vm2434_vm3  ;;  %vm2036_vm10 = vcmp.eq.s32.totalorder %v8135_v9, %v14032_v3 }
 0x417   : > { %vm2599_vm11 = vmor %vm2183_vm8, %vm2439_vm0  ;;  %v2754_v30 = vsel %vm2594_vm15, 1.0, %v13473_v60  ;;  %vm1625_vm8 = vcmp.eq.s32.totalorder %v8135_v9, %v14033_v0  ;;  %vm2452_vm15 = vcmp.eq.s32.totalorder %v8135_v9, %v14036_v26 }
 0x418   : > { %v2759_v37 = vsel %vm2599_vm11, 1.0, %v13473_v60  ;;  %vm948_vm5 = vmor %vm532_vm2, %vm788_vm7  ;;  %vm2041_vm7 = vcmp.eq.s32.totalorder %v8135_v9, %v14034_v45 }
 0x419   : > { %v2889_v21 = vpack.c.bf16 %v2759_v37, %v2754_v30  ;;  %vm953_vm1 = vmor %vm537_vm12, %vm793_vm9  ;;  %vm2457_vm9 = vcmp.eq.s32.totalorder %v8135_v9, %v14037_v8  ;;  %vm543_vm12 = vcmp.eq.s32.totalorder %v8166_v11, %v14039_v20  ;;  %v14059_v30 = vld [vmem:[#allocation83_spill] sm:$0xff] }
 0x41a   : > { %vm1364_vm4 = vmor %vm948_vm5, %vm1204_vm13  ;;  %v14061_v37 = vld [vmem:[#allocation111_spill] sm:$0xff] }
 0x41b   : > { %3767 = vmatmul.mubr.bf16.gmra.mrb[52].mxu0 %v2889_v21  ;;  %vm1369_vm3 = vmor %vm953_vm1, %vm1209_vm14  ;;  %vm799_vm14 = vcmp.eq.s32.totalorder %v8166_v11, %v14040_v5 }
 0x41c   : > { %vm1780_vm2 = vmor %vm1364_vm4, %vm1620_vm6  ;;  %3774 = vmatprep.mubr.bf16.mxu0 %v2978_v2  ;;  %vm804_vm6 = vcmp.eq.s32.totalorder %v8166_v11, %v14041_v4  ;;  %vm1215_vm4 = vcmp.eq.s32.totalorder %v8166_v11, %v14042_v38  ;;  %v14062_v2 = vld [vmem:[#allocation116_spill] sm:$0xff] }
 0x41d   : > { %vm1785_vm0 = vmor %vm1369_vm3, %vm1625_vm8  ;;  %vm548_vm3 = vcmp.eq.s32.totalorder %v8166_v11, %v14043_v42  ;;  %vm1220_vm8 = vcmp.eq.s32.totalorder %v8166_v11, %v14044_v1 }
 0x41e   : > { %vm2196_vm11 = vmor %vm1780_vm2, %vm2036_vm10 }
 0x41f   : > { %vm2201_vm13 = vmor %vm1785_vm0, %vm2041_vm7  ;;  %vm1636_vm0 = vcmp.eq.s32.totalorder %v8166_v11, %v14045_v33 }
 0x420   : > { %vm2612_vm5 = vmor %vm2196_vm11, %vm2452_vm15  ;;  %vm1631_vm11 = vcmp.eq.s32.totalorder %v8166_v11, %v14046_v54 }
 0x421   : > { %vm2617_vm1 = vmor %vm2201_vm13, %vm2457_vm9  ;;  %v2772_v12 = vsel %vm2612_vm5, 1.0, %v13473_v60  ;;  %vm2052_vm13 = vcmp.eq.s32.totalorder %v8166_v11, %v14047_v52 }
 0x422   : > { %v2777_v62 = vsel %vm2617_vm1, 1.0, %v13473_v60  ;;  %vm959_vm10 = vmor %vm543_vm12, %vm799_vm14  ;;  %vm2047_vm12 = vcmp.eq.s32.totalorder %v8166_v11, %v14048_v6  ;;  %vm2463_vm14 = vcmp.eq.s32.totalorder %v8166_v11, %v14049_v7 }
 0x423   : > { %v2897_v13 = vpack.c.bf16 %v2777_v62, %v2772_v12  ;;  %vm964_vm2 = vmor %vm548_vm3, %vm804_vm6  ;;  %vm780_vm3 = vcmp.eq.s32.totalorder %v8313_v56, %v13965_v47  ;;  %v2954_v47 = vld [vmem:[%s5709_s16 + $0x70] sm:$0xff]  ;;  %v14064_v12 = vld [vmem:[#allocation36_spill] sm:$0xff] }
 0x424   : > { %vm1375_vm7 = vmor %vm959_vm10, %vm1215_vm4  ;;  %vm524_vm4 = vcmp.eq.s32.totalorder %v8313_v56, %v13960_v48  ;;  %vm2468_vm10 = vcmp.eq.s32.totalorder %v8166_v11, %v14050_v49  ;;  %v14065_v62 = vld [vmem:[#allocation67_spill] sm:$0xff] }
 0x425   : > { %3622 = vmatmul.mubr.bf16.gmra.mrb[60].mxu1 %v2897_v13  ;;  %vm1380_vm15 = vmor %vm964_vm2, %vm1220_vm8  ;;  %vm785_vm2 = vcmp.eq.s32.totalorder %v8313_v56, %v13971_v57  ;;  %v2955_v57 = vld [vmem:[%s5709_s16 + $0x78] sm:$0xff] }
 0x426   : > { %vm1791_vm9 = vmor %vm1375_vm7, %vm1631_vm11  ;;  %v14066_v13 = vld [vmem:[#allocation68_spill] sm:$0xff] }
 0x427   : > { %vm1796_vm5 = vmor %vm1380_vm15, %vm1636_vm0  ;;  %vm1196_vm0 = vcmp.eq.s32.totalorder %v8313_v56, %v13978_v40  ;;  %vm529_vm15 = vcmp.eq.s32.totalorder %v8313_v56, %v13986_v19 }
 0x428   : > { %vm2207_vm6 = vmor %vm1791_vm9, %vm2047_vm12  ;;  %vm1201_vm9 = vcmp.eq.s32.totalorder %v8313_v56, %v13989_v36  ;;  %vm1617_vm12 = vcmp.eq.s32.totalorder %v8313_v56, %v13995_v27  ;;  %v2979_v36 = vpack.c.bf16 %v2955_v57, %v2954_v47  ;;  %v14051_v27 = vld [vmem:[#allocation34_spill] sm:$0xff]  ;;  %v14068_v47 = vld [vmem:[#allocation35_spill] sm:$0xff] }
 0x429   : > { %vm2212_vm1 = vmor %vm1796_vm5, %vm2052_vm13  ;;  %vm1612_vm13 = vcmp.eq.s32.totalorder %v8313_v56, %v13990_v63  ;;  %v14069_v57 = vld [vmem:[#allocation124_spill] sm:$0xff] }
 0x42a   : > { %vm2623_vm8 = vmor %vm2207_vm6, %vm2463_vm14 }
 0x42b   : > { %vm2628_vm7 = vmor %vm2212_vm1, %vm2468_vm10  ;;  %v2783_v50 = vsel %vm2623_vm8, 1.0, %v13473_v60  ;;  %vm2028_vm1 = vcmp.eq.s32.totalorder %v8313_v56, %v14003_v43  ;;  %v14052_v43 = vld [vmem:[#allocation65_spill] sm:$0xff] }
 0x42c   : > { %v2788_v29 = vsel %vm2628_vm7, 1.0, %v13473_v60  ;;  %vm940_vm11 = vmor %vm524_vm4, %vm780_vm3  ;;  %vm2033_vm3 = vcmp.eq.s32.totalorder %v8313_v56, %v14006_v51  ;;  %vm2449_vm7 = vcmp.eq.s32.totalorder %v8313_v56, %v14011_v18  ;;  %v14053_v51 = vld [vmem:[#allocation66_spill] sm:$0xff] }
 0x42d   : > { %v2903_v48 = vpack.c.bf16 %v2788_v29, %v2783_v50  ;;  %vm945_vm5 = vmor %vm529_vm15, %vm785_vm2  ;;  %vm2444_vm15 = vcmp.eq.s32.totalorder %v8313_v56, %v14012_v24  ;;  %v14054_v18 = vld [vmem:[#allocation114_spill] sm:$0xff] }
 0x42e   : > { %vm1356_vm14 = vmor %vm940_vm11, %vm1196_vm0  ;;  %vm542_vm0 = vcmp.eq.s32.totalorder %v8135_v9, %v14039_v20  ;;  %vm798_vm11 = vcmp.eq.s32.totalorder %v8135_v9, %v14040_v5  ;;  %v14067_v50 = vld [vmem:[#allocation122_spill] sm:$0xff] }
 0x42f   : > { %3629 = vmatprep.mubr.bf16.mxu1 %v2903_v48  ;;  %vm1361_vm6 = vmor %vm945_vm5, %vm1201_vm9 }
 0x430   : > { %vm1772_vm4 = vmor %vm1356_vm14, %vm1612_vm13  ;;  %vm803_vm13 = vcmp.eq.s32.totalorder %v8135_v9, %v14041_v4  ;;  %vm1214_vm14 = vcmp.eq.s32.totalorder %v8135_v9, %v14042_v38 }
 0x431   : > { %vm1777_vm10 = vmor %vm1361_vm6, %vm1617_vm12  ;;  %vm547_vm12 = vcmp.eq.s32.totalorder %v8135_v9, %v14043_v42 }
 0x432   : > { %vm2188_vm8 = vmor %vm1772_vm4, %vm2028_vm1  ;;  %vm1219_vm1 = vcmp.eq.s32.totalorder %v8135_v9, %v14044_v1 }
 0x433   : > { %vm2193_vm2 = vmor %vm1777_vm10, %vm2033_vm3  ;;  %vm1635_vm10 = vcmp.eq.s32.totalorder %v8135_v9, %v14045_v33 }
 0x434   : > { %vm2604_vm9 = vmor %vm2188_vm8, %vm2444_vm15  ;;  %vm2051_vm15 = vcmp.eq.s32.totalorder %v8135_v9, %v14047_v52 }
 0x435   : > { %vm2609_vm5 = vmor %vm2193_vm2, %vm2449_vm7  ;;  %v2764_v40 = vsel %vm2604_vm9, 1.0, %v13473_v60  ;;  %vm1630_vm7 = vcmp.eq.s32.totalorder %v8135_v9, %v14046_v54  ;;  %vm2462_vm9 = vcmp.eq.s32.totalorder %v8135_v9, %v14049_v7 }
 0x436   : > { %v2769_v19 = vsel %vm2609_vm5, 1.0, %v13473_v60  ;;  %vm958_vm6 = vmor %vm542_vm0, %vm798_vm11  ;;  %vm2046_vm11 = vcmp.eq.s32.totalorder %v8135_v9, %v14048_v6 }
 0x437   : > { %v2894_v63 = vpack.c.bf16 %v2769_v19, %v2764_v40  ;;  %vm963_vm4 = vmor %vm547_vm12, %vm803_vm13  ;;  %vm553_vm12 = vcmp.eq.s32.totalorder %v8166_v11, %v14051_v27  ;;  %v14070_v40 = vld [vmem:[#allocation129_spill] sm:$0xff] }
 0x438   : > { %vm1374_vm3 = vmor %vm958_vm6, %vm1214_vm14  ;;  %vm809_vm14 = vcmp.eq.s32.totalorder %v8166_v11, %v14052_v43  ;;  %vm2467_vm6 = vcmp.eq.s32.totalorder %v8135_v9, %v14050_v49 }
 0x439   : > { %3775 = vmatmul.mubr.bf16.gmra.mrb[56].mxu0 %v2894_v63  ;;  %vm1379_vm8 = vmor %vm963_vm4, %vm1219_vm1  ;;  %vm814_vm4 = vcmp.eq.s32.totalorder %v8166_v11, %v14053_v51  ;;  %v14072_v63 = vld [vmem:[#allocation128_spill] sm:$0xff] }
 0x43a   : > { %vm1790_vm2 = vmor %vm1374_vm3, %vm1630_vm7  ;;  %3782 = vmatprep.mubr.bf16.mxu0 %v2979_v36  ;;  %v14071_v36 = vld [vmem:[#allocation126_spill] sm:$0xff] }
 0x43b   : > { %vm1795_vm0 = vmor %vm1379_vm8, %vm1635_vm10  ;;  %vm1225_vm10 = vcmp.eq.s32.totalorder %v8166_v11, %v14054_v18  ;;  %vm558_vm8 = vcmp.eq.s32.totalorder %v8166_v11, %v14055_v15 }
 0x43c   : > { %vm2206_vm13 = vmor %vm1790_vm2, %vm2046_vm11  ;;  %vm1230_vm2 = vcmp.eq.s32.totalorder %v8166_v11, %v14056_v28 }
 0x43d   : > { %vm2211_vm5 = vmor %vm1795_vm0, %vm2051_vm15  ;;  %vm1646_vm0 = vcmp.eq.s32.totalorder %v8166_v11, %v14057_v32 }
 0x43e   : > { %vm2622_vm1 = vmor %vm2206_vm13, %vm2462_vm9  ;;  %vm1641_vm13 = vcmp.eq.s32.totalorder %v8166_v11, %v14058_v10 }
 0x43f   : > { %vm2627_vm3 = vmor %vm2211_vm5, %vm2467_vm6  ;;  %v2782_v24 = vsel %vm2622_vm1, 1.0, %v13473_v60  ;;  %vm2057_vm5 = vcmp.eq.s32.totalorder %v8166_v11, %v14059_v30 }
 0x440   : > { %v2787_v22 = vsel %vm2627_vm3, 1.0, %v13473_v60  ;;  %vm969_vm7 = vmor %vm553_vm12, %vm809_vm14  ;;  %vm2473_vm12 = vcmp.eq.s32.totalorder %v8166_v11, %v14060_v23  ;;  %vm2062_vm14 = vcmp.eq.s32.totalorder %v8166_v11, %v14061_v37 }
 0x441   : > { %v2902_v34 = vpack.c.bf16 %v2787_v22, %v2782_v24  ;;  %vm974_vm15 = vmor %vm558_vm8, %vm814_vm4  ;;  %vm790_vm8 = vcmp.eq.s32.totalorder %v8313_v56, %v14026_v31  ;;  %v14073_v24 = vld [vmem:[#allocation130_spill] sm:$0xff]  ;;  %v14074_v22 = vld [vmem:[#allocation131_spill] sm:$0xff] }
 0x442   : > { %vm1385_vm11 = vmor %vm969_vm7, %vm1225_vm10  ;;  %vm534_vm10 = vcmp.eq.s32.totalorder %v8313_v56, %v14025_v61  ;;  %vm2478_vm7 = vcmp.eq.s32.totalorder %v8166_v11, %v14062_v2 }
 0x443   : > { %3630 = vmatmul.mubr.bf16.gmra.mrb[64].mxu1 %v2902_v34  ;;  %vm1390_vm9 = vmor %vm974_vm15, %vm1230_vm2  ;;  %vm795_vm15 = vcmp.eq.s32.totalorder %v8313_v56, %v14027_v58  ;;  %v4626_v58 = vpop.f32.mrb[20].mxu1 }
 0x444   : > { %vm1801_vm6 = vmor %vm1385_vm11, %vm1641_vm13  ;;  %vm539_vm13 = vcmp.eq.s32.totalorder %v8313_v56, %v14030_v39  ;;  %v2957_v39 = vld [vmem:[%s5709_s16 + $0x88] sm:$0xff] }
 0x445   : > { %vm1806_vm1 = vmor %vm1390_vm9, %vm1646_vm0  ;;  %vm1206_vm0 = vcmp.eq.s32.totalorder %v8313_v56, %v14028_v59  ;;  %vm1211_vm9 = vcmp.eq.s32.totalorder %v8313_v56, %v14029_v41  ;;  %v4627_v59 = vpop.f32.mrb[21].mxu1  ;;  %v2956_v41 = vld [vmem:[%s5709_s16 + $0x80] sm:$0xff] }
 0x446   : > { %vm2217_vm4 = vmor %vm1801_vm6, %vm2057_vm5  ;;  %vm1622_vm6 = vcmp.eq.s32.totalorder %v8313_v56, %v14031_v17  ;;  %v11040_v17 = vadd.f32 %v4627_v59, %v4626_v58  ;;  %v14080_v59 = vld [vmem:[#allocation117_spill] sm:$0xff] }
 0x447   : > { %vm2222_vm3 = vmor %vm1806_vm1, %vm2062_vm14 }
 0x448   : > { %vm2633_vm2 = vmor %vm2217_vm4, %vm2473_vm12  ;;  %vm2038_vm4 = vcmp.eq.s32.totalorder %v8313_v56, %v14032_v3  ;;  %14063 = vst [vmem:[#allocation191_spill] sm:$0xff] %v11040_v17 }
 0x449   : > { %vm2638_vm11 = vmor %vm2222_vm3, %vm2478_vm7  ;;  %v2793_v21 = vsel %vm2633_vm2, 1.0, %v13473_v60  ;;  %vm1627_vm3 = vcmp.eq.s32.totalorder %v8313_v56, %v14033_v0  ;;  %vm2454_vm2 = vcmp.eq.s32.totalorder %v8313_v56, %v14036_v26 }
 0x44a   : > { %v2798_v61 = vsel %vm2638_vm11, 1.0, %v13473_v60  ;;  %vm950_vm5 = vmor %vm534_vm10, %vm790_vm8  ;;  %vm2043_vm10 = vcmp.eq.s32.totalorder %v8313_v56, %v14034_v45  ;;  %v2980_v45 = vpack.c.bf16 %v2957_v39, %v2956_v41  ;;  %v14081_v39 = vld [vmem:[#allocation37_spill] sm:$0xff] }
 0x44b   : > { %v2908_v31 = vpack.c.bf16 %v2798_v61, %v2793_v21  ;;  %vm955_vm1 = vmor %vm539_vm13, %vm795_vm15  ;;  %vm808_vm13 = vcmp.eq.s32.totalorder %v8135_v9, %v14052_v43  ;;  %v14075_v21 = vld [vmem:[#allocation98_spill] sm:$0xff] }
 0x44c   : > { %vm1366_vm12 = vmor %vm950_vm5, %vm1206_vm0  ;;  %vm2459_vm0 = vcmp.eq.s32.totalorder %v8313_v56, %v14037_v8  ;;  %v4629_v8 = vpop.f32.mrb[22].mxu1 }
 0x44d   : > { %3637 = vmatprep.mubr.bf16.mxu1 %v2908_v31  ;;  %vm1371_vm14 = vmor %vm955_vm1, %vm1211_vm9  ;;  %vm552_vm9 = vcmp.eq.s32.totalorder %v8135_v9, %v14051_v27  ;;  %v4630_v34 = vpop.f32.mrb[23].mxu1 }
 0x44e   : > { %vm1782_vm7 = vmor %vm1366_vm12, %vm1622_vm6  ;;  %vm813_vm6 = vcmp.eq.s32.totalorder %v8135_v9, %v14053_v51  ;;  %vm1224_vm12 = vcmp.eq.s32.totalorder %v8135_v9, %v14054_v18  ;;  %v11090_v61 = vadd.f32 %v4630_v34, %v4629_v8  ;;  %v14085_v8 = vld [vmem:[#allocation87_spill] sm:$0xff]  ;;  %v14088_v34 = vld [vmem:[#allocation144_spill] sm:$0xff] }
 0x44f   : > { %vm1787_vm8 = vmor %vm1371_vm14, %vm1627_vm3  ;;  %vm557_vm14 = vcmp.eq.s32.totalorder %v8135_v9, %v14055_v15  ;;  %vm1229_vm3 = vcmp.eq.s32.totalorder %v8135_v9, %v14056_v28 }
 0x450   : > { %vm2198_vm15 = vmor %vm1782_vm7, %vm2038_vm4  ;;  %14076 = vst [vmem:[#allocation194_spill] sm:$0xff] %v11090_v61 }
 0x451   : > { %vm2203_vm11 = vmor %vm1787_vm8, %vm2043_vm10  ;;  %vm1645_vm10 = vcmp.eq.s32.totalorder %v8135_v9, %v14057_v32 }
 0x452   : > { %vm2614_vm5 = vmor %vm2198_vm15, %vm2454_vm2  ;;  %vm1640_vm15 = vcmp.eq.s32.totalorder %v8135_v9, %v14058_v10 }
 0x453   : > { %vm2619_vm1 = vmor %vm2203_vm11, %vm2459_vm0  ;;  %v2774_v3 = vsel %vm2614_vm5, 1.0, %v13473_v60  ;;  %vm2056_vm0 = vcmp.eq.s32.totalorder %v8135_v9, %v14059_v30  ;;  %vm2061_vm5 = vcmp.eq.s32.totalorder %v8135_v9, %v14061_v37 }
 0x454   : > { %v2779_v0 = vsel %vm2619_vm1, 1.0, %v13473_v60  ;;  %vm968_vm4 = vmor %vm552_vm9, %vm808_vm13  ;;  %vm2472_vm13 = vcmp.eq.s32.totalorder %v8135_v9, %v14060_v23 }
 0x455   : > { %v2899_v26 = vpack.c.bf16 %v2779_v0, %v2774_v3  ;;  %vm973_vm7 = vmor %vm557_vm14, %vm813_vm6  ;;  %vm819_vm14 = vcmp.eq.s32.totalorder %v8166_v11, %v14065_v62  ;;  %v14082_v3 = vld [vmem:[#allocation135_spill] sm:$0xff] }
 0x456   : > { %vm1384_vm8 = vmor %vm968_vm4, %vm1224_vm12  ;;  %vm563_vm12 = vcmp.eq.s32.totalorder %v8166_v11, %v14064_v12  ;;  %vm2477_vm4 = vcmp.eq.s32.totalorder %v8135_v9, %v14062_v2 }
 0x457   : > { %3783 = vmatmul.mubr.bf16.gmra.mrb[60].mxu0 %v2899_v26  ;;  %vm1389_vm2 = vmor %vm973_vm7, %vm1229_vm3  ;;  %vm824_vm7 = vcmp.eq.s32.totalorder %v8166_v11, %v14066_v13  ;;  %v14084_v26 = vld [vmem:[#allocation139_spill] sm:$0xff] }
 0x458   : > { %vm1800_vm11 = vmor %vm1384_vm8, %vm1640_vm15  ;;  %3790 = vmatprep.mubr.bf16.mxu0 %v2980_v45  ;;  %vm1235_vm8 = vcmp.eq.s32.totalorder %v8166_v11, %v14067_v50  ;;  %v14083_v45 = vld [vmem:[#allocation136_spill] sm:$0xff] }
 0x459   : > { %vm1805_vm9 = vmor %vm1389_vm2, %vm1645_vm10  ;;  %vm568_vm2 = vcmp.eq.s32.totalorder %v8166_v11, %v14068_v47 }
 0x45a   : > { %vm2216_vm6 = vmor %vm1800_vm11, %vm2056_vm0  ;;  %vm1240_vm0 = vcmp.eq.s32.totalorder %v8166_v11, %v14069_v57  ;;  %vm1651_vm11 = vcmp.eq.s32.totalorder %v8166_v11, %v14070_v40 }
 0x45b   : > { %vm2221_vm1 = vmor %vm1805_vm9, %vm2061_vm5  ;;  %vm1656_vm5 = vcmp.eq.s32.totalorder %v8166_v11, %v14071_v36 }
 0x45c   : > { %vm2632_vm3 = vmor %vm2216_vm6, %vm2472_vm13 }
 0x45d   : > { %vm2637_vm10 = vmor %vm2221_vm1, %vm2477_vm4  ;;  %v2792_v29 = vsel %vm2632_vm3, 1.0, %v13473_v60  ;;  %vm2067_vm1 = vcmp.eq.s32.totalorder %v8166_v11, %v14072_v63  ;;  %vm2483_vm3 = vcmp.eq.s32.totalorder %v8166_v11, %v14074_v22 }
 0x45e   : > { %v2797_v48 = vsel %vm2637_vm10, 1.0, %v13473_v60  ;;  %vm979_vm15 = vmor %vm563_vm12, %vm819_vm14  ;;  %vm2072_vm12 = vcmp.eq.s32.totalorder %v8166_v11, %v14073_v24 }
 0x45f   : > { %v2907_v19 = vpack.c.bf16 %v2797_v48, %v2792_v29  ;;  %vm984_vm9 = vmor %vm568_vm2, %vm824_vm7  ;;  %vm2488_vm7 = vcmp.eq.s32.totalorder %v8166_v11, %v14075_v21  ;;  %vm544_vm2 = vcmp.eq.s32.totalorder %v8313_v56, %v14039_v20  ;;  %v14086_v29 = vld [vmem:[#allocation140_spill] sm:$0xff]  ;;  %v14087_v48 = vld [vmem:[#allocation143_spill] sm:$0xff] }
 0x460   : > { %vm1395_vm13 = vmor %vm979_vm15, %vm1235_vm8  ;;  %vm800_vm15 = vcmp.eq.s32.totalorder %v8313_v56, %v14040_v5  ;;  %v2958_v5 = vld [vmem:[%s5709_s16 + $0x90] sm:$0xff] }
 0x461   : > { %3638 = vmatmul.mubr.bf16.gmra.mrb[68].mxu1 %v2907_v19  ;;  %vm1400_vm6 = vmor %vm984_vm9, %vm1240_vm0 }
 0x462   : > { %vm1811_vm4 = vmor %vm1395_vm13, %vm1651_vm11  ;;  %vm805_vm11 = vcmp.eq.s32.totalorder %v8313_v56, %v14041_v4  ;;  %vm1216_vm13 = vcmp.eq.s32.totalorder %v8313_v56, %v14042_v38  ;;  %v2959_v4 = vld [vmem:[%s5709_s16 + $0x98] sm:$0xff] }
 0x463   : > { %vm1816_vm14 = vmor %vm1400_vm6, %vm1656_vm5  ;;  %vm549_vm5 = vcmp.eq.s32.totalorder %v8313_v56, %v14043_v42 }
 0x464   : > { %vm2227_vm10 = vmor %vm1811_vm4, %vm2067_vm1  ;;  %vm1221_vm1 = vcmp.eq.s32.totalorder %v8313_v56, %v14044_v1  ;;  %v2981_v1 = vpack.c.bf16 %v2959_v4, %v2958_v5  ;;  %v14091_v5 = vld [vmem:[#allocation72_spill] sm:$0xff]  ;;  %v14092_v4 = vld [vmem:[#allocation147_spill] sm:$0xff] }
 0x465   : > { %vm2232_vm8 = vmor %vm1816_vm14, %vm2072_vm12  ;;  %vm1637_vm14 = vcmp.eq.s32.totalorder %v8313_v56, %v14045_v33 }
 0x466   : > { %vm2643_vm0 = vmor %vm2227_vm10, %vm2483_vm3  ;;  %vm1632_vm10 = vcmp.eq.s32.totalorder %v8313_v56, %v14046_v54  ;;  %v4578_v54 = vpop.f32.mrb[20].mxu0 }
 0x467   : > { %vm2648_vm9 = vmor %vm2232_vm8, %vm2488_vm7  ;;  %v2803_v31 = vsel %vm2643_vm0, 1.0, %v13473_v60  ;;  %vm2053_vm8 = vcmp.eq.s32.totalorder %v8313_v56, %v14047_v52  ;;  %vm2464_vm0 = vcmp.eq.s32.totalorder %v8313_v56, %v14049_v7  ;;  %v14077_v52 = vld [vmem:[#allocation38_spill] sm:$0xff]  ;;  %v4579_v19 = vpop.f32.mrb[21].mxu0 }
 0x468   : > { %v2808_v58 = vsel %vm2648_vm9, 1.0, %v13473_v60  ;;  %vm960_vm6 = vmor %vm544_vm2, %vm800_vm15  ;;  %vm2048_vm15 = vcmp.eq.s32.totalorder %v8313_v56, %v14048_v6  ;;  %v14078_v6 = vld [vmem:[#allocation69_spill] sm:$0xff]  ;;  %v14079_v7 = vld [vmem:[#allocation70_spill] sm:$0xff] }
 0x469   : > { %v2913_v20 = vpack.c.bf16 %v2808_v58, %v2803_v31  ;;  %vm965_vm4 = vmor %vm549_vm5, %vm805_vm11  ;;  %vm818_vm5 = vcmp.eq.s32.totalorder %v8135_v9, %v14065_v62  ;;  %v11172_v31 = vadd.f32 %v4579_v19, %v4578_v54  ;;  %v14095_v54 = vld [vmem:[#allocation151_spill] sm:$0xff]  ;;  %v14098_v19 = vld [vmem:[#allocation153_spill] sm:$0xff] }
 0x46a   : > { %vm1376_vm12 = vmor %vm960_vm6, %vm1216_vm13  ;;  %vm562_vm13 = vcmp.eq.s32.totalorder %v8135_v9, %v14064_v12  ;;  %vm2469_vm6 = vcmp.eq.s32.totalorder %v8313_v56, %v14050_v49 }
 0x46b   : > { %3645 = vmatprep.mubr.bf16.mxu1 %v2913_v20  ;;  %vm1381_vm3 = vmor %vm965_vm4, %vm1221_vm1  ;;  %vm823_vm4 = vcmp.eq.s32.totalorder %v8135_v9, %v14066_v13 }
 0x46c   : > { %vm1792_vm7 = vmor %vm1376_vm12, %vm1632_vm10 }
 0x46d   : > { %vm1797_vm2 = vmor %vm1381_vm3, %vm1637_vm14  ;;  %vm567_vm14 = vcmp.eq.s32.totalorder %v8135_v9, %v14068_v47  ;;  %vm1234_vm3 = vcmp.eq.s32.totalorder %v8135_v9, %v14067_v50 }
 0x46e   : > { %vm2208_vm11 = vmor %vm1792_vm7, %vm2048_vm15  ;;  %vm1239_vm7 = vcmp.eq.s32.totalorder %v8135_v9, %v14069_v57 }
 0x46f   : > { %vm2213_vm9 = vmor %vm1797_vm2, %vm2053_vm8  ;;  %vm1650_vm8 = vcmp.eq.s32.totalorder %v8135_v9, %v14070_v40 }
 0x470   : > { %vm2624_vm1 = vmor %vm2208_vm11, %vm2464_vm0  ;;  %vm1655_vm0 = vcmp.eq.s32.totalorder %v8135_v9, %v14071_v36 }
 0x471   : > { %vm2629_vm12 = vmor %vm2213_vm9, %vm2469_vm6  ;;  %v2784_v38 = vsel %vm2624_vm1, 1.0, %v13473_v60  ;;  %vm2066_vm9 = vcmp.eq.s32.totalorder %v8135_v9, %v14072_v63  ;;  %vm2482_vm1 = vcmp.eq.s32.totalorder %v8135_v9, %v14074_v22 }
 0x472   : > { %v2789_v42 = vsel %vm2629_vm12, 1.0, %v13473_v60  ;;  %vm978_vm10 = vmor %vm562_vm13, %vm818_vm5  ;;  %vm2071_vm13 = vcmp.eq.s32.totalorder %v8135_v9, %v14073_v24  ;;  %vm2487_vm12 = vcmp.eq.s32.totalorder %v8135_v9, %v14075_v21 }
 0x473   : > { %v2904_v33 = vpack.c.bf16 %v2789_v42, %v2784_v38  ;;  %vm983_vm2 = vmor %vm567_vm14, %vm823_vm4 }
 0x474   : > { %vm1394_vm15 = vmor %vm978_vm10, %vm1234_vm3  ;;  %vm573_vm3 = vcmp.eq.s32.totalorder %v8166_v11, %v14077_v52  ;;  %vm829_vm10 = vcmp.eq.s32.totalorder %v8166_v11, %v14078_v6 }
 0x475   : > { %3791 = vmatmul.mubr.bf16.gmra.mrb[64].mxu0 %v2904_v33  ;;  %vm1399_vm11 = vmor %vm983_vm2, %vm1239_vm7  ;;  %v14094_v33 = vld [vmem:[#allocation148_spill] sm:$0xff] }
 0x476   : > { %vm1810_vm6 = vmor %vm1394_vm15, %vm1650_vm8  ;;  %3798 = vmatprep.mubr.bf16.mxu0 %v2981_v1  ;;  %vm834_vm8 = vcmp.eq.s32.totalorder %v8166_v11, %v14079_v7  ;;  %vm1245_vm15 = vcmp.eq.s32.totalorder %v8166_v11, %v14080_v59  ;;  %v14093_v1 = vld [vmem:[#allocation39_spill] sm:$0xff] }
 0x477   : > { %vm1815_vm5 = vmor %vm1399_vm11, %vm1655_vm0  ;;  %vm578_vm0 = vcmp.eq.s32.totalorder %v8166_v11, %v14081_v39 }
 0x478   : > { %vm2226_vm4 = vmor %vm1810_vm6, %vm2066_vm9  ;;  %vm1250_vm9 = vcmp.eq.s32.totalorder %v8166_v11, %v14082_v3 }
 0x479   : > { %vm2231_vm14 = vmor %vm1815_vm5, %vm2071_vm13  ;;  %vm1661_vm13 = vcmp.eq.s32.totalorder %v8166_v11, %v14083_v45  ;;  %vm1666_vm5 = vcmp.eq.s32.totalorder %v8166_v11, %v14084_v26 }
 0x47a   : > { %vm2642_vm7 = vmor %vm2226_vm4, %vm2482_vm1 }
 0x47b   : > { %vm2647_vm2 = vmor %vm2231_vm14, %vm2487_vm12  ;;  %v2802_v49 = vsel %vm2642_vm7, 1.0, %v13473_v60  ;;  %vm2077_vm12 = vcmp.eq.s32.totalorder %v8166_v11, %v14085_v8  ;;  %vm2493_vm7 = vcmp.eq.s32.totalorder %v8166_v11, %v14087_v48 }
 0x47c   : > { %v2807_v41 = vsel %vm2647_vm2, 1.0, %v13473_v60  ;;  %vm989_vm11 = vmor %vm573_vm3, %vm829_vm10  ;;  %vm2082_vm3 = vcmp.eq.s32.totalorder %v8166_v11, %v14086_v29  ;;  %vm2498_vm2 = vcmp.eq.s32.totalorder %v8166_v11, %v14088_v34 }
 0x47d   : > { %v2912_v0 = vpack.c.bf16 %v2807_v41, %v2802_v49  ;;  %vm994_vm6 = vmor %vm578_vm0, %vm834_vm8  ;;  %vm554_vm0 = vcmp.eq.s32.totalorder %v8313_v56, %v14051_v27  ;;  %v14096_v41 = vld [vmem:[#allocation149_spill] sm:$0xff] }
 0x47e   : > { %vm1405_vm1 = vmor %vm989_vm11, %vm1245_vm15  ;;  %vm810_vm11 = vcmp.eq.s32.totalorder %v8313_v56, %v14052_v43  ;;  %v4581_v43 = vpop.f32.mrb[22].mxu0 }
 0x47f   : > { %3646 = vmatmul.mubr.bf16.gmra.mrb[72].mxu1 %v2912_v0  ;;  %vm1410_vm4 = vmor %vm994_vm6, %vm1250_vm9  ;;  %vm815_vm6 = vcmp.eq.s32.totalorder %v8313_v56, %v14053_v51  ;;  %v4582_v51 = vpop.f32.mrb[23].mxu0  ;;  %v14097_v0 = vld [vmem:[#allocation152_spill] sm:$0xff] }
 0x480   : > { %vm1821_vm14 = vmor %vm1405_vm1, %vm1661_vm13  ;;  %vm559_vm1 = vcmp.eq.s32.totalorder %v8313_v56, %v14055_v15  ;;  %v2961_v15 = vld [vmem:[%s5709_s16 + $0xa8] sm:$0xff] }
 0x481   : > { %vm1826_vm10 = vmor %vm1410_vm4, %vm1666_vm5  ;;  %vm1226_vm5 = vcmp.eq.s32.totalorder %v8313_v56, %v14054_v18  ;;  %v2960_v18 = vld [vmem:[%s5709_s16 + $0xa0] sm:$0xff] }
 0x482   : > { %vm2237_vm8 = vmor %vm1821_vm14, %vm2077_vm12  ;;  %vm1231_vm12 = vcmp.eq.s32.totalorder %v8313_v56, %v14056_v28  ;;  %v11204_v28 = vadd.f32 %v4582_v51, %v4581_v43 }
 0x483   : > { %vm2242_vm15 = vmor %vm1826_vm10, %vm2082_vm3  ;;  %vm1647_vm3 = vcmp.eq.s32.totalorder %v8313_v56, %v14057_v32 }
 0x484   : > { %vm2653_vm9 = vmor %vm2237_vm8, %vm2493_vm7  ;;  %vm1642_vm8 = vcmp.eq.s32.totalorder %v8313_v56, %v14058_v10 }
 0x485   : > { %vm2658_vm13 = vmor %vm2242_vm15, %vm2498_vm2  ;;  %v2813_v58 = vsel %vm2653_vm9, 1.0, %v13473_v60  ;;  %vm2058_vm2 = vcmp.eq.s32.totalorder %v8313_v56, %v14059_v30  ;;  %vm2063_vm9 = vcmp.eq.s32.totalorder %v8313_v56, %v14061_v37  ;;  %v2982_v30 = vpack.c.bf16 %v2961_v15, %v2960_v18  ;;  %v14089_v37 = vld [vmem:[#allocation40_spill] sm:$0xff] }
 0x486   : > { %v2818_v20 = vsel %vm2658_vm13, 1.0, %v13473_v60  ;;  %vm970_vm4 = vmor %vm554_vm0, %vm810_vm11  ;;  %vm2474_vm11 = vcmp.eq.s32.totalorder %v8313_v56, %v14060_v23 }
 0x487   : > { %v2918_v27 = vpack.c.bf16 %v2818_v20, %v2813_v58  ;;  %vm975_vm14 = vmor %vm559_vm1, %vm815_vm6  ;;  %vm828_vm1 = vcmp.eq.s32.totalorder %v8135_v9, %v14078_v6  ;;  %v14099_v58 = vld [vmem:[#allocation156_spill] sm:$0xff] }
 0x488   : > { %vm1386_vm10 = vmor %vm970_vm4, %vm1226_vm5  ;;  %vm572_vm5 = vcmp.eq.s32.totalorder %v8135_v9, %v14077_v52  ;;  %vm2479_vm4 = vcmp.eq.s32.totalorder %v8313_v56, %v14062_v2  ;;  %v14090_v2 = vld [vmem:[#allocation71_spill] sm:$0xff]  ;;  %v14100_v20 = vld [vmem:[#allocation104_spill] sm:$0xff] }
 0x489   : > { %3653 = vmatprep.mubr.bf16.mxu1 %v2918_v27  ;;  %vm1391_vm7 = vmor %vm975_vm14, %vm1231_vm12  ;;  %vm833_vm14 = vcmp.eq.s32.totalorder %v8135_v9, %v14079_v7 }
 0x48a   : > { %vm1802_vm15 = vmor %vm1386_vm10, %vm1642_vm8  ;;  %vm577_vm10 = vcmp.eq.s32.totalorder %v8135_v9, %v14081_v39 }
 0x48b   : > { %vm1807_vm0 = vmor %vm1391_vm7, %vm1647_vm3  ;;  %vm1244_vm7 = vcmp.eq.s32.totalorder %v8135_v9, %v14080_v59 }
 0x48c   : > { %vm2218_vm6 = vmor %vm1802_vm15, %vm2058_vm2  ;;  %vm1249_vm2 = vcmp.eq.s32.totalorder %v8135_v9, %v14082_v3 }
 0x48d   : > { %vm2223_vm13 = vmor %vm1807_vm0, %vm2063_vm9  ;;  %vm1660_vm0 = vcmp.eq.s32.totalorder %v8135_v9, %v14083_v45 }
 0x48e   : > { %vm2634_vm12 = vmor %vm2218_vm6, %vm2474_vm11  ;;  %vm1665_vm11 = vcmp.eq.s32.totalorder %v8135_v9, %v14084_v26 }
 0x48f   : > { %vm2639_vm3 = vmor %vm2223_vm13, %vm2479_vm4  ;;  %v2794_v32 = vsel %vm2634_vm12, 1.0, %v13473_v60  ;;  %vm2076_vm13 = vcmp.eq.s32.totalorder %v8135_v9, %v14085_v8  ;;  %vm2492_vm12 = vcmp.eq.s32.totalorder %v8135_v9, %v14087_v48 }
 0x490   : > { %v2799_v10 = vsel %vm2639_vm3, 1.0, %v13473_v60  ;;  %vm988_vm8 = vmor %vm572_vm5, %vm828_vm1  ;;  %vm2081_vm5 = vcmp.eq.s32.totalorder %v8135_v9, %v14086_v29  ;;  %vm2497_vm3 = vcmp.eq.s32.totalorder %v8135_v9, %v14088_v34 }
 0x491   : > { %v2909_v23 = vpack.c.bf16 %v2799_v10, %v2794_v32  ;;  %vm993_vm15 = vmor %vm577_vm10, %vm833_vm14 }
 0x492   : > { %vm1404_vm9 = vmor %vm988_vm8, %vm1244_vm7  ;;  %vm583_vm7 = vcmp.eq.s32.totalorder %v8166_v11, %v14089_v37  ;;  %vm839_vm8 = vcmp.eq.s32.totalorder %v8166_v11, %v14090_v2 }
 0x493   : > { %3799 = vmatmul.mubr.bf16.gmra.mrb[68].mxu0 %v2909_v23  ;;  %vm1409_vm6 = vmor %vm993_vm15, %vm1249_vm2  ;;  %vm844_vm15 = vcmp.eq.s32.totalorder %v8166_v11, %v14091_v5 }
 0x494   : > { %vm1820_vm4 = vmor %vm1404_vm9, %vm1660_vm0  ;;  %3806 = vmatprep.mubr.bf16.mxu0 %v2982_v30  ;;  %vm588_vm9 = vcmp.eq.s32.totalorder %v8166_v11, %v14093_v1 }
 0x495   : > { %vm1825_vm1 = vmor %vm1409_vm6, %vm1665_vm11  ;;  %vm1255_vm11 = vcmp.eq.s32.totalorder %v8166_v11, %v14092_v4 }
 0x496   : > { %vm2236_vm14 = vmor %vm1820_vm4, %vm2076_vm13  ;;  %vm1260_vm13 = vcmp.eq.s32.totalorder %v8166_v11, %v14094_v33  ;;  %vm1671_vm4 = vcmp.eq.s32.totalorder %v8166_v11, %v14095_v54 }
 0x497   : > { %vm2241_vm10 = vmor %vm1825_vm1, %vm2081_vm5 }
 0x498   : > { %vm2652_vm2 = vmor %vm2236_vm14, %vm2492_vm12  ;;  %vm1676_vm12 = vcmp.eq.s32.totalorder %v8166_v11, %v14096_v41 }
 0x499   : > { %vm2657_vm0 = vmor %vm2241_vm10, %vm2497_vm3  ;;  %v2812_v38 = vsel %vm2652_vm2, 1.0, %v13473_v60  ;;  %vm2087_vm3 = vcmp.eq.s32.totalorder %v8166_v11, %v14097_v0  ;;  %vm2503_vm2 = vcmp.eq.s32.totalorder %v8166_v11, %v14099_v58 }
 0x49a   : > { %v2817_v42 = vsel %vm2657_vm0, 1.0, %v13473_v60  ;;  %vm999_vm6 = vmor %vm583_vm7, %vm839_vm8  ;;  %vm2092_vm7 = vcmp.eq.s32.totalorder %v8166_v11, %v14098_v19 }
 0x49b   : > { %v2917_v49 = vpack.c.bf16 %v2817_v42, %v2812_v38  ;;  %vm1004_vm5 = vmor %vm588_vm9, %vm844_vm15  ;;  %vm2508_vm15 = vcmp.eq.s32.totalorder %v8166_v11, %v14100_v20  ;;  %vm564_vm9 = vcmp.eq.s32.totalorder %v8313_v56, %v14064_v12 }
 0x49c   : > { %vm1415_vm1 = vmor %vm999_vm6, %vm1255_vm11  ;;  %vm820_vm6 = vcmp.eq.s32.totalorder %v8313_v56, %v14065_v62  ;;  %v4632_v62 = vpop.f32.mrb[24].mxu1 }
 0x49d   : > { %3654 = vmatmul.mubr.bf16.gmra.mrb[76].mxu1 %v2917_v49  ;;  %vm1420_vm14 = vmor %vm1004_vm5, %vm1260_vm13 }
 0x49e   : > { %vm1831_vm10 = vmor %vm1415_vm1, %vm1671_vm4  ;;  %vm825_vm4 = vcmp.eq.s32.totalorder %v8313_v56, %v14066_v13  ;;  %vm1236_vm1 = vcmp.eq.s32.totalorder %v8313_v56, %v14067_v50  ;;  %v4584_v13 = vpop.f32.mrb[24].mxu0  ;;  %v4633_v50 = vpop.f32.mrb[25].mxu1 }
 0x49f   : > { %vm1836_vm8 = vmor %vm1420_vm14, %vm1676_vm12  ;;  %vm569_vm12 = vcmp.eq.s32.totalorder %v8313_v56, %v14068_v47  ;;  %v4585_v47 = vpop.f32.mrb[25].mxu0 }
 0x4a0   : > { %vm2247_vm0 = vmor %vm1831_vm10, %vm2087_vm3  ;;  %vm1241_vm3 = vcmp.eq.s32.totalorder %v8313_v56, %v14069_v57  ;;  %vm1652_vm10 = vcmp.eq.s32.totalorder %v8313_v56, %v14070_v40  ;;  %v2962_v57 = vld [vmem:[%s5709_s16 + $0xb0] sm:$0xff]  ;;  %v2963_v40 = vld [vmem:[%s5709_s16 + $0xb8] sm:$0xff]  ;;  %v4587_v51 = vpop.f32.mrb[26].mxu0 }
 0x4a1   : > { %vm2252_vm11 = vmor %vm1836_vm8, %vm2092_vm7  ;;  %v4588_v15 = vpop.f32.mrb[27].mxu0 }
 0x4a2   : > { %vm2663_vm13 = vmor %vm2247_vm0, %vm2503_vm2  ;;  %vm1657_vm2 = vcmp.eq.s32.totalorder %v8313_v56, %v14071_v36  ;;  %v11288_v36 = vadd.f32 %v4633_v50, %v4632_v62  ;;  %v11305_v30 = vadd.f32 %v4588_v15, %v4587_v51  ;;  %v4590_v23 = vpop.f32.mrb[28].mxu0 }
 0x4a3   : > { %vm2668_vm5 = vmor %vm2252_vm11, %vm2508_vm15  ;;  %v2823_v27 = vsel %vm2663_vm13, 1.0, %v13473_v60  ;;  %vm2068_vm15 = vcmp.eq.s32.totalorder %v8313_v56, %v14072_v63  ;;  %vm2484_vm13 = vcmp.eq.s32.totalorder %v8313_v56, %v14074_v22  ;;  %v4635_v63 = vpop.f32.mrb[26].mxu1  ;;  %v4591_v49 = vpop.f32.mrb[29].mxu0 }
 0x4a4   : > { %v2828_v43 = vsel %vm2668_vm5, 1.0, %v13473_v60  ;;  %vm980_vm14 = vmor %vm564_vm9, %vm820_vm6  ;;  %vm2073_vm9 = vcmp.eq.s32.totalorder %v8313_v56, %v14073_v24  ;;  %vm2489_vm5 = vcmp.eq.s32.totalorder %v8313_v56, %v14075_v21  ;;  %14101 = vst [vmem:[#allocation155_spill] sm:$0xff] %v11288_v36  ;;  %v11290_v24 = vadd.f32 %v4585_v47, %v4584_v13  ;;  %v4636_v18 = vpop.f32.mrb[27].mxu1  ;;  %v4593_v13 = vpop.f32.mrb[30].mxu0 }
 0x4a5   : > { %v2923_v12 = vpack.c.bf16 %v2828_v43, %v2823_v27  ;;  %vm985_vm7 = vmor %vm569_vm12, %vm825_vm4  ;;  %vm582_vm12 = vcmp.eq.s32.totalorder %v8135_v9, %v14089_v37  ;;  %v11303_v10 = vadd.f32 %v4636_v18, %v4635_v63  ;;  %v4638_v22 = vpop.f32.mrb[28].mxu1  ;;  %v2983_v21 = vpack.c.bf16 %v2963_v40, %v2962_v57  ;;  %v4594_v47 = vpop.f32.mrb[31].mxu0 }
 0x4a6   : > { %vm1396_vm8 = vmor %vm980_vm14, %vm1236_vm1  ;;  %vm838_vm14 = vcmp.eq.s32.totalorder %v8135_v9, %v14090_v2  ;;  %v4639_v42 = vpop.f32.mrb[29].mxu1  ;;  %v11325_v62 = vadd.f32 %v4591_v49, %v4590_v23  ;;  %v11339_v63 = vadd.f32 %v4594_v47, %v4593_v13  ;;  %v4772_v51 = vpop.f32.mrb[32].mxu0 }
 0x4a7   : > { %3661 = vmatprep.mubr.bf16.mxu1 %v2923_v12  ;;  %vm1401_vm0 = vmor %vm985_vm7, %vm1241_vm3  ;;  %14102 = vst [vmem:[#allocation100_spill] sm:$0xff] %v11303_v10  ;;  %v11323_v43 = vadd.f32 %v4639_v42, %v4638_v22  ;;  %v4641_v12 = vpop.f32.mrb[30].mxu1  ;;  %v4773_v15 = vpop.f32.mrb[33].mxu0 }
 0x4a8   : > { %vm1812_vm11 = vmor %vm1396_vm8, %vm1652_vm10  ;;  %vm843_vm10 = vcmp.eq.s32.totalorder %v8135_v9, %v14091_v5  ;;  %vm1254_vm8 = vcmp.eq.s32.totalorder %v8135_v9, %v14092_v4  ;;  %14104 = vst [vmem:[#allocation89_spill] sm:$0xff] %v11325_v62  ;;  %v4642_v50 = vpop.f32.mrb[31].mxu1  ;;  %v4774_v23 = vadd.f32 %v4773_v15, %v4772_v51  ;;  %v14110_v51 = vld [vmem:[#allocation74_spill] sm:$0xff] }
 0x4a9   : > { %vm1817_vm6 = vmor %vm1401_vm0, %vm1657_vm2  ;;  %vm587_vm2 = vcmp.eq.s32.totalorder %v8135_v9, %v14093_v1  ;;  %14103 = vst [vmem:[#allocation134_spill] sm:$0xff] %v11323_v43  ;;  %v11337_v57 = vadd.f32 %v4642_v50, %v4641_v12  ;;  %v4660_v40 = vpop.f32.mrb[32].mxu1  ;;  %v14109_v12 = vld [vmem:[#allocation165_spill] sm:$0xff]  ;;  %v14112_v43 = vld [vmem:[#allocation166_spill] sm:$0xff] }
 0x4aa   : > { %vm2228_vm4 = vmor %vm1812_vm11, %vm2068_vm15  ;;  %vm1259_vm15 = vcmp.eq.s32.totalorder %v8135_v9, %v14094_v33  ;;  %vm1670_vm11 = vcmp.eq.s32.totalorder %v8135_v9, %v14095_v54  ;;  %14106 = vst [vmem:[#allocation26_spill] sm:$0xff] %v11339_v63  ;;  %v4661_v18 = vpop.f32.mrb[33].mxu1 }
 0x4ab   : > { %vm2233_vm1 = vmor %vm1817_vm6, %vm2073_vm9  ;;  %14105 = vst [vmem:[#allocation145_spill] sm:$0xff] %v11337_v57  ;;  %v4663_v22 = vpop.f32.mrb[34].mxu1 }
 0x4ac   : > { %vm2644_vm3 = vmor %vm2228_vm4, %vm2484_vm13  ;;  %vm1675_vm13 = vcmp.eq.s32.totalorder %v8135_v9, %v14096_v41  ;;  %v4664_v42 = vpop.f32.mrb[35].mxu1 }
 0x4ad   : > { %vm2649_vm7 = vmor %vm2233_vm1, %vm2489_vm5  ;;  %v2804_v32 = vsel %vm2644_vm3, 1.0, %v13473_v60  ;;  %vm2086_vm5 = vcmp.eq.s32.totalorder %v8135_v9, %v14097_v0  ;;  %vm2502_vm3 = vcmp.eq.s32.totalorder %v8135_v9, %v14099_v58  ;;  %v4665_v50 = vadd.f32 %v4664_v42, %v4663_v22  ;;  %v4666_v47 = vpop.f32.mrb[36].mxu1 }
 0x4ae   : > { %v2809_v38 = vsel %vm2649_vm7, 1.0, %v13473_v60  ;;  %vm998_vm0 = vmor %vm582_vm12, %vm838_vm14  ;;  %vm2091_vm12 = vcmp.eq.s32.totalorder %v8135_v9, %v14098_v19  ;;  %vm2507_vm7 = vcmp.eq.s32.totalorder %v8135_v9, %v14100_v20  ;;  %v4667_v15 = vpop.f32.mrb[37].mxu1 }
 0x4af   : > { %v2914_v27 = vpack.c.bf16 %v2809_v38, %v2804_v32  ;;  %vm1003_vm9 = vmor %vm587_vm2, %vm843_vm10  ;;  %v4662_v32 = vadd.f32 %v4661_v18, %v4660_v40  ;;  %v4775_v38 = vpop.f32.mrb[34].mxu0  ;;  %v14111_v18 = vld [vmem:[#allocation119_spill] sm:$0xff]  ;;  %v3571_v10 = vadd.f32 %v4665_v50, %v14112_v43  ;;  %v4669_v22 = vpop.f32.mrb[38].mxu1  ;;  %v14116_v43 = vld [vmem:[#allocation161_spill] sm:$0xff] }
 0x4b0   : > { %vm1414_vm6 = vmor %vm998_vm0, %vm1254_vm8  ;;  %v4776_v49 = vpop.f32.mrb[35].mxu0  ;;  %v14117_v50 = vld [vmem:[#allocation19_spill] sm:$0xff] }
 0x4b1   : > { %3807 = vmatmul.mubr.bf16.gmra.mrb[72].mxu0 %v2914_v27  ;;  %vm1419_vm4 = vmor %vm1003_vm9, %vm1259_vm15  ;;  %v14108_v27 = vld [vmem:[#allocation73_spill] sm:$0xff]  ;;  %v3568_v13 = vadd.f32 %v4662_v32, %v14109_v12  ;;  %v4777_v40 = vadd.f32 %v4776_v49, %v4775_v38  ;;  %vm1265_vm9 = vcmp.eq.s32.totalorder %v8166_v11, %v14111_v18  ;;  %v4668_v32 = vadd.f32 %v4667_v15, %v4666_v47  ;;  %v14115_v12 = vld [vmem:[#allocation160_spill] sm:$0xff]  ;;  %v4778_v17 = vpop.f32.mrb[36].mxu0 }
 0x4b2   : > { %vm1830_vm1 = vmor %vm1414_vm6, %vm1670_vm11  ;;  %3814 = vmatprep.mubr.bf16.mxu0 %v2983_v21  ;;  %v14107_v21 = vld [vmem:[#allocation42_spill] sm:$0xff]  ;;  %vm849_vm0 = vcmp.eq.s32.totalorder %v8166_v11, %v14108_v27  ;;  %vm854_vm11 = vcmp.eq.s32.totalorder %v8166_v11, %v14110_v51  ;;  %v14114_v49 = vld [vmem:[#allocation41_spill] sm:$0xff] }
 0x4b3   : > { %vm1835_vm14 = vmor %vm1419_vm4, %vm1675_vm13  ;;  %vm593_vm8 = vcmp.eq.s32.totalorder %v8166_v11, %v14107_v21  ;;  %v11373_v42 = vadd.f32 %v4774_v23, %v3568_v13  ;;  %vm598_vm13 = vcmp.eq.s32.totalorder %v8166_v11, %v14114_v49  ;;  %v4670_v23 = vpop.f32.mrb[39].mxu1  ;;  %v3576_v47 = vadd.f32 %v4668_v32, %v14117_v50 }
 0x4b4   : > { %vm2246_vm10 = vmor %vm1830_vm1, %vm2086_vm5  ;;  %vm1270_vm5 = vcmp.eq.s32.totalorder %v8166_v11, %v14115_v12  ;;  %vm1681_vm1 = vcmp.eq.s32.totalorder %v8166_v11, %v14116_v43  ;;  %v4671_v15 = vadd.f32 %v4670_v23, %v4669_v22  ;;  %v11392_v36 = vadd.f32 %v4777_v40, %v3571_v10  ;;  %v4672_v61 = vpop.f32.mrb[40].mxu1  ;;  %v14120_v10 = vld [vmem:[#allocation185_spill] sm:$0xff] }
 0x4b5   : > { %vm2251_vm2 = vmor %vm1835_vm14, %vm2091_vm12  ;;  %14113 = vst [vmem:[#allocation57_spill] sm:$0xff] %v11373_v42  ;;  %3855 = vadd.xlane.f32.xlu1 %v11373_v42  ;;  %vm1686_vm14 = vcmp.eq.s32.totalorder %v8166_v11, %v14119_v55  ;;  %v14121_v42 = vld [vmem:[#allocation91_spill] sm:$0xff] }
 0x4b6   : > { %vm2662_vm15 = vmor %vm2246_vm10, %vm2502_vm3  ;;  %14118 = vst [vmem:[#allocation58_spill] sm:$0xff] %v11392_v36  ;;  %v3579_v40 = vadd.f32 %v4671_v15, %v14120_v10  ;;  %3857 = vadd.xlane.f32.xlu0 %v11392_v36 }
 0x4b7   : > { %vm2667_vm6 = vmor %vm2251_vm2, %vm2507_vm7  ;;  %v2822_v57 = vsel %vm2662_vm15, 1.0, %v13473_v60 }
 0x4b8   : > { %v2827_v38 = vsel %vm2667_vm6, 1.0, %v13473_v60  ;;  %vm1009_vm4 = vmor %vm593_vm8, %vm849_vm0  ;;  %vm2097_vm8 = vcmp.eq.s32.totalorder %v8166_v11, %v14121_v42  ;;  %vm2513_vm0 = vcmp.eq.s32.totalorder %v8166_v11, %v14123_v35 }
 0x4b9   : > { %v2922_v13 = vpack.c.bf16 %v2827_v38, %v2822_v57  ;;  %vm1014_vm12 = vmor %vm598_vm13, %vm854_vm11  ;;  %v4673_v57 = vpop.f32.mrb[41].mxu1  ;;  %v4779_v38 = vpop.f32.mrb[37].mxu0  ;;  %vm574_vm13 = vcmp.eq.s32.totalorder %v8313_v56, %v14077_v52 }
 0x4ba   : > { %vm1425_vm3 = vmor %vm1009_vm4, %vm1265_vm9  ;;  %v4674_v32 = vadd.f32 %v4673_v57, %v4672_v61  ;;  %v4675_v22 = vpop.f32.mrb[42].mxu1  ;;  %v4780_v23 = vadd.f32 %v4779_v38, %v4778_v17  ;;  %v4781_v50 = vpop.f32.mrb[38].mxu0  ;;  %v14124_v17 = vld [vmem:[#allocation101_spill] sm:$0xff]  ;;  %vm2518_vm9 = vcmp.eq.s32.totalorder %v8166_v11, %v14125_v25  ;;  %vm830_vm4 = vcmp.eq.s32.totalorder %v8313_v56, %v14078_v6 }
 0x4bb   : > { %3662 = vmatmul.mubr.bf16.gmra.mrb[80].mxu1 %v2922_v13  ;;  %vm1430_vm10 = vmor %vm1014_vm12, %vm1270_vm5  ;;  %v14122_v13 = vld [vmem:[#allocation167_spill] sm:$0xff]  ;;  %v4676_v15 = vpop.f32.mrb[43].mxu1  ;;  %v4782_v61 = vpop.f32.mrb[39].mxu0 }
 0x4bc   : > { %vm1841_vm7 = vmor %vm1425_vm3, %vm1681_vm1  ;;  %vm2102_vm2 = vcmp.eq.s32.totalorder %v8166_v11, %v14122_v13  ;;  %v3584_v57 = vadd.f32 %v4674_v32, %v14124_v17  ;;  %v4677_v38 = vadd.f32 %v4676_v15, %v4675_v22  ;;  %v11418_v10 = vadd.f32 %v4780_v23, %v3576_v47  ;;  %v4678_v32 = vpop.f32.mrb[44].mxu1 }
 0x4bd   : > { %vm1846_vm15 = vmor %vm1430_vm10, %vm1686_vm14  ;;  %v4783_v36 = vadd.f32 %v4782_v61, %v4781_v50  ;;  %vm835_vm1 = vcmp.eq.s32.totalorder %v8313_v56, %v14079_v7  ;;  %v4679_v47 = vpop.f32.mrb[45].mxu1  ;;  %vm579_vm14 = vcmp.eq.s32.totalorder %v8313_v56, %v14081_v39  ;;  %vm1246_vm3 = vcmp.eq.s32.totalorder %v8313_v56, %v14080_v59 }
 0x4be   : > { %vm2257_vm11 = vmor %vm1841_vm7, %vm2097_vm8  ;;  %v3587_v63 = vadd.f32 %v4677_v38, %v14126_v46  ;;  %3859 = vadd.xlane.f32.xlu1 %v11418_v10  ;;  %v4680_v46 = vadd.f32 %v4679_v47, %v4678_v32  ;;  %vm1251_vm7 = vcmp.eq.s32.totalorder %v8313_v56, %v14082_v3  ;;  %vm1662_vm8 = vcmp.eq.s32.totalorder %v8313_v56, %v14083_v45 }
 0x4bf   : > { %vm2262_vm6 = vmor %vm1846_vm15, %vm2102_vm2  ;;  %v11427_v62 = vadd.f32 %v4783_v36, %v3579_v40  ;;  %v4681_v36 = vpop.f32.mrb[46].mxu1  ;;  %v4784_v40 = vpop.f32.mrb[40].mxu0 }
 0x4c0   : > { %vm2673_vm5 = vmor %vm2257_vm11, %vm2513_vm0  ;;  %v4682_v39 = vpop.f32.mrb[47].mxu1  ;;  %v4785_v50 = vpop.f32.mrb[41].mxu0  ;;  %v3592_v61 = vadd.f32 %v4680_v46, %v10535_v16  ;;  %vm1667_vm0 = vcmp.eq.s32.totalorder %v8313_v56, %v14084_v26 }
 0x4c1   : > { %vm2678_vm12 = vmor %vm2262_vm6, %vm2518_vm9  ;;  %3861 = vadd.xlane.f32.xlu0 %v11427_v62  ;;  %v2833_v22 = vsel %vm2673_vm5, 1.0, %v13473_v60  ;;  %v4683_v6 = vadd.f32 %v4682_v39, %v4681_v36  ;;  %v4786_v17 = vadd.f32 %v4785_v50, %v4784_v40  ;;  %v4787_v38 = vpop.f32.mrb[42].mxu0  ;;  %vm2078_vm9 = vcmp.eq.s32.totalorder %v8313_v56, %v14085_v8  ;;  %v2964_v8 = vld [vmem:[%s5709_s16 + $0xc0] sm:$0xff] }
 0x4c2   : > { %v2838_v23 = vsel %vm2678_vm12, 1.0, %v13473_v60  ;;  %vm990_vm10 = vmor %vm574_vm13, %vm830_vm4  ;;  %v4788_v52 = vpop.f32.mrb[43].mxu0  ;;  %vm2083_vm13 = vcmp.eq.s32.totalorder %v8313_v56, %v14086_v29  ;;  %vm2494_vm5 = vcmp.eq.s32.totalorder %v8313_v56, %v14087_v48  ;;  %vm2499_vm12 = vcmp.eq.s32.totalorder %v8313_v56, %v14088_v34  ;;  %v2965_v29 = vld [vmem:[%s5709_s16 + $0xc8] sm:$0xff] }
 0x4c3   : > { %v2928_v15 = vpack.c.bf16 %v2838_v23, %v2833_v22  ;;  %vm995_vm2 = vmor %vm579_vm14, %vm835_vm1  ;;  %v3595_v7 = vadd.f32 %v4683_v6, %v10563_v53  ;;  %v11464_v16 = vadd.f32 %v4786_v17, %v3584_v57  ;;  %v4789_v3 = vadd.f32 %v4788_v52, %v4787_v38 }
 0x4c4   : > { %vm1406_vm15 = vmor %vm990_vm10, %vm1246_vm3  ;;  %v4684_v26 = vpop.f32.mrb[48].mxu1  ;;  %vm592_vm3 = vcmp.eq.s32.totalorder %v8135_v9, %v14107_v21  ;;  %vm848_vm10 = vcmp.eq.s32.totalorder %v8135_v9, %v14108_v27  ;;  %v2984_v34 = vpack.c.bf16 %v2965_v29, %v2964_v8  ;;  %v14130_v8 = vld [vmem:[#allocation75_spill] sm:$0xff] }
 0x4c5   : > { %3669 = vmatprep.mubr.bf16.mxu1 %v2928_v15  ;;  %vm1411_vm11 = vmor %vm995_vm2, %vm1251_vm7  ;;  %v11473_v59 = vadd.f32 %v4789_v3, %v3587_v63  ;;  %3863 = vadd.xlane.f32.xlu1 %v11464_v16  ;;  %v4685_v53 = vpop.f32.mrb[49].mxu1  ;;  %v4790_v32 = vpop.f32.mrb[44].mxu0  ;;  %vm853_vm2 = vcmp.eq.s32.totalorder %v8135_v9, %v14110_v51 }
 0x4c6   : > { %vm1822_vm6 = vmor %vm1406_vm15, %vm1662_vm8  ;;  %v4686_v63 = vadd.f32 %v4685_v53, %v4684_v26  ;;  %v4687_v57 = vpop.f32.mrb[50].mxu1  ;;  %vm597_vm8 = vcmp.eq.s32.totalorder %v8135_v9, %v14114_v49  ;;  %v4791_v46 = vpop.f32.mrb[45].mxu0  ;;  %v14129_v26 = vld [vmem:[#allocation44_spill] sm:$0xff] }
 0x4c7   : > { %vm1827_vm4 = vmor %vm1411_vm11, %vm1667_vm0  ;;  %3865 = vadd.xlane.f32.xlu0 %v11473_v59  ;;  %vm1264_vm0 = vcmp.eq.s32.totalorder %v8135_v9, %v14111_v18  ;;  %v4688_v47 = vpop.f32.mrb[51].mxu1  ;;  %vm1269_vm11 = vcmp.eq.s32.totalorder %v8135_v9, %v14115_v12  ;;  %v4792_v40 = vadd.f32 %v4791_v46, %v4790_v32  ;;  %v4793_v22 = vpop.f32.mrb[46].mxu0 }
 0x4c8   : > { %vm2238_vm1 = vmor %vm1822_vm6, %vm2078_vm9  ;;  %v3600_v48 = vadd.f32 %v4686_v63, %v10869_v14  ;;  %v4689_v36 = vadd.f32 %v4688_v47, %v4687_v57  ;;  %vm1680_vm6 = vcmp.eq.s32.totalorder %v8135_v9, %v14116_v43  ;;  %v4794_v50 = vpop.f32.mrb[47].mxu0  ;;  %v14131_v47 = vld [vmem:[#allocation76_spill] sm:$0xff] }
 0x4c9   : > { %vm11478_vm14 = vmor %vm1827_vm4, %vm2083_vm13  ;;  %v11523_v6 = vadd.f32 %v4792_v40, %v3592_v61  ;;  %v4795_v17 = vadd.f32 %v4794_v50, %v4793_v22  ;;  %vm1685_vm4 = vcmp.eq.s32.totalorder %v8135_v9, %v14119_v55  ;;  %v14134_v50 = vld [vmem:[#allocation175_spill] sm:$0xff] }
 0x4ca   : > { %vm2654_vm7 = vmor %vm2238_vm1, %vm2494_vm5  ;;  %v3603_v15 = vadd.f32 %v4689_v36, %v10885_v44  ;;  %v14132_v36 = vld [vmem:[#allocation174_spill] sm:$0xff] }
 0x4cb   : > { %vm2659_vm15 = vmor %vm11478_vm14, %vm2499_vm12  ;;  %v2814_v23 = vsel %vm2654_vm7, 1.0, %v13473_v60  ;;  %v11533_v38 = vadd.f32 %v4795_v17, %v3595_v7  ;;  %3867 = vadd.xlane.f32.xlu1 %v11523_v6  ;;  %vm2101_vm14 = vcmp.eq.s32.totalorder %v8135_v9, %v14122_v13  ;;  %vm2512_vm7 = vcmp.eq.s32.totalorder %v8135_v9, %v14123_v35  ;;  %v14136_v17 = vld [vmem:[#allocation176_spill] sm:$0xff] }
 0x4cc   : > { %v2819_v39 = vsel %vm2659_vm15, 1.0, %v13473_v60  ;;  %vm1008_vm9 = vmor %vm592_vm3, %vm848_vm10  ;;  %v4690_v52 = vpop.f32.mrb[52].mxu1  ;;  %vm2096_vm10 = vcmp.eq.s32.totalorder %v8135_v9, %v14121_v42 }
 0x4cd   : > { %v2919_v14 = vpack.c.bf16 %v2819_v39, %v2814_v23  ;;  %vm1013_vm13 = vmor %vm597_vm8, %vm853_vm2  ;;  %v4691_v44 = vpop.f32.mrb[53].mxu1  ;;  %3869 = vadd.xlane.f32.xlu0 %v11533_v38  ;;  %vm2517_vm2 = vcmp.eq.s32.totalorder %v8135_v9, %v14125_v25 }
 0x4ce   : > { %vm1424_vm5 = vmor %vm1008_vm9, %vm1264_vm0  ;;  %v4692_v61 = vadd.f32 %v4691_v44, %v4690_v52  ;;  %v4693_v7 = vpop.f32.mrb[54].mxu1  ;;  %vm603_vm0 = vcmp.eq.s32.totalorder %v8166_v11, %v14129_v26  ;;  %v14137_v52 = vld [vmem:[#allocation179_spill] sm:$0xff]  ;;  %v14138_v44 = vld [vmem:[#allocation180_spill] sm:$0xff] }
 0x4cf   : > { %3815 = vmatmul.mubr.bf16.gmra.mrb[76].mxu0 %v2919_v14  ;;  %vm1429_vm1 = vmor %vm1013_vm13, %vm1269_vm11  ;;  %v4694_v53 = vpop.f32.mrb[55].mxu1  ;;  %vm859_vm11 = vcmp.eq.s32.totalorder %v8166_v11, %v14130_v8 }
 0x4d0   : > { %vm1840_vm12 = vmor %vm1424_vm5, %vm1680_vm6  ;;  %3822 = vmatprep.mubr.bf16.mxu0 %v2984_v34  ;;  %v4796_v3 = vpop.f32.mrb[48].mxu0  ;;  %v11556_v29 = vadd.f32 %v4692_v61, %v11172_v31  ;;  %v4695_v63 = vadd.f32 %v4694_v53, %v4693_v7  ;;  %vm864_vm6 = vcmp.eq.s32.totalorder %v8166_v11, %v14131_v47  ;;  %v14133_v34 = vld [vmem:[#allocation43_spill] sm:$0xff] }
 0x4d1   : > { %vm1845_vm3 = vmor %vm1429_vm1, %vm1685_vm4  ;;  %v4797_v45 = vpop.f32.mrb[49].mxu0  ;;  %vm1275_vm4 = vcmp.eq.s32.totalorder %v8166_v11, %v14132_v36  ;;  %vm608_vm5 = vcmp.eq.s32.totalorder %v8166_v11, %v14133_v34 }
 0x4d2   : > { %vm2256_vm8 = vmor %vm1840_vm12, %vm2096_vm10  ;;  %v4798_v57 = vadd.f32 %v4797_v45, %v4796_v3  ;;  %v4799_v32 = vpop.f32.mrb[50].mxu0  ;;  %v11566_v40 = vadd.f32 %v4695_v63, %v11204_v28  ;;  %vm1280_vm12 = vcmp.eq.s32.totalorder %v8166_v11, %v14134_v50  ;;  %v14135_v28 = vld [vmem:[#allocation178_spill] sm:$0xff]  ;;  %v14140_v63 = vld [vmem:[#allocation109_spill] sm:$0xff] }
 0x4d3   : > { %vm2261_vm15 = vmor %vm1845_vm3, %vm2101_vm14  ;;  %v4800_v46 = vpop.f32.mrb[51].mxu0  ;;  %vm1691_vm14 = vcmp.eq.s32.totalorder %v8166_v11, %v14135_v28 }
 0x4d4   : > { %vm2672_vm9 = vmor %vm2256_vm8, %vm2512_vm7  ;;  %v11568_v31 = vadd.f32 %v4798_v57, %v3600_v48  ;;  %v4801_v22 = vadd.f32 %v4800_v46, %v4799_v32  ;;  %vm1696_vm7 = vcmp.eq.s32.totalorder %v8166_v11, %v14136_v17 }
 0x4d5   : > { %vm2677_vm13 = vmor %vm2261_vm15, %vm2517_vm2  ;;  %v2832_v23 = vsel %vm2672_vm9, 1.0, %v13473_v60  ;;  %vm2107_vm2 = vcmp.eq.s32.totalorder %v8166_v11, %v14137_v52  ;;  %vm2112_vm15 = vcmp.eq.s32.totalorder %v8166_v11, %v14138_v44 }
 0x4d6   : > { %v2837_v39 = vsel %vm2677_vm13, 1.0, %v13473_v60  ;;  %vm1019_vm1 = vmor %vm603_vm0, %vm859_vm11  ;;  %v11584_v14 = vadd.f32 %v4801_v22, %v3603_v15  ;;  %3871 = vadd.xlane.f32.xlu1 %v11568_v31  ;;  %v14139_v15 = vld [vmem:[#allocation183_spill] sm:$0xff]  ;;  %v14142_v22 = vld [vmem:[#allocation77_spill] sm:$0xff] }
 0x4d7   : > { %v2927_v48 = vpack.c.bf16 %v2837_v39, %v2832_v23  ;;  %vm1024_vm3 = vmor %vm608_vm5, %vm864_vm6  ;;  %vm2523_vm9 = vcmp.eq.s32.totalorder %v8166_v11, %v14139_v15  ;;  %vm840_vm5 = vcmp.eq.s32.totalorder %v8313_v56, %v14090_v2  ;;  %v14143_v39 = vld [vmem:[#allocation78_spill] sm:$0xff] }
 0x4d8   : > { %vm1435_vm10 = vmor %vm1019_vm1, %vm1275_vm4  ;;  %3873 = vadd.xlane.f32.xlu0 %v11584_v14  ;;  %vm584_vm4 = vcmp.eq.s32.totalorder %v8313_v56, %v14089_v37  ;;  %vm2528_vm1 = vcmp.eq.s32.totalorder %v8166_v11, %v14140_v63 }
 0x4d9   : > { %3670 = vmatmul.mubr.bf16.gmra.mrb[84].mxu1 %v2927_v48  ;;  %vm1440_vm8 = vmor %vm1024_vm3, %vm1280_vm12 }
 0x4da   : > { %vm1851_vm0 = vmor %vm1435_vm10, %vm1691_vm14  ;;  %v4696_v61 = vpop.f32.mrb[56].mxu1  ;;  %vm845_vm14 = vcmp.eq.s32.totalorder %v8313_v56, %v14091_v5  ;;  %vm1256_vm10 = vcmp.eq.s32.totalorder %v8313_v56, %v14092_v4  ;;  %v2966_v4 = vld [vmem:[%s5709_s16 + $0xd0] sm:$0xff] }
 0x4db   : > { %vm1856_vm11 = vmor %vm1440_vm8, %vm1696_vm7  ;;  %v4697_v7 = vpop.f32.mrb[57].mxu1  ;;  %vm589_vm7 = vcmp.eq.s32.totalorder %v8313_v56, %v14093_v1  ;;  %v2967_v1 = vld [vmem:[%s5709_s16 + $0xd8] sm:$0xff] }
 0x4dc   : > { %vm2267_vm6 = vmor %vm1851_vm0, %vm2107_vm2  ;;  %v4698_v3 = vadd.f32 %v4697_v7, %v4696_v61  ;;  %v4699_v53 = vpop.f32.mrb[58].mxu1  ;;  %vm1261_vm2 = vcmp.eq.s32.totalorder %v8313_v56, %v14094_v33  ;;  %vm1672_vm0 = vcmp.eq.s32.totalorder %v8313_v56, %v14095_v54 }
 0x4dd   : > { %vm2272_vm13 = vmor %vm1856_vm11, %vm2112_vm15  ;;  %v4700_v45 = vpop.f32.mrb[59].mxu1 }
 0x4de   : > { %vm2683_vm12 = vmor %vm2267_vm6, %vm2523_vm9  ;;  %v11605_v57 = vadd.f32 %v4698_v3, %v11290_v24  ;;  %v4701_v32 = vadd.f32 %v4700_v45, %v4699_v53  ;;  %vm1677_vm9 = vcmp.eq.s32.totalorder %v8313_v56, %v14096_v41  ;;  %v2985_v41 = vpack.c.bf16 %v2967_v1, %v2966_v4  ;;  %v14144_v3 = vld [vmem:[#allocation123_spill] sm:$0xff]  ;;  %v14145_v53 = vld [vmem:[#allocation17_spill] sm:$0xff] }
 0x4df   : > { %vm2688_vm3 = vmor %vm2272_vm13, %vm2528_vm1  ;;  %v2843_v46 = vsel %vm2683_vm12, 1.0, %v13473_v60  ;;  %vm2088_vm13 = vcmp.eq.s32.totalorder %v8313_v56, %v14097_v0  ;;  %vm2504_vm12 = vcmp.eq.s32.totalorder %v8313_v56, %v14099_v58  ;;  %v14149_v4 = vld [vmem:[#allocation92_spill] sm:$0xff] }
 0x4e0   : > { %v2848_v37 = vsel %vm2688_vm3, 1.0, %v13473_v60  ;;  %vm1000_vm8 = vmor %vm584_vm4, %vm840_vm5  ;;  %v11616_v2 = vadd.f32 %v4701_v32, %v11305_v30  ;;  %vm2093_vm5 = vcmp.eq.s32.totalorder %v8313_v56, %v14098_v19  ;;  %v14141_v30 = vld [vmem:[#allocation46_spill] sm:$0xff]  ;;  %v14146_v32 = vld [vmem:[#allocation45_spill] sm:$0xff] }
 0x4e1   : > { %v2933_v5 = vpack.c.bf16 %v2848_v37, %v2843_v46  ;;  %vm1005_vm15 = vmor %vm589_vm7, %vm845_vm14  ;;  %vm2509_vm14 = vcmp.eq.s32.totalorder %v8313_v56, %v14100_v20  ;;  %vm602_vm7 = vcmp.eq.s32.totalorder %v8135_v9, %v14129_v26 }
 0x4e2   : > { %vm1416_vm11 = vmor %vm1000_vm8, %vm1256_vm10  ;;  %vm858_vm8 = vcmp.eq.s32.totalorder %v8135_v9, %v14130_v8 }
 0x4e3   : > { %3677 = vmatprep.mubr.bf16.mxu1 %v2933_v5  ;;  %vm1421_vm6 = vmor %vm1005_vm15, %vm1261_vm2  ;;  %v14148_v5 = vld [vmem:[#allocation192_spill] sm:$0xff] }
 0x4e4   : > { %vm1832_vm4 = vmor %vm1416_vm11, %vm1672_vm0  ;;  %vm863_vm0 = vcmp.eq.s32.totalorder %v8135_v9, %v14131_v47  ;;  %vm1274_vm11 = vcmp.eq.s32.totalorder %v8135_v9, %v14132_v36 }
 0x4e5   : > { %vm1837_vm1 = vmor %vm1421_vm6, %vm1677_vm9  ;;  %vm607_vm9 = vcmp.eq.s32.totalorder %v8135_v9, %v14133_v34 }
 0x4e6   : > { %vm2248_vm3 = vmor %vm1832_vm4, %vm2088_vm13  ;;  %vm1279_vm13 = vcmp.eq.s32.totalorder %v8135_v9, %v14134_v50  ;;  %vm1690_vm4 = vcmp.eq.s32.totalorder %v8135_v9, %v14135_v28 }
 0x4e7   : > { %vm2253_vm10 = vmor %vm1837_vm1, %vm2093_vm5 }
 0x4e8   : > { %vm2664_vm2 = vmor %vm2248_vm3, %vm2504_vm12  ;;  %vm1695_vm12 = vcmp.eq.s32.totalorder %v8135_v9, %v14136_v17 }
 0x4e9   : > { %vm2669_vm15 = vmor %vm2253_vm10, %vm2509_vm14  ;;  %v2824_v33 = vsel %vm2664_vm2, 1.0, %v13473_v60  ;;  %vm2106_vm14 = vcmp.eq.s32.totalorder %v8135_v9, %v14137_v52  ;;  %vm2522_vm2 = vcmp.eq.s32.totalorder %v8135_v9, %v14139_v15 }
 0x4ea   : > { %v2829_v54 = vsel %vm2669_vm15, 1.0, %v13473_v60  ;;  %vm1018_vm6 = vmor %vm602_vm7, %vm858_vm8  ;;  %vm2111_vm7 = vcmp.eq.s32.totalorder %v8135_v9, %v14138_v44 }
 0x4eb   : > { %v2924_v0 = vpack.c.bf16 %v2829_v54, %v2824_v33  ;;  %vm1023_vm5 = vmor %vm607_vm9, %vm863_vm0  ;;  %vm869_vm9 = vcmp.eq.s32.totalorder %v8166_v11, %v14142_v22  ;;  %v14151_v33 = vld [vmem:[#allocation52_spill] sm:$0xff] }
 0x4ec   : > { %vm1434_vm1 = vmor %vm1018_vm6, %vm1274_vm11  ;;  %vm613_vm11 = vcmp.eq.s32.totalorder %v8166_v11, %v14141_v30  ;;  %vm2527_vm6 = vcmp.eq.s32.totalorder %v8135_v9, %v14140_v63 }
 0x4ed   : > { %3823 = vmatmul.mubr.bf16.gmra.mrb[80].mxu0 %v2924_v0  ;;  %vm1439_vm3 = vmor %vm1023_vm5, %vm1279_vm13 }
 0x4ee   : > { %vm1850_vm10 = vmor %vm1434_vm1, %vm1690_vm4  ;;  %3830 = vmatprep.mubr.bf16.mxu0 %v2985_v41  ;;  %v4802_v19 = vpop.f32.mrb[52].mxu0  ;;  %vm874_vm4 = vcmp.eq.s32.totalorder %v8166_v11, %v14143_v39  ;;  %vm1285_vm1 = vcmp.eq.s32.totalorder %v8166_v11, %v14144_v3  ;;  %v14152_v41 = vld [vmem:[#allocation96_spill] sm:$0xff] }
 0x4ef   : > { %vm1855_vm8 = vmor %vm1439_vm3, %vm1695_vm12  ;;  %v4803_v58 = vpop.f32.mrb[53].mxu0  ;;  %vm1290_vm12 = vcmp.eq.s32.totalorder %v8166_v11, %v14145_v53  ;;  %vm618_vm3 = vcmp.eq.s32.totalorder %v8166_v11, %v14146_v32 }
 0x4f0   : > { %vm2266_vm0 = vmor %vm1850_vm10, %vm2106_vm14  ;;  %v4804_v20 = vadd.f32 %v4803_v58, %v4802_v19  ;;  %v4805_v24 = vpop.f32.mrb[54].mxu0 }
 0x4f1   : > { %vm2271_vm15 = vmor %vm1855_vm8, %vm2111_vm7  ;;  %v4806_v23 = vpop.f32.mrb[55].mxu0 }
 0x4f2   : > { %vm2682_vm13 = vmor %vm2266_vm0, %vm2522_vm2  ;;  %v11665_v48 = vadd.f32 %v4804_v20, %v11556_v29  ;;  %v4807_v61 = vadd.f32 %v4806_v23, %v4805_v24  ;;  %v14147_v29 = vld [vmem:[#allocation50_spill] sm:$0xff]  ;;  %vm2117_vm0 = vcmp.eq.s32.totalorder %v8166_v11, %v14148_v5  ;;  %v14153_v20 = vld [vmem:[#allocation89_spill] sm:$0xff] }
 0x4f3   : > { %vm2687_vm5 = vmor %vm2271_vm15, %vm2527_vm6  ;;  %v2842_v7 = vsel %vm2682_vm13, 1.0, %v13473_v60  ;;  %vm1701_vm10 = vcmp.eq.s32.totalorder %v8166_v11, %v14147_v29  ;;  %vm1706_vm15 = vcmp.eq.s32.totalorder %v8166_v11, %v14149_v4  ;;  %vm2533_vm13 = vcmp.eq.s32.totalorder %v8166_v11, %v14151_v33 }
 0x4f4   : > { %v2847_v45 = vsel %vm2687_vm5, 1.0, %v13473_v60  ;;  %vm1029_vm14 = vmor %vm613_vm11, %vm869_vm9  ;;  %v11676_v46 = vadd.f32 %v4807_v61, %v11566_v40  ;;  %3875 = vadd.xlane.f32.xlu1 %v11665_v48  ;;  %v14150_v40 = vld [vmem:[#allocation193_spill] sm:$0xff]  ;;  %vm2538_vm5 = vcmp.eq.s32.totalorder %v8166_v11, %v14152_v41 }
 0x4f5   : > { %v2932_v37 = vpack.c.bf16 %v2847_v45, %v2842_v7  ;;  %vm1034_vm7 = vmor %vm618_vm3, %vm874_vm4  ;;  %vm2122_vm9 = vcmp.eq.s32.totalorder %v8166_v11, %v14150_v40  ;;  %vm850_vm3 = vcmp.eq.s32.totalorder %v8313_v56, %v14108_v27  ;;  %v14154_v27 = vld [vmem:[#allocation26_spill] sm:$0xff] }
 0x4f6   : > { %vm1445_vm8 = vmor %vm1029_vm14, %vm1285_vm1  ;;  %3877 = vadd.xlane.f32.xlu0 %v11676_v46 }
 0x4f7   : > { %3678 = vmatmul.mubr.bf16.gmra.mrb[88].mxu1 %v2932_v37  ;;  %vm1450_vm2 = vmor %vm1034_vm7, %vm1290_vm12  ;;  %vm594_vm12 = vcmp.eq.s32.totalorder %v8313_v56, %v14107_v21 }
 0x4f8   : > { %vm1861_vm11 = vmor %vm1445_vm8, %vm1701_vm10  ;;  %v4702_v1 = vpop.f32.mrb[60].mxu1  ;;  %vm855_vm10 = vcmp.eq.s32.totalorder %v8313_v56, %v14110_v51  ;;  %vm599_vm8 = vcmp.eq.s32.totalorder %v8313_v56, %v14114_v49 }
 0x4f9   : > { %vm1866_vm6 = vmor %vm1450_vm2, %vm1706_vm15  ;;  %v4703_v54 = vpop.f32.mrb[61].mxu1  ;;  %vm1266_vm2 = vcmp.eq.s32.totalorder %v8313_v56, %v14111_v18  ;;  %vm1271_vm15 = vcmp.eq.s32.totalorder %v8313_v56, %v14115_v12  ;;  %v2969_v18 = vld [vmem:[%s5709_s16 + $0xe8] sm:$0xff] }
 0x4fa   : > { %vm2277_vm4 = vmor %vm1861_vm11, %vm2117_vm0  ;;  %v4704_v0 = vadd.f32 %v4703_v54, %v4702_v1  ;;  %v4705_v19 = vpop.f32.mrb[62].mxu1 }
 0x4fb   : > { %vm2282_vm1 = vmor %vm1866_vm6, %vm2122_vm9  ;;  %v4706_v58 = vpop.f32.mrb[63].mxu1  ;;  %vm1682_vm9 = vcmp.eq.s32.totalorder %v8313_v56, %v14116_v43  ;;  %vm1687_vm6 = vcmp.eq.s32.totalorder %v8313_v56, %v14119_v55  ;;  %v2968_v55 = vld [vmem:[%s5709_s16 + $0xe0] sm:$0xff] }
 0x4fc   : > { %vm2693_vm14 = vmor %vm2277_vm4, %vm2533_vm13  ;;  %v11699_v24 = vadd.f32 %v4704_v0, %v14153_v20  ;;  %v4707_v23 = vadd.f32 %v4706_v58, %v4705_v19 }
 0x4fd   : > { %vm2698_vm7 = vmor %vm2282_vm1, %vm2538_vm5  ;;  %v2853_v11 = vsel %vm2693_vm14, 1.0, %v13473_v60  ;;  %vm2103_vm1 = vcmp.eq.s32.totalorder %v8313_v56, %v14122_v13  ;;  %vm2514_vm14 = vcmp.eq.s32.totalorder %v8313_v56, %v14123_v35 }
 0x4fe   : > { %v2858_v21 = vsel %vm2698_vm7, 1.0, %v13473_v60  ;;  %vm1010_vm0 = vmor %vm594_vm12, %vm850_vm3  ;;  %v11710_v51 = vadd.f32 %v4707_v23, %v14154_v27  ;;  %vm2098_vm3 = vcmp.eq.s32.totalorder %v8313_v56, %v14121_v42  ;;  %vm2519_vm7 = vcmp.eq.s32.totalorder %v8313_v56, %v14125_v25 }
 0x4ff   : > { %v2938_v61 = vpack.c.bf16 %v2858_v21, %v2853_v11  ;;  %vm1015_vm11 = vmor %vm599_vm8, %vm855_vm10  ;;  %v2986_v42 = vpack.c.bf16 %v2969_v18, %v2968_v55  ;;  %v14157_v21 = vld [vmem:[#allocation47_spill] sm:$0xff] }
 0x500   : > { %vm1426_vm13 = vmor %vm1010_vm0, %vm1266_vm2  ;;  %vm612_vm2 = vcmp.eq.s32.totalorder %v8135_v9, %v14141_v30  ;;  %vm868_vm0 = vcmp.eq.s32.totalorder %v8135_v9, %v14142_v22  ;;  %v14158_v55 = vld [vmem:[#allocation79_spill] sm:$0xff] }
 0x501   : > { %3685 = vmatprep.mubr.bf16.mxu1 %v2938_v61  ;;  %vm1431_vm4 = vmor %vm1015_vm11, %vm1271_vm15  ;;  %vm873_vm11 = vcmp.eq.s32.totalorder %v8135_v9, %v14143_v39 }
 0x502   : > { %vm1842_vm5 = vmor %vm1426_vm13, %vm1682_vm9  ;;  %vm1289_vm9 = vcmp.eq.s32.totalorder %v8135_v9, %v14145_v53  ;;  %vm1284_vm13 = vcmp.eq.s32.totalorder %v8135_v9, %v14144_v3 }
 0x503   : > { %vm1847_vm12 = vmor %vm1431_vm4, %vm1687_vm6  ;;  %vm617_vm4 = vcmp.eq.s32.totalorder %v8135_v9, %v14146_v32 }
 0x504   : > { %vm2258_vm10 = vmor %vm1842_vm5, %vm2098_vm3 }
 0x505   : > { %vm2263_vm8 = vmor %vm1847_vm12, %vm2103_vm1  ;;  %vm1700_vm1 = vcmp.eq.s32.totalorder %v8135_v9, %v14147_v29 }
 0x506   : > { %vm2674_vm15 = vmor %vm2258_vm10, %vm2514_vm14  ;;  %vm2116_vm10 = vcmp.eq.s32.totalorder %v8135_v9, %v14148_v5 }
 0x507   : > { %vm2679_vm6 = vmor %vm2263_vm8, %vm2519_vm7  ;;  %v2834_v25 = vsel %vm2674_vm15, 1.0, %v13473_v60  ;;  %vm1705_vm7 = vcmp.eq.s32.totalorder %v8135_v9, %v14149_v4  ;;  %vm2121_vm15 = vcmp.eq.s32.totalorder %v8135_v9, %v14150_v40 }
 0x508   : > { %v2839_v35 = vsel %vm2679_vm6, 1.0, %v13473_v60  ;;  %vm1028_vm5 = vmor %vm612_vm2, %vm868_vm0  ;;  %vm2532_vm0 = vcmp.eq.s32.totalorder %v8135_v9, %v14151_v33 }
 0x509   : > { %v2929_v49 = vpack.c.bf16 %v2839_v35, %v2834_v25  ;;  %vm1033_vm12 = vmor %vm617_vm4, %vm873_vm11  ;;  %vm860_vm4 = vcmp.eq.s32.totalorder %v8313_v56, %v14130_v8 }
 0x50a   : > { %vm1444_vm3 = vmor %vm1028_vm5, %vm1284_vm13  ;;  %vm604_vm13 = vcmp.eq.s32.totalorder %v8313_v56, %v14129_v26 }
 0x50b   : > { %3831 = vmatmul.mubr.bf16.gmra.mrb[84].mxu0 %v2929_v49  ;;  %vm1449_vm14 = vmor %vm1033_vm12, %vm1289_vm9  ;;  %vm2537_vm9 = vcmp.eq.s32.totalorder %v8135_v9, %v14152_v41 }
 0x50c   : > { %vm1860_vm8 = vmor %vm1444_vm3, %vm1700_vm1  ;;  %3838 = vmatprep.mubr.bf16.mxu0 %v2986_v42  ;;  %v4808_v12 = vpop.f32.mrb[56].mxu0  ;;  %vm865_vm1 = vcmp.eq.s32.totalorder %v8313_v56, %v14131_v47  ;;  %vm609_vm3 = vcmp.eq.s32.totalorder %v8313_v56, %v14133_v34 }
 0x50d   : > { %vm1865_vm2 = vmor %vm1449_vm14, %vm1705_vm7  ;;  %v4809_v43 = vpop.f32.mrb[57].mxu0  ;;  %vm1276_vm14 = vcmp.eq.s32.totalorder %v8313_v56, %v14132_v36  ;;  %vm1281_vm7 = vcmp.eq.s32.totalorder %v8313_v56, %v14134_v50 }
 0x50e   : > { %vm2276_vm11 = vmor %vm1860_vm8, %vm2116_vm10  ;;  %v4810_v13 = vadd.f32 %v4809_v43, %v4808_v12  ;;  %v4811_v7 = vpop.f32.mrb[58].mxu0  ;;  %vm1692_vm8 = vcmp.eq.s32.totalorder %v8313_v56, %v14135_v28 }
 0x50f   : > { %vm2281_vm6 = vmor %vm1865_vm2, %vm2121_vm15  ;;  %v4812_v45 = vpop.f32.mrb[59].mxu0 }
 0x510   : > { %vm2692_vm5 = vmor %vm2276_vm11, %vm2532_vm0  ;;  %v11759_v37 = vadd.f32 %v4810_v13, %v11605_v57  ;;  %v4813_v1 = vadd.f32 %v4812_v45, %v4811_v7  ;;  %vm1697_vm0 = vcmp.eq.s32.totalorder %v8313_v56, %v14136_v17  ;;  %v2970_v17 = vld [vmem:[%s5709_s16 + $0xf0] sm:$0xff]  ;;  %v2971_v57 = vld [vmem:[%s5709_s16 + $0xf8] sm:$0xff] }
 0x511   : > { %vm2697_vm12 = vmor %vm2281_vm6, %vm2537_vm9  ;;  %v2852_v9 = vsel %vm2692_vm5, 1.0, %v13473_v60  ;;  %vm2108_vm9 = vcmp.eq.s32.totalorder %v8313_v56, %v14137_v52  ;;  %vm2524_vm5 = vcmp.eq.s32.totalorder %v8313_v56, %v14139_v15  ;;  %v2987_v0 = vpack.c.bf16 %v2971_v57, %v2970_v17 }
 0x512   : > { %v2857_v26 = vsel %vm2697_vm12, 1.0, %v13473_v60  ;;  %vm1020_vm10 = vmor %vm604_vm13, %vm860_vm4  ;;  %v11770_v8 = vadd.f32 %v4813_v1, %v11616_v2  ;;  %3879 = vadd.xlane.f32.xlu1 %v11759_v37  ;;  %vm2113_vm13 = vcmp.eq.s32.totalorder %v8313_v56, %v14138_v44  ;;  %v14155_v44 = vld [vmem:[#allocation182_spill] sm:$0xff] }
 0x513   : > { %v2937_v47 = vpack.c.bf16 %v2857_v26, %v2852_v9  ;;  %vm1025_vm15 = vmor %vm609_vm3, %vm865_vm1  ;;  %vm614_vm3 = vcmp.eq.s32.totalorder %v8313_v56, %v14141_v30  ;;  %v14159_v26 = vld [vmem:[#allocation86_spill] sm:$0xff] }
 0x514   : > { %vm1436_vm2 = vmor %vm1020_vm10, %vm1276_vm14  ;;  %3881 = vadd.xlane.f32.xlu0 %v11770_v8  ;;  %vm870_vm14 = vcmp.eq.s32.totalorder %v8313_v56, %v14142_v22  ;;  %vm2529_vm10 = vcmp.eq.s32.totalorder %v8313_v56, %v14140_v63  ;;  %v14156_v63 = vld [vmem:[#allocation48_spill] sm:$0xff] }
 0x515   : > { %3686 = vmatmul.mubr.bf16.gmra.mrb[92].mxu1 %v2937_v47  ;;  %vm1441_vm11 = vmor %vm1025_vm15, %vm1281_vm7  ;;  %vm1291_vm15 = vcmp.eq.s32.totalorder %v8313_v56, %v14145_v53 }
 0x516   : > { %vm1852_vm6 = vmor %vm1436_vm2, %vm1692_vm8  ;;  %v4708_v36 = vpop.f32.mrb[64].mxu1  ;;  %vm875_vm8 = vcmp.eq.s32.totalorder %v8313_v56, %v14143_v39 }
 0x517   : > { %vm1857_vm4 = vmor %vm1441_vm11, %vm1697_vm0  ;;  %v4709_v34 = vpop.f32.mrb[65].mxu1  ;;  %vm1286_vm0 = vcmp.eq.s32.totalorder %v8313_v56, %v14144_v3  ;;  %vm619_vm11 = vcmp.eq.s32.totalorder %v8313_v56, %v14146_v32 }
 0x518   : > { %vm2268_vm1 = vmor %vm1852_vm6, %vm2108_vm9  ;;  %v4710_v50 = vadd.f32 %v4709_v34, %v4708_v36  ;;  %v4711_v28 = vpop.f32.mrb[66].mxu1  ;;  %vm1702_vm6 = vcmp.eq.s32.totalorder %v8313_v56, %v14147_v29  ;;  %v14160_v34 = vld [vmem:[#allocation49_spill] sm:$0xff] }
 0x519   : > { %vm2273_vm12 = vmor %vm1857_vm4, %vm2113_vm13  ;;  %v4712_v52 = vpop.f32.mrb[67].mxu1 }
 0x51a   : > { %vm2684_vm7 = vmor %vm2268_vm1, %vm2524_vm5  ;;  %v3632_v15 = vadd.f32 %v4710_v50, %v14155_v44  ;;  %v4713_v2 = vadd.f32 %v4712_v52, %v4711_v28  ;;  %vm2118_vm1 = vcmp.eq.s32.totalorder %v8313_v56, %v14148_v5 }
 0x51b   : > { %vm2689_vm2 = vmor %vm2273_vm12, %vm2529_vm10  ;;  %v2844_v54 = vsel %vm2684_vm7, 1.0, %v13473_v60  ;;  %vm1707_vm12 = vcmp.eq.s32.totalorder %v8313_v56, %v14149_v4  ;;  %vm2534_vm7 = vcmp.eq.s32.totalorder %v8313_v56, %v14151_v33 }
 0x51c   : > { %v2849_v22 = vsel %vm2689_vm2, 1.0, %v13473_v60  ;;  %vm1030_vm9 = vmor %vm614_vm3, %vm870_vm14  ;;  %v3635_v39 = vadd.f32 %v4713_v2, %v14156_v63  ;;  %vm2123_vm3 = vcmp.eq.s32.totalorder %v8313_v56, %v14150_v40 }
 0x51d   : > { %v2934_v53 = vpack.c.bf16 %v2849_v22, %v2844_v54  ;;  %vm1035_vm13 = vmor %vm619_vm11, %vm875_vm8  ;;  %vm2539_vm8 = vcmp.eq.s32.totalorder %v8313_v56, %v14152_v41 }
 0x51e   : > { %vm1446_vm4 = vmor %vm1030_vm9, %vm1286_vm0 }
 0x51f   : > { %3839 = vmatmul.mubr.bf16.gmra.mrb[88].mxu0 %v2934_v53  ;;  %vm1451_vm5 = vmor %vm1035_vm13, %vm1291_vm15 }
 0x520   : > { %3846 = vmatprep.mubr.bf16.mxu0 %v2987_v0  ;;  %vm1862_vm10 = vmor %vm1446_vm4, %vm1702_vm6 }
 0x521   : > { %vm1867_vm14 = vmor %vm1451_vm5, %vm1707_vm12 }
 0x522   : > { %vm2278_vm2 = vmor %vm1862_vm10, %vm2118_vm1 }
 0x523   : > { %vm2283_vm15 = vmor %vm1867_vm14, %vm2123_vm3 }
 0x524   : > { %vm2694_vm0 = vmor %vm2278_vm2, %vm2534_vm7 }
 0x525   : > { %vm2699_vm11 = vmor %vm2283_vm15, %vm2539_vm8  ;;  %v2854_v30 = vsel %vm2694_vm0, 1.0, %v13473_v60 }
 0x526   : > { %v2859_v3 = vsel %vm2699_vm11, 1.0, %v13473_v60 }
 0x527   : > { %v2939_v32 = vpack.c.bf16 %v2859_v3, %v2854_v30  ;;  %v14161_v30 = vld [vmem:[#allocation118_spill] sm:$0xff] }
 0x529   : > { %3847 = vmatmul.mubr.bf16.gmra.mrb[92].mxu0 %v2939_v32 }
 0x52a   : > { %v4814_v29 = vpop.f32.mrb[60].mxu0 }
 0x52b   : > { %v4815_v5 = vpop.f32.mrb[61].mxu0 }
 0x52c   : > { %v4816_v4 = vadd.f32 %v4815_v5, %v4814_v29  ;;  %v4817_v40 = vpop.f32.mrb[62].mxu0  ;;  %v14162_v29 = vld [vmem:[#allocation82_spill] sm:$0xff] }
 0x52d   : > { %v4818_v19 = vpop.f32.mrb[63].mxu0 }
 0x52e   : > { %v11822_v33 = vadd.f32 %v4816_v4, %v11699_v24  ;;  %v4819_v58 = vadd.f32 %v4818_v19, %v4817_v40 }
 0x530   : > { %v11825_v56 = vadd.f32 %v4819_v58, %v11710_v51  ;;  %3883 = vadd.xlane.f32.xlu1 %v11822_v33 }
 0x532   : > { %3885 = vadd.xlane.f32.xlu0 %v11825_v56 }
 0x534   : > { %v4714_v41 = vpop.f32.mrb[68].mxu1 }
 0x535   : > { %v4715_v60 = vpop.f32.mrb[69].mxu1 }
 0x536   : > { %v4716_v20 = vadd.f32 %v4715_v60, %v4714_v41  ;;  %v4717_v23 = vpop.f32.mrb[70].mxu1 }
 0x537   : > { %v4718_v11 = vpop.f32.mrb[71].mxu1 }
 0x538   : > { %v3640_v27 = vadd.f32 %v4716_v20, %v14157_v21  ;;  %v4719_v61 = vadd.f32 %v4718_v11, %v4717_v23 }
 0x53a   : > { %v3643_v18 = vadd.f32 %v4719_v61, %v14158_v55 }
 0x548   : > { %v4820_v24 = vpop.f32.mrb[64].mxu0 }
 0x549   : > { %v4821_v25 = vpop.f32.mrb[65].mxu0 }
 0x54a   : > { %v4822_v35 = vadd.f32 %v4821_v25, %v4820_v24  ;;  %v4823_v42 = vpop.f32.mrb[66].mxu0 }
 0x54b   : > { %v4824_v51 = vpop.f32.mrb[67].mxu0 }
 0x54c   : > { %v11831_v49 = vadd.f32 %v4822_v35, %v3632_v15  ;;  %v4825_v12 = vadd.f32 %v4824_v51, %v4823_v42  ;;  %v14164_v35 = vld [vmem:[#allocation190_spill] sm:$0xff] }
 0x54e   : > { %v11833_v43 = vadd.f32 %v4825_v12, %v3635_v39  ;;  %3887 = vadd.xlane.f32.xlu1 %v11831_v49 }
 0x550   : > { %3889 = vadd.xlane.f32.xlu0 %v11833_v43 }
 0x552   : > { %v4720_v13 = vpop.f32.mrb[72].mxu1 }
 0x553   : > { %v4721_v7 = vpop.f32.mrb[73].mxu1 }
 0x554   : > { %v4722_v45 = vadd.f32 %v4721_v7, %v4720_v13  ;;  %v4723_v1 = vpop.f32.mrb[74].mxu1 }
 0x555   : > { %v4724_v9 = vpop.f32.mrb[75].mxu1 }
 0x556   : > { %v3648_v47 = vadd.f32 %v4722_v45, %v14159_v26  ;;  %v4725_v36 = vadd.f32 %v4724_v9, %v4723_v1 }
 0x558   : > { %v3651_v50 = vadd.f32 %v4725_v36, %v14160_v34 }
 0x566   : > { %v4826_v28 = vpop.f32.mrb[68].mxu0 }
 0x567   : > { %v4827_v17 = vpop.f32.mrb[69].mxu0 }
 0x568   : > { %v4828_v57 = vadd.f32 %v4827_v17, %v4826_v28  ;;  %v4829_v52 = vpop.f32.mrb[70].mxu0  ;;  %v14165_v17 = vld [vmem:[#allocation191_spill] sm:$0xff] }
 0x569   : > { %v4830_v44 = vpop.f32.mrb[71].mxu0 }
 0x56a   : > { %v11839_v15 = vadd.f32 %v4828_v57, %v3640_v27  ;;  %v4831_v2 = vadd.f32 %v4830_v44, %v4829_v52  ;;  %v14166_v44 = vld [vmem:[#allocation194_spill] sm:$0xff] }
 0x56c   : > { %v11841_v54 = vadd.f32 %v4831_v2, %v3643_v18  ;;  %3891 = vadd.xlane.f32.xlu1 %v11839_v15  ;;  %v14163_v18 = vld [vmem:[#allocation188_spill] sm:$0xff] }
 0x56e   : > { %3893 = vadd.xlane.f32.xlu0 %v11841_v54 }
 0x570   : > { %v4726_v22 = vpop.f32.mrb[76].mxu1 }
 0x571   : > { %v4727_v0 = vpop.f32.mrb[77].mxu1 }
 0x572   : > { %v4728_v63 = vadd.f32 %v4727_v0, %v4726_v22  ;;  %v4729_v39 = vpop.f32.mrb[78].mxu1 }
 0x573   : > { %v4730_v53 = vpop.f32.mrb[79].mxu1 }
 0x574   : > { %v3656_v3 = vadd.f32 %v4728_v63, %v14161_v30  ;;  %v4731_v32 = vadd.f32 %v4730_v53, %v4729_v39 }
 0x576   : > { %v3659_v5 = vadd.f32 %v4731_v32, %v14162_v29 }
 0x584   : > { %v4832_v4 = vpop.f32.mrb[72].mxu0 }
 0x585   : > { %v4833_v40 = vpop.f32.mrb[73].mxu0 }
 0x586   : > { %v4834_v19 = vadd.f32 %v4833_v40, %v4832_v4  ;;  %v4835_v58 = vpop.f32.mrb[74].mxu0 }
 0x587   : > { %v4836_v41 = vpop.f32.mrb[75].mxu0 }
 0x588   : > { %v11847_v60 = vadd.f32 %v4834_v19, %v3648_v47  ;;  %v4837_v20 = vadd.f32 %v4836_v41, %v4835_v58  ;;  %v14167_v58 = vld [vmem:[#allocation155_spill] sm:$0xff] }
 0x58a   : > { %v11849_v23 = vadd.f32 %v4837_v20, %v3651_v50  ;;  %3895 = vadd.xlane.f32.xlu1 %v11847_v60 }
 0x58c   : > { %3897 = vadd.xlane.f32.xlu0 %v11849_v23 }
 0x58e   : > { %v4732_v11 = vpop.f32.mrb[80].mxu1 }
 0x58f   : > { %v4733_v21 = vpop.f32.mrb[81].mxu1 }
 0x590   : > { %v4734_v27 = vadd.f32 %v4733_v21, %v4732_v11  ;;  %v4735_v61 = vpop.f32.mrb[82].mxu1  ;;  %v14168_v11 = vld [vmem:[#allocation100_spill] sm:$0xff] }
 0x591   : > { %v4736_v55 = vpop.f32.mrb[83].mxu1 }
 0x592   : > { %v3664_v24 = vadd.f32 %v4734_v27, %v14163_v18  ;;  %v4737_v25 = vadd.f32 %v4736_v55, %v4735_v61 }
 0x594   : > { %v3667_v42 = vadd.f32 %v4737_v25, %v14164_v35 }
 0x5a2   : > { %v4838_v51 = vpop.f32.mrb[76].mxu0 }
 0x5a3   : > { %v4839_v12 = vpop.f32.mrb[77].mxu0 }
 0x5a4   : > { %v4840_v13 = vadd.f32 %v4839_v12, %v4838_v51  ;;  %v4841_v7 = vpop.f32.mrb[78].mxu0 }
 0x5a5   : > { %v4842_v45 = vpop.f32.mrb[79].mxu0 }
 0x5a6   : > { %v11855_v1 = vadd.f32 %v4840_v13, %v3656_v3  ;;  %v4843_v9 = vadd.f32 %v4842_v45, %v4841_v7 }
 0x5a8   : > { %v11857_v26 = vadd.f32 %v4843_v9, %v3659_v5  ;;  %3899 = vadd.xlane.f32.xlu1 %v11855_v1  ;;  %v14169_v9 = vld [vmem:[#allocation134_spill] sm:$0xff] }
 0x5aa   : > { %3901 = vadd.xlane.f32.xlu0 %v11857_v26 }
 0x5ac   : > { %v4738_v47 = vpop.f32.mrb[84].mxu1 }
 0x5ad   : > { %v4739_v36 = vpop.f32.mrb[85].mxu1 }
 0x5ae   : > { %v4740_v34 = vadd.f32 %v4739_v36, %v4738_v47  ;;  %v4741_v50 = vpop.f32.mrb[86].mxu1 }
 0x5af   : > { %v4742_v28 = vpop.f32.mrb[87].mxu1 }
 0x5b0   : > { %v3672_v57 = vadd.f32 %v4740_v34, %v14165_v17  ;;  %v4743_v52 = vadd.f32 %v4742_v28, %v4741_v50  ;;  %v14170_v34 = vld [vmem:[#allocation145_spill] sm:$0xff] }
 0x5b2   : > { %v3675_v2 = vadd.f32 %v4743_v52, %v14166_v44 }
 0x5c0   : > { %v4844_v22 = vpop.f32.mrb[80].mxu0 }
 0x5c1   : > { %v4845_v0 = vpop.f32.mrb[81].mxu0 }
 0x5c2   : > { %v4846_v63 = vadd.f32 %v4845_v0, %v4844_v22  ;;  %v4847_v39 = vpop.f32.mrb[82].mxu0  ;;  %v3856_v0 = vpop.xlane.xlu1 %3855 }
 0x5c3   : > { %v4848_v53 = vpop.f32.mrb[83].mxu0 }
 0x5c4   : > { %v11863_v30 = vadd.f32 %v4846_v63, %v3664_v24  ;;  %v4849_v3 = vadd.f32 %v4848_v53, %v4847_v39  ;;  %v3858_v39 = vpop.xlane.xlu0 %3857  ;;  %v3919_v53 = vmul.f32 0.0078125, %v3856_v0 }
 0x5c6   : > { %v11865_v32 = vadd.f32 %v4849_v3, %v3667_v42  ;;  %3903 = vadd.xlane.f32.xlu1 %v11863_v30  ;;  %v3860_v3 = vpop.xlane.xlu1 %3859 }
 0x5c8   : > { %3905 = vadd.xlane.f32.xlu0 %v11865_v32 }
 0x5ca   : > { %v4744_v29 = vpop.f32.mrb[88].mxu1 }
 0x5cb   : > { %v4745_v5 = vpop.f32.mrb[89].mxu1 }
 0x5cc   : > { %v4746_v4 = vadd.f32 %v4745_v5, %v4744_v29  ;;  %v4747_v40 = vpop.f32.mrb[90].mxu1  ;;  %v3920_v5 = vmul.f32 0.0078125, %v3858_v39 }
 0x5cd   : > { %v4748_v19 = vpop.f32.mrb[91].mxu1 }
 0x5ce   : > { %v3680_v41 = vadd.f32 %v4746_v4, %v14167_v58  ;;  %v4749_v20 = vadd.f32 %v4748_v19, %v4747_v40  ;;  %v3862_v40 = vpop.xlane.xlu0 %3861 }
 0x5d0   : > { %v3683_v21 = vadd.f32 %v4749_v20, %v14168_v11  ;;  %v14171_v20 = vld [vmem:[#allocation57_spill] sm:$0xff]  ;;  %v3921_v11 = vmul.f32 0.0078125, %v3860_v3 }
 0x5de   : > { %v4850_v27 = vpop.f32.mrb[84].mxu0 }
 0x5df   : > { %v4851_v61 = vpop.f32.mrb[85].mxu0 }
 0x5e0   : > { %v4852_v55 = vadd.f32 %v4851_v61, %v4850_v27  ;;  %v4853_v18 = vpop.f32.mrb[86].mxu0 }
 0x5e1   : > { %v4854_v24 = vpop.f32.mrb[87].mxu0 }
 0x5e2   : > { %v11871_v25 = vadd.f32 %v4852_v55, %v3672_v57  ;;  %v4855_v35 = vadd.f32 %v4854_v24, %v4853_v18  ;;  %v14172_v18 = vld [vmem:[#allocation58_spill] sm:$0xff] }
 0x5e3   : > { %v11891_v24 = vsub.f32 %v14172_v18, %v3920_v5 }
 0x5e4   : > { %v11873_v42 = vadd.f32 %v4855_v35, %v3675_v2  ;;  %3907 = vadd.xlane.f32.xlu1 %v11871_v25  ;;  %v3922_v35 = vmul.f32 0.0078125, %v3862_v40 }
 0x5e6   : > { %3909 = vadd.xlane.f32.xlu0 %v11873_v42 }
 0x5e8   : > { %v4750_v51 = vpop.f32.mrb[92].mxu1 }
 0x5e9   : > { %v4751_v12 = vpop.f32.mrb[93].mxu1 }
 0x5ea   : > { %v4752_v13 = vadd.f32 %v4751_v12, %v4750_v51  ;;  %v4753_v7 = vpop.f32.mrb[94].mxu1  ;;  %v3866_v51 = vpop.xlane.xlu0 %3865 }
 0x5eb   : > { %v4754_v45 = vpop.f32.mrb[95].mxu1 }
 0x5ec   : > { %v3688_v47 = vadd.f32 %v4752_v13, %v14169_v9  ;;  %v4755_v36 = vadd.f32 %v4754_v45, %v4753_v7  ;;  %v11899_v7 = vsub.f32 %v11418_v10, %v3921_v11 }
 0x5ee   : > { %v3691_v50 = vadd.f32 %v4755_v36, %v14170_v34  ;;  %v11905_v36 = vsub.f32 %v11427_v62, %v3922_v35  ;;  %v3924_v34 = vmul.f32 0.0078125, %v3866_v51 }
 0x5f2   : > { %v4856_v28 = vpop.f32.mrb[88].mxu0 }
 0x5f3   : > { %v4857_v17 = vpop.f32.mrb[89].mxu0 }
 0x5f4   : > { %v4858_v57 = vadd.f32 %v4857_v17, %v4856_v28  ;;  %v4859_v52 = vpop.f32.mrb[90].mxu0  ;;  %v3985_v28 = vmul.f32 %v11899_v7, %v11899_v7 }
 0x5f5   : > { %v4860_v44 = vpop.f32.mrb[91].mxu0 }
 0x5f6   : > { %v11879_v2 = vadd.f32 %v4858_v57, %v3680_v41  ;;  %v4861_v22 = vadd.f32 %v4860_v44, %v4859_v52  ;;  %v11886_v41 = vsub.f32 %v14171_v20, %v3919_v53  ;;  %v3986_v52 = vmul.f32 %v11905_v36, %v11905_v36 }
 0x5f7   : > { %v11915_v44 = vsub.f32 %v11473_v59, %v3924_v34 }
 0x5f8   : > { %v11881_v63 = vadd.f32 %v4861_v22, %v3683_v21  ;;  %3911 = vadd.xlane.f32.xlu1 %v11879_v2  ;;  %v3864_v21 = vpop.xlane.xlu1 %3863  ;;  %v3983_v13 = vmul.f32 %v11886_v41, %v11886_v41 }
 0x5f9   : > { %v3923_v45 = vmul.f32 0.0078125, %v3864_v21  ;;  %v3988_v3 = vmul.f32 %v11915_v44, %v11915_v44 }
 0x5fa   : > { %3913 = vadd.xlane.f32.xlu0 %v11881_v63 }
 0x5fb   : > { %v11910_v17 = vsub.f32 %v11464_v16, %v3923_v45 }
 0x5fc   : > { %v4862_v29 = vpop.f32.mrb[92].mxu0  ;;  %v3868_v9 = vpop.xlane.xlu1 %3867 }
 0x5fd   : > { %v4863_v4 = vpop.f32.mrb[93].mxu0  ;;  %v3925_v10 = vmul.f32 0.0078125, %v3868_v9  ;;  %v3987_v0 = vmul.f32 %v11910_v17, %v11910_v17 }
 0x5fe   : > { %v4864_v19 = vadd.f32 %v4863_v4, %v4862_v29  ;;  %v4865_v58 = vpop.f32.mrb[94].mxu0 }
 0x5ff   : > { %v4866_v27 = vpop.f32.mrb[95].mxu0  ;;  %v11920_v39 = vsub.f32 %v11523_v6, %v3925_v10 }
 0x600   : > { %v11888_v61 = vadd.f32 %v4864_v19, %v3688_v47  ;;  %v4867_v55 = vadd.f32 %v4866_v27, %v4865_v58  ;;  %v3984_v47 = vmul.f32 %v11891_v24, %v11891_v24  ;;  %v3872_v57 = vpop.xlane.xlu1 %3871 }
 0x601   : > { %v3927_v16 = vmul.f32 0.0078125, %v3872_v57  ;;  %v3989_v4 = vmul.f32 %v11920_v39, %v11920_v39 }
 0x602   : > { %v11893_v12 = vadd.f32 %v4867_v55, %v3691_v50  ;;  %3915 = vadd.xlane.f32.xlu1 %v11888_v61  ;;  %v3870_v50 = vpop.xlane.xlu0 %3869 }
 0x603   : > { %v3926_v62 = vmul.f32 0.0078125, %v3870_v50  ;;  %v11930_v40 = vsub.f32 %v11568_v31, %v3927_v16 }
 0x604   : > { %3917 = vadd.xlane.f32.xlu0 %v11893_v12  ;;  %v3876_v53 = vpop.xlane.xlu1 %3875 }
 0x605   : > { %v11925_v29 = vsub.f32 %v11533_v38, %v3926_v62  ;;  %v3929_v6 = vmul.f32 0.0078125, %v3876_v53  ;;  %v3991_v27 = vmul.f32 %v11930_v40, %v11930_v40 }
 0x606   : > { %4015 = vadd.xlane.f32.xlu1 %v3983_v13  ;;  %v3874_v22 = vpop.xlane.xlu0 %3873 }
 0x607   : > { %v3928_v59 = vmul.f32 0.0078125, %v3874_v22  ;;  %v3990_v58 = vmul.f32 %v11925_v29, %v11925_v29  ;;  %v11940_v21 = vsub.f32 %v11665_v48, %v3929_v6 }
 0x608   : > { %4017 = vadd.xlane.f32.xlu0 %v3984_v47  ;;  %v3880_v19 = vpop.xlane.xlu1 %3879 }
 0x609   : > { %v11935_v20 = vsub.f32 %v11584_v14, %v3928_v59  ;;  %v3931_v31 = vmul.f32 0.0078125, %v3880_v19  ;;  %v3993_v13 = vmul.f32 %v11940_v21, %v11940_v21 }
 0x60a   : > { %4019 = vadd.xlane.f32.xlu1 %v3985_v28  ;;  %v3878_v5 = vpop.xlane.xlu0 %3877 }
 0x60b   : > { %v3930_v38 = vmul.f32 0.0078125, %v3878_v5  ;;  %v3992_v18 = vmul.f32 %v11935_v20, %v11935_v20  ;;  %v11950_v45 = vsub.f32 %v11759_v37, %v3931_v31 }
 0x60c   : > { %4021 = vadd.xlane.f32.xlu0 %v3986_v52  ;;  %v3884_v55 = vpop.xlane.xlu1 %3883 }
 0x60d   : > { %v11945_v35 = vsub.f32 %v11676_v46, %v3930_v38  ;;  %v3933_v48 = vmul.f32 0.0078125, %v3884_v55  ;;  %v3995_v28 = vmul.f32 %v11950_v45, %v11950_v45 }
 0x60e   : > { %4023 = vadd.xlane.f32.xlu1 %v3987_v0  ;;  %v3882_v11 = vpop.xlane.xlu0 %3881 }
 0x60f   : > { %v3932_v14 = vmul.f32 0.0078125, %v3882_v11  ;;  %v3994_v47 = vmul.f32 %v11945_v35, %v11945_v35  ;;  %v11960_v10 = vsub.f32 %v11822_v33, %v3933_v48 }
 0x610   : > { %4025 = vadd.xlane.f32.xlu0 %v3988_v3  ;;  %v3888_v9 = vpop.xlane.xlu1 %3887 }
 0x611   : > { %v11955_v34 = vsub.f32 %v11770_v8, %v3932_v14  ;;  %v3935_v37 = vmul.f32 0.0078125, %v3888_v9  ;;  %v3997_v0 = vmul.f32 %v11960_v10, %v11960_v10 }
 0x612   : > { %4027 = vadd.xlane.f32.xlu1 %v3989_v4  ;;  %v3886_v51 = vpop.xlane.xlu0 %3885 }
 0x613   : > { %v3934_v46 = vmul.f32 0.0078125, %v3886_v51  ;;  %v3996_v52 = vmul.f32 %v11955_v34, %v11955_v34  ;;  %v11970_v16 = vsub.f32 %v11831_v49, %v3935_v37 }
 0x614   : > { %4029 = vadd.xlane.f32.xlu0 %v3990_v58  ;;  %v3892_v57 = vpop.xlane.xlu1 %3891 }
 0x615   : > { %v11965_v62 = vsub.f32 %v11825_v56, %v3934_v46  ;;  %v3937_v33 = vmul.f32 0.0078125, %v3892_v57  ;;  %v3999_v4 = vmul.f32 %v11970_v16, %v11970_v16 }
 0x616   : > { %4031 = vadd.xlane.f32.xlu1 %v3991_v27  ;;  %v3890_v50 = vpop.xlane.xlu0 %3889 }
 0x617   : > { %v3936_v8 = vmul.f32 0.0078125, %v3890_v50  ;;  %v3998_v3 = vmul.f32 %v11965_v62, %v11965_v62  ;;  %v11980_v6 = vsub.f32 %v11839_v15, %v3937_v33 }
 0x618   : > { %4033 = vadd.xlane.f32.xlu0 %v3992_v18  ;;  %v3896_v53 = vpop.xlane.xlu1 %3895 }
 0x619   : > { %v11975_v59 = vsub.f32 %v11833_v43, %v3936_v8  ;;  %v3939_v49 = vmul.f32 0.0078125, %v3896_v53  ;;  %v4001_v43 = vmul.f32 %v11980_v6, %v11980_v6 }
 0x61a   : > { %4035 = vadd.xlane.f32.xlu1 %v3993_v13  ;;  %v3894_v22 = vpop.xlane.xlu0 %3893 }
 0x61b   : > { %v3938_v56 = vmul.f32 0.0078125, %v3894_v22  ;;  %v4000_v19 = vmul.f32 %v11975_v59, %v11975_v59  ;;  %v11990_v11 = vsub.f32 %v11847_v60, %v3939_v49 }
 0x61c   : > { %4037 = vadd.xlane.f32.xlu0 %v3994_v47 }
 0x61d   : > { %v11985_v58 = vsub.f32 %v11841_v54, %v3938_v56  ;;  %v4003_v54 = vmul.f32 %v11990_v11, %v11990_v11 }
 0x61e   : > { %4039 = vadd.xlane.f32.xlu1 %v3995_v28  ;;  %v3898_v5 = vpop.xlane.xlu0 %3897 }
 0x61f   : > { %v3940_v38 = vmul.f32 0.0078125, %v3898_v5  ;;  %v4002_v15 = vmul.f32 %v11985_v58, %v11985_v58 }
 0x620   : > { %4041 = vadd.xlane.f32.xlu0 %v3996_v52 }
 0x621   : > { %v11995_v27 = vsub.f32 %v11849_v23, %v3940_v38 }
 0x622   : > { %4043 = vadd.xlane.f32.xlu1 %v3997_v0 }
 0x623   : > { %v4004_v31 = vmul.f32 %v11995_v27, %v11995_v27 }
 0x624   : > { %4045 = vadd.xlane.f32.xlu0 %v3998_v3 }
 0x626   : > { %4047 = vadd.xlane.f32.xlu1 %v3999_v4 }
 0x628   : > { %4049 = vadd.xlane.f32.xlu0 %v4000_v19 }
 0x62a   : > { %4051 = vadd.xlane.f32.xlu1 %v4001_v43 }
 0x62c   : > { %4053 = vadd.xlane.f32.xlu0 %v4002_v15 }
 0x62e   : > { %4055 = vadd.xlane.f32.xlu1 %v4003_v54 }
 0x630   : > { %4057 = vadd.xlane.f32.xlu0 %v4004_v31 }
 0x635   : > { %v3900_v55 = vpop.xlane.xlu1 %3899 }
 0x636   : > { %v3941_v60 = vmul.f32 0.0078125, %v3900_v55 }
 0x637   : > { %v3902_v18 = vpop.xlane.xlu0 %3901 }
 0x638   : > { %v12002_v14 = vsub.f32 %v11855_v1, %v3941_v60  ;;  %v3942_v51 = vmul.f32 0.0078125, %v3902_v18 }
 0x63a   : > { %v12005_v23 = vsub.f32 %v11857_v26, %v3942_v51  ;;  %v4005_v13 = vmul.f32 %v12002_v14, %v12002_v14 }
 0x63c   : > { %4059 = vadd.xlane.f32.xlu1 %v4005_v13  ;;  %v4006_v48 = vmul.f32 %v12005_v23, %v12005_v23 }
 0x63e   : > { %4061 = vadd.xlane.f32.xlu0 %v4006_v48 }
 0x653   : > { %v3904_v9 = vpop.xlane.xlu1 %3903 }
 0x654   : > { %v3943_v47 = vmul.f32 0.0078125, %v3904_v9 }
 0x655   : > { %v3906_v46 = vpop.xlane.xlu0 %3905 }
 0x656   : > { %v12012_v50 = vsub.f32 %v11863_v30, %v3943_v47  ;;  %v3944_v1 = vmul.f32 0.0078125, %v3906_v46 }
 0x658   : > { %v12015_v28 = vsub.f32 %v11865_v32, %v3944_v1  ;;  %v4007_v26 = vmul.f32 %v12012_v50, %v12012_v50 }
 0x65a   : > { %4063 = vadd.xlane.f32.xlu1 %v4007_v26  ;;  %v4008_v37 = vmul.f32 %v12015_v28, %v12015_v28 }
 0x65c   : > { %4065 = vadd.xlane.f32.xlu0 %v4008_v37 }
 0x671   : > { %v3908_v57 = vpop.xlane.xlu1 %3907 }
 0x672   : > { %v3945_v52 = vmul.f32 0.0078125, %v3908_v57 }
 0x673   : > { %v3910_v8 = vpop.xlane.xlu0 %3909 }
 0x674   : > { %v12022_v22 = vsub.f32 %v11871_v25, %v3945_v52  ;;  %v3946_v30 = vmul.f32 0.0078125, %v3910_v8 }
 0x676   : > { %v12025_v0 = vsub.f32 %v11873_v42, %v3946_v30  ;;  %v4009_v32 = vmul.f32 %v12022_v22, %v12022_v22 }
 0x678   : > { %4067 = vadd.xlane.f32.xlu1 %v4009_v32  ;;  %v4010_v33 = vmul.f32 %v12025_v0, %v12025_v0 }
 0x67a   : > { %4069 = vadd.xlane.f32.xlu0 %v4010_v33 }
 0x685   : > { %v3912_v53 = vpop.xlane.xlu1 %3911 }
 0x686   : > { %v3947_v3 = vmul.f32 0.0078125, %v3912_v53 }
 0x687   : > { %v3914_v56 = vpop.xlane.xlu0 %3913 }
 0x688   : > { %v12032_v5 = vsub.f32 %v11879_v2, %v3947_v3  ;;  %v3948_v25 = vmul.f32 0.0078125, %v3914_v56  ;;  %v12051_v56 = vld [vmem:[#allocation8] ss:$0 sm:$0xff] }
 0x68a   : > { %v12035_v4 = vsub.f32 %v11881_v63, %v3948_v25  ;;  %v4011_v42 = vmul.f32 %v12032_v5, %v12032_v5 }
 0x68c   : > { %4071 = vadd.xlane.f32.xlu1 %v4011_v42  ;;  %v4012_v49 = vmul.f32 %v12035_v4, %v12035_v4 }
 0x68e   : > { %4073 = vadd.xlane.f32.xlu0 %v4012_v49 }
 0x68f   : > { %v3916_v19 = vpop.xlane.xlu1 %3915 }
 0x690   : > { %v3949_v38 = vmul.f32 0.0078125, %v3916_v19 }
 0x691   : > { %v3918_v43 = vpop.xlane.xlu0 %3917 }
 0x692   : > { %v12042_v15 = vsub.f32 %v11888_v61, %v3949_v38  ;;  %v3950_v2 = vmul.f32 0.0078125, %v3918_v43  ;;  %v12054_v43 = vld [vmem:[#allocation10] ss:$0 sm:$0xff] }
 0x693   : > { %v4016_v54 = vpop.xlane.xlu1 %4015 }
 0x694   : > { %v12045_v31 = vsub.f32 %v11893_v12, %v3950_v2  ;;  %v4013_v63 = vmul.f32 %v12042_v15, %v12042_v15  ;;  %v4079_v55 = vmul.f32 0.0078125, %v4016_v54 }
 0x695   : > { %v4018_v60 = vpop.xlane.xlu0 %4017 }
 0x696   : > { %4075 = vadd.xlane.f32.xlu1 %v4013_v63  ;;  %v4014_v18 = vmul.f32 %v12045_v31, %v12045_v31  ;;  %v4111_v51 = vadd.f32 1e-12, %v4079_v55  ;;  %v4080_v13 = vmul.f32 0.0078125, %v4018_v60 }
 0x697   : > { %v4020_v48 = vpop.xlane.xlu1 %4019 }
 0x698   : > { %4077 = vadd.xlane.f32.xlu0 %v4014_v18  ;;  %5101 = vrsqrt.f32 %v4111_v51  ;;  %v4112_v61 = vadd.f32 1e-12, %v4080_v13  ;;  %v4081_v9 = vmul.f32 0.0078125, %v4020_v48 }
 0x699   : > { %v4022_v47 = vpop.xlane.xlu0 %4021 }
 0x69a   : > { %5103 = vrsqrt.f32 %v4112_v61  ;;  %v4113_v12 = vadd.f32 1e-12, %v4081_v9  ;;  %v4082_v46 = vmul.f32 0.0078125, %v4022_v47 }
 0x69b   : > { %v4024_v1 = vpop.xlane.xlu1 %4023 }
 0x69c   : > { %5105 = vrsqrt.f32 %v4113_v12  ;;  %v4114_v26 = vadd.f32 1e-12, %v4082_v46  ;;  %v4083_v37 = vmul.f32 0.0078125, %v4024_v1 }
 0x69d   : > { %v4026_v57 = vpop.xlane.xlu0 %4025 }
 0x69e   : > { %5107 = vrsqrt.f32 %v4114_v26  ;;  %v4115_v52 = vadd.f32 1e-12, %v4083_v37  ;;  %v4084_v8 = vmul.f32 0.0078125, %v4026_v57 }
 0x69f   : > { %v4028_v30 = vpop.xlane.xlu1 %4027 }
 0x6a0   : > { %5109 = vrsqrt.f32 %v4115_v52  ;;  %v4116_v32 = vadd.f32 1e-12, %v4084_v8  ;;  %v4085_v33 = vmul.f32 0.0078125, %v4028_v30 }
 0x6a1   : > { %v4030_v53 = vpop.xlane.xlu0 %4029 }
 0x6a2   : > { %v5102_v3 = vpop.eup %5101  ;;  %5111 = vrsqrt.f32 %v4116_v32  ;;  %v4117_v25 = vadd.f32 1e-12, %v4085_v33  ;;  %v4086_v42 = vmul.f32 0.0078125, %v4030_v53 }
 0x6a3   : > { %v4175_v49 = vmul.f32 %v5102_v3, %v11886_v41  ;;  %v4032_v19 = vpop.xlane.xlu1 %4031 }
 0x6a4   : > { %v5104_v38 = vpop.eup %5103  ;;  %5113 = vrsqrt.f32 %v4117_v25  ;;  %v4118_v2 = vadd.f32 1e-12, %v4086_v42  ;;  %v4087_v54 = vmul.f32 0.0078125, %v4032_v19 }
 0x6a5   : > { %v4214_v63 = vmul.f32 %v12051_v56, %v4175_v49  ;;  %v4176_v55 = vmul.f32 %v5104_v38, %v11891_v24  ;;  %v4034_v60 = vpop.xlane.xlu0 %4033 }
 0x6a6   : > { %v5106_v18 = vpop.eup %5105  ;;  %5115 = vrsqrt.f32 %v4118_v2  ;;  %v4119_v51 = vadd.f32 1e-12, %v4087_v54  ;;  %v4088_v13 = vmul.f32 0.0078125, %v4034_v60 }
 0x6a7   : > { %v4253_v48 = vadd.f32 %v12054_v43, %v4214_v63  ;;  %v4215_v41 = vmul.f32 %v12051_v56, %v4176_v55  ;;  %v4177_v61 = vmul.f32 %v5106_v18, %v11899_v7  ;;  %v4036_v9 = vpop.xlane.xlu1 %4035 }
 0x6a8   : > { %v5108_v47 = vpop.eup %5107  ;;  %5117 = vrsqrt.f32 %v4119_v51  ;;  %v4120_v12 = vadd.f32 1e-12, %v4088_v13  ;;  %v4089_v46 = vmul.f32 0.0078125, %v4036_v9 }
 0x6a9   : > { %4285 = vst [vmem:[%s12062_s24] sm:$0xff] %v4253_v48  ;;  %v4254_v24 = vadd.f32 %v12054_v43, %v4215_v41  ;;  %v4216_v1 = vmul.f32 %v12051_v56, %v4177_v61  ;;  %v4178_v26 = vmul.f32 %v5108_v47, %v11905_v36  ;;  %v4038_v37 = vpop.xlane.xlu0 %4037 }
 0x6aa   : > { %v5110_v57 = vpop.eup %5109  ;;  %5119 = vrsqrt.f32 %v4120_v12  ;;  %v4121_v7 = vadd.f32 1e-12, %v4089_v46  ;;  %v4090_v52 = vmul.f32 0.0078125, %v4038_v37 }
 0x6ab   : > { %4286 = vst [vmem:[%s12062_s24 + $0x8] sm:$0xff] %v4254_v24  ;;  %v4255_v8 = vadd.f32 %v12054_v43, %v4216_v1  ;;  %v4217_v30 = vmul.f32 %v12051_v56, %v4178_v26  ;;  %v4179_v32 = vmul.f32 %v5110_v57, %v11910_v17  ;;  %v4040_v33 = vpop.xlane.xlu1 %4039 }
 0x6ac   : > { %v5112_v53 = vpop.eup %5111  ;;  %5121 = vrsqrt.f32 %v4121_v7  ;;  %v4122_v3 = vadd.f32 1e-12, %v4090_v52  ;;  %v4091_v25 = vmul.f32 0.0078125, %v4040_v33 }
 0x6ad   : > { %4287 = vst [vmem:[%s12062_s24 + $0x10] sm:$0xff] %v4255_v8  ;;  %v4256_v36 = vadd.f32 %v12054_v43, %v4217_v30  ;;  %v4218_v42 = vmul.f32 %v12051_v56, %v4179_v32  ;;  %v4180_v49 = vmul.f32 %v5112_v53, %v11915_v44  ;;  %v4042_v19 = vpop.xlane.xlu0 %4041 }
 0x6ae   : > { %v5114_v38 = vpop.eup %5113  ;;  %5123 = vrsqrt.f32 %v4122_v3  ;;  %v4123_v2 = vadd.f32 1e-12, %v4091_v25  ;;  %v4092_v54 = vmul.f32 0.0078125, %v4042_v19 }
 0x6af   : > { %4288 = vst [vmem:[%s12062_s24 + $0x18] sm:$0xff] %v4256_v36  ;;  %v4257_v17 = vadd.f32 %v12054_v43, %v4218_v42  ;;  %v4219_v63 = vmul.f32 %v12051_v56, %v4180_v49  ;;  %v4181_v55 = vmul.f32 %v5114_v38, %v11920_v39  ;;  %v4044_v60 = vpop.xlane.xlu1 %4043 }
 0x6b0   : > { %v5116_v18 = vpop.eup %5115  ;;  %5125 = vrsqrt.f32 %v4123_v2  ;;  %v4124_v51 = vadd.f32 1e-12, %v4092_v54  ;;  %v4093_v13 = vmul.f32 0.0078125, %v4044_v60 }
 0x6b1   : > { %4289 = vst [vmem:[%s12062_s24 + $0x20] sm:$0xff] %v4257_v17  ;;  %v4258_v44 = vadd.f32 %v12054_v43, %v4219_v63  ;;  %v4220_v48 = vmul.f32 %v12051_v56, %v4181_v55  ;;  %v4182_v41 = vmul.f32 %v5116_v18, %v11925_v29  ;;  %v4046_v61 = vpop.xlane.xlu0 %4045 }
 0x6b2   : > { %v5118_v9 = vpop.eup %5117  ;;  %5127 = vrsqrt.f32 %v4124_v51  ;;  %v4125_v47 = vadd.f32 1e-12, %v4093_v13  ;;  %v4094_v12 = vmul.f32 0.0078125, %v4046_v61 }
 0x6b3   : > { %4290 = vst [vmem:[%s12062_s24 + $0x28] sm:$0xff] %v4258_v44  ;;  %v4259_v39 = vadd.f32 %v12054_v43, %v4220_v48  ;;  %v4221_v46 = vmul.f32 %v12051_v56, %v4182_v41  ;;  %v4183_v24 = vmul.f32 %v5118_v9, %v11930_v40  ;;  %v4048_v1 = vpop.xlane.xlu1 %4047 }
 0x6b4   : > { %v5120_v26 = vpop.eup %5119  ;;  %5129 = vrsqrt.f32 %v4125_v47  ;;  %v4126_v37 = vadd.f32 1e-12, %v4094_v12  ;;  %v4095_v57 = vmul.f32 0.0078125, %v4048_v1 }
 0x6b5   : > { %4291 = vst [vmem:[%s12062_s24 + $0x30] sm:$0xff] %v4259_v39  ;;  %v4260_v29 = vadd.f32 %v12054_v43, %v4221_v46  ;;  %v4222_v7 = vmul.f32 %v12051_v56, %v4183_v24  ;;  %v4184_v52 = vmul.f32 %v5120_v26, %v11935_v20  ;;  %v4050_v8 = vpop.xlane.xlu0 %4049 }
 0x6b6   : > { %v5122_v30 = vpop.eup %5121  ;;  %5131 = vrsqrt.f32 %v4126_v37  ;;  %v4127_v32 = vadd.f32 1e-12, %v4095_v57  ;;  %v4096_v33 = vmul.f32 0.0078125, %v4050_v8 }
 0x6b7   : > { %4292 = vst [vmem:[%s12062_s24 + $0x38] sm:$0xff] %v4260_v29  ;;  %v4261_v40 = vadd.f32 %v12054_v43, %v4222_v7  ;;  %v4223_v53 = vmul.f32 %v12051_v56, %v4184_v52  ;;  %v4185_v3 = vmul.f32 %v5122_v30, %v11940_v21  ;;  %v4052_v25 = vpop.xlane.xlu1 %4051 }
 0x6b8   : > { %v5124_v36 = vpop.eup %5123  ;;  %5133 = vrsqrt.f32 %v4127_v32  ;;  %v4128_v42 = vadd.f32 1e-12, %v4096_v33  ;;  %v4097_v49 = vmul.f32 0.0078125, %v4052_v25 }
 0x6b9   : > { %4293 = vst [vmem:[%s12062_s24 + $0x40] sm:$0xff] %v4261_v40  ;;  %v4262_v20 = vadd.f32 %v12054_v43, %v4223_v53  ;;  %v4224_v19 = vmul.f32 %v12051_v56, %v4185_v3  ;;  %v4186_v38 = vmul.f32 %v5124_v36, %v11945_v35  ;;  %v4054_v2 = vpop.xlane.xlu0 %4053 }
 0x6ba   : > { %v5126_v54 = vpop.eup %5125  ;;  %5135 = vrsqrt.f32 %v4128_v42  ;;  %v4129_v17 = vadd.f32 1e-12, %v4097_v49  ;;  %v4098_v63 = vmul.f32 0.0078125, %v4054_v2 }
 0x6bb   : > { %4294 = vst [vmem:[%s12062_s24 + $0x48] sm:$0xff] %v4262_v20  ;;  %v4263_v21 = vadd.f32 %v12054_v43, %v4224_v19  ;;  %v4225_v55 = vmul.f32 %v12051_v56, %v4186_v38  ;;  %v4187_v60 = vmul.f32 %v5126_v54, %v11950_v45  ;;  %v4056_v18 = vpop.xlane.xlu1 %4055 }
 0x6bc   : > { %v5128_v51 = vpop.eup %5127  ;;  %5137 = vrsqrt.f32 %v4129_v17  ;;  %v4130_v13 = vadd.f32 1e-12, %v4098_v63  ;;  %v4099_v44 = vmul.f32 0.0078125, %v4056_v18 }
 0x6bd   : > { %4295 = vst [vmem:[%s12062_s24 + $0x50] sm:$0xff] %v4263_v21  ;;  %v4264_v35 = vadd.f32 %v12054_v43, %v4225_v55  ;;  %v4226_v48 = vmul.f32 %v12051_v56, %v4187_v60  ;;  %v4188_v41 = vmul.f32 %v5128_v51, %v11955_v34  ;;  %v4058_v61 = vpop.xlane.xlu0 %4057 }
 0x6be   : > { %v5130_v9 = vpop.eup %5129  ;;  %5139 = vrsqrt.f32 %v4130_v13  ;;  %v4131_v47 = vadd.f32 1e-12, %v4099_v44  ;;  %v4100_v12 = vmul.f32 0.0078125, %v4058_v61 }
 0x6bf   : > { %4296 = vst [vmem:[%s12062_s24 + $0x58] sm:$0xff] %v4264_v35  ;;  %v4265_v45 = vadd.f32 %v12054_v43, %v4226_v48  ;;  %v4227_v39 = vmul.f32 %v12051_v56, %v4188_v41  ;;  %v4189_v46 = vmul.f32 %v5130_v9, %v11960_v10 }
 0x6c0   : > { %v5132_v24 = vpop.eup %5131  ;;  %5141 = vrsqrt.f32 %v4131_v47  ;;  %v4132_v1 = vadd.f32 1e-12, %v4100_v12 }
 0x6c1   : > { %4297 = vst [vmem:[%s12062_s24 + $0x60] sm:$0xff] %v4265_v45  ;;  %v4266_v34 = vadd.f32 %v12054_v43, %v4227_v39  ;;  %v4228_v26 = vmul.f32 %v12051_v56, %v4189_v46  ;;  %v4190_v37 = vmul.f32 %v5132_v24, %v11965_v62 }
 0x6c2   : > { %v5134_v57 = vpop.eup %5133  ;;  %5143 = vrsqrt.f32 %v4132_v1 }
 0x6c3   : > { %4298 = vst [vmem:[%s12062_s24 + $0x68] sm:$0xff] %v4266_v34  ;;  %v4267_v29 = vadd.f32 %v12054_v43, %v4228_v26  ;;  %v4229_v7 = vmul.f32 %v12051_v56, %v4190_v37  ;;  %v4191_v10 = vmul.f32 %v5134_v57, %v11970_v16 }
 0x6c4   : > { %v5136_v52 = vpop.eup %5135 }
 0x6c5   : > { %4299 = vst [vmem:[%s12062_s24 + $0x70] sm:$0xff] %v4267_v29  ;;  %v4268_v8 = vadd.f32 %v12054_v43, %v4229_v7  ;;  %v4230_v30 = vmul.f32 %v12051_v56, %v4191_v10  ;;  %v4192_v32 = vmul.f32 %v5136_v52, %v11975_v59 }
 0x6c6   : > { %v5138_v62 = vpop.eup %5137 }
 0x6c7   : > { %4300 = vst [vmem:[%s12062_s24 + $0x78] sm:$0xff] %v4268_v8  ;;  %v4269_v33 = vadd.f32 %v12054_v43, %v4230_v30  ;;  %v4231_v40 = vmul.f32 %v12051_v56, %v4192_v32  ;;  %v4193_v53 = vmul.f32 %v5138_v62, %v11980_v6 }
 0x6c8   : > { %v5140_v3 = vpop.eup %5139 }
 0x6c9   : > { %4301 = vst [vmem:[%s12062_s24 + $0x80] sm:$0xff] %v4269_v33  ;;  %v4270_v16 = vadd.f32 %v12054_v43, %v4231_v40  ;;  %v4232_v25 = vmul.f32 %v12051_v56, %v4193_v53  ;;  %v4194_v36 = vmul.f32 %v5140_v3, %v11985_v58  ;;  %v4060_v42 = vpop.xlane.xlu1 %4059 }
 0x6ca   : > { %v5142_v49 = vpop.eup %5141  ;;  %v4101_v59 = vmul.f32 0.0078125, %v4060_v42 }
 0x6cb   : > { %4302 = vst [vmem:[%s12062_s24 + $0x88] sm:$0xff] %v4270_v16  ;;  %v4271_v20 = vadd.f32 %v12054_v43, %v4232_v25  ;;  %v4233_v19 = vmul.f32 %v12051_v56, %v4194_v36  ;;  %v4195_v6 = vmul.f32 %v5142_v49, %v11990_v11  ;;  %v4062_v38 = vpop.xlane.xlu0 %4061 }
 0x6cc   : > { %v5144_v2 = vpop.eup %5143  ;;  %v4133_v54 = vadd.f32 1e-12, %v4101_v59  ;;  %v4102_v17 = vmul.f32 0.0078125, %v4062_v38 }
 0x6cd   : > { %4303 = vst [vmem:[%s12062_s24 + $0x90] sm:$0xff] %v4271_v20  ;;  %v4272_v58 = vadd.f32 %v12054_v43, %v4233_v19  ;;  %v4234_v63 = vmul.f32 %v12051_v56, %v4195_v6  ;;  %v4196_v21 = vmul.f32 %v5144_v2, %v11995_v27 }
 0x6ce   : > { %5145 = vrsqrt.f32 %v4133_v54  ;;  %v4134_v55 = vadd.f32 1e-12, %v4102_v17 }
 0x6cf   : > { %4304 = vst [vmem:[%s12062_s24 + $0x98] sm:$0xff] %v4272_v58  ;;  %v4273_v60 = vadd.f32 %v12054_v43, %v4234_v63  ;;  %v4235_v11 = vmul.f32 %v12051_v56, %v4196_v21 }
 0x6d0   : > { %5147 = vrsqrt.f32 %v4134_v55 }
 0x6d1   : > { %4305 = vst [vmem:[%s12062_s24 + $0xa0] sm:$0xff] %v4273_v60  ;;  %v4274_v18 = vadd.f32 %v12054_v43, %v4235_v11 }
 0x6d3   : > { %4306 = vst [vmem:[%s12062_s24 + $0xa8] sm:$0xff] %v4274_v18 }
 0x6d8   : > { %v5146_v51 = vpop.eup %5145 }
 0x6d9   : > { %v4197_v13 = vmul.f32 %v5146_v51, %v12002_v14 }
 0x6da   : > { %v5148_v44 = vpop.eup %5147 }
 0x6db   : > { %v4236_v27 = vmul.f32 %v12051_v56, %v4197_v13  ;;  %v4198_v35 = vmul.f32 %v5148_v44, %v12005_v23 }
 0x6dd   : > { %v4275_v48 = vadd.f32 %v12054_v43, %v4236_v27  ;;  %v4237_v41 = vmul.f32 %v12051_v56, %v4198_v35 }
 0x6df   : > { %4307 = vst [vmem:[%s12062_s24 + $0xb0] sm:$0xff] %v4275_v48  ;;  %v4276_v61 = vadd.f32 %v12054_v43, %v4237_v41 }
 0x6e1   : > { %4308 = vst [vmem:[%s12062_s24 + $0xb8] sm:$0xff] %v4276_v61 }
 0x6e7   : > { %v4064_v9 = vpop.xlane.xlu1 %4063 }
 0x6e8   : > { %v4103_v47 = vmul.f32 0.0078125, %v4064_v9 }
 0x6e9   : > { %v4066_v12 = vpop.xlane.xlu0 %4065 }
 0x6ea   : > { %v4135_v45 = vadd.f32 1e-12, %v4103_v47  ;;  %v4104_v14 = vmul.f32 0.0078125, %v4066_v12 }
 0x6ec   : > { %5149 = vrsqrt.f32 %v4135_v45  ;;  %v4136_v39 = vadd.f32 1e-12, %v4104_v14 }
 0x6ee   : > { %5151 = vrsqrt.f32 %v4136_v39 }
 0x6f6   : > { %v5150_v46 = vpop.eup %5149 }
 0x6f7   : > { %v4199_v23 = vmul.f32 %v5150_v46, %v12012_v50 }
 0x6f8   : > { %v5152_v24 = vpop.eup %5151 }
 0x6f9   : > { %v4238_v1 = vmul.f32 %v12051_v56, %v4199_v23  ;;  %v4200_v34 = vmul.f32 %v5152_v24, %v12015_v28 }
 0x6fb   : > { %v4277_v26 = vadd.f32 %v12054_v43, %v4238_v1  ;;  %v4239_v37 = vmul.f32 %v12051_v56, %v4200_v34 }
 0x6fd   : > { %4309 = vst [vmem:[%s12062_s24 + $0xc0] sm:$0xff] %v4277_v26  ;;  %v4278_v57 = vadd.f32 %v12054_v43, %v4239_v37 }
 0x6ff   : > { %4310 = vst [vmem:[%s12062_s24 + $0xc8] sm:$0xff] %v4278_v57 }
 0x705   : > { %v4068_v29 = vpop.xlane.xlu1 %4067 }
 0x706   : > { %v4105_v7 = vmul.f32 0.0078125, %v4068_v29 }
 0x707   : > { %v4070_v10 = vpop.xlane.xlu0 %4069 }
 0x708   : > { %v4137_v52 = vadd.f32 1e-12, %v4105_v7  ;;  %v4106_v8 = vmul.f32 0.0078125, %v4070_v10 }
 0x70a   : > { %5153 = vrsqrt.f32 %v4137_v52  ;;  %v4138_v50 = vadd.f32 1e-12, %v4106_v8 }
 0x70c   : > { %5155 = vrsqrt.f32 %v4138_v50 }
 0x714   : > { %v5154_v30 = vpop.eup %5153 }
 0x715   : > { %v4201_v28 = vmul.f32 %v5154_v30, %v12022_v22 }
 0x716   : > { %v5156_v32 = vpop.eup %5155 }
 0x717   : > { %v4240_v62 = vmul.f32 %v12051_v56, %v4201_v28  ;;  %v4202_v33 = vmul.f32 %v5156_v32, %v12025_v0 }
 0x719   : > { %v4279_v40 = vadd.f32 %v12054_v43, %v4240_v62  ;;  %v4241_v53 = vmul.f32 %v12051_v56, %v4202_v33  ;;  %v4072_v3 = vpop.xlane.xlu1 %4071 }
 0x71a   : > { %v4107_v16 = vmul.f32 0.0078125, %v4072_v3 }
 0x71b   : > { %4311 = vst [vmem:[%s12062_s24 + $0xd0] sm:$0xff] %v4279_v40  ;;  %v4280_v25 = vadd.f32 %v12054_v43, %v4241_v53  ;;  %v4074_v36 = vpop.xlane.xlu0 %4073 }
 0x71c   : > { %v4139_v42 = vadd.f32 1e-12, %v4107_v16  ;;  %v4108_v49 = vmul.f32 0.0078125, %v4074_v36 }
 0x71d   : > { %4312 = vst [vmem:[%s12062_s24 + $0xd8] sm:$0xff] %v4280_v25 }
 0x71e   : > { %5157 = vrsqrt.f32 %v4139_v42  ;;  %v4140_v22 = vadd.f32 1e-12, %v4108_v49 }
 0x720   : > { %5159 = vrsqrt.f32 %v4140_v22 }
 0x723   : > { %v4076_v59 = vpop.xlane.xlu1 %4075 }
 0x724   : > { %v4109_v20 = vmul.f32 0.0078125, %v4076_v59 }
 0x725   : > { %v4078_v0 = vpop.xlane.xlu0 %4077 }
 0x726   : > { %v4141_v19 = vadd.f32 1e-12, %v4109_v20  ;;  %v4110_v6 = vmul.f32 0.0078125, %v4078_v0 }
 0x728   : > { %v5158_v38 = vpop.eup %5157  ;;  %5161 = vrsqrt.f32 %v4141_v19  ;;  %v4142_v2 = vadd.f32 1e-12, %v4110_v6 }
 0x729   : > { %v4203_v54 = vmul.f32 %v5158_v38, %v12032_v5 }
 0x72a   : > { %v5160_v17 = vpop.eup %5159  ;;  %5163 = vrsqrt.f32 %v4142_v2 }
 0x72b   : > { %v4242_v58 = vmul.f32 %v12051_v56, %v4203_v54  ;;  %v4204_v63 = vmul.f32 %v5160_v17, %v12035_v4 }
 0x72d   : > { %v4281_v21 = vadd.f32 %v12054_v43, %v4242_v58  ;;  %v4243_v55 = vmul.f32 %v12051_v56, %v4204_v63 }
 0x72f   : > { %4313 = vst [vmem:[%s12062_s24 + $0xe0] sm:$0xff] %v4281_v21  ;;  %v4282_v60 = vadd.f32 %v12054_v43, %v4243_v55 }
 0x731   : > { %4314 = vst [vmem:[%s12062_s24 + $0xe8] sm:$0xff] %v4282_v60 }
 0x732   : > { %v5162_v11 = vpop.eup %5161 }
 0x733   : > { %v4205_v5 = vmul.f32 %v5162_v11, %v12042_v15 }
 0x734   : > { %v5164_v18 = vpop.eup %5163 }
 0x735   : > { %v4244_v51 = vmul.f32 %v12051_v56, %v4205_v5  ;;  %v4206_v4 = vmul.f32 %v5164_v18, %v12045_v31 }
 0x737   : > { %v4283_v13 = vadd.f32 %v12054_v43, %v4244_v51  ;;  %v4245_v44 = vmul.f32 %v12051_v56, %v4206_v4 }
 0x739   : > { %4315 = vst [vmem:[%s12062_s24 + $0xf0] sm:$0xff] %v4283_v13  ;;  %v4284_v15 = vadd.f32 %v12054_v43, %v4245_v44 }
 0x73b   : > { %4316 = vst [vmem:[%s12062_s24 + $0xf8] sm:$0xff] %v4284_v15 }
 0x73c   : > { %5336 = shalt.err (!%p5333_p3)
}
 0x73d   : > { %s5337_s29 = scalar_lea.hbm %s12188_s6, 4096  ;;  %s5341_s7 = scalar_lea.hbm %s12242_s5, 8192 }
 0x73e   : > { %p5338_p9 = scmp.ne.s32.totalorder %s12188_s6, %s5337_s29  ;;  %p5342_p7 = scmp.lt.u32.totalorder %s12188_s6, %s12242_s5 }
 0x73f   : > { %p5343_p12 = scmp.lt.u32.totalorder %s5341_s7, %s5337_s29  ;;  %p5345_p1 = scmp.lt.u32.totalorder %s5337_s29, %s12188_s6 }
 0x740   : > { %p5339_p13 = pnand %p5338_p9, %p5598_p5 }
 0x741   : > { %p5344_p2 = por %p5343_p12, %p5342_p7 }
 0x742   : > { %p5340_p11 = pneg %p5339_p13 }
 0x743   : > { %p5346_p4 = por %p5345_p1, %p5344_p2 }
 0x745   : > { %p5347_p0 = pnand %p5346_p4, %p5340_p11 }
 0x747   : > { %5350 = shalt.err (!%p5347_p0)
}
 0x748   : > { %s5420_s16 = smov 128   ;;  %s5421_s24 = smov 8  }
 0x749   : > { %4900 = dma.vmem_to_hbm [thread:$0]  (%p5598_p5), %s12190_s30, 4096, %s12188_s6, %s4318_s22, %s5420_s16, %s5420_s16, %s5421_s24  }
 0x74a PF: > { %s4346_s17 = sand.u32 1, %s5389_s18   ;;  %p14173_p8 = scmp.ne.s32.totalorder %s12638_s25, 0 }
 0x74b   : > { %p14174_p6 = scmp.ge.s32.totalorder %s5401_s21, 2  ;;  %s4347_s28 = scalar_lea.sflag [#allocation4], %s4346_s17 }
 0x74d   : > { %p4920_p10 = pnand %p14174_p6, %p14173_p8 }
 0x74f   : > { %5384 = dma.done.wait (!%p4920_p10), %s4347_s28, 4096  }
 0x750   : > { %5386 = vsyncadd (!%p4920_p10), %s4347_s28, 4294963200  ;;  %p22_p3 = scmp.ge.s32.totalorder %s5584_s14, 4   ;;  %s14175_s18 = smov %s5393_s19 }
 0x751   : > { %s14176_s19 = smov %s5397_s20  ;;  %s14177_s20 = smov %s5594_s23 }
 0x752   : > { %s14178_s21 = smov %s5584_s14  ;;  %24 = sbr.rel (!%p22_p3) target bundleno = 11 (0xb), region = 110 }
 0x759   :  { %4352 = vsyncpa [#allocation3], 1 }
 0x75a   :  { %4354 = vsyncpa [#allocation3 + $0x1], 1 }
 0x75b   :  { %4355 = vsyncpa [#allocation6], 1 }
 0x75c   :  { %4357 = vsyncpa [#allocation6 + $0x1], 1 }
 0x75d   :  { %4358 = vsyncpa [#allocation9], 1 }
 0x75e   :  { %4359 = vsyncpa [#allocation4], 1 }
 0x75f   :  { %4361 = vsyncpa [#allocation4 + $0x1], 1 }

</bundles_post_ra>
